<compile_context>
chip_gen: v5e
topology: v5e:2x2
jax: 0.10.0
libtpu: 0.0.40
codegen_flags: <defaults>
</compile_context>

<pallas_src>
import functools

import numpy as np

import jax
import jax.numpy as jnp
from jax.experimental import pallas as pl
from jax.experimental.pallas import tpu as pltpu


# ------------------------------ fused kernel --------------------------------

def _fused_forward_kernel(x_ref, w1_ref, b1_ref, w2_ref, b2_ref,
                          wf1_ref, bf1_ref, wf2_ref, bf2_ref, wf3_ref, bf3_ref,
                          out_ref, *, b_tile):
  """Whole ClientModelB forward for one batch tile; activations stay on-chip.

  Row ordering of all conv GEMMs is (output_row, batch) so that 2x2 max-pool
  and the fc1 flatten are static, aligned slices + lane concats (no relayouts).
  """
  B = b_tile
  cdt = w1_ref.dtype            # bf16 (fast path) or f32 (exact-parity path)
  f32 = jnp.float32

  # ---- conv1: one GEMM, K = 3(kh)*28, N = 2(dj)*16(pw_pad)*32(oc) = 1024 ----
  xin = x_ref[...].astype(cdt)                                   # (26B, 84)
  y1 = jnp.dot(xin, w1_ref[...], preferred_element_type=f32)     # (26B, 1024)
  y1 = jnp.maximum(y1[:, :512], y1[:, 512:])                     # col-phase max
  b1 = b1_ref[...]                                               # (1, 512)
  # row pool + bias + relu  (bias const over window, relu monotone => commutes)
  p1 = []
  for ph in range(13):
    e = y1[(2 * ph) * B:(2 * ph + 1) * B, :]                     # (B, 512)
    o = y1[(2 * ph + 1) * B:(2 * ph + 2) * B, :]
    p1.append(jnp.maximum(jnp.maximum(e, o) + b1, 0.0))

  # ---- conv2: one GEMM, K = 3(kh)*512, N = 2(dj)*6(pw_pad)*64(oc) = 768 -----
  # im2col via lane-aligned concats of the pooled slabs; only output rows 0..9
  # are computed (row 10 is dropped by the pool anyway).
  rows = [jnp.concatenate([p1[r], p1[r + 1], p1[r + 2]], axis=1)
          for r in range(10)]                                    # 10 x (B, 1536)
  x2 = jnp.concatenate(rows, axis=0).astype(cdt)                 # (10B, 1536)
  y2 = jnp.dot(x2, w2_ref[...], preferred_element_type=f32)      # (10B, 768)
  y2 = jnp.maximum(y2[:, :384], y2[:, 384:])                     # col-phase max
  b2 = b2_ref[...]                                               # (1, 384)
  p2 = []
  for ph in range(5):
    e = y2[(2 * ph) * B:(2 * ph + 1) * B, :]                     # (B, 384)
    o = y2[(2 * ph + 1) * B:(2 * ph + 2) * B, :]
    p2.append(jnp.maximum(jnp.maximum(e, o) + b2, 0.0))

  # ---- fc1 / fc2 / fc3 (batched GEMMs; CHW-flatten perm baked into Wf1) -----
  f_in = jnp.concatenate(p2, axis=1).astype(cdt)                 # (B, 1920)
  h1 = jnp.maximum(
      jnp.dot(f_in, wf1_ref[...], preferred_element_type=f32) + bf1_ref[...],
      0.0)                                                       # (B, 128)
  h2 = jnp.maximum(
      jnp.dot(h1.astype(cdt), wf2_ref[...], preferred_element_type=f32)
      + bf2_ref[...], 0.0)                                       # (B, 64)
  h3 = jnp.dot(h2.astype(cdt), wf3_ref[...], preferred_element_type=f32) \
      + bf3_ref[...]                                             # (B, 128)
  out_ref[...] = h3        # lanes 10..127 are exact zeros (padded weights/bias)


# --------------------------- one-time weight prep ----------------------------

def prepare_params(params, compute_dtype=jnp.bfloat16):
  """Pack PyTorch-layout weights into banded / merged GEMM layouts (hoisted)."""
  w1 = np.asarray(params["conv1_w"], np.float32)   # (32, 1, 3, 3)
  b1 = np.asarray(params["conv1_b"], np.float32)
  w2 = np.asarray(params["conv2_w"], np.float32)   # (64, 32, 3, 3)
  b2 = np.asarray(params["conv2_b"], np.float32)
  f1w = np.asarray(params["fc1_w"], np.float32)    # (128, 1600)
  f1b = np.asarray(params["fc1_b"], np.float32)
  f2w = np.asarray(params["fc2_w"], np.float32)    # (64, 128)
  f2b = np.asarray(params["fc2_b"], np.float32)
  f3w = np.asarray(params["fc3_w"], np.float32)    # (10, 64)
  f3b = np.asarray(params["fc3_b"], np.float32)

  # conv1 merged banded weights: (kh, wi=28) x (dj=2, pw_pad=16, oc=32)
  W1 = np.zeros((3, 28, 2, 16, 32), np.float32)
  for kh in range(3):
    for kw in range(3):
      for dj in range(2):
        for pw in range(13):
          W1[kh, 2 * pw + dj + kw, dj, pw, :] = w1[:, 0, kh, kw]
  W1 = W1.reshape(84, 1024)
  b1p = np.zeros((1, 16, 32), np.float32)
  b1p[0, :13, :] = b1[None, :]
  b1p = b1p.reshape(1, 512)

  # conv2 merged banded weights: (kh, wi_pad=16, ic=32) x (dj=2, pw_pad=6, oc=64)
  W2 = np.zeros((3, 16, 32, 2, 6, 64), np.float32)
  for kh in range(3):
    for kw in range(3):
      for dj in range(2):
        for pw in range(5):
          W2[kh, 2 * pw + dj + kw, :, dj, pw, :] = w2[:, :, kh, kw].T
  W2 = W2.reshape(1536, 768)
  b2p = np.zeros((1, 6, 64), np.float32)
  b2p[0, :5, :] = b2[None, :]
  b2p = b2p.reshape(1, 384)

  # fc1: reorder from torch CHW-flatten (c*25+h*5+w) to slab (h, w_pad*64+c)
  Wf1 = np.zeros((5, 6, 64, 128), np.float32)
  Wf1[:, :5, :, :] = np.transpose(f1w.reshape(128, 64, 5, 5), (2, 3, 1, 0))
  Wf1 = Wf1.reshape(1920, 128)
  bf1 = f1b.reshape(1, 128)

  Wf2 = np.ascontiguousarray(f2w.T)                # (128, 64)
  bf2 = f2b.reshape(1, 64)

  Wf3 = np.zeros((64, 128), np.float32)            # lane-pad 10 -> 128
  Wf3[:, :10] = f3w.T
  bf3 = np.zeros((1, 128), np.float32)
  bf3[0, :10] = f3b

  cd = compute_dtype
  return dict(W1=jnp.asarray(W1, cd), b1=jnp.asarray(b1p),
              W2=jnp.asarray(W2, cd), b2=jnp.asarray(b2p),
              Wf1=jnp.asarray(Wf1, cd), bf1=jnp.asarray(bf1),
              Wf2=jnp.asarray(Wf2, cd), bf2=jnp.asarray(bf2),
              Wf3=jnp.asarray(Wf3, cd), bf3=jnp.asarray(bf3))


# --------------------------------- wrapper -----------------------------------

def client_model_b_forward(x_nchw, prepped, b_tile=8):
  assert b_tile % 8 == 0, "b_tile must be a multiple of 8 (sublane alignment)"
  N = x_nchw.shape[0]
  T = -(-N // b_tile)                    # number of grid steps (batch tiles)
  Np = T * b_tile

  x = x_nchw.reshape(N, 28, 28).astype(jnp.float32)
  if Np != N:
    x = jnp.concatenate([x, jnp.zeros((Np - N, 28, 28), jnp.float32)], axis=0)

  # conv1 im2col / row-reorder (layout prep only, ~9 KB/image): rows ordered
  # (tile, output_row, batch) so in-kernel pooling is static aligned slicing.
  xcat = jnp.concatenate([x[:, kh:kh + 26, :] for kh in range(3)], axis=-1)
  xin = (xcat.reshape(T, b_tile, 26, 84)
             .transpose(0, 2, 1, 3)
             .reshape(T * 26 * b_tile, 84))

  kernel = functools.partial(_fused_forward_kernel, b_tile=b_tile)

  macs_per_image = 26 * 84 * 1024 + 10 * 1536 * 768 + 1920 * 128 + 128 * 64 + 64 * 128
  weight_bytes = sum(int(np.prod(v.shape)) * v.dtype.itemsize
                     for v in prepped.values())
  cost = pl.CostEstimate(
      flops=2 * Np * macs_per_image,
      transcendentals=0,
      bytes_accessed=int(xin.size) * 4 + weight_bytes + Np * 128 * 4)

  out = pl.pallas_call(
      kernel,
      out_shape=jax.ShapeDtypeStruct((Np, 128), jnp.float32),
      grid=(T,),
      in_specs=[
          pl.BlockSpec((26 * b_tile, 84), lambda t: (t, 0)),   # conv1 input
          pl.BlockSpec((84, 1024), lambda t: (0, 0)),          # W1 (merged)
          pl.BlockSpec((1, 512), lambda t: (0, 0)),            # b1 (padded)
          pl.BlockSpec((1536, 768), lambda t: (0, 0)),         # W2 (merged)
          pl.BlockSpec((1, 384), lambda t: (0, 0)),            # b2 (padded)
          pl.BlockSpec((1920, 128), lambda t: (0, 0)),         # Wfc1
          pl.BlockSpec((1, 128), lambda t: (0, 0)),            # bfc1
          pl.BlockSpec((128, 64), lambda t: (0, 0)),           # Wfc2
          pl.BlockSpec((1, 64), lambda t: (0, 0)),             # bfc2
          pl.BlockSpec((64, 128), lambda t: (0, 0)),           # Wfc3 (padded)
          pl.BlockSpec((1, 128), lambda t: (0, 0)),            # bfc3 (padded)
      ],
      out_specs=pl.BlockSpec((b_tile, 128), lambda t: (t, 0)),
      compiler_params=pltpu.CompilerParams(
          dimension_semantics=("parallel",),
          vmem_limit_bytes=32 * 1024 * 1024),
      cost_estimate=cost,
  )(xin, prepped["W1"], prepped["b1"], prepped["W2"], prepped["b2"],
    prepped["Wf1"], prepped["bf1"], prepped["Wf2"], prepped["bf2"],
    prepped["Wf3"], prepped["bf3"])

  return out[:N, :10]


# ------------------------- pure-JAX reference check --------------------------

def reference_forward(x_nchw, params):
  y = jax.lax.conv_general_dilated(
      x_nchw, params["conv1_w"], (1, 1), "VALID",
      dimension_numbers=("NCHW", "OIHW", "NCHW"))
  y = jax.nn.relu(y + params["conv1_b"][None, :, None, None])
  y = jax.lax.reduce_window(y, -jnp.inf, jax.lax.max,
                            (1, 1, 2, 2), (1, 1, 2, 2), "VALID")
  y = jax.lax.conv_general_dilated(
      y, params["conv2_w"], (1, 1), "VALID",
      dimension_numbers=("NCHW", "OIHW", "NCHW"))
  y = jax.nn.relu(y + params["conv2_b"][None, :, None, None])
  y = jax.lax.reduce_window(y, -jnp.inf, jax.lax.max,
                            (1, 1, 2, 2), (1, 1, 2, 2), "VALID")
  y = y.reshape(y.shape[0], -1)
  y = jax.nn.relu(y @ params["fc1_w"].T + params["fc1_b"])
  y = jax.nn.relu(y @ params["fc2_w"].T + params["fc2_b"])
  y = y @ params["fc3_w"].T + params["fc3_b"]
  return y


def init_params(key):
  ks = jax.random.split(key, 10)
  scale = 0.05
  return {
      "conv1_w": scale * jax.random.normal(ks[0], (32, 1, 3, 3), jnp.float32),
      "conv1_b": scale * jax.random.normal(ks[1], (32,), jnp.float32),
      "conv2_w": scale * jax.random.normal(ks[2], (64, 32, 3, 3), jnp.float32),
      "conv2_b": scale * jax.random.normal(ks[3], (64,), jnp.float32),
      "fc1_w": scale * jax.random.normal(ks[4], (128, 64 * 5 * 5), jnp.float32),
      "fc1_b": scale * jax.random.normal(ks[5], (128,), jnp.float32),
      "fc2_w": scale * jax.random.normal(ks[6], (64, 128), jnp.float32),
      "fc2_b": scale * jax.random.normal(ks[7], (64,), jnp.float32),
      "fc3_w": scale * jax.random.normal(ks[8], (10, 64), jnp.float32),
      "fc3_b": scale * jax.random.normal(ks[9], (10,), jnp.float32),
  }


if __name__ == "__main__":
  key = jax.random.PRNGKey(0)
  pkey, xkey = jax.random.split(key)
  params = init_params(pkey)

  # Architecture forces 28x28 single-channel input (fc1 expects 64*5*5).
  # N=16 with B_TILE=8 gives 2 grid steps so both v7x TensorCores are fed.
  x = jax.random.normal(xkey, (16, 1, 28, 28), jnp.float32)

  fwd = jax.jit(lambda xx, pp: client_model_b_forward(xx, pp, b_tile=8))
  ref = jax.block_until_ready(reference_forward(x, params))

  # Exact-parity path (f32 weights) — proves the fused structure is exact.
  prep_f32 = prepare_params(params, jnp.float32)
  out_f32 = jax.block_until_ready(fwd(x, prep_f32))
  assert out_f32.shape == (16, 10), out_f32.shape
  assert jnp.allclose(out_f32, ref, atol=2e-4, rtol=2e-4), (
      float(jnp.max(jnp.abs(out_f32 - ref))))

  # Fast path (bf16 MXU inputs, f32 accumulation) — looser tolerance.
  prep_bf16 = prepare_params(params, jnp.bfloat16)
  out_bf16 = jax.block_until_ready(fwd(x, prep_bf16))
  assert out_bf16.shape == (16, 10), out_bf16.shape
  assert jnp.allclose(out_bf16, ref, atol=1e-2, rtol=2e-2), (
      float(jnp.max(jnp.abs(out_bf16 - ref))))

  print("KERNEL_OK")
</pallas_src>

<mosaic_0001>
module attributes {stable_mosaic.version = 11 : i64} {
  func.func @_fused_forward_kernel(%arg0: i32, %arg1: memref<208x84xf32, #tpu.memory_space<vmem>>, %arg2: memref<84x1024xf32, #tpu.memory_space<vmem>>, %arg3: memref<1x512xf32, #tpu.memory_space<vmem>>, %arg4: memref<1536x768xf32, #tpu.memory_space<vmem>>, %arg5: memref<1x384xf32, #tpu.memory_space<vmem>>, %arg6: memref<1920x128xf32, #tpu.memory_space<vmem>>, %arg7: memref<1x128xf32, #tpu.memory_space<vmem>>, %arg8: memref<128x64xf32, #tpu.memory_space<vmem>>, %arg9: memref<1x64xf32, #tpu.memory_space<vmem>>, %arg10: memref<64x128xf32, #tpu.memory_space<vmem>>, %arg11: memref<1x128xf32, #tpu.memory_space<vmem>>, %arg12: memref<8x128xf32, #tpu.memory_space<vmem>>) attributes {dimension_semantics = [#tpu.dimension_semantics<parallel>], iteration_bounds = array<i64: 2>, scalar_prefetch = 0 : i64, scratch_operands = 0 : i64, tpu.core_type = #tpu.core_type<tc>, window_params = [{transform_indices = @transform_0, window_bounds = array<i64: 208, 84>}, {pipeline_mode = #tpu.pipeline_mode<synchronous>, transform_indices = @transform_1, window_bounds = array<i64: 84, 1024>}, {pipeline_mode = #tpu.pipeline_mode<synchronous>, transform_indices = @transform_2, window_bounds = array<i64: 1, 512>}, {pipeline_mode = #tpu.pipeline_mode<synchronous>, transform_indices = @transform_3, window_bounds = array<i64: 1536, 768>}, {pipeline_mode = #tpu.pipeline_mode<synchronous>, transform_indices = @transform_4, window_bounds = array<i64: 1, 384>}, {pipeline_mode = #tpu.pipeline_mode<synchronous>, transform_indices = @transform_5, window_bounds = array<i64: 1920, 128>}, {pipeline_mode = #tpu.pipeline_mode<synchronous>, transform_indices = @transform_6, window_bounds = array<i64: 1, 128>}, {pipeline_mode = #tpu.pipeline_mode<synchronous>, transform_indices = @transform_7, window_bounds = array<i64: 128, 64>}, {pipeline_mode = #tpu.pipeline_mode<synchronous>, transform_indices = @transform_8, window_bounds = array<i64: 1, 64>}, {pipeline_mode = #tpu.pipeline_mode<synchronous>, transform_indices = @transform_9, window_bounds = array<i64: 64, 128>}, {pipeline_mode = #tpu.pipeline_mode<synchronous>, transform_indices = @transform_10, window_bounds = array<i64: 1, 128>}, {transform_indices = @transform_11, window_bounds = array<i64: 8, 128>}]} {
    %c0 = arith.constant 0 : index
    %c0_0 = arith.constant 0 : index
    %0 = vector.load %arg1[%c0, %c0_0] : memref<208x84xf32, #tpu.memory_space<vmem>>, vector<208x84xf32>
    %c0_1 = arith.constant 0 : index
    %c0_2 = arith.constant 0 : index
    %1 = vector.load %arg2[%c0_1, %c0_2] : memref<84x1024xf32, #tpu.memory_space<vmem>>, vector<84x1024xf32>
    %cst = arith.constant dense<0.000000e+00> : vector<208x1024xf32>
    %2 = tpu.matmul %0, %1, %cst {dimension_numbers = #tpu.dot_dimension_numbers<[1], [0], [0], [1], [0, 0, 1, 1], [], []>} : vector<208x84xf32>, vector<84x1024xf32>, vector<208x1024xf32> -> vector<208x1024xf32>
    %3 = vector.extract_strided_slice %2 {offsets = [0, 0], sizes = [208, 512], strides = [1, 1]} : vector<208x1024xf32> to vector<208x512xf32>
    %4 = vector.extract_strided_slice %2 {offsets = [0, 512], sizes = [208, 512], strides = [1, 1]} : vector<208x1024xf32> to vector<208x512xf32>
    %5 = arith.maximumf %3, %4 : vector<208x512xf32>
    %c0_3 = arith.constant 0 : index
    %c0_4 = arith.constant 0 : index
    %6 = vector.load %arg3[%c0_3, %c0_4] : memref<1x512xf32, #tpu.memory_space<vmem>>, vector<1x512xf32>
    %7 = vector.extract_strided_slice %5 {offsets = [0, 0], sizes = [8, 512], strides = [1, 1]} : vector<208x512xf32> to vector<8x512xf32>
    %8 = vector.extract_strided_slice %5 {offsets = [8, 0], sizes = [8, 512], strides = [1, 1]} : vector<208x512xf32> to vector<8x512xf32>
    %9 = arith.maximumf %7, %8 : vector<8x512xf32>
    %10 = vector.broadcast %6 : vector<1x512xf32> to vector<8x512xf32>
    %11 = arith.addf %9, %10 : vector<8x512xf32>
    %cst_5 = arith.constant 0.000000e+00 : f32
    %12 = vector.broadcast %cst_5 : f32 to vector<8x512xf32>
    %13 = arith.maximumf %11, %12 : vector<8x512xf32>
    %14 = vector.extract_strided_slice %5 {offsets = [16, 0], sizes = [8, 512], strides = [1, 1]} : vector<208x512xf32> to vector<8x512xf32>
    %15 = vector.extract_strided_slice %5 {offsets = [24, 0], sizes = [8, 512], strides = [1, 1]} : vector<208x512xf32> to vector<8x512xf32>
    %16 = arith.maximumf %14, %15 : vector<8x512xf32>
    %17 = vector.broadcast %6 : vector<1x512xf32> to vector<8x512xf32>
    %18 = arith.addf %16, %17 : vector<8x512xf32>
    %cst_6 = arith.constant 0.000000e+00 : f32
    %19 = vector.broadcast %cst_6 : f32 to vector<8x512xf32>
    %20 = arith.maximumf %18, %19 : vector<8x512xf32>
    %21 = vector.extract_strided_slice %5 {offsets = [32, 0], sizes = [8, 512], strides = [1, 1]} : vector<208x512xf32> to vector<8x512xf32>
    %22 = vector.extract_strided_slice %5 {offsets = [40, 0], sizes = [8, 512], strides = [1, 1]} : vector<208x512xf32> to vector<8x512xf32>
    %23 = arith.maximumf %21, %22 : vector<8x512xf32>
    %24 = vector.broadcast %6 : vector<1x512xf32> to vector<8x512xf32>
    %25 = arith.addf %23, %24 : vector<8x512xf32>
    %cst_7 = arith.constant 0.000000e+00 : f32
    %26 = vector.broadcast %cst_7 : f32 to vector<8x512xf32>
    %27 = arith.maximumf %25, %26 : vector<8x512xf32>
    %28 = vector.extract_strided_slice %5 {offsets = [48, 0], sizes = [8, 512], strides = [1, 1]} : vector<208x512xf32> to vector<8x512xf32>
    %29 = vector.extract_strided_slice %5 {offsets = [56, 0], sizes = [8, 512], strides = [1, 1]} : vector<208x512xf32> to vector<8x512xf32>
    %30 = arith.maximumf %28, %29 : vector<8x512xf32>
    %31 = vector.broadcast %6 : vector<1x512xf32> to vector<8x512xf32>
    %32 = arith.addf %30, %31 : vector<8x512xf32>
    %cst_8 = arith.constant 0.000000e+00 : f32
    %33 = vector.broadcast %cst_8 : f32 to vector<8x512xf32>
    %34 = arith.maximumf %32, %33 : vector<8x512xf32>
    %35 = vector.extract_strided_slice %5 {offsets = [64, 0], sizes = [8, 512], strides = [1, 1]} : vector<208x512xf32> to vector<8x512xf32>
    %36 = vector.extract_strided_slice %5 {offsets = [72, 0], sizes = [8, 512], strides = [1, 1]} : vector<208x512xf32> to vector<8x512xf32>
    %37 = arith.maximumf %35, %36 : vector<8x512xf32>
    %38 = vector.broadcast %6 : vector<1x512xf32> to vector<8x512xf32>
    %39 = arith.addf %37, %38 : vector<8x512xf32>
    %cst_9 = arith.constant 0.000000e+00 : f32
    %40 = vector.broadcast %cst_9 : f32 to vector<8x512xf32>
    %41 = arith.maximumf %39, %40 : vector<8x512xf32>
    %42 = vector.extract_strided_slice %5 {offsets = [80, 0], sizes = [8, 512], strides = [1, 1]} : vector<208x512xf32> to vector<8x512xf32>
    %43 = vector.extract_strided_slice %5 {offsets = [88, 0], sizes = [8, 512], strides = [1, 1]} : vector<208x512xf32> to vector<8x512xf32>
    %44 = arith.maximumf %42, %43 : vector<8x512xf32>
    %45 = vector.broadcast %6 : vector<1x512xf32> to vector<8x512xf32>
    %46 = arith.addf %44, %45 : vector<8x512xf32>
    %cst_10 = arith.constant 0.000000e+00 : f32
    %47 = vector.broadcast %cst_10 : f32 to vector<8x512xf32>
    %48 = arith.maximumf %46, %47 : vector<8x512xf32>
    %49 = vector.extract_strided_slice %5 {offsets = [96, 0], sizes = [8, 512], strides = [1, 1]} : vector<208x512xf32> to vector<8x512xf32>
    %50 = vector.extract_strided_slice %5 {offsets = [104, 0], sizes = [8, 512], strides = [1, 1]} : vector<208x512xf32> to vector<8x512xf32>
    %51 = arith.maximumf %49, %50 : vector<8x512xf32>
    %52 = vector.broadcast %6 : vector<1x512xf32> to vector<8x512xf32>
    %53 = arith.addf %51, %52 : vector<8x512xf32>
    %cst_11 = arith.constant 0.000000e+00 : f32
    %54 = vector.broadcast %cst_11 : f32 to vector<8x512xf32>
    %55 = arith.maximumf %53, %54 : vector<8x512xf32>
    %56 = vector.extract_strided_slice %5 {offsets = [112, 0], sizes = [8, 512], strides = [1, 1]} : vector<208x512xf32> to vector<8x512xf32>
    %57 = vector.extract_strided_slice %5 {offsets = [120, 0], sizes = [8, 512], strides = [1, 1]} : vector<208x512xf32> to vector<8x512xf32>
    %58 = arith.maximumf %56, %57 : vector<8x512xf32>
    %59 = vector.broadcast %6 : vector<1x512xf32> to vector<8x512xf32>
    %60 = arith.addf %58, %59 : vector<8x512xf32>
    %cst_12 = arith.constant 0.000000e+00 : f32
    %61 = vector.broadcast %cst_12 : f32 to vector<8x512xf32>
    %62 = arith.maximumf %60, %61 : vector<8x512xf32>
    %63 = vector.extract_strided_slice %5 {offsets = [128, 0], sizes = [8, 512], strides = [1, 1]} : vector<208x512xf32> to vector<8x512xf32>
    %64 = vector.extract_strided_slice %5 {offsets = [136, 0], sizes = [8, 512], strides = [1, 1]} : vector<208x512xf32> to vector<8x512xf32>
    %65 = arith.maximumf %63, %64 : vector<8x512xf32>
    %66 = vector.broadcast %6 : vector<1x512xf32> to vector<8x512xf32>
    %67 = arith.addf %65, %66 : vector<8x512xf32>
    %cst_13 = arith.constant 0.000000e+00 : f32
    %68 = vector.broadcast %cst_13 : f32 to vector<8x512xf32>
    %69 = arith.maximumf %67, %68 : vector<8x512xf32>
    %70 = vector.extract_strided_slice %5 {offsets = [144, 0], sizes = [8, 512], strides = [1, 1]} : vector<208x512xf32> to vector<8x512xf32>
    %71 = vector.extract_strided_slice %5 {offsets = [152, 0], sizes = [8, 512], strides = [1, 1]} : vector<208x512xf32> to vector<8x512xf32>
    %72 = arith.maximumf %70, %71 : vector<8x512xf32>
    %73 = vector.broadcast %6 : vector<1x512xf32> to vector<8x512xf32>
    %74 = arith.addf %72, %73 : vector<8x512xf32>
    %cst_14 = arith.constant 0.000000e+00 : f32
    %75 = vector.broadcast %cst_14 : f32 to vector<8x512xf32>
    %76 = arith.maximumf %74, %75 : vector<8x512xf32>
    %77 = vector.extract_strided_slice %5 {offsets = [160, 0], sizes = [8, 512], strides = [1, 1]} : vector<208x512xf32> to vector<8x512xf32>
    %78 = vector.extract_strided_slice %5 {offsets = [168, 0], sizes = [8, 512], strides = [1, 1]} : vector<208x512xf32> to vector<8x512xf32>
    %79 = arith.maximumf %77, %78 : vector<8x512xf32>
    %80 = vector.broadcast %6 : vector<1x512xf32> to vector<8x512xf32>
    %81 = arith.addf %79, %80 : vector<8x512xf32>
    %cst_15 = arith.constant 0.000000e+00 : f32
    %82 = vector.broadcast %cst_15 : f32 to vector<8x512xf32>
    %83 = arith.maximumf %81, %82 : vector<8x512xf32>
    %84 = vector.extract_strided_slice %5 {offsets = [176, 0], sizes = [8, 512], strides = [1, 1]} : vector<208x512xf32> to vector<8x512xf32>
    %85 = vector.extract_strided_slice %5 {offsets = [184, 0], sizes = [8, 512], strides = [1, 1]} : vector<208x512xf32> to vector<8x512xf32>
    %86 = arith.maximumf %84, %85 : vector<8x512xf32>
    %87 = vector.broadcast %6 : vector<1x512xf32> to vector<8x512xf32>
    %88 = arith.addf %86, %87 : vector<8x512xf32>
    %cst_16 = arith.constant 0.000000e+00 : f32
    %89 = vector.broadcast %cst_16 : f32 to vector<8x512xf32>
    %90 = arith.maximumf %88, %89 : vector<8x512xf32>
    %91 = tpu.concatenate %13, %20, %27 in 1 : vector<8x512xf32>, vector<8x512xf32>, vector<8x512xf32> -> vector<8x1536xf32>
    %92 = tpu.concatenate %20, %27, %34 in 1 : vector<8x512xf32>, vector<8x512xf32>, vector<8x512xf32> -> vector<8x1536xf32>
    %93 = tpu.concatenate %27, %34, %41 in 1 : vector<8x512xf32>, vector<8x512xf32>, vector<8x512xf32> -> vector<8x1536xf32>
    %94 = tpu.concatenate %34, %41, %48 in 1 : vector<8x512xf32>, vector<8x512xf32>, vector<8x512xf32> -> vector<8x1536xf32>
    %95 = tpu.concatenate %41, %48, %55 in 1 : vector<8x512xf32>, vector<8x512xf32>, vector<8x512xf32> -> vector<8x1536xf32>
    %96 = tpu.concatenate %48, %55, %62 in 1 : vector<8x512xf32>, vector<8x512xf32>, vector<8x512xf32> -> vector<8x1536xf32>
    %97 = tpu.concatenate %55, %62, %69 in 1 : vector<8x512xf32>, vector<8x512xf32>, vector<8x512xf32> -> vector<8x1536xf32>
    %98 = tpu.concatenate %62, %69, %76 in 1 : vector<8x512xf32>, vector<8x512xf32>, vector<8x512xf32> -> vector<8x1536xf32>
    %99 = tpu.concatenate %69, %76, %83 in 1 : vector<8x512xf32>, vector<8x512xf32>, vector<8x512xf32> -> vector<8x1536xf32>
    %100 = tpu.concatenate %76, %83, %90 in 1 : vector<8x512xf32>, vector<8x512xf32>, vector<8x512xf32> -> vector<8x1536xf32>
    %101 = tpu.concatenate %91, %92, %93, %94, %95, %96, %97, %98, %99, %100 in 0 : vector<8x1536xf32>, vector<8x1536xf32>, vector<8x1536xf32>, vector<8x1536xf32>, vector<8x1536xf32>, vector<8x1536xf32>, vector<8x1536xf32>, vector<8x1536xf32>, vector<8x1536xf32>, vector<8x1536xf32> -> vector<80x1536xf32>
    %c0_17 = arith.constant 0 : index
    %c0_18 = arith.constant 0 : index
    %102 = vector.load %arg4[%c0_17, %c0_18] : memref<1536x768xf32, #tpu.memory_space<vmem>>, vector<1536x768xf32>
    %cst_19 = arith.constant dense<0.000000e+00> : vector<80x768xf32>
    %103 = tpu.matmul %101, %102, %cst_19 {dimension_numbers = #tpu.dot_dimension_numbers<[1], [0], [0], [1], [0, 0, 1, 1], [], []>} : vector<80x1536xf32>, vector<1536x768xf32>, vector<80x768xf32> -> vector<80x768xf32>
    %104 = vector.extract_strided_slice %103 {offsets = [0, 0], sizes = [80, 384], strides = [1, 1]} : vector<80x768xf32> to vector<80x384xf32>
    %105 = vector.extract_strided_slice %103 {offsets = [0, 384], sizes = [80, 384], strides = [1, 1]} : vector<80x768xf32> to vector<80x384xf32>
    %106 = arith.maximumf %104, %105 : vector<80x384xf32>
    %c0_20 = arith.constant 0 : index
    %c0_21 = arith.constant 0 : index
    %107 = vector.load %arg5[%c0_20, %c0_21] : memref<1x384xf32, #tpu.memory_space<vmem>>, vector<1x384xf32>
    %108 = vector.extract_strided_slice %106 {offsets = [0, 0], sizes = [8, 384], strides = [1, 1]} : vector<80x384xf32> to vector<8x384xf32>
    %109 = vector.extract_strided_slice %106 {offsets = [8, 0], sizes = [8, 384], strides = [1, 1]} : vector<80x384xf32> to vector<8x384xf32>
    %110 = arith.maximumf %108, %109 : vector<8x384xf32>
    %111 = vector.broadcast %107 : vector<1x384xf32> to vector<8x384xf32>
    %112 = arith.addf %110, %111 : vector<8x384xf32>
    %cst_22 = arith.constant 0.000000e+00 : f32
    %113 = vector.broadcast %cst_22 : f32 to vector<8x384xf32>
    %114 = arith.maximumf %112, %113 : vector<8x384xf32>
    %115 = vector.extract_strided_slice %106 {offsets = [16, 0], sizes = [8, 384], strides = [1, 1]} : vector<80x384xf32> to vector<8x384xf32>
    %116 = vector.extract_strided_slice %106 {offsets = [24, 0], sizes = [8, 384], strides = [1, 1]} : vector<80x384xf32> to vector<8x384xf32>
    %117 = arith.maximumf %115, %116 : vector<8x384xf32>
    %118 = vector.broadcast %107 : vector<1x384xf32> to vector<8x384xf32>
    %119 = arith.addf %117, %118 : vector<8x384xf32>
    %cst_23 = arith.constant 0.000000e+00 : f32
    %120 = vector.broadcast %cst_23 : f32 to vector<8x384xf32>
    %121 = arith.maximumf %119, %120 : vector<8x384xf32>
    %122 = vector.extract_strided_slice %106 {offsets = [32, 0], sizes = [8, 384], strides = [1, 1]} : vector<80x384xf32> to vector<8x384xf32>
    %123 = vector.extract_strided_slice %106 {offsets = [40, 0], sizes = [8, 384], strides = [1, 1]} : vector<80x384xf32> to vector<8x384xf32>
    %124 = arith.maximumf %122, %123 : vector<8x384xf32>
    %125 = vector.broadcast %107 : vector<1x384xf32> to vector<8x384xf32>
    %126 = arith.addf %124, %125 : vector<8x384xf32>
    %cst_24 = arith.constant 0.000000e+00 : f32
    %127 = vector.broadcast %cst_24 : f32 to vector<8x384xf32>
    %128 = arith.maximumf %126, %127 : vector<8x384xf32>
    %129 = vector.extract_strided_slice %106 {offsets = [48, 0], sizes = [8, 384], strides = [1, 1]} : vector<80x384xf32> to vector<8x384xf32>
    %130 = vector.extract_strided_slice %106 {offsets = [56, 0], sizes = [8, 384], strides = [1, 1]} : vector<80x384xf32> to vector<8x384xf32>
    %131 = arith.maximumf %129, %130 : vector<8x384xf32>
    %132 = vector.broadcast %107 : vector<1x384xf32> to vector<8x384xf32>
    %133 = arith.addf %131, %132 : vector<8x384xf32>
    %cst_25 = arith.constant 0.000000e+00 : f32
    %134 = vector.broadcast %cst_25 : f32 to vector<8x384xf32>
    %135 = arith.maximumf %133, %134 : vector<8x384xf32>
    %136 = vector.extract_strided_slice %106 {offsets = [64, 0], sizes = [8, 384], strides = [1, 1]} : vector<80x384xf32> to vector<8x384xf32>
    %137 = vector.extract_strided_slice %106 {offsets = [72, 0], sizes = [8, 384], strides = [1, 1]} : vector<80x384xf32> to vector<8x384xf32>
    %138 = arith.maximumf %136, %137 : vector<8x384xf32>
    %139 = vector.broadcast %107 : vector<1x384xf32> to vector<8x384xf32>
    %140 = arith.addf %138, %139 : vector<8x384xf32>
    %cst_26 = arith.constant 0.000000e+00 : f32
    %141 = vector.broadcast %cst_26 : f32 to vector<8x384xf32>
    %142 = arith.maximumf %140, %141 : vector<8x384xf32>
    %143 = tpu.concatenate %114, %121, %128, %135, %142 in 1 : vector<8x384xf32>, vector<8x384xf32>, vector<8x384xf32>, vector<8x384xf32>, vector<8x384xf32> -> vector<8x1920xf32>
    %c0_27 = arith.constant 0 : index
    %c0_28 = arith.constant 0 : index
    %144 = vector.load %arg6[%c0_27, %c0_28] : memref<1920x128xf32, #tpu.memory_space<vmem>>, vector<1920x128xf32>
    %cst_29 = arith.constant dense<0.000000e+00> : vector<8x128xf32>
    %145 = tpu.matmul %143, %144, %cst_29 {dimension_numbers = #tpu.dot_dimension_numbers<[1], [0], [0], [1], [0, 0, 1, 1], [], []>} : vector<8x1920xf32>, vector<1920x128xf32>, vector<8x128xf32> -> vector<8x128xf32>
    %c0_30 = arith.constant 0 : index
    %c0_31 = arith.constant 0 : index
    %146 = vector.load %arg7[%c0_30, %c0_31] : memref<1x128xf32, #tpu.memory_space<vmem>>, vector<1x128xf32>
    %147 = vector.broadcast %146 : vector<1x128xf32> to vector<8x128xf32>
    %148 = arith.addf %145, %147 : vector<8x128xf32>
    %cst_32 = arith.constant 0.000000e+00 : f32
    %149 = vector.broadcast %cst_32 : f32 to vector<8x128xf32>
    %150 = arith.maximumf %148, %149 : vector<8x128xf32>
    %c0_33 = arith.constant 0 : index
    %c0_34 = arith.constant 0 : index
    %151 = vector.load %arg8[%c0_33, %c0_34] : memref<128x64xf32, #tpu.memory_space<vmem>>, vector<128x64xf32>
    %cst_35 = arith.constant dense<0.000000e+00> : vector<8x64xf32>
    %152 = tpu.matmul %150, %151, %cst_35 {dimension_numbers = #tpu.dot_dimension_numbers<[1], [0], [0], [1], [0, 0, 1, 1], [], []>} : vector<8x128xf32>, vector<128x64xf32>, vector<8x64xf32> -> vector<8x64xf32>
    %c0_36 = arith.constant 0 : index
    %c0_37 = arith.constant 0 : index
    %153 = vector.load %arg9[%c0_36, %c0_37] : memref<1x64xf32, #tpu.memory_space<vmem>>, vector<1x64xf32>
    %154 = vector.broadcast %153 : vector<1x64xf32> to vector<8x64xf32>
    %155 = arith.addf %152, %154 : vector<8x64xf32>
    %cst_38 = arith.constant 0.000000e+00 : f32
    %156 = vector.broadcast %cst_38 : f32 to vector<8x64xf32>
    %157 = arith.maximumf %155, %156 : vector<8x64xf32>
    %c0_39 = arith.constant 0 : index
    %c0_40 = arith.constant 0 : index
    %158 = vector.load %arg10[%c0_39, %c0_40] : memref<64x128xf32, #tpu.memory_space<vmem>>, vector<64x128xf32>
    %cst_41 = arith.constant dense<0.000000e+00> : vector<8x128xf32>
    %159 = tpu.matmul %157, %158, %cst_41 {dimension_numbers = #tpu.dot_dimension_numbers<[1], [0], [0], [1], [0, 0, 1, 1], [], []>} : vector<8x64xf32>, vector<64x128xf32>, vector<8x128xf32> -> vector<8x128xf32>
    %c0_42 = arith.constant 0 : index
    %c0_43 = arith.constant 0 : index
    %160 = vector.load %arg11[%c0_42, %c0_43] : memref<1x128xf32, #tpu.memory_space<vmem>>, vector<1x128xf32>
    %161 = vector.broadcast %160 : vector<1x128xf32> to vector<8x128xf32>
    %162 = arith.addf %159, %161 : vector<8x128xf32>
    %c0_44 = arith.constant 0 : index
    %c0_45 = arith.constant 0 : index
    %163 = vector.load %arg12[%c0_44, %c0_45] : memref<8x128xf32, #tpu.memory_space<vmem>>, vector<8x128xf32>
    tpu.vector_store %arg12[%c0_44, %c0_45], %162 {strides = array<i32>} : memref<8x128xf32, #tpu.memory_space<vmem>>, vector<8x128xf32>,
    return
  }
  func.func @transform_0(%arg0: i32) -> (i32, i32) {
    %c0_i32 = arith.constant 0 : i32
    %c0_i32_0 = arith.constant 0 : i32
    return %arg0, %c0_i32 : i32, i32
  }
  func.func @transform_1(%arg0: i32) -> (i32, i32) {
    %c0_i32 = arith.constant 0 : i32
    %c0_i32_0 = arith.constant 0 : i32
    %c0_i32_1 = arith.constant 0 : i32
    return %c0_i32, %c0_i32_0 : i32, i32
  }
  func.func @transform_2(%arg0: i32) -> (i32, i32) {
    %c0_i32 = arith.constant 0 : i32
    %c0_i32_0 = arith.constant 0 : i32
    %c0_i32_1 = arith.constant 0 : i32
    return %c0_i32, %c0_i32_0 : i32, i32
  }
  func.func @transform_3(%arg0: i32) -> (i32, i32) {
    %c0_i32 = arith.constant 0 : i32
    %c0_i32_0 = arith.constant 0 : i32
    %c0_i32_1 = arith.constant 0 : i32
    return %c0_i32, %c0_i32_0 : i32, i32
  }
  func.func @transform_4(%arg0: i32) -> (i32, i32) {
    %c0_i32 = arith.constant 0 : i32
    %c0_i32_0 = arith.constant 0 : i32
    %c0_i32_1 = arith.constant 0 : i32
    return %c0_i32, %c0_i32_0 : i32, i32
  }
  func.func @transform_5(%arg0: i32) -> (i32, i32) {
    %c0_i32 = arith.constant 0 : i32
    %c0_i32_0 = arith.constant 0 : i32
    %c0_i32_1 = arith.constant 0 : i32
    return %c0_i32, %c0_i32_0 : i32, i32
  }
  func.func @transform_6(%arg0: i32) -> (i32, i32) {
    %c0_i32 = arith.constant 0 : i32
    %c0_i32_0 = arith.constant 0 : i32
    %c0_i32_1 = arith.constant 0 : i32
    return %c0_i32, %c0_i32_0 : i32, i32
  }
  func.func @transform_7(%arg0: i32) -> (i32, i32) {
    %c0_i32 = arith.constant 0 : i32
    %c0_i32_0 = arith.constant 0 : i32
    %c0_i32_1 = arith.constant 0 : i32
    return %c0_i32, %c0_i32_0 : i32, i32
  }
  func.func @transform_8(%arg0: i32) -> (i32, i32) {
    %c0_i32 = arith.constant 0 : i32
    %c0_i32_0 = arith.constant 0 : i32
    %c0_i32_1 = arith.constant 0 : i32
    return %c0_i32, %c0_i32_0 : i32, i32
  }
  func.func @transform_9(%arg0: i32) -> (i32, i32) {
    %c0_i32 = arith.constant 0 : i32
    %c0_i32_0 = arith.constant 0 : i32
    %c0_i32_1 = arith.constant 0 : i32
    return %c0_i32, %c0_i32_0 : i32, i32
  }
  func.func @transform_10(%arg0: i32) -> (i32, i32) {
    %c0_i32 = arith.constant 0 : i32
    %c0_i32_0 = arith.constant 0 : i32
    %c0_i32_1 = arith.constant 0 : i32
    return %c0_i32, %c0_i32_0 : i32, i32
  }
  func.func @transform_11(%arg0: i32) -> (i32, i32) {
    %c0_i32 = arith.constant 0 : i32
    %c0_i32_0 = arith.constant 0 : i32
    return %arg0, %c0_i32 : i32, i32
  }
}

</mosaic_0001>

<bundles_post_ra>
// kernel: _lambda_.1
= control target key start
LH: loop header
LB: loop body
LE: loop exit
PB: predicated region body
PF: predicated region fallthrough
CT: control target
= control target key end

     0   :  { %s10693_s0 = inlined_call_operand.vmem [shape: f32[416,84], index: 0, kind: input, shape index: {}]   ;;  %s10694_s1 = inlined_call_operand.hbm [shape: f32[84,1024], index: 1, kind: input, shape index: {}]   ;;  %s10695_s2 = inlined_call_operand.hbm [shape: f32[1,512], index: 2, kind: input, shape index: {}]   ;;  %s10696_s3 = inlined_call_operand.hbm [shape: f32[1536,768], index: 3, kind: input, shape index: {}]   ;;  %s10697_s4 = inlined_call_operand.hbm [shape: f32[1,384], index: 4, kind: input, shape index: {}]   ;;  %s10698_s5 = inlined_call_operand.hbm [shape: f32[1920,128], index: 5, kind: input, shape index: {}]   ;;  %s10699_s6 = inlined_call_operand.hbm [shape: f32[1,128], index: 6, kind: input, shape index: {}]   ;;  %s10700_s7 = inlined_call_operand.vmem [shape: f32[128,64], index: 7, kind: input, shape index: {}]   ;;  %s10701_s8 = inlined_call_operand.hbm [shape: f32[1,64], index: 8, kind: input, shape index: {}]   ;;  %s10702_s9 = inlined_call_operand.hbm [shape: f32[64,128], index: 9, kind: input, shape index: {}]   ;;  %s10703_s10 = inlined_call_operand.hbm [shape: f32[1,128], index: 10, kind: input, shape index: {}]   ;;  %s10704_s11 = inlined_call_operand.hbm [shape: f32[16,128], index: 11, kind: output, shape index: {}]  }
   0x1   :  { %10815 = sst [smem:[#allocation112_spill]] %s10694_s1 }
   0x2   :  { %10816 = sst [smem:[#allocation113_spill]] %s10695_s2 }
   0x3   :  { %10817 = sst [smem:[#allocation114_spill]] %s10696_s3 }
   0x4   :  { %10818 = sst [smem:[#allocation115_spill]] %s10697_s4 }
   0x5   :  { %10819 = sst [smem:[#allocation116_spill]] %s10699_s6 }
   0x6   :  { %10820 = sst [smem:[#allocation117_spill]] %s10702_s9 }
   0x7   :  { %16 = vsyncpa [#allocation3], 0 }
   0x8   :  { %17 = vsyncpa [#allocation6], 0 }
   0x9   :  { %18 = vsyncpa [#allocation9], 0 }
   0xa   :  { %19 = vsyncpa [#allocation12], 0 }
   0xb   :  { %20 = vsyncpa [#allocation15], 0 }
   0xc   :  { %21 = vsyncpa [#allocation4], 0 }
   0xd   :  { %23 = vsyncpa [#allocation4 + $0x1], 0  ;;  %s7958_s17 = smov 0   ;;  %s7960_s18 = smov 0  }
   0xe   :  { %s7962_s19 = smov 0   ;;  %s7964_s20 = smov 0  }
   0xf LB: > { %10821 = sst [smem:[#allocation24_spill]] %s7877_s19  ;;  %s7979_s21 = sadd.s32 4294967295, %s7881_s20   ;;  %s7881_s20 = sphi %s7964_s20, %s11227_s20   ;;  %s7877_s19 = sphi %s7962_s19, %s11229_s19   ;;  %s7873_s18 = sphi %s7960_s18, %s11231_s18   ;;  %s7869_s17 = sphi %s7958_s17, %s11230_s17  }
  0x10   : > { %s7143_s22 = sadd.s32 4294967294, %s7881_s20   ;;  %s7983_s23 = sadd.s32 1, %s7881_s20  }
  0x11   : > { %10822 = sst [smem:[#allocation25_spill]] %s7983_s23  ;;  %s272_s24 = sadd.s32 1, %s7877_s19 }
  0x12   : > { %s269_s25 = ssub.s32 %s7881_s20, %s7983_s23  ;;  %p282_p0 = scmp.ne.s32.totalorder %s7877_s19, %s7873_s18 }
  0x13   : > { %p270_p1 = scmp.eq.s32.totalorder %s269_s25, 0  ;;  %p283_p2 = scmp.eq.s32.totalorder %s7979_s21, 1 }
  0x14   : > { %p288_p3 = scmp.ne.s32.totalorder %s7873_s18, %s7869_s17  ;;  %p289_p4 = scmp.eq.s32.totalorder %s7143_s22, 1 }
  0x15   : > { %s7994_s26 = scalar_select %p270_p1, %s7877_s19, %s272_s24  }
  0x16   : > { %p7996_p5 = por %p283_p2, %p282_p0  ;;  %p8000_p6 = por %p289_p4, %p288_p3 }
  0x17   : > { %10823 = sst [smem:[#allocation26_spill]] %s7994_s26  ;;  %p7144_p7 = scmp.ge.s32.totalorder %s7881_s20, 1 }
  0x18   : > { %p296_p8 = scmp.lt.s32.totalorder %s7881_s20, 3  ;;  %p7458_p9 = scmp.eq.s32.totalorder %s7979_s21, 0 }
  0x19   : > { %s10827_s2 = sld [smem:[#allocation113_spill]]  ;;  %s7883_s14 = smov [#allocation5]  }
  0x1a   : > { %p8007_p10 = pnand %p7144_p7, %p296_p8  ;;  %s324_s15 = sshll.u32 %s7883_s14, 4  ;;  %s325_s15 = int_to_ptr.vmem [resolvable:$true] %s324_s15 }
  0x1b   : > { %s10828_s4 = sld [smem:[#allocation115_spill]]  ;;  %s7884_s26 = smov [#allocation8]  }
  0x1c   : > { %p7426_p11 = pneg %p8007_p10  ;;  %s10830_s6 = sld [smem:[#allocation116_spill]] }
  0x1d   : > { %s350_s14 = sshll.u32 %s7884_s26, 4  ;;  %s7885_s16 = smov [#allocation11]   ;;  %s351_s14 = int_to_ptr.vmem [resolvable:$true] %s350_s14 }
  0x1e   : > { %p8021_p12 = pnand %p7458_p9, %p7426_p11  ;;  %s376_s22 = sshll.u32 %s7885_s16, 4  ;;  %s377_s22 = int_to_ptr.vmem [resolvable:$true] %s376_s22 }
  0x1f   : > { %s322_s13 = sshll.u32 %s10827_s2, 4  ;;  %s10831_s9 = sld [smem:[#allocation117_spill]]  ;;  %s323_s13 = int_to_ptr.hbm [resolvable:$true] %s322_s13 }
  0x20   : > { %7432 = dma.hbm_to_vmem [thread:$0]  (!%p8021_p12), %s323_s13, 64, %s325_s15, [#allocation6]  }
  0x21   : > { %s348_s24 = sshll.u32 %s10828_s4, 4  ;;  %s7886_s30 = smov [#allocation14]   ;;  %s349_s24 = int_to_ptr.hbm [resolvable:$true] %s348_s24 }
  0x22   : > { %s374_s2 = sshll.u32 %s10830_s6, 4  ;;  %s402_s26 = sshll.u32 %s7886_s30, 4  ;;  %s375_s2 = int_to_ptr.hbm [resolvable:$true] %s374_s2  ;;  %s403_s26 = int_to_ptr.vmem [resolvable:$true] %s402_s26 }
  0x23   : > { %7438 = dma.hbm_to_vmem [thread:$0]  (!%p8021_p12), %s349_s24, 48, %s351_s14, [#allocation9]  }
  0x24   : > { %7444 = dma.hbm_to_vmem [thread:$0]  (!%p8021_p12), %s375_s2, 16, %s377_s22, [#allocation12]  }
  0x25   : > { %s400_s23 = sshll.u32 %s10831_s9, 4  ;;  %s10832_s1 = sld [smem:[#allocation112_spill]]  ;;  %s401_s23 = int_to_ptr.hbm [resolvable:$true] %s400_s23 }
  0x26   : > { %s7887_s24 = smov 128   ;;  %s7888_s14 = smov 8  }
  0x27   : > { %7450 = dma.hbm_to_vmem [thread:$0]  (!%p8021_p12), %s401_s23, 1024, %s403_s26, [#allocation15], %s7887_s24, %s7887_s24, %s7888_s14  }
  0x28   : > { %s7889_s16 = smov [#allocation2]   ;;  %s10833_s3 = sld [smem:[#allocation114_spill]] }
  0x29   : > { %s309_s4 = sshll.u32 %s7889_s16, 4  ;;  %s7890_s6 = smov 1024   ;;  %s310_s4 = int_to_ptr.vmem [resolvable:$true] %s309_s4 }
  0x2a   : > { %s7891_s30 = smov 64   ;;  %s7892_s12 = smov [#allocation7]  }
  0x2b   : > { %s307_s15 = sshll.u32 %s10832_s1, 4  ;;  %s335_s13 = sshll.u32 %s7892_s12, 4  ;;  %s308_s15 = int_to_ptr.hbm [resolvable:$true] %s307_s15  ;;  %s336_s13 = int_to_ptr.vmem [resolvable:$true] %s335_s13 }
  0x2c   : > { %7429 = dma.hbm_to_vmem [thread:$0]  (!%p8021_p12), %s308_s15, 11264, %s310_s4, [#allocation3], %s7890_s6, %s7890_s6, %s7891_s30  }
  0x2d   : > { %s7893_s1 = smov 768   ;;  %s7894_s9 = smov 48  }
  0x2e   : > { %s333_s22 = sshll.u32 %s10833_s3, 4  ;;  %s359_s16 = sshll.u32 %s10698_s5, 4  ;;  %s334_s22 = int_to_ptr.hbm [resolvable:$true] %s333_s22  ;;  %s360_s16 = int_to_ptr.hbm [resolvable:$true] %s359_s16 }
  0x2f   : > { %7435 = dma.hbm_to_vmem [thread:$0]  (!%p8021_p12), %s334_s22, 147456, %s336_s13, [#allocation6], %s7893_s1, %s7893_s1, %s7894_s9  }
  0x30   : > { %s7895_s19 = smov [#allocation10]   ;;  %s389_s15 = sshll.u32 %s10701_s8, 4  ;;  %s390_s15 = int_to_ptr.hbm [resolvable:$true] %s389_s15 }
  0x31   : > { %s361_s2 = sshll.u32 %s7895_s19, 4  ;;  %s7896_s4 = smov [#allocation13]   ;;  %s362_s2 = int_to_ptr.vmem [resolvable:$true] %s361_s2 }
  0x32   : > { %7441 = dma.hbm_to_vmem [thread:$0]  (!%p8021_p12), %s360_s16, 30720, %s362_s2, [#allocation9], %s7887_s24, %s7887_s24, %s7888_s14  }
  0x33   : > { %s391_s30 = sshll.u32 %s7896_s4, 4  ;;  %s415_s9 = sshll.u32 %s10703_s10, 4  ;;  %s392_s30 = int_to_ptr.vmem [resolvable:$true] %s391_s30  ;;  %s416_s9 = int_to_ptr.hbm [resolvable:$true] %s415_s9 }
  0x34   : > { %7447 = dma.hbm_to_vmem [thread:$0]  (!%p8021_p12), %s390_s15, 16, %s392_s30, [#allocation12]  }
  0x35   : > { %s7897_s22 = smov [#allocation16]   ;;  %439 = sbr.rel (%p8007_p10) target bundleno = 2498 (0x9c2), region = 64 }
  0x36   : > { %s417_s13 = sshll.u32 %s7897_s22, 4  ;;  %s418_s13 = int_to_ptr.vmem [resolvable:$true] %s417_s13 }
  0x37   : > { %7453 = dma.hbm_to_vmem [thread:$0]  (!%p8021_p12), %s416_s9, 16, %s418_s13, [#allocation15]  }
  0x3a   : > { %7844 = dma.done.wait (%p7458_p9), [#allocation3], 11264  }
  0x3b   : > { %7846 = vsyncadd (%p7458_p9), [#allocation3], 4294956032 }
  0x3c   : > { %7848 = dma.done.wait (%p7458_p9), [#allocation6], 147520  }
  0x3d   : > { %7850 = vsyncadd (%p7458_p9), [#allocation6], 4294819776 }
  0x3e   : > { %7852 = dma.done.wait (%p7458_p9), [#allocation9], 30768  }
  0x3f   : > { %7854 = vsyncadd (%p7458_p9), [#allocation9], 4294936528 }
  0x40   : > { %7856 = dma.done.wait (%p7458_p9), [#allocation12], 32  }
  0x41   : > { %7858 = vsyncadd (%p7458_p9), [#allocation12], 4294967264 }
  0x42   : > { %7860 = dma.done.wait (%p7458_p9), [#allocation15], 1040  }
  0x43   : > { %7862 = vsyncadd (%p7458_p9), [#allocation15], 4294966256  ;;  %vm719_vm0 = vcmask 1043456   ;;  %v632_v0 = vld [vmem:[#allocation2 + $0x280] sm:$0xf]  ;;  %v625_v5 = vld [vmem:[#allocation2 + $0x248] sm:$0xff] }
  0x44   : > { %v633_v1 = vld [vmem:[#allocation2 + $0x288] sm:$0xf]  ;;  %v634_v2 = vld [vmem:[#allocation2 + $0x290] sm:$0xf]  ;;  %7167 = vmatpush.msk.msra.mxu0 %vm719_vm0, %v632_v0  ;;  %v635_v3 = vld [vmem:[#allocation2 + $0x298] sm:$0xf] }
  0x45   : > { %7194 = vmatpush.msk.msra.mxu1 %vm719_vm0, %v633_v1  ;;  %v624_v4 = vld [vmem:[#allocation2 + $0x240] sm:$0xff]  ;;  %7221 = vmatpush.msk.msra.mxu2 %vm719_vm0, %v634_v2  ;;  %v626_v6 = vld [vmem:[#allocation2 + $0x250] sm:$0xff]  ;;  %v627_v7 = vld [vmem:[#allocation2 + $0x258] sm:$0xff]  ;;  %s520_s3 = smul.u32 26, %s7979_s21  ;;  %vm640_vm1 = vcmask 687104   ;;  %vm6955_vm2 = vcmask 523264  }
  0x46   : > { %7248 = vmatpush.msk.msra.mxu3 %vm719_vm0, %v635_v3  ;;  %v616_v8 = vld [vmem:[#allocation2 + $0x200] sm:$0xff]  ;;  %750 = vmatpush.msra.mxu0 %v624_v4  ;;  %v617_v9 = vld [vmem:[#allocation2 + $0x208] sm:$0xff]  ;;  %v618_v10 = vld [vmem:[#allocation2 + $0x210] sm:$0xff]  ;;  %s7819_s30 = scalar_lea.hbm %s10704_s11, 16 }
  0x47   : > { %843 = vmatpush.msra.mxu1 %v625_v5  ;;  %v619_v11 = vld [vmem:[#allocation2 + $0x218] sm:$0xff]  ;;  %936 = vmatpush.msra.mxu2 %v626_v6  ;;  %v608_v12 = vld [vmem:[#allocation2 + $0x1c0] sm:$0xff]  ;;  %v609_v13 = vld [vmem:[#allocation2 + $0x1c8] sm:$0xff]  ;;  %p8093_p13 = scmp.lt.s32.totalorder %s520_s3, 51 }
  0x48   : > { %1029 = vmatpush.msra.mxu3 %v627_v7  ;;  %751 = vmatpush.msra.mxu0 %v616_v8  ;;  %v610_v14 = vld [vmem:[#allocation2 + $0x1d0] sm:$0xff]  ;;  %v611_v15 = vld [vmem:[#allocation2 + $0x1d8] sm:$0xff]  ;;  %v600_v16 = vld [vmem:[#allocation2 + $0x180] sm:$0xff] }
  0x49   : > { %844 = vmatpush.msra.mxu1 %v617_v9  ;;  %937 = vmatpush.msra.mxu2 %v618_v10  ;;  %v601_v17 = vld [vmem:[#allocation2 + $0x188] sm:$0xff]  ;;  %v602_v18 = vld [vmem:[#allocation2 + $0x190] sm:$0xff]  ;;  %v603_v19 = vld [vmem:[#allocation2 + $0x198] sm:$0xff]  ;;  %s11233_s3 = smov (!%p8093_p13, %s520_s3), 51 }
  0x4a   : > { %1030 = vmatpush.msra.mxu3 %v619_v11  ;;  %752 = vmatpush.msra.mxu0 %v608_v12  ;;  %v592_v20 = vld [vmem:[#allocation2 + $0x140] sm:$0xff]  ;;  %v593_v21 = vld [vmem:[#allocation2 + $0x148] sm:$0xff]  ;;  %v594_v22 = vld [vmem:[#allocation2 + $0x150] sm:$0xff]  ;;  %s7166_s25 = sshll.u32 %s11233_s3, 3  ;;  %s517_s3 = sand.u32 1, %s7873_s18  }
  0x4b   : > { %845 = vmatpush.msra.mxu1 %v609_v13  ;;  %938 = vmatpush.msra.mxu2 %v610_v14  ;;  %v595_v23 = vld [vmem:[#allocation2 + $0x158] sm:$0xff]  ;;  %v584_v24 = vld [vmem:[#allocation2 + $0x100] sm:$0xff]  ;;  %v585_v25 = vld [vmem:[#allocation2 + $0x108] sm:$0xff]  ;;  %s8107_s23 = scalar_lea.vmem %s10693_s0, %s7166_s25  ;;  %s7165_s29 = sshll.u32 %s517_s3, 3 }
  0x4c   : > { %1031 = vmatpush.msra.mxu3 %v611_v15  ;;  %753 = vmatpush.msra.mxu0 %v600_v16  ;;  %v586_v26 = vld [vmem:[#allocation2 + $0x110] sm:$0xff]  ;;  %v587_v27 = vld [vmem:[#allocation2 + $0x118] sm:$0xff]  ;;  %v576_v28 = vld [vmem:[#allocation2 + $0xc0] sm:$0xff]  ;;  %s7385_s25 = sshll.u32 %s7979_s21, 3  ;;  %s519_s26 = scalar_lea.vmem [#allocation17], %s7165_s29 }
  0x4d   : > { %846 = vmatpush.msra.mxu1 %v601_v17  ;;  %939 = vmatpush.msra.mxu2 %v602_v18  ;;  %v577_v29 = vld [vmem:[#allocation2 + $0xc8] sm:$0xff]  ;;  %v578_v30 = vld [vmem:[#allocation2 + $0xd0] sm:$0xff]  ;;  %v579_v31 = vld [vmem:[#allocation2 + $0xd8] sm:$0xff]  ;;  %s6993_s16 = sshll.u32 %s519_s26, 4  ;;  %s6981_s2 = scalar_lea.sflag [#allocation4], %s517_s3  ;;  %s6994_s16 = int_to_ptr.vmem [resolvable:$true] %s6993_s16 }
  0x4e   : > { %1032 = vmatpush.msra.mxu3 %v603_v19  ;;  %754 = vmatpush.msra.mxu0 %v592_v20  ;;  %v568_v32 = vld [vmem:[#allocation2 + $0x80] sm:$0xff]  ;;  %v569_v33 = vld [vmem:[#allocation2 + $0x88] sm:$0xff]  ;;  %v570_v34 = vld [vmem:[#allocation2 + $0x90] sm:$0xff] }
  0x4f   : > { %847 = vmatpush.msra.mxu1 %v593_v21  ;;  %940 = vmatpush.msra.mxu2 %v594_v22  ;;  %v571_v35 = vld [vmem:[#allocation2 + $0x98] sm:$0xff]  ;;  %v560_v36 = vld [vmem:[#allocation2 + $0x40] sm:$0xff]  ;;  %v561_v37 = vld [vmem:[#allocation2 + $0x48] sm:$0xff] }
  0x50   : > { %1033 = vmatpush.msra.mxu3 %v595_v23  ;;  %755 = vmatpush.msra.mxu0 %v584_v24  ;;  %v562_v38 = vld [vmem:[#allocation2 + $0x50] sm:$0xff]  ;;  %v563_v39 = vld [vmem:[#allocation2 + $0x58] sm:$0xff]  ;;  %v552_v40 = vld [vmem:[#allocation2] sm:$0xff] }
  0x51   : > { %848 = vmatpush.msra.mxu1 %v585_v25  ;;  %941 = vmatpush.msra.mxu2 %v586_v26  ;;  %v553_v41 = vld [vmem:[#allocation2 + $0x8] sm:$0xff]  ;;  %v554_v42 = vld [vmem:[#allocation2 + $0x10] sm:$0xff]  ;;  %v555_v43 = vld [vmem:[#allocation2 + $0x18] sm:$0xff] }
  0x52   : > { %1034 = vmatpush.msra.mxu3 %v587_v27  ;;  %756 = vmatpush.msra.mxu0 %v576_v28  ;;  %v8110_v44 = vld [vmem:[%s8107_s23] sm:$0xff]  ;;  %v638_v45 = vld [vmem:[#allocation2 + $0x2b0] sm:$0xf]  ;;  %v639_v46 = vld [vmem:[#allocation2 + $0x2b8] sm:$0xf] }
  0x53   : > { %849 = vmatpush.msra.mxu1 %v577_v29  ;;  %942 = vmatpush.msra.mxu2 %v578_v30  ;;  %v636_v47 = vld [vmem:[#allocation2 + $0x2a0] sm:$0xf]  ;;  %v637_v48 = vld [vmem:[#allocation2 + $0x2a8] sm:$0xf]  ;;  %v630_v49 = vld [vmem:[#allocation2 + $0x270] sm:$0xff] }
  0x54   : > { %1035 = vmatpush.msra.mxu3 %v579_v31  ;;  %757 = vmatpush.msra.mxu0 %v568_v32  ;;  %v631_v50 = vld [vmem:[#allocation2 + $0x278] sm:$0xff]  ;;  %v628_v51 = vld [vmem:[#allocation2 + $0x260] sm:$0xff]  ;;  %v629_v52 = vld [vmem:[#allocation2 + $0x268] sm:$0xff] }
  0x55   : > { %850 = vmatpush.msra.mxu1 %v569_v33  ;;  %943 = vmatpush.msra.mxu2 %v570_v34  ;;  %v622_v53 = vld [vmem:[#allocation2 + $0x230] sm:$0xff]  ;;  %v8125_v54 = vld [vmem:[%s8107_s23 + $0x8] sm:$0xff]  ;;  %v623_v55 = vld [vmem:[#allocation2 + $0x238] sm:$0xff] }
  0x56   : > { %1036 = vmatpush.msra.mxu3 %v571_v35  ;;  %758 = vmatpush.msra.mxu0 %v560_v36  ;;  %v620_v56 = vld [vmem:[#allocation2 + $0x220] sm:$0xff]  ;;  %v8136_v57 = vld [vmem:[%s8107_s23 + $0x10] sm:$0xff]  ;;  %v621_v58 = vld [vmem:[#allocation2 + $0x228] sm:$0xff] }
  0x57   : > { %851 = vmatpush.msra.mxu1 %v561_v37  ;;  %944 = vmatpush.msra.mxu2 %v562_v38  ;;  %v8147_v59 = vld [vmem:[%s8107_s23 + $0x18] sm:$0xff]  ;;  %v614_v60 = vld [vmem:[#allocation2 + $0x1f0] sm:$0xff]  ;;  %v8158_v62 = vld [vmem:[%s8107_s23 + $0x20] sm:$0xff] }
  0x58   : > { %1037 = vmatpush.msra.mxu3 %v563_v39  ;;  %759 = vmatpush.msra.mxu0 %v552_v40  ;;  %v615_v61 = vld [vmem:[#allocation2 + $0x1f8] sm:$0xff]  ;;  %v612_v63 = vld [vmem:[#allocation2 + $0x1e0] sm:$0xff]  ;;  %v613_v0 = vld [vmem:[#allocation2 + $0x1e8] sm:$0xff] }
  0x59   : > { %852 = vmatpush.msra.mxu1 %v553_v41  ;;  %945 = vmatpush.msra.mxu2 %v554_v42  ;;  %v8169_v1 = vld [vmem:[%s8107_s23 + $0x28] sm:$0xff]  ;;  %v606_v2 = vld [vmem:[#allocation2 + $0x1b0] sm:$0xff]  ;;  %v607_v3 = vld [vmem:[#allocation2 + $0x1b8] sm:$0xff] }
  0x5a   : > { %1038 = vmatpush.msra.mxu3 %v555_v43  ;;  %7168 = vmatmul.msk.f32.vlgmr.msra.gmra.mxu0 %vm640_vm1, %v8110_v44  ;;  %v8180_v4 = vld [vmem:[%s8107_s23 + $0x30] sm:$0xff]  ;;  %v604_v5 = vld [vmem:[#allocation2 + $0x1a0] sm:$0xff]  ;;  %v605_v6 = vld [vmem:[#allocation2 + $0x1a8] sm:$0xff] }
  0x5b   : > { %7195 = vmatmul.msk.f32.vlgmr.msra.gmra.mxu1 %vm640_vm1, %v8110_v44  ;;  %7222 = vmatmul.msk.f32.vlgmr.msra.gmra.mxu2 %vm640_vm1, %v8110_v44  ;;  %v8191_v7 = vld [vmem:[%s8107_s23 + $0x38] sm:$0xff]  ;;  %v598_v8 = vld [vmem:[#allocation2 + $0x170] sm:$0xff]  ;;  %v8202_v9 = vld [vmem:[%s8107_s23 + $0x40] sm:$0xff] }
  0x5c   : > { %7249 = vmatmul.msk.f32.vlgmr.msra.gmra.mxu3 %vm640_vm1, %v8110_v44  ;;  %7329 = vmatpush.msk.msrb.mxu2 %vm719_vm0, %v638_v45  ;;  %v599_v10 = vld [vmem:[#allocation2 + $0x178] sm:$0xff]  ;;  %v596_v11 = vld [vmem:[#allocation2 + $0x160] sm:$0xff]  ;;  %v8213_v12 = vld [vmem:[%s8107_s23 + $0x48] sm:$0xff] }
  0x5d   : > { %7356 = vmatpush.msk.msrb.mxu3 %vm719_vm0, %v639_v46  ;;  %7275 = vmatpush.msk.msrb.mxu0 %vm719_vm0, %v636_v47  ;;  %v597_v13 = vld [vmem:[#allocation2 + $0x168] sm:$0xff]  ;;  %v8224_v14 = vld [vmem:[%s8107_s23 + $0x50] sm:$0xff]  ;;  %v591_v16 = vld [vmem:[#allocation2 + $0x138] sm:$0xff] }
  0x5e   : > { %7302 = vmatpush.msk.msrb.mxu1 %vm719_vm0, %v637_v48  ;;  %1308 = vmatpush.msrb.mxu2 %v630_v49  ;;  %v590_v15 = vld [vmem:[#allocation2 + $0x130] sm:$0xff]  ;;  %v8235_v17 = vld [vmem:[%s8107_s23 + $0x58] sm:$0xff]  ;;  %v588_v18 = vld [vmem:[#allocation2 + $0x120] sm:$0xff] }
  0x5f   : > { %1401 = vmatpush.msrb.mxu3 %v631_v50  ;;  %1122 = vmatpush.msrb.mxu0 %v628_v51  ;;  %v589_v19 = vld [vmem:[#allocation2 + $0x128] sm:$0xff]  ;;  %v8246_v20 = vld [vmem:[%s8107_s23 + $0x60] sm:$0xff]  ;;  %v582_v22 = vld [vmem:[#allocation2 + $0xf0] sm:$0xff] }
  0x60   : > { %1215 = vmatpush.msrb.mxu1 %v629_v52  ;;  %1309 = vmatpush.msrb.mxu2 %v622_v53  ;;  %v8257_v21 = vld [vmem:[%s8107_s23 + $0x68] sm:$0xff]  ;;  %v583_v23 = vld [vmem:[#allocation2 + $0xf8] sm:$0xff]  ;;  %v8268_v24 = vld [vmem:[%s8107_s23 + $0x70] sm:$0xff] }
  0x61   : > { %1402 = vmatpush.msrb.mxu3 %v623_v55  ;;  %1123 = vmatpush.msrb.mxu0 %v620_v56  ;;  %v580_v25 = vld [vmem:[#allocation2 + $0xe0] sm:$0xff]  ;;  %v581_v26 = vld [vmem:[#allocation2 + $0xe8] sm:$0xff]  ;;  %v8279_v27 = vld [vmem:[%s8107_s23 + $0x78] sm:$0xff] }
  0x62   : > { %7169 = vmatmul.msk.f32.gmra.mxu0 %vm640_vm1, %v8125_v54  ;;  %1216 = vmatpush.msrb.mxu1 %v621_v58  ;;  %v574_v28 = vld [vmem:[#allocation2 + $0xb0] sm:$0xff]  ;;  %v575_v29 = vld [vmem:[#allocation2 + $0xb8] sm:$0xff]  ;;  %v8294_v32 = vld [vmem:[%s8107_s23 + $0x80] sm:$0xff] }
  0x63   : > { %7196 = vmatmul.msk.f32.gmra.mxu1 %vm640_vm1, %v8125_v54  ;;  %7223 = vmatmul.msk.f32.gmra.mxu2 %vm640_vm1, %v8125_v54  ;;  %v572_v33 = vld [vmem:[#allocation2 + $0xa0] sm:$0xff]  ;;  %v573_v34 = vld [vmem:[#allocation2 + $0xa8] sm:$0xff]  ;;  %v566_v42 = vld [vmem:[#allocation2 + $0x70] sm:$0xff] }
  0x64   : > { %7250 = vmatmul.msk.f32.gmra.mxu3 %vm640_vm1, %v8125_v54  ;;  %1310 = vmatpush.msrb.mxu2 %v614_v60  ;;  %v8313_v39 = vld [vmem:[%s8107_s23 + $0x88] sm:$0xff]  ;;  %v8332_v46 = vld [vmem:[%s8107_s23 + $0x90] sm:$0xff]  ;;  %v567_v47 = vld [vmem:[#allocation2 + $0x78] sm:$0xff] }
  0x65   : > { %1403 = vmatpush.msrb.mxu3 %v615_v61  ;;  %1124 = vmatpush.msrb.mxu0 %v612_v63  ;;  %v564_v50 = vld [vmem:[#allocation2 + $0x60] sm:$0xff]  ;;  %v8351_v53 = vld [vmem:[%s8107_s23 + $0x98] sm:$0xff]  ;;  %v565_v55 = vld [vmem:[#allocation2 + $0x68] sm:$0xff] }
  0x66   : > { %1217 = vmatpush.msrb.mxu1 %v613_v0  ;;  %1311 = vmatpush.msrb.mxu2 %v606_v2  ;;  %v8370_v63 = vld [vmem:[%s8107_s23 + $0xa0] sm:$0xff]  ;;  %v558_v0 = vld [vmem:[#allocation2 + $0x30] sm:$0xff]  ;;  %v559_v2 = vld [vmem:[#allocation2 + $0x38] sm:$0xff] }
  0x67   : > { %1404 = vmatpush.msrb.mxu3 %v607_v3  ;;  %1125 = vmatpush.msrb.mxu0 %v604_v5 }
  0x68   : > { %1218 = vmatpush.msrb.mxu1 %v605_v6  ;;  %1312 = vmatpush.msrb.mxu2 %v598_v8 }
  0x69   : > { %1405 = vmatpush.msrb.mxu3 %v599_v10  ;;  %1126 = vmatpush.msrb.mxu0 %v596_v11  ;;  %v8389_v10 = vld [vmem:[%s8107_s23 + $0xa8] sm:$0xff]  ;;  %v556_v11 = vld [vmem:[#allocation2 + $0x20] sm:$0xff] }
  0x6a   : > { %7170 = vmatmul.msk.f32.gmra.mxu0 %vm640_vm1, %v8136_v57  ;;  %1219 = vmatpush.msrb.mxu1 %v597_v13  ;;  %v557_v13 = vld [vmem:[#allocation2 + $0x28] sm:$0xff] }
  0x6b   : > { %7197 = vmatmul.msk.f32.gmra.mxu1 %vm640_vm1, %v8136_v57  ;;  %7224 = vmatmul.msk.f32.gmra.mxu2 %vm640_vm1, %v8136_v57 }
  0x6c   : > { %7251 = vmatmul.msk.f32.gmra.mxu3 %vm640_vm1, %v8136_v57  ;;  %1313 = vmatpush.msrb.mxu2 %v590_v15 }
  0x6d   : > { %1406 = vmatpush.msrb.mxu3 %v591_v16  ;;  %1127 = vmatpush.msrb.mxu0 %v588_v18 }
  0x6e   : > { %1220 = vmatpush.msrb.mxu1 %v589_v19  ;;  %1314 = vmatpush.msrb.mxu2 %v582_v22  ;;  %v8408_v22 = vld [vmem:[%s8107_s23 + $0xb0] sm:$0xff] }
  0x6f   : > { %1407 = vmatpush.msrb.mxu3 %v583_v23  ;;  %1128 = vmatpush.msrb.mxu0 %v580_v25 }
  0x70   : > { %1221 = vmatpush.msrb.mxu1 %v581_v26  ;;  %1315 = vmatpush.msrb.mxu2 %v574_v28 }
  0x71   : > { %1408 = vmatpush.msrb.mxu3 %v575_v29  ;;  %1129 = vmatpush.msrb.mxu0 %v572_v33  ;;  %v8427_v29 = vld [vmem:[%s8107_s23 + $0xb8] sm:$0xff] }
  0x72   : > { %7171 = vmatmul.msk.f32.gmra.mxu0 %vm640_vm1, %v8147_v59  ;;  %1222 = vmatpush.msrb.mxu1 %v573_v34 }
  0x73   : > { %7198 = vmatmul.msk.f32.gmra.mxu1 %vm640_vm1, %v8147_v59  ;;  %7225 = vmatmul.msk.f32.gmra.mxu2 %vm640_vm1, %v8147_v59 }
  0x74   : > { %7252 = vmatmul.msk.f32.gmra.mxu3 %vm640_vm1, %v8147_v59  ;;  %1316 = vmatpush.msrb.mxu2 %v566_v42  ;;  %v2020_v42 = vld [vmem:[#allocation7 + $0x8d0] sm:$0xff] }
  0x75   : > { %1409 = vmatpush.msrb.mxu3 %v567_v47  ;;  %1130 = vmatpush.msrb.mxu0 %v564_v50 }
  0x76   : > { %1223 = vmatpush.msrb.mxu1 %v565_v55  ;;  %1317 = vmatpush.msrb.mxu2 %v558_v0  ;;  %v8446_v55 = vld [vmem:[%s8107_s23 + $0xc0] sm:$0xff]  ;;  %v1828_v0 = vld [vmem:[#allocation7 + $0x2d0] sm:$0xff] }
  0x77   : > { %1410 = vmatpush.msrb.mxu3 %v559_v2  ;;  %1131 = vmatpush.msrb.mxu0 %v556_v11  ;;  %v2116_v2 = vld [vmem:[#allocation7 + $0xbd0] sm:$0xff] }
  0x78   : > { %1224 = vmatpush.msrb.mxu1 %v557_v13  ;;  %2984 = vmatpush.msra.mxu2 %v2020_v42  ;;  %v1924_v11 = vld [vmem:[#allocation7 + $0x5d0] sm:$0xff] }
  0x79   : > { %2890 = vmatpush.msra.mxu0 %v1828_v0  ;;  %3031 = vmatpush.msra.mxu3 %v2116_v2 }
  0x7a   : > { %7172 = vmatmul.msk.f32.gmra.mxu0 %vm640_vm1, %v8158_v62  ;;  %2937 = vmatpush.msra.mxu1 %v1924_v11  ;;  %v2014_v11 = vld [vmem:[#allocation7 + $0x8a0] sm:$0xff] }
  0x7b   : > { %7199 = vmatmul.msk.f32.gmra.mxu1 %vm640_vm1, %v8158_v62  ;;  %7226 = vmatmul.msk.f32.gmra.mxu2 %vm640_vm1, %v8158_v62 }
  0x7c   : > { %7253 = vmatmul.msk.f32.gmra.mxu3 %vm640_vm1, %v8158_v62  ;;  %2985 = vmatpush.msra.mxu2 %v2014_v11 }
  0x82   : > { %7173 = vmatmul.msk.f32.gmra.mxu0 %vm640_vm1, %v8169_v1 }
  0x83   : > { %7200 = vmatmul.msk.f32.gmra.mxu1 %vm640_vm1, %v8169_v1  ;;  %7227 = vmatmul.msk.f32.gmra.mxu2 %vm640_vm1, %v8169_v1 }
  0x84   : > { %7254 = vmatmul.msk.f32.gmra.mxu3 %vm640_vm1, %v8169_v1 }
  0x8a   : > { %7174 = vmatmul.msk.f32.gmra.mxu0 %vm640_vm1, %v8180_v4 }
  0x8b   : > { %7201 = vmatmul.msk.f32.gmra.mxu1 %vm640_vm1, %v8180_v4  ;;  %7228 = vmatmul.msk.f32.gmra.mxu2 %vm640_vm1, %v8180_v4 }
  0x8c   : > { %7255 = vmatmul.msk.f32.gmra.mxu3 %vm640_vm1, %v8180_v4 }
  0x92   : > { %7175 = vmatmul.msk.f32.gmra.mxu0 %vm640_vm1, %v8191_v7 }
  0x93   : > { %7202 = vmatmul.msk.f32.gmra.mxu1 %vm640_vm1, %v8191_v7  ;;  %7229 = vmatmul.msk.f32.gmra.mxu2 %vm640_vm1, %v8191_v7 }
  0x94   : > { %7256 = vmatmul.msk.f32.gmra.mxu3 %vm640_vm1, %v8191_v7 }
  0x9a   : > { %7176 = vmatmul.msk.f32.gmra.mxu0 %vm640_vm1, %v8202_v9 }
  0x9b   : > { %7203 = vmatmul.msk.f32.gmra.mxu1 %vm640_vm1, %v8202_v9  ;;  %7230 = vmatmul.msk.f32.gmra.mxu2 %vm640_vm1, %v8202_v9 }
  0x9c   : > { %7257 = vmatmul.msk.f32.gmra.mxu3 %vm640_vm1, %v8202_v9 }
  0xa2   : > { %7177 = vmatmul.msk.f32.gmra.mxu0 %vm640_vm1, %v8213_v12 }
  0xa3   : > { %7204 = vmatmul.msk.f32.gmra.mxu1 %vm640_vm1, %v8213_v12  ;;  %7231 = vmatmul.msk.f32.gmra.mxu2 %vm640_vm1, %v8213_v12 }
  0xa4   : > { %7258 = vmatmul.msk.f32.gmra.mxu3 %vm640_vm1, %v8213_v12 }
  0xaa   : > { %7178 = vmatmul.msk.f32.gmra.mxu0 %vm640_vm1, %v8224_v14 }
  0xab   : > { %7205 = vmatmul.msk.f32.gmra.mxu1 %vm640_vm1, %v8224_v14  ;;  %7232 = vmatmul.msk.f32.gmra.mxu2 %vm640_vm1, %v8224_v14 }
  0xac   : > { %7259 = vmatmul.msk.f32.gmra.mxu3 %vm640_vm1, %v8224_v14 }
  0xb2   : > { %7179 = vmatmul.msk.f32.gmra.mxu0 %vm640_vm1, %v8235_v17 }
  0xb3   : > { %7206 = vmatmul.msk.f32.gmra.mxu1 %vm640_vm1, %v8235_v17  ;;  %7233 = vmatmul.msk.f32.gmra.mxu2 %vm640_vm1, %v8235_v17 }
  0xb4   : > { %7260 = vmatmul.msk.f32.gmra.mxu3 %vm640_vm1, %v8235_v17 }
  0xba   : > { %7180 = vmatmul.msk.f32.gmra.mxu0 %vm640_vm1, %v8246_v20 }
  0xbb   : > { %7207 = vmatmul.msk.f32.gmra.mxu1 %vm640_vm1, %v8246_v20  ;;  %7234 = vmatmul.msk.f32.gmra.mxu2 %vm640_vm1, %v8246_v20 }
  0xbc   : > { %7261 = vmatmul.msk.f32.gmra.mxu3 %vm640_vm1, %v8246_v20 }
  0xc2   : > { %7181 = vmatmul.msk.f32.gmra.mxu0 %vm640_vm1, %v8257_v21 }
  0xc3   : > { %7208 = vmatmul.msk.f32.gmra.mxu1 %vm640_vm1, %v8257_v21  ;;  %7235 = vmatmul.msk.f32.gmra.mxu2 %vm640_vm1, %v8257_v21 }
  0xc4   : > { %7262 = vmatmul.msk.f32.gmra.mxu3 %vm640_vm1, %v8257_v21 }
  0xca   : > { %7182 = vmatmul.msk.f32.gmra.mxu0 %vm640_vm1, %v8268_v24 }
  0xcb   : > { %7209 = vmatmul.msk.f32.gmra.mxu1 %vm640_vm1, %v8268_v24  ;;  %7236 = vmatmul.msk.f32.gmra.mxu2 %vm640_vm1, %v8268_v24 }
  0xcc   : > { %7263 = vmatmul.msk.f32.gmra.mxu3 %vm640_vm1, %v8268_v24 }
  0xd2   : > { %7183 = vmatmul.msk.f32.gmra.mxu0 %vm640_vm1, %v8279_v27 }
  0xd3   : > { %7210 = vmatmul.msk.f32.gmra.mxu1 %vm640_vm1, %v8279_v27  ;;  %7237 = vmatmul.msk.f32.gmra.mxu2 %vm640_vm1, %v8279_v27 }
  0xd4   : > { %7264 = vmatmul.msk.f32.gmra.mxu3 %vm640_vm1, %v8279_v27 }
  0xd7   : > { %v8289_v30 = vpop.f32.mrf.mxu0 }
  0xd8   : > { %v8291_v31 = vpop.f32.mrf.mxu1 }
  0xda   : > { %7184 = vmatmul.msk.f32.gmra.mxu0 %vm640_vm1, %v8294_v32 }
  0xdb   : > { %7211 = vmatmul.msk.f32.gmra.mxu1 %vm640_vm1, %v8294_v32  ;;  %7238 = vmatmul.msk.f32.gmra.mxu2 %vm640_vm1, %v8294_v32 }
  0xdc   : > { %7265 = vmatmul.msk.f32.gmra.mxu3 %vm640_vm1, %v8294_v32 }
  0xde   : > { %v8304_v35 = vpop.f32.mrf.mxu2 }
  0xdf   : > { %v8306_v36 = vpop.f32.mrf.mxu3  ;;  %v8308_v37 = vpop.f32.mrf.mxu0 }
  0xe0   : > { %v8310_v38 = vpop.f32.mrf.mxu1 }
  0xe2   : > { %7185 = vmatmul.msk.f32.gmra.mxu0 %vm640_vm1, %v8313_v39 }
  0xe3   : > { %7212 = vmatmul.msk.f32.gmra.mxu1 %vm640_vm1, %v8313_v39  ;;  %7239 = vmatmul.msk.f32.gmra.mxu2 %vm640_vm1, %v8313_v39 }
  0xe4   : > { %7266 = vmatmul.msk.f32.gmra.mxu3 %vm640_vm1, %v8313_v39 }
  0xe6   : > { %v8323_v40 = vpop.f32.mrf.mxu2 }
  0xe7   : > { %v8325_v41 = vpop.f32.mrf.mxu3  ;;  %v8327_v43 = vpop.f32.mrf.mxu0 }
  0xe8   : > { %v8329_v45 = vpop.f32.mrf.mxu1 }
  0xea   : > { %7186 = vmatmul.msk.f32.gmra.mxu0 %vm640_vm1, %v8332_v46 }
  0xeb   : > { %7213 = vmatmul.msk.f32.gmra.mxu1 %vm640_vm1, %v8332_v46  ;;  %7240 = vmatmul.msk.f32.gmra.mxu2 %vm640_vm1, %v8332_v46 }
  0xec   : > { %7267 = vmatmul.msk.f32.gmra.mxu3 %vm640_vm1, %v8332_v46 }
  0xee   : > { %v8342_v48 = vpop.f32.mrf.mxu2 }
  0xef   : > { %v8344_v49 = vpop.f32.mrf.mxu3  ;;  %v8346_v51 = vpop.f32.mrf.mxu0 }
  0xf0   : > { %v8348_v52 = vpop.f32.mrf.mxu1 }
  0xf2   : > { %7187 = vmatmul.msk.f32.gmra.mxu0 %vm640_vm1, %v8351_v53 }
  0xf3   : > { %7214 = vmatmul.msk.f32.gmra.mxu1 %vm640_vm1, %v8351_v53  ;;  %7241 = vmatmul.msk.f32.gmra.mxu2 %vm640_vm1, %v8351_v53 }
  0xf4   : > { %7268 = vmatmul.msk.f32.gmra.mxu3 %vm640_vm1, %v8351_v53 }
  0xf6   : > { %v8361_v56 = vpop.f32.mrf.mxu2 }
  0xf7   : > { %v8363_v58 = vpop.f32.mrf.mxu3  ;;  %v8365_v60 = vpop.f32.mrf.mxu0 }
  0xf8   : > { %v8367_v61 = vpop.f32.mrf.mxu1 }
  0xfa   : > { %7188 = vmatmul.msk.f32.gmra.mxu0 %vm640_vm1, %v8370_v63 }
  0xfb   : > { %7215 = vmatmul.msk.f32.gmra.mxu1 %vm640_vm1, %v8370_v63  ;;  %7242 = vmatmul.msk.f32.gmra.mxu2 %vm640_vm1, %v8370_v63 }
  0xfc   : > { %7269 = vmatmul.msk.f32.gmra.mxu3 %vm640_vm1, %v8370_v63 }
  0xfe   : > { %v8380_v3 = vpop.f32.mrf.mxu2 }
  0xff   : > { %v8382_v5 = vpop.f32.mrf.mxu3  ;;  %v8384_v6 = vpop.f32.mrf.mxu0 }
 0x100   : > { %v8386_v8 = vpop.f32.mrf.mxu1 }
 0x102   : > { %7189 = vmatmul.msk.f32.gmra.mxu0 %vm640_vm1, %v8389_v10 }
 0x103   : > { %7216 = vmatmul.msk.f32.gmra.mxu1 %vm640_vm1, %v8389_v10  ;;  %7243 = vmatmul.msk.f32.gmra.mxu2 %vm640_vm1, %v8389_v10 }
 0x104   : > { %7270 = vmatmul.msk.f32.gmra.mxu3 %vm640_vm1, %v8389_v10 }
 0x106   : > { %v8399_v15 = vpop.f32.mrf.mxu2 }
 0x107   : > { %v8401_v16 = vpop.f32.mrf.mxu3  ;;  %v8403_v18 = vpop.f32.mrf.mxu0 }
 0x108   : > { %10835 = vst [vmem:[#allocation27_spill] sm:$0xff] %v8403_v18  ;;  %v8405_v19 = vpop.f32.mrf.mxu1 }
 0x109   : > { %10836 = vst [vmem:[#allocation28_spill] sm:$0xff] %v8405_v19  ;;  %v1930_v19 = vld [vmem:[#allocation7 + $0x600] sm:$0xff] }
 0x10a   : > { %7190 = vmatmul.msk.f32.gmra.mxu0 %vm640_vm1, %v8408_v22 }
 0x10b   : > { %7217 = vmatmul.msk.f32.gmra.mxu1 %vm640_vm1, %v8408_v22  ;;  %7244 = vmatmul.msk.f32.gmra.mxu2 %vm640_vm1, %v8408_v22 }
 0x10c   : > { %7271 = vmatmul.msk.f32.gmra.mxu3 %vm640_vm1, %v8408_v22 }
 0x10e   : > { %v8418_v23 = vpop.f32.mrf.mxu2 }
 0x10f   : > { %10837 = vst [vmem:[#allocation29_spill] sm:$0xff] %v8418_v23  ;;  %v8420_v25 = vpop.f32.mrf.mxu3  ;;  %v8422_v26 = vpop.f32.mrf.mxu0  ;;  %v1918_v23 = vld [vmem:[#allocation7 + $0x5a0] sm:$0xff] }
 0x110   : > { %10838 = vst [vmem:[#allocation30_spill] sm:$0xff] %v8420_v25  ;;  %v8424_v28 = vpop.f32.mrf.mxu1  ;;  %2938 = vmatpush.msra.mxu1 %v1918_v23  ;;  %v2008_v23 = vld [vmem:[#allocation7 + $0x870] sm:$0xff] }
 0x111   : > { %2986 = vmatpush.msra.mxu2 %v2008_v23 }
 0x112   : > { %7191 = vmatmul.msk.f32.gmra.mxu0 %vm640_vm1, %v8427_v29 }
 0x113   : > { %7218 = vmatmul.msk.f32.gmra.mxu1 %vm640_vm1, %v8427_v29  ;;  %7245 = vmatmul.msk.f32.gmra.mxu2 %vm640_vm1, %v8427_v29 }
 0x114   : > { %7272 = vmatmul.msk.f32.gmra.mxu3 %vm640_vm1, %v8427_v29 }
 0x116   : > { %v8437_v33 = vpop.f32.mrf.mxu2 }
 0x117   : > { %10839 = vst [vmem:[#allocation31_spill] sm:$0xff] %v8437_v33  ;;  %v8439_v34 = vpop.f32.mrf.mxu3  ;;  %v8441_v47 = vpop.f32.mrf.mxu0 }
 0x118   : > { %10840 = vst [vmem:[#allocation32_spill] sm:$0xff] %v8439_v34  ;;  %v8443_v50 = vpop.f32.mrf.mxu1  ;;  %v2212_v34 = vld [vmem:[#allocation7 + $0xed0] sm:$0xff] }
 0x119   : > { %10841 = vst [vmem:[#allocation33_spill] sm:$0xff] %v8441_v47  ;;  %v1822_v47 = vld [vmem:[#allocation7 + $0x2a0] sm:$0xff] }
 0x11a   : > { %10842 = vst [vmem:[#allocation34_spill] sm:$0xff] %v8443_v50  ;;  %7192 = vmatmul.msk.f32.gmra.mxu0 %vm640_vm1, %v8446_v55  ;;  %v8465_v50 = vld [vmem:[%s8107_s23 + $0xc8] sm:$0xff]  ;;  %s6991_s23 = scalar_lea.hbm %s10704_s11, %s7385_s25 }
 0x11b   : > { %7219 = vmatmul.msk.f32.gmra.mxu1 %vm640_vm1, %v8446_v55  ;;  %7246 = vmatmul.msk.f32.gmra.mxu2 %vm640_vm1, %v8446_v55  ;;  %s6995_s19 = sshll.u32 %s6991_s23, 4  ;;  %s6996_s19 = int_to_ptr.hbm [resolvable:$true] %s6995_s19 }
 0x11c   : > { %7273 = vmatmul.msk.f32.gmra.mxu3 %vm640_vm1, %v8446_v55  ;;  %2891 = vmatpush.msra.mxu0 %v1822_v47  ;;  %s7813_s6 = sshra.s32 %s6996_s19, 4  ;;  %s7814_s6 = int_to_ptr.hbm [resolvable:$true] %s7813_s6 }
 0x11d   : > { %s7815_s15 = scalar_lea.hbm %s7814_s6, 8  ;;  %p7820_p3 = scmp.lt.s32.totalorder %s7814_s6, %s10704_s11 }
 0x11e   : > { %v8456_v13 = vpop.f32.mrf.mxu2  ;;  %p7816_p0 = scmp.ne.s32.totalorder %s7814_s6, %s7815_s15  ;;  %p7821_p4 = scmp.lt.s32.totalorder %s7819_s30, %s7815_s15 }
 0x11f   : > { %10843 = vst [vmem:[#allocation35_spill] sm:$0xff] %v8456_v13  ;;  %v8458_v42 = vpop.f32.mrf.mxu3  ;;  %v8460_v0 = vpop.f32.mrf.mxu0 }
 0x120   : > { %10844 = vst [vmem:[#allocation36_spill] sm:$0xff] %v8458_v42  ;;  %v8462_v2 = vpop.f32.mrf.mxu1  ;;  %p7817_p1 = pnand %p7816_p0, %p7996_p5  ;;  %p7822_p7 = por %p7821_p4, %p7820_p3 }
 0x121   : > { %10845 = vst [vmem:[#allocation37_spill] sm:$0xff] %v8460_v0 }
 0x122   : > { %10846 = vst [vmem:[#allocation38_spill] sm:$0xff] %v8462_v2  ;;  %7193 = vmatmul.msk.f32.gmra.mxu0 %vm640_vm1, %v8465_v50  ;;  %v2110_v2 = vld [vmem:[#allocation7 + $0xba0] sm:$0xff]  ;;  %p7818_p2 = pneg %p7817_p1 }
 0x123   : > { %7220 = vmatmul.msk.f32.gmra.mxu1 %vm640_vm1, %v8465_v50  ;;  %7247 = vmatmul.msk.f32.gmra.mxu2 %vm640_vm1, %v8465_v50 }
 0x124   : > { %7274 = vmatmul.msk.f32.gmra.mxu3 %vm640_vm1, %v8465_v50  ;;  %p7823_p8 = pnand %p7822_p7, %p7818_p2 }
 0x125   : > { %3032 = vmatpush.msra.mxu3 %v2110_v2 }
 0x126   : > { %v8475_v42 = vpop.f32.mrf.mxu2 }
 0x127   : > { %10847 = vst [vmem:[#allocation39_spill] sm:$0xff] %v8475_v42  ;;  %v8477_v13 = vpop.f32.mrf.mxu3  ;;  %v8479_v0 = vpop.f32.mrf.mxu0  ;;  %v1834_v42 = vld [vmem:[#allocation7 + $0x300] sm:$0xff] }
 0x128   : > { %10848 = vst [vmem:[#allocation40_spill] sm:$0xff] %v8477_v13  ;;  %v8481_v25 = vpop.f32.mrf.mxu1 }
 0x129   : > { %10849 = vst [vmem:[#allocation41_spill] sm:$0xff] %v8479_v0 }
 0x12a   : > { %10850 = vst [vmem:[#allocation42_spill] sm:$0xff] %v8481_v25  ;;  %7276 = vmatmul.msk.f32.vlgmr.msrb.gmra.mxu0 %vm640_vm1, %v8110_v44 }
 0x12b   : > { %7303 = vmatmul.msk.f32.vlgmr.msrb.gmra.mxu1 %vm640_vm1, %v8110_v44  ;;  %7330 = vmatmul.msk.f32.vlgmr.msrb.gmra.mxu2 %vm640_vm1, %v8110_v44 }
 0x12c   : > { %7357 = vmatmul.msk.f32.vlgmr.msrb.gmra.mxu3 %vm640_vm1, %v8110_v44  ;;  %v1816_v44 = vld [vmem:[#allocation7 + $0x270] sm:$0xff] }
 0x12d   : > { %2892 = vmatpush.msra.mxu0 %v1816_v44 }
 0x12e   : > { %v8491_v11 = vpop.f32.mrf.mxu2 }
 0x12f   : > { %10851 = vst [vmem:[#allocation43_spill] sm:$0xff] %v8491_v11  ;;  %v8493_v0 = vpop.f32.mrf.mxu3  ;;  %v8495_v47 = vpop.f32.mrf.mxu0  ;;  %v1912_v11 = vld [vmem:[#allocation7 + $0x570] sm:$0xff] }
 0x130   : > { %10852 = vst [vmem:[#allocation44_spill] sm:$0xff] %v8493_v0  ;;  %v8497_v2 = vpop.f32.mrf.mxu1  ;;  %v2104_v0 = vld [vmem:[#allocation7 + $0xb70] sm:$0xff]  ;;  %2939 = vmatpush.msra.mxu1 %v1912_v11  ;;  %v2002_v11 = vld [vmem:[#allocation7 + $0x840] sm:$0xff] }
 0x131   : > { %10853 = vst [vmem:[#allocation45_spill] sm:$0xff] %v8495_v47  ;;  %3033 = vmatpush.msra.mxu3 %v2104_v0  ;;  %2987 = vmatpush.msra.mxu2 %v2002_v11 }
 0x132   : > { %10854 = vst [vmem:[#allocation46_spill] sm:$0xff] %v8497_v2  ;;  %7277 = vmatmul.msk.f32.gmra.mxu0 %vm640_vm1, %v8125_v54 }
 0x133   : > { %7304 = vmatmul.msk.f32.gmra.mxu1 %vm640_vm1, %v8125_v54  ;;  %7331 = vmatmul.msk.f32.gmra.mxu2 %vm640_vm1, %v8125_v54 }
 0x134   : > { %7358 = vmatmul.msk.f32.gmra.mxu3 %vm640_vm1, %v8125_v54 }
 0x136   : > { %v8507_v25 = vpop.f32.mrf.mxu2 }
 0x137   : > { %10855 = vst [vmem:[#allocation47_spill] sm:$0xff] %v8507_v25  ;;  %v8509_v23 = vpop.f32.mrf.mxu3  ;;  %v8511_v2 = vpop.f32.mrf.mxu0  ;;  %v1906_v25 = vld [vmem:[#allocation7 + $0x540] sm:$0xff] }
 0x138   : > { %10856 = vst [vmem:[#allocation48_spill] sm:$0xff] %v8509_v23  ;;  %v8513_v47 = vpop.f32.mrf.mxu1  ;;  %v2098_v23 = vld [vmem:[#allocation7 + $0xb40] sm:$0xff]  ;;  %2940 = vmatpush.msra.mxu1 %v1906_v25  ;;  %v1804_v25 = vld [vmem:[#allocation7 + $0x210] sm:$0xff] }
 0x139   : > { %10857 = vst [vmem:[#allocation49_spill] sm:$0xff] %v8511_v2  ;;  %v1810_v2 = vld [vmem:[#allocation7 + $0x240] sm:$0xff]  ;;  %3034 = vmatpush.msra.mxu3 %v2098_v23  ;;  %v2092_v23 = vld [vmem:[#allocation7 + $0xb10] sm:$0xff] }
 0x13a   : > { %10858 = vst [vmem:[#allocation50_spill] sm:$0xff] %v8513_v47  ;;  %7278 = vmatmul.msk.f32.gmra.mxu0 %vm640_vm1, %v8136_v57 }
 0x13b   : > { %7305 = vmatmul.msk.f32.gmra.mxu1 %vm640_vm1, %v8136_v57  ;;  %7332 = vmatmul.msk.f32.gmra.mxu2 %vm640_vm1, %v8136_v57 }
 0x13c   : > { %7359 = vmatmul.msk.f32.gmra.mxu3 %vm640_vm1, %v8136_v57  ;;  %2893 = vmatpush.msra.mxu0 %v1810_v2 }
 0x13d   : > { %3035 = vmatpush.msra.mxu3 %v2092_v23 }
 0x13e   : > { %v8523_v54 = vpop.f32.mrf.mxu2  ;;  %2894 = vmatpush.msra.mxu0 %v1804_v25 }
 0x13f   : > { %10859 = vst [vmem:[#allocation51_spill] sm:$0xff] %v8523_v54  ;;  %v8525_v0 = vpop.f32.mrf.mxu3  ;;  %v8527_v44 = vpop.f32.mrf.mxu0  ;;  %v1900_v54 = vld [vmem:[#allocation7 + $0x510] sm:$0xff] }
 0x140   : > { %10860 = vst [vmem:[#allocation52_spill] sm:$0xff] %v8525_v0  ;;  %v8529_v47 = vpop.f32.mrf.mxu1  ;;  %2941 = vmatpush.msra.mxu1 %v1900_v54  ;;  %v1990_v54 = vld [vmem:[#allocation7 + $0x7e0] sm:$0xff] }
 0x141   : > { %10861 = vst [vmem:[#allocation53_spill] sm:$0xff] %v8527_v44  ;;  %v1840_v44 = vld [vmem:[#allocation7 + $0x330] sm:$0xff] }
 0x142   : > { %10862 = vst [vmem:[#allocation54_spill] sm:$0xff] %v8529_v47  ;;  %7279 = vmatmul.msk.f32.gmra.mxu0 %vm640_vm1, %v8147_v59  ;;  %v2032_v47 = vld [vmem:[#allocation7 + $0x930] sm:$0xff] }
 0x143   : > { %7306 = vmatmul.msk.f32.gmra.mxu1 %vm640_vm1, %v8147_v59  ;;  %7333 = vmatmul.msk.f32.gmra.mxu2 %vm640_vm1, %v8147_v59 }
 0x144   : > { %7360 = vmatmul.msk.f32.gmra.mxu3 %vm640_vm1, %v8147_v59  ;;  %v1996_v59 = vld [vmem:[#allocation7 + $0x810] sm:$0xff] }
 0x145   : > { %2988 = vmatpush.msra.mxu2 %v1996_v59 }
 0x146   : > { %v8539_v57 = vpop.f32.mrf.mxu2 }
 0x147   : > { %10863 = vst [vmem:[#allocation55_spill] sm:$0xff] %v8539_v57  ;;  %v8541_v11 = vpop.f32.mrf.mxu3  ;;  %v8543_v0 = vpop.f32.mrf.mxu0  ;;  %2989 = vmatpush.msra.mxu2 %v1990_v54 }
 0x148   : > { %10864 = vst [vmem:[#allocation56_spill] sm:$0xff] %v8541_v11  ;;  %v8545_v2 = vpop.f32.mrf.mxu1 }
 0x149   : > { %10865 = vst [vmem:[#allocation57_spill] sm:$0xff] %v8543_v0 }
 0x14a   : > { %10866 = vst [vmem:[#allocation58_spill] sm:$0xff] %v8545_v2  ;;  %7280 = vmatmul.msk.f32.gmra.mxu0 %vm640_vm1, %v8158_v62 }
 0x14b   : > { %7307 = vmatmul.msk.f32.gmra.mxu1 %vm640_vm1, %v8158_v62  ;;  %7334 = vmatmul.msk.f32.gmra.mxu2 %vm640_vm1, %v8158_v62 }
 0x14c   : > { %7361 = vmatmul.msk.f32.gmra.mxu3 %vm640_vm1, %v8158_v62 }
 0x14e   : > { %v8555_v0 = vpop.f32.mrf.mxu2 }
 0x14f   : > { %10867 = vst [vmem:[#allocation59_spill] sm:$0xff] %v8555_v0  ;;  %v8557_v2 = vpop.f32.mrf.mxu3  ;;  %v8559_v11 = vpop.f32.mrf.mxu0  ;;  %v2086_v0 = vld [vmem:[#allocation7 + $0xae0] sm:$0xff] }
 0x150   : > { %10868 = vst [vmem:[#allocation60_spill] sm:$0xff] %v8557_v2  ;;  %v8561_v57 = vpop.f32.mrf.mxu1  ;;  %v1798_v2 = vld [vmem:[#allocation7 + $0x1e0] sm:$0xff]  ;;  %3036 = vmatpush.msra.mxu3 %v2086_v0 }
 0x151   : > { %10869 = vst [vmem:[#allocation61_spill] sm:$0xff] %v8559_v11  ;;  %2895 = vmatpush.msra.mxu0 %v1798_v2 }
 0x152   : > { %10870 = vst [vmem:[#allocation62_spill] sm:$0xff] %v8561_v57  ;;  %7281 = vmatmul.msk.f32.gmra.mxu0 %vm640_vm1, %v8169_v1  ;;  %v1846_v57 = vld [vmem:[#allocation7 + $0x360] sm:$0xff] }
 0x153   : > { %7308 = vmatmul.msk.f32.gmra.mxu1 %vm640_vm1, %v8169_v1  ;;  %7335 = vmatmul.msk.f32.gmra.mxu2 %vm640_vm1, %v8169_v1 }
 0x154   : > { %7362 = vmatmul.msk.f32.gmra.mxu3 %vm640_vm1, %v8169_v1  ;;  %v1894_v1 = vld [vmem:[#allocation7 + $0x4e0] sm:$0xff] }
 0x155   : > { %2942 = vmatpush.msra.mxu1 %v1894_v1 }
 0x156   : > { %v8571_v62 = vpop.f32.mrf.mxu2 }
 0x157   : > { %10871 = vst [vmem:[#allocation63_spill] sm:$0xff] %v8571_v62  ;;  %v8573_v59 = vpop.f32.mrf.mxu3  ;;  %v8575_v25 = vpop.f32.mrf.mxu0 }
 0x158   : > { %10872 = vst [vmem:[#allocation64_spill] sm:$0xff] %v8573_v59  ;;  %v8577_v23 = vpop.f32.mrf.mxu1  ;;  %v1888_v59 = vld [vmem:[#allocation7 + $0x4b0] sm:$0xff] }
 0x159   : > { %10873 = vst [vmem:[#allocation65_spill] sm:$0xff] %v8575_v25  ;;  %2943 = vmatpush.msra.mxu1 %v1888_v59  ;;  %v1978_v59 = vld [vmem:[#allocation7 + $0x780] sm:$0xff] }
 0x15a   : > { %10874 = vst [vmem:[#allocation66_spill] sm:$0xff] %v8577_v23  ;;  %7282 = vmatmul.msk.f32.gmra.mxu0 %vm640_vm1, %v8180_v4 }
 0x15b   : > { %7309 = vmatmul.msk.f32.gmra.mxu1 %vm640_vm1, %v8180_v4  ;;  %7336 = vmatmul.msk.f32.gmra.mxu2 %vm640_vm1, %v8180_v4 }
 0x15c   : > { %7363 = vmatmul.msk.f32.gmra.mxu3 %vm640_vm1, %v8180_v4  ;;  %v1984_v4 = vld [vmem:[#allocation7 + $0x7b0] sm:$0xff] }
 0x15d   : > { %2990 = vmatpush.msra.mxu2 %v1984_v4 }
 0x15e   : > { %v8587_v23 = vpop.f32.mrf.mxu2 }
 0x15f   : > { %10875 = vst [vmem:[#allocation67_spill] sm:$0xff] %v8587_v23  ;;  %v8589_v25 = vpop.f32.mrf.mxu3  ;;  %v8591_v2 = vpop.f32.mrf.mxu0  ;;  %v2080_v23 = vld [vmem:[#allocation7 + $0xab0] sm:$0xff]  ;;  %2991 = vmatpush.msra.mxu2 %v1978_v59  ;;  %v1882_v59 = vld [vmem:[#allocation7 + $0x480] sm:$0xff] }
 0x160   : > { %10876 = vst [vmem:[#allocation68_spill] sm:$0xff] %v8589_v25  ;;  %v8593_v0 = vpop.f32.mrf.mxu1  ;;  %v1792_v25 = vld [vmem:[#allocation7 + $0x1b0] sm:$0xff]  ;;  %3037 = vmatpush.msra.mxu3 %v2080_v23  ;;  %2944 = vmatpush.msra.mxu1 %v1882_v59 }
 0x161   : > { %10877 = vst [vmem:[#allocation69_spill] sm:$0xff] %v8591_v2  ;;  %2896 = vmatpush.msra.mxu0 %v1792_v25 }
 0x162   : > { %10878 = vst [vmem:[#allocation70_spill] sm:$0xff] %v8593_v0  ;;  %7283 = vmatmul.msk.f32.gmra.mxu0 %vm640_vm1, %v8191_v7 }
 0x163   : > { %7310 = vmatmul.msk.f32.gmra.mxu1 %vm640_vm1, %v8191_v7  ;;  %7337 = vmatmul.msk.f32.gmra.mxu2 %vm640_vm1, %v8191_v7 }
 0x164   : > { %7364 = vmatmul.msk.f32.gmra.mxu3 %vm640_vm1, %v8191_v7 }
 0x166   : > { %v8603_v54 = vpop.f32.mrf.mxu2 }
 0x167   : > { %10879 = vst [vmem:[#allocation71_spill] sm:$0xff] %v8603_v54  ;;  %v8605_v1 = vpop.f32.mrf.mxu3  ;;  %v8607_v0 = vpop.f32.mrf.mxu0 }
 0x168   : > { %10880 = vst [vmem:[#allocation72_spill] sm:$0xff] %v8605_v1  ;;  %v8609_v2 = vpop.f32.mrf.mxu1  ;;  %v2038_v1 = vld [vmem:[#allocation7 + $0x960] sm:$0xff] }
 0x169   : > { %10881 = vst [vmem:[#allocation73_spill] sm:$0xff] %v8607_v0  ;;  %v1750_v0 = vld [vmem:[#allocation7 + $0x60] sm:$0xff] }
 0x16a   : > { %10882 = vst [vmem:[#allocation74_spill] sm:$0xff] %v8609_v2  ;;  %7284 = vmatmul.msk.f32.gmra.mxu0 %vm640_vm1, %v8202_v9 }
 0x16b   : > { %7311 = vmatmul.msk.f32.gmra.mxu1 %vm640_vm1, %v8202_v9  ;;  %7338 = vmatmul.msk.f32.gmra.mxu2 %vm640_vm1, %v8202_v9 }
 0x16c   : > { %7365 = vmatmul.msk.f32.gmra.mxu3 %vm640_vm1, %v8202_v9  ;;  %v1786_v9 = vld [vmem:[#allocation7 + $0x180] sm:$0xff] }
 0x16d   : > { %2897 = vmatpush.msra.mxu0 %v1786_v9  ;;  %v1972_v9 = vld [vmem:[#allocation7 + $0x750] sm:$0xff] }
 0x16e   : > { %v8619_v7 = vpop.f32.mrf.mxu2  ;;  %2992 = vmatpush.msra.mxu2 %v1972_v9 }
 0x16f   : > { %10883 = vst [vmem:[#allocation75_spill] sm:$0xff] %v8619_v7  ;;  %v8621_v4 = vpop.f32.mrf.mxu3  ;;  %v8623_v25 = vpop.f32.mrf.mxu0 }
 0x170   : > { %10884 = vst [vmem:[#allocation76_spill] sm:$0xff] %v8621_v4  ;;  %v8625_v23 = vpop.f32.mrf.mxu1  ;;  %v2074_v4 = vld [vmem:[#allocation7 + $0xa80] sm:$0xff] }
 0x171   : > { %10885 = vst [vmem:[#allocation77_spill] sm:$0xff] %v8623_v25  ;;  %3038 = vmatpush.msra.mxu3 %v2074_v4 }
 0x172   : > { %10886 = vst [vmem:[#allocation78_spill] sm:$0xff] %v8625_v23  ;;  %7285 = vmatmul.msk.f32.gmra.mxu0 %vm640_vm1, %v8213_v12 }
 0x173   : > { %7312 = vmatmul.msk.f32.gmra.mxu1 %vm640_vm1, %v8213_v12  ;;  %7339 = vmatmul.msk.f32.gmra.mxu2 %vm640_vm1, %v8213_v12 }
 0x174   : > { %7366 = vmatmul.msk.f32.gmra.mxu3 %vm640_vm1, %v8213_v12 }
 0x176   : > { %v8635_v7 = vpop.f32.mrf.mxu2 }
 0x177   : > { %10887 = vst [vmem:[#allocation79_spill] sm:$0xff] %v8635_v7  ;;  %v8637_v23 = vpop.f32.mrf.mxu3  ;;  %v8639_v25 = vpop.f32.mrf.mxu0 }
 0x178   : > { %10888 = vst [vmem:[#allocation80_spill] sm:$0xff] %v8637_v23  ;;  %v8641_v2 = vpop.f32.mrf.mxu1  ;;  %v2068_v23 = vld [vmem:[#allocation7 + $0xa50] sm:$0xff] }
 0x179   : > { %10889 = vst [vmem:[#allocation81_spill] sm:$0xff] %v8639_v25  ;;  %3039 = vmatpush.msra.mxu3 %v2068_v23 }
 0x17a   : > { %10890 = vst [vmem:[#allocation82_spill] sm:$0xff] %v8641_v2  ;;  %7286 = vmatmul.msk.f32.gmra.mxu0 %vm640_vm1, %v8224_v14  ;;  %v1780_v2 = vld [vmem:[#allocation7 + $0x150] sm:$0xff] }
 0x17b   : > { %7313 = vmatmul.msk.f32.gmra.mxu1 %vm640_vm1, %v8224_v14  ;;  %7340 = vmatmul.msk.f32.gmra.mxu2 %vm640_vm1, %v8224_v14 }
 0x17c   : > { %7367 = vmatmul.msk.f32.gmra.mxu3 %vm640_vm1, %v8224_v14  ;;  %2898 = vmatpush.msra.mxu0 %v1780_v2  ;;  %v1876_v14 = vld [vmem:[#allocation7 + $0x450] sm:$0xff] }
 0x17d   : > { %2945 = vmatpush.msra.mxu1 %v1876_v14 }
 0x17e   : > { %v8651_v12 = vpop.f32.mrf.mxu2 }
 0x17f   : > { %10891 = vst [vmem:[#allocation83_spill] sm:$0xff] %v8651_v12  ;;  %v8653_v4 = vpop.f32.mrf.mxu3  ;;  %v8655_v25 = vpop.f32.mrf.mxu0 }
 0x180   : > { %10892 = vst [vmem:[#allocation84_spill] sm:$0xff] %v8653_v4  ;;  %v8657_v59 = vpop.f32.mrf.mxu1 }
 0x181   : > { %10893 = vst [vmem:[#allocation85_spill] sm:$0xff] %v8655_v25 }
 0x182   : > { %10894 = vst [vmem:[#allocation86_spill] sm:$0xff] %v8657_v59  ;;  %7287 = vmatmul.msk.f32.gmra.mxu0 %vm640_vm1, %v8235_v17 }
 0x183   : > { %7314 = vmatmul.msk.f32.gmra.mxu1 %vm640_vm1, %v8235_v17  ;;  %7341 = vmatmul.msk.f32.gmra.mxu2 %vm640_vm1, %v8235_v17 }
 0x184   : > { %7368 = vmatmul.msk.f32.gmra.mxu3 %vm640_vm1, %v8235_v17  ;;  %v1966_v17 = vld [vmem:[#allocation7 + $0x720] sm:$0xff] }
 0x185   : > { %2993 = vmatpush.msra.mxu2 %v1966_v17 }
 0x186   : > { %v8667_v4 = vpop.f32.mrf.mxu2 }
 0x187   : > { %10895 = vst [vmem:[#allocation87_spill] sm:$0xff] %v8667_v4  ;;  %v8669_v9 = vpop.f32.mrf.mxu3  ;;  %v8671_v2 = vpop.f32.mrf.mxu0  ;;  %v2062_v4 = vld [vmem:[#allocation7 + $0xa20] sm:$0xff] }
 0x188   : > { %10896 = vst [vmem:[#allocation88_spill] sm:$0xff] %v8669_v9  ;;  %v8673_v23 = vpop.f32.mrf.mxu1  ;;  %v1774_v9 = vld [vmem:[#allocation7 + $0x120] sm:$0xff]  ;;  %3040 = vmatpush.msra.mxu3 %v2062_v4  ;;  %v1768_v4 = vld [vmem:[#allocation7 + $0xf0] sm:$0xff] }
 0x189   : > { %10897 = vst [vmem:[#allocation89_spill] sm:$0xff] %v8671_v2  ;;  %2899 = vmatpush.msra.mxu0 %v1774_v9 }
 0x18a   : > { %10898 = vst [vmem:[#allocation90_spill] sm:$0xff] %v8673_v23  ;;  %7288 = vmatmul.msk.f32.gmra.mxu0 %vm640_vm1, %v8246_v20 }
 0x18b   : > { %7315 = vmatmul.msk.f32.gmra.mxu1 %vm640_vm1, %v8246_v20  ;;  %7342 = vmatmul.msk.f32.gmra.mxu2 %vm640_vm1, %v8246_v20 }
 0x18c   : > { %7369 = vmatmul.msk.f32.gmra.mxu3 %vm640_vm1, %v8246_v20  ;;  %2900 = vmatpush.msra.mxu0 %v1768_v4  ;;  %v2050_v4 = vld [vmem:[#allocation7 + $0x9c0] sm:$0xff] }
 0x18e   : > { %v8683_v14 = vpop.f32.mrf.mxu2 }
 0x18f   : > { %10899 = vst [vmem:[#allocation91_spill] sm:$0xff] %v8683_v14  ;;  %v8685_v12 = vpop.f32.mrf.mxu3  ;;  %v8687_v2 = vpop.f32.mrf.mxu0 }
 0x190   : > { %10900 = vst [vmem:[#allocation92_spill] sm:$0xff] %v8685_v12  ;;  %v8689_v23 = vpop.f32.mrf.mxu1  ;;  %v1870_v12 = vld [vmem:[#allocation7 + $0x420] sm:$0xff] }
 0x191   : > { %10901 = vst [vmem:[#allocation93_spill] sm:$0xff] %v8687_v2  ;;  %2946 = vmatpush.msra.mxu1 %v1870_v12  ;;  %v1864_v12 = vld [vmem:[#allocation7 + $0x3f0] sm:$0xff] }
 0x192   : > { %10902 = vst [vmem:[#allocation94_spill] sm:$0xff] %v8689_v23  ;;  %7289 = vmatmul.msk.f32.gmra.mxu0 %vm640_vm1, %v8257_v21  ;;  %v1756_v2 = vld [vmem:[#allocation7 + $0x90] sm:$0xff] }
 0x193   : > { %7316 = vmatmul.msk.f32.gmra.mxu1 %vm640_vm1, %v8257_v21  ;;  %7343 = vmatmul.msk.f32.gmra.mxu2 %vm640_vm1, %v8257_v21 }
 0x194   : > { %7370 = vmatmul.msk.f32.gmra.mxu3 %vm640_vm1, %v8257_v21  ;;  %v1960_v21 = vld [vmem:[#allocation7 + $0x6f0] sm:$0xff]  ;;  %2947 = vmatpush.msra.mxu1 %v1864_v12 }
 0x195   : > { %2994 = vmatpush.msra.mxu2 %v1960_v21 }
 0x196   : > { %v8699_v20 = vpop.f32.mrf.mxu2 }
 0x197   : > { %10903 = vst [vmem:[#allocation95_spill] sm:$0xff] %v8699_v20  ;;  %v8701_v17 = vpop.f32.mrf.mxu3  ;;  %v833_v14 = vpop.f32.mrf.mxu0  ;;  %v2056_v20 = vld [vmem:[#allocation7 + $0x9f0] sm:$0xff] }
 0x198   : > { %10904 = vst [vmem:[#allocation96_spill] sm:$0xff] %v8701_v17  ;;  %v926_v9 = vpop.f32.mrf.mxu1  ;;  %3041 = vmatpush.msra.mxu3 %v2056_v20  ;;  %v1954_v20 = vld [vmem:[#allocation7 + $0x6c0] sm:$0xff] }
 0x199   : > { %2995 = vmatpush.msra.mxu2 %v1954_v20 }
 0x19a   : > { %7290 = vmatmul.msk.f32.gmra.mxu0 %vm640_vm1, %v8268_v24  ;;  %3042 = vmatpush.msra.mxu3 %v2050_v4  ;;  %v2044_v4 = vld [vmem:[#allocation7 + $0x990] sm:$0xff] }
 0x19b   : > { %7317 = vmatmul.msk.f32.gmra.mxu1 %vm640_vm1, %v8268_v24  ;;  %7344 = vmatmul.msk.f32.gmra.mxu2 %vm640_vm1, %v8268_v24 }
 0x19c   : > { %7371 = vmatmul.msk.f32.gmra.mxu3 %vm640_vm1, %v8268_v24 }
 0x19d   : > { %3043 = vmatpush.msra.mxu3 %v2044_v4 }
 0x19e   : > { %v1019_v17 = vpop.f32.mrf.mxu2 }
 0x19f   : > { %v1112_v23 = vpop.f32.mrf.mxu3  ;;  %v835_v14 = vpop.f32.mrf.mxu0  ;;  %3044 = vmatpush.msra.mxu3 %v2038_v1  ;;  %v1744_v1 = vld [vmem:[#allocation7 + $0x30] sm:$0xff] }
 0x1a0   : > { %v928_v9 = vpop.f32.mrf.mxu1 }
 0x1a1   : > { %v1858_v9 = vld [vmem:[#allocation7 + $0x3c0] sm:$0xff]  ;;  %3045 = vmatpush.msra.mxu3 %v2032_v47 }
 0x1a2   : > { %7291 = vmatmul.msk.f32.gmra.mxu0 %vm640_vm1, %v8279_v27  ;;  %2948 = vmatpush.msra.mxu1 %v1858_v9 }
 0x1a3   : > { %7318 = vmatmul.msk.f32.gmra.mxu1 %vm640_vm1, %v8279_v27  ;;  %7345 = vmatmul.msk.f32.gmra.mxu2 %vm640_vm1, %v8279_v27 }
 0x1a4   : > { %7372 = vmatmul.msk.f32.gmra.mxu3 %vm640_vm1, %v8279_v27  ;;  %v1762_v27 = vld [vmem:[#allocation7 + $0xc0] sm:$0xff] }
 0x1a5   : > { %2901 = vmatpush.msra.mxu0 %v1762_v27  ;;  %v1948_v27 = vld [vmem:[#allocation7 + $0x690] sm:$0xff] }
 0x1a6   : > { %v1021_v24 = vpop.f32.mrf.mxu2  ;;  %2996 = vmatpush.msra.mxu2 %v1948_v27 }
 0x1a7   : > { %v1114_v23 = vpop.f32.mrf.mxu3  ;;  %v8719_v17 = vpop.f32.mrf.mxu0  ;;  %2902 = vmatpush.msra.mxu0 %v1756_v2 }
 0x1a8   : > { %v8721_v21 = vpop.f32.mrf.mxu1  ;;  %v1488_v33 = vmax.f32 %v8289_v30, %v8719_v17  ;;  %v2494_v17 = vld [vmem:[#allocation7 + $0x17a0] sm:$0xff] }
 0x1a9   : > { %2903 = vmatpush.msra.mxu0 %v1750_v0 }
 0x1aa   : > { %7292 = vmatmul.msk.f32.gmra.mxu0 %vm640_vm1, %v8294_v32 }
 0x1ab   : > { %7319 = vmatmul.msk.f32.gmra.mxu1 %vm640_vm1, %v8294_v32  ;;  %7346 = vmatmul.msk.f32.gmra.mxu2 %vm640_vm1, %v8294_v32 }
 0x1ac   : > { %7373 = vmatmul.msk.f32.gmra.mxu3 %vm640_vm1, %v8294_v32  ;;  %2904 = vmatpush.msra.mxu0 %v1744_v1  ;;  %v1738_v1 = vld [vmem:[#allocation7] sm:$0xff] }
 0x1ae   : > { %v8731_v12 = vpop.f32.mrf.mxu2  ;;  %2905 = vmatpush.msra.mxu0 %v1738_v1 }
 0x1af   : > { %v8733_v14 = vpop.f32.mrf.mxu3  ;;  %v8735_v24 = vpop.f32.mrf.mxu0 }
 0x1b0   : > { %v8737_v23 = vpop.f32.mrf.mxu1  ;;  %3078 = vmatpush.msrb.mxu0 %v2212_v34 }
 0x1b2   : > { %7293 = vmatmul.msk.f32.gmra.mxu0 %vm640_vm1, %v8313_v39 }
 0x1b3   : > { %7320 = vmatmul.msk.f32.gmra.mxu1 %vm640_vm1, %v8313_v39  ;;  %7347 = vmatmul.msk.f32.gmra.mxu2 %vm640_vm1, %v8313_v39 }
 0x1b4   : > { %7374 = vmatmul.msk.f32.gmra.mxu3 %vm640_vm1, %v8313_v39  ;;  %v1852_v39 = vld [vmem:[#allocation7 + $0x390] sm:$0xff] }
 0x1b5   : > { %2949 = vmatpush.msra.mxu1 %v1852_v39  ;;  %v1942_v39 = vld [vmem:[#allocation7 + $0x660] sm:$0xff] }
 0x1b6   : > { %v8747_v32 = vpop.f32.mrf.mxu2  ;;  %2997 = vmatpush.msra.mxu2 %v1942_v39 }
 0x1b7   : > { %v8749_v20 = vpop.f32.mrf.mxu3  ;;  %v8751_v9 = vpop.f32.mrf.mxu0  ;;  %2950 = vmatpush.msra.mxu1 %v1846_v57 }
 0x1b8   : > { %v8753_v59 = vpop.f32.mrf.mxu1 }
 0x1b9   : > { %2951 = vmatpush.msra.mxu1 %v1840_v44 }
 0x1ba   : > { %7294 = vmatmul.msk.f32.gmra.mxu0 %vm640_vm1, %v8332_v46 }
 0x1bb   : > { %7321 = vmatmul.msk.f32.gmra.mxu1 %vm640_vm1, %v8332_v46  ;;  %7348 = vmatmul.msk.f32.gmra.mxu2 %vm640_vm1, %v8332_v46 }
 0x1bc   : > { %7375 = vmatmul.msk.f32.gmra.mxu3 %vm640_vm1, %v8332_v46  ;;  %2952 = vmatpush.msra.mxu1 %v1834_v42 }
 0x1be   : > { %v8763_v25 = vpop.f32.mrf.mxu2 }
 0x1bf   : > { %v8765_v7 = vpop.f32.mrf.mxu3  ;;  %v8767_v2 = vpop.f32.mrf.mxu0 }
 0x1c0   : > { %v8769_v27 = vpop.f32.mrf.mxu1 }
 0x1c2   : > { %7295 = vmatmul.msk.f32.gmra.mxu0 %vm640_vm1, %v8351_v53 }
 0x1c3   : > { %7322 = vmatmul.msk.f32.gmra.mxu1 %vm640_vm1, %v8351_v53  ;;  %7349 = vmatmul.msk.f32.gmra.mxu2 %vm640_vm1, %v8351_v53 }
 0x1c4   : > { %7376 = vmatmul.msk.f32.gmra.mxu3 %vm640_vm1, %v8351_v53  ;;  %v1936_v53 = vld [vmem:[#allocation7 + $0x630] sm:$0xff] }
 0x1c5   : > { %2998 = vmatpush.msra.mxu2 %v1936_v53 }
 0x1c6   : > { %v8779_v46 = vpop.f32.mrf.mxu2 }
 0x1c7   : > { %v8781_v4 = vpop.f32.mrf.mxu3  ;;  %v8783_v54 = vpop.f32.mrf.mxu0  ;;  %2999 = vmatpush.msra.mxu2 %v1930_v19 }
 0x1c8   : > { %v8785_v62 = vpop.f32.mrf.mxu1 }
 0x1ca   : > { %7296 = vmatmul.msk.f32.gmra.mxu0 %vm640_vm1, %v8370_v63 }
 0x1cb   : > { %7323 = vmatmul.msk.f32.gmra.mxu1 %vm640_vm1, %v8370_v63  ;;  %7350 = vmatmul.msk.f32.gmra.mxu2 %vm640_vm1, %v8370_v63 }
 0x1cc   : > { %7377 = vmatmul.msk.f32.gmra.mxu3 %vm640_vm1, %v8370_v63 }
 0x1ce   : > { %v8795_v11 = vpop.f32.mrf.mxu2 }
 0x1cf   : > { %v8797_v39 = vpop.f32.mrf.mxu3  ;;  %v8799_v0 = vpop.f32.mrf.mxu0 }
 0x1d0   : > { %v8801_v57 = vpop.f32.mrf.mxu1 }
 0x1d2   : > { %7297 = vmatmul.msk.f32.gmra.mxu0 %vm640_vm1, %v8389_v10 }
 0x1d3   : > { %7324 = vmatmul.msk.f32.gmra.mxu1 %vm640_vm1, %v8389_v10  ;;  %7351 = vmatmul.msk.f32.gmra.mxu2 %vm640_vm1, %v8389_v10 }
 0x1d4   : > { %7378 = vmatmul.msk.f32.gmra.mxu3 %vm640_vm1, %v8389_v10  ;;  %v2026_v10 = vld [vmem:[#allocation7 + $0x900] sm:$0xff] }
 0x1d5   : > { %3046 = vmatpush.msra.mxu3 %v2026_v10  ;;  %v1584_v10 = vld [vmem:[#allocation5] sm:$0xf] }
 0x1d6   : > { %v8811_v63 = vpop.f32.mrf.mxu2 }
 0x1d7   : > { %v8813_v53 = vpop.f32.mrf.mxu3  ;;  %v8815_v13 = vpop.f32.mrf.mxu0 }
 0x1d8   : > { %10905 = vst [vmem:[#allocation97_spill] sm:$0xff] %v8815_v13  ;;  %v8817_v47 = vpop.f32.mrf.mxu1 }
 0x1d9   : > { %10906 = vst [vmem:[#allocation98_spill] sm:$0xff] %v8817_v47 }
 0x1da   : > { %7298 = vmatmul.msk.f32.gmra.mxu0 %vm640_vm1, %v8408_v22 }
 0x1db   : > { %7325 = vmatmul.msk.f32.gmra.mxu1 %vm640_vm1, %v8408_v22  ;;  %7352 = vmatmul.msk.f32.gmra.mxu2 %vm640_vm1, %v8408_v22 }
 0x1dc   : > { %7379 = vmatmul.msk.f32.gmra.mxu3 %vm640_vm1, %v8408_v22 }
 0x1de   : > { %v8827_v44 = vpop.f32.mrf.mxu2 }
 0x1df   : > { %10907 = vst [vmem:[#allocation99_spill] sm:$0xff] %v8827_v44  ;;  %v8829_v47 = vpop.f32.mrf.mxu3  ;;  %v8831_v18 = vpop.f32.mrf.mxu0  ;;  %v2404_v44 = vld [vmem:[#allocation7 + $0x14d0] sm:$0xff] }
 0x1e0   : > { %10908 = vst [vmem:[#allocation100_spill] sm:$0xff] %v8829_v47  ;;  %v8833_v13 = vpop.f32.mrf.mxu1  ;;  %v1495_v47 = vmax.f32 %v8325_v41, %v8749_v20  ;;  %3172 = vmatpush.msrb.mxu2 %v2404_v44  ;;  %v1490_v41 = vmax.f32 %v8304_v35, %v8731_v12  ;;  %v8883_v20 = vperm.slane %v1584_v10, 0  ;;  %v8885_v44 = vperm.slane %v1584_v10, 1 }
 0x1e1   : > { %v8887_v12 = vperm.slane %v1584_v10, 2 }
 0x1e2   : > { %7299 = vmatmul.msk.f32.gmra.mxu0 %vm640_vm1, %v8427_v29 }
 0x1e3   : > { %7326 = vmatmul.msk.f32.gmra.mxu1 %vm640_vm1, %v8427_v29  ;;  %7353 = vmatmul.msk.f32.gmra.mxu2 %vm640_vm1, %v8427_v29 }
 0x1e4   : > { %7380 = vmatmul.msk.f32.gmra.mxu3 %vm640_vm1, %v8427_v29  ;;  %v1492_v29 = vmax.f32 %v8308_v37, %v8735_v24 }
 0x1e6   : > { %v8843_v19 = vpop.f32.mrf.mxu2 }
 0x1e7   : > { %v8845_v22 = vpop.f32.mrf.mxu3  ;;  %v8847_v42 = vpop.f32.mrf.mxu0 }
 0x1e8   : > { %10909 = vst [vmem:[#allocation101_spill] sm:$0xff] %v8845_v22  ;;  %v8849_v1 = vpop.f32.mrf.mxu1  ;;  %v2500_v22 = vld [vmem:[#allocation7 + $0x17d0] sm:$0xff] }
 0x1e9   : > { %10910 = vst [vmem:[#allocation102_spill] sm:$0xff] %v8847_v42  ;;  %v1493_v42 = vmax.f32 %v8310_v38, %v8737_v23  ;;  %v2308_v38 = vld [vmem:[#allocation7 + $0x11d0] sm:$0xff]  ;;  %v1491_v23 = vmax.f32 %v8306_v36, %v8733_v14  ;;  %3219 = vmatpush.msrb.mxu3 %v2500_v22  ;;  %v8889_v14 = vperm.slane %v1584_v10, 3  ;;  %v1502_v10 = vmax.f32 %v8361_v56, %v8779_v46 }
 0x1ea   : > { %10911 = vst [vmem:[#allocation103_spill] sm:$0xff] %v8849_v1  ;;  %7300 = vmatmul.msk.f32.gmra.mxu0 %vm640_vm1, %v8446_v55  ;;  %v1494_v1 = vmax.f32 %v8323_v40, %v8747_v32  ;;  %v2398_v40 = vld [vmem:[#allocation7 + $0x14a0] sm:$0xff]  ;;  %3125 = vmatpush.msrb.mxu1 %v2308_v38  ;;  %v1497_v38 = vmax.f32 %v8329_v45, %v8753_v59  ;;  %v2296_v45 = vld [vmem:[#allocation7 + $0x1170] sm:$0xff] }
 0x1eb   : > { %7327 = vmatmul.msk.f32.gmra.mxu1 %vm640_vm1, %v8446_v55  ;;  %7354 = vmatmul.msk.f32.gmra.mxu2 %vm640_vm1, %v8446_v55  ;;  %v1588_v36 = vmax.f32 %v1491_v23, %v1495_v47  ;;  %v1500_v47 = vmax.f32 %v8346_v51, %v8767_v2  ;;  %v1499_v56 = vmax.f32 %v8344_v49, %v8765_v7 }
 0x1ec   : > { %7381 = vmatmul.msk.f32.gmra.mxu3 %vm640_vm1, %v8446_v55  ;;  %v1489_v55 = vmax.f32 %v8291_v31, %v8721_v21  ;;  %v2206_v31 = vld [vmem:[#allocation7 + $0xea0] sm:$0xff]  ;;  %v1585_v21 = vmax.f32 %v1488_v33, %v1492_v29  ;;  %3173 = vmatpush.msrb.mxu2 %v2398_v40  ;;  %v1587_v35 = vmax.f32 %v1490_v41, %v1494_v1  ;;  %v2200_v40 = vld [vmem:[#allocation7 + $0xe70] sm:$0xff] }
 0x1ed   : > { %3079 = vmatpush.msrb.mxu0 %v2206_v31  ;;  %3220 = vmatpush.msrb.mxu3 %v2494_v17  ;;  %v1601_v29 = vadd.f32 %v8889_v14, %v1588_v36  ;;  %v1498_v41 = vmax.f32 %v8342_v48, %v8763_v25 }
 0x1ee   : > { %v8871_v37 = vpop.f32.mrf.mxu2  ;;  %v1586_v34 = vmax.f32 %v1489_v55, %v1493_v42  ;;  %v1598_v33 = vadd.f32 %v8883_v20, %v1585_v21  ;;  %v1501_v42 = vmax.f32 %v8348_v52, %v8769_v27  ;;  %v1600_v1 = vadd.f32 %v8887_v12, %v1587_v35  ;;  %v2302_v52 = vld [vmem:[#allocation7 + $0x11a0] sm:$0xff]  ;;  %v2392_v27 = vld [vmem:[#allocation7 + $0x1470] sm:$0xff] }
 0x1ef   : > { %v8873_v24 = vpop.f32.mrf.mxu3  ;;  %v8879_v32 = vpop.f32.mrf.mxu0  ;;  %v1496_v55 = vmax.f32 %v8327_v43, %v8751_v9  ;;  %3126 = vmatpush.msrb.mxu1 %v2302_v52  ;;  %3174 = vmatpush.msrb.mxu2 %v2392_v27  ;;  %v2488_v43 = vld [vmem:[#allocation7 + $0x1770] sm:$0xff]  ;;  %v8933_v25 = vmax.f32 %v1601_v29, 0.0  ;;  %v1608_v49 = vmax.f32 %v1498_v41, %v1502_v10  ;;  %v1508_v21 = vmax.f32 %v8384_v6, %v8799_v0 }
 0x1f0   : > { %v8881_v30 = vpop.f32.mrf.mxu1  ;;  %v1599_v22 = vadd.f32 %v8885_v44, %v1586_v34  ;;  %v8927_v59 = vmax.f32 %v1598_v33, 0.0  ;;  %v1607_v23 = vmax.f32 %v1497_v38, %v1501_v42  ;;  %3080 = vmatpush.msrb.mxu0 %v2200_v40  ;;  %3221 = vmatpush.msrb.mxu3 %v2488_v43  ;;  %v8931_v48 = vmax.f32 %v1600_v1, 0.0  ;;  %v2194_v42 = vld [vmem:[#allocation7 + $0xe40] sm:$0xff] }
 0x1f1   : > { %10915 = vst [vmem:[#allocation107_spill] sm:$0xff] %v8933_v25  ;;  %3127 = vmatpush.msrb.mxu1 %v2296_v45  ;;  %v1509_v34 = vmax.f32 %v8386_v8, %v8801_v57  ;;  %v1612_v35 = vadd.f32 %v1608_v49, %v8887_v12  ;;  %v1510_v33 = vmax.f32 %v8399_v15, %v8811_v63  ;;  %v2482_v1 = vld [vmem:[#allocation7 + $0x1740] sm:$0xff]  ;;  %v2380_v15 = vld [vmem:[#allocation7 + $0x1410] sm:$0xff] }
 0x1f2   : > { %7301 = vmatmul.msk.f32.gmra.mxu0 %vm640_vm1, %v8465_v50  ;;  %10912 = vst [vmem:[#allocation104_spill] sm:$0xff] %v8927_v59  ;;  %v8929_v9 = vmax.f32 %v1599_v22, 0.0  ;;  %v1611_v17 = vadd.f32 %v1607_v23, %v8885_v44  ;;  %v1511_v22 = vmax.f32 %v8401_v16, %v8813_v53  ;;  %v1504_v29 = vmax.f32 %v8365_v60, %v8783_v54  ;;  %v2290_v57 = vld [vmem:[#allocation7 + $0x1140] sm:$0xff]  ;;  %v2188_v63 = vld [vmem:[#allocation7 + $0xe10] sm:$0xff] }
 0x1f3   : > { %7328 = vmatmul.msk.f32.gmra.mxu1 %vm640_vm1, %v8465_v50  ;;  %7355 = vmatmul.msk.f32.gmra.mxu2 %vm640_vm1, %v8465_v50  ;;  %10914 = vst [vmem:[#allocation106_spill] sm:$0xff] %v8931_v48  ;;  %v1505_v6 = vmax.f32 %v8367_v61, %v8785_v62  ;;  %v1506_v16 = vmax.f32 %v8380_v3, %v8795_v11  ;;  %v2476_v61 = vld [vmem:[#allocation7 + $0x1710] sm:$0xff]  ;;  %v8971_v3 = vmax.f32 %v1612_v35, 0.0  ;;  %v10920_v45 = vld [vmem:[#allocation31_spill] sm:$0xff]  ;;  %v10922_v49 = vld [vmem:[#allocation32_spill] sm:$0xff] }
 0x1f4   : > { %7382 = vmatmul.msk.f32.gmra.mxu3 %vm640_vm1, %v8465_v50  ;;  %v1503_v50 = vmax.f32 %v8363_v58, %v8781_v4  ;;  %10913 = vst [vmem:[#allocation105_spill] sm:$0xff] %v8929_v9  ;;  %v1606_v4 = vmax.f32 %v1496_v55, %v1500_v47  ;;  %v2386_v47 = vld [vmem:[#allocation7 + $0x1440] sm:$0xff]  ;;  %3081 = vmatpush.msrb.mxu0 %v2194_v42  ;;  %v2284_v62 = vld [vmem:[#allocation7 + $0x1110] sm:$0xff] }
 0x1f5   : > { %3175 = vmatpush.msrb.mxu2 %v2386_v47  ;;  %v1507_v53 = vmax.f32 %v8382_v5, %v8797_v39  ;;  %3222 = vmatpush.msrb.mxu3 %v2482_v1  ;;  %v1618_v55 = vmax.f32 %v1504_v29, %v1508_v21  ;;  %v1619_v38 = vmax.f32 %v1505_v6, %v1509_v34  ;;  %v10921_v23 = vld [vmem:[#allocation101_spill] sm:$0xff]  ;;  %v10925_v34 = vld [vmem:[#allocation98_spill] sm:$0xff]  ;;  %v10926_v35 = vld [vmem:[#allocation28_spill] sm:$0xff] }
 0x1f6   : > { %v8915_v51 = vpop.f32.mrf.mxu2  ;;  %v1609_v7 = vmax.f32 %v1499_v56, %v1503_v50  ;;  %v1610_v31 = vadd.f32 %v1606_v4, %v8883_v20  ;;  %3128 = vmatpush.msrb.mxu1 %v2290_v57  ;;  %v8969_v50 = vmax.f32 %v1611_v17, 0.0  ;;  %3082 = vmatpush.msrb.mxu0 %v2188_v63  ;;  %10918 = vst [vmem:[#allocation110_spill] sm:$0xff] %v8971_v3  ;;  %v10924_v17 = vld [vmem:[#allocation27_spill] sm:$0xff]  ;;  %v10928_v47 = vld [vmem:[#allocation29_spill] sm:$0xff]  ;;  %v10930_v1 = vld [vmem:[#allocation30_spill] sm:$0xff] }
 0x1f7   : > { %v8917_v2 = vpop.f32.mrf.mxu3  ;;  %v8923_v58 = vpop.f32.mrf.mxu0  ;;  %3176 = vmatpush.msrb.mxu2 %v2380_v15  ;;  %v1620_v5 = vmax.f32 %v1506_v16, %v1510_v33  ;;  %v1621_v39 = vmax.f32 %v1507_v53, %v1511_v22  ;;  %3223 = vmatpush.msrb.mxu3 %v2476_v61  ;;  %v1622_v52 = vadd.f32 %v1618_v55, %v8883_v20  ;;  %v2470_v33 = vld [vmem:[#allocation7 + $0x16e0] sm:$0xff]  ;;  %v2368_v63 = vld [vmem:[#allocation7 + $0x13b0] sm:$0xff] }
 0x1f8   : > { %v8925_v46 = vpop.f32.mrf.mxu1  ;;  %v1613_v36 = vadd.f32 %v1609_v7, %v8889_v14  ;;  %v8967_v54 = vmax.f32 %v1610_v31, 0.0  ;;  %10917 = vst [vmem:[#allocation109_spill] sm:$0xff] %v8969_v50  ;;  %3129 = vmatpush.msrb.mxu1 %v2284_v62  ;;  %v1623_v27 = vadd.f32 %v1619_v38, %v8885_v44  ;;  %v1516_v40 = vmax.f32 %v8422_v26, %v8831_v18  ;;  %v10923_v31 = vld [vmem:[#allocation97_spill] sm:$0xff]  ;;  %v10927_v22 = vld [vmem:[#allocation99_spill] sm:$0xff] }
 0x1f9   : > { %v1517_v41 = vmax.f32 %v8424_v28, %v8833_v13  ;;  %v1624_v56 = vadd.f32 %v1620_v5, %v8887_v12  ;;  %v1625_v43 = vadd.f32 %v1621_v39, %v8889_v14  ;;  %v1518_v4 = vmax.f32 %v10920_v45, %v8843_v19  ;;  %v2374_v28 = vld [vmem:[#allocation7 + $0x13e0] sm:$0xff]  ;;  %3224 = vmatpush.msrb.mxu3 %v2470_v33 }
 0x1fa   : > { %2906 = vmatmul.f32.vlgmr.msra.gmra.mxu0 %v8927_v59  ;;  %10916 = vst [vmem:[#allocation108_spill] sm:$0xff] %v8967_v54  ;;  %v8973_v11 = vmax.f32 %v1613_v36, 0.0  ;;  %v1519_v7 = vmax.f32 %v10922_v49, %v10921_v23  ;;  %v1512_v21 = vmax.f32 %v10924_v17, %v10923_v31  ;;  %v1513_v36 = vmax.f32 %v10926_v35, %v10925_v34  ;;  %v2182_v13 = vld [vmem:[#allocation7 + $0xde0] sm:$0xff]  ;;  %v2176_v17 = vld [vmem:[#allocation7 + $0xdb0] sm:$0xff] }
 0x1fb   : > { %2953 = vmatmul.f32.vlgmr.msra.gmra.mxu1 %v8929_v9  ;;  %3000 = vmatmul.f32.vlgmr.msra.gmra.mxu2 %v8931_v48  ;;  %v1514_v42 = vmax.f32 %v10928_v47, %v10927_v22  ;;  %v10929_v19 = vld [vmem:[#allocation100_spill] sm:$0xff]  ;;  %v9007_v16 = vmax.f32 %v1622_v52, 0.0  ;;  %v9009_v53 = vmax.f32 %v1623_v27, 0.0  ;;  %v9011_v55 = vmax.f32 %v1624_v56, 0.0  ;;  %v10935_v56 = vld [vmem:[#allocation38_spill] sm:$0xff]  ;;  %v10936_v23 = vld [vmem:[#allocation39_spill] sm:$0xff] }
 0x1fc   : > { %3047 = vmatmul.f32.vlgmr.msra.gmra.mxu3 %v8933_v25  ;;  %10919 = vst [vmem:[#allocation111_spill] sm:$0xff] %v8973_v11  ;;  %v1515_v29 = vmax.f32 %v10930_v1, %v10929_v19  ;;  %3177 = vmatpush.msrb.mxu2 %v2374_v28  ;;  %v2278_v15 = vld [vmem:[#allocation7 + $0x10e0] sm:$0xff]  ;;  %v1630_v61 = vmax.f32 %v1512_v21, %v1516_v40  ;;  %v9013_v38 = vmax.f32 %v1625_v43, 0.0  ;;  %v10934_v40 = vld [vmem:[#allocation37_spill] sm:$0xff]  ;;  %v10938_v35 = vld [vmem:[#allocation102_spill] sm:$0xff] }
 0x1fd   : > { %3083 = vmatpush.msrb.mxu0 %v2182_v13  ;;  %10931 = vst [vmem:[#allocation31_spill] sm:$0xff] %v9007_v16  ;;  %v1631_v62 = vmax.f32 %v1513_v36, %v1517_v41  ;;  %3130 = vmatpush.msrb.mxu1 %v2278_v15  ;;  %v1632_v5 = vmax.f32 %v1514_v42, %v1518_v4  ;;  %v2464_v21 = vld [vmem:[#allocation7 + $0x16b0] sm:$0xff]  ;;  %v2362_v47 = vld [vmem:[#allocation7 + $0x1380] sm:$0xff] }
 0x1fe   : > { %v8955_v8 = vpop.f32.mrf.mxu2  ;;  %10932 = vst [vmem:[#allocation101_spill] sm:$0xff] %v9009_v53  ;;  %v1633_v39 = vmax.f32 %v1515_v29, %v1519_v7  ;;  %3178 = vmatpush.msrb.mxu2 %v2368_v63  ;;  %v1634_v52 = vadd.f32 %v1630_v61, %v8883_v20  ;;  %v1524_v41 = vmax.f32 %v10934_v40, %v8879_v32  ;;  %v10937_v7 = vld [vmem:[#allocation40_spill] sm:$0xff]  ;;  %v2272_v34 = vld [vmem:[#allocation7 + $0x10b0] sm:$0xff]  ;;  %v10940_v32 = vld [vmem:[#allocation103_spill] sm:$0xff] }
 0x1ff   : > { %v8957_v0 = vpop.f32.mrf.mxu3  ;;  %v8963_v10 = vpop.f32.mrf.mxu0  ;;  %10933 = vst [vmem:[#allocation32_spill] sm:$0xff] %v9013_v38  ;;  %v1635_v27 = vadd.f32 %v1631_v62, %v8885_v44  ;;  %v1525_v43 = vmax.f32 %v10935_v56, %v8881_v30  ;;  %v1636_v45 = vadd.f32 %v1632_v5, %v8887_v12  ;;  %v1526_v49 = vmax.f32 %v10936_v23, %v8915_v51  ;;  %v10939_v36 = vld [vmem:[#allocation33_spill] sm:$0xff]  ;;  %v10941_v13 = vld [vmem:[#allocation34_spill] sm:$0xff]  ;;  %v2170_v51 = vld [vmem:[#allocation7 + $0xd80] sm:$0xff] }
 0x200   : > { %v8965_v60 = vpop.f32.mrf.mxu1  ;;  %v1637_v4 = vadd.f32 %v1633_v39, %v8889_v14  ;;  %v1527_v31 = vmax.f32 %v10937_v7, %v8917_v2  ;;  %v1520_v28 = vmax.f32 %v10939_v36, %v10938_v35  ;;  %v1521_v33 = vmax.f32 %v10941_v13, %v10940_v32  ;;  %3084 = vmatpush.msrb.mxu0 %v2176_v17  ;;  %v2458_v42 = vld [vmem:[#allocation7 + $0x1680] sm:$0xff]  ;;  %v2356_v62 = vld [vmem:[#allocation7 + $0x1350] sm:$0xff] }
 0x201   : > { %3225 = vmatpush.msrb.mxu3 %v2464_v21  ;;  %v10942_v2 = vld [vmem:[#allocation35_spill] sm:$0xff]  ;;  %v10943_v1 = vld [vmem:[#allocation36_spill] sm:$0xff]  ;;  %3131 = vmatpush.msrb.mxu1 %v2272_v34  ;;  %v9047_v5 = vmax.f32 %v1634_v52, 0.0  ;;  %v9049_v39 = vmax.f32 %v1635_v27, 0.0  ;;  %v10951_v36 = vld [vmem:[#allocation41_spill] sm:$0xff] }
 0x202   : > { %2909 = vmatmul.f32.gmra.mxu0 %v8967_v54  ;;  %v1522_v19 = vmax.f32 %v10942_v2, %v8871_v37  ;;  %v1523_v29 = vmax.f32 %v10943_v1, %v8873_v24  ;;  %3179 = vmatpush.msrb.mxu2 %v2362_v47  ;;  %v2266_v61 = vld [vmem:[#allocation7 + $0x1080] sm:$0xff]  ;;  %v1642_v40 = vmax.f32 %v1520_v28, %v1524_v41  ;;  %v9051_v37 = vmax.f32 %v1636_v45, 0.0  ;;  %v10947_v41 = vld [vmem:[#allocation45_spill] sm:$0xff]  ;;  %v10948_v45 = vld [vmem:[#allocation46_spill] sm:$0xff] }
 0x203   : > { %2956 = vmatmul.f32.gmra.mxu1 %v8969_v50  ;;  %3003 = vmatmul.f32.gmra.mxu2 %v8971_v3  ;;  %10944 = vst [vmem:[#allocation97_spill] sm:$0xff] %v9047_v5  ;;  %v1643_v56 = vmax.f32 %v1521_v33, %v1525_v43  ;;  %v9053_v23 = vmax.f32 %v1637_v4, 0.0  ;;  %v1532_v43 = vmax.f32 %v10947_v41, %v8963_v10  ;;  %v10949_v17 = vld [vmem:[#allocation47_spill] sm:$0xff]  ;;  %v10950_v34 = vld [vmem:[#allocation48_spill] sm:$0xff]  ;;  %v10952_v32 = vld [vmem:[#allocation42_spill] sm:$0xff] }
 0x204   : > { %3050 = vmatmul.f32.gmra.mxu3 %v8973_v11  ;;  %3085 = vmatpush.msrb.mxu0 %v2170_v51  ;;  %10945 = vst [vmem:[#allocation27_spill] sm:$0xff] %v9051_v37  ;;  %v1644_v24 = vmax.f32 %v1522_v19, %v1526_v49  ;;  %v1645_v7 = vmax.f32 %v1523_v29, %v1527_v31  ;;  %v2452_v47 = vld [vmem:[#allocation7 + $0x1650] sm:$0xff] }
 0x205   : > { %3226 = vmatpush.msrb.mxu3 %v2458_v42  ;;  %10946 = vst [vmem:[#allocation98_spill] sm:$0xff] %v9053_v23  ;;  %3132 = vmatpush.msrb.mxu1 %v2266_v61  ;;  %v1646_v52 = vadd.f32 %v1642_v40, %v8883_v20  ;;  %v1647_v27 = vadd.f32 %v1643_v56, %v8885_v44  ;;  %v2260_v51 = vld [vmem:[#allocation7 + $0x1050] sm:$0xff]  ;;  %v10953_v42 = vld [vmem:[#allocation43_spill] sm:$0xff] }
 0x206   : > { %v8995_v18 = vpop.f32.mrf.mxu2  ;;  %3180 = vmatpush.msrb.mxu2 %v2356_v62  ;;  %v1533_v4 = vmax.f32 %v10948_v45, %v8965_v60  ;;  %v1648_v49 = vadd.f32 %v1644_v24, %v8887_v12  ;;  %v1649_v31 = vadd.f32 %v1645_v7, %v8889_v14  ;;  %v1528_v28 = vmax.f32 %v10951_v36, %v8923_v58  ;;  %v2164_v60 = vld [vmem:[#allocation7 + $0xd50] sm:$0xff]  ;;  %v2350_v58 = vld [vmem:[#allocation7 + $0x1320] sm:$0xff] }
 0x207   : > { %v8997_v26 = vpop.f32.mrf.mxu3  ;;  %v9003_v6 = vpop.f32.mrf.mxu0  ;;  %v1534_v21 = vmax.f32 %v10949_v17, %v8995_v18  ;;  %v1529_v13 = vmax.f32 %v10952_v32, %v8925_v46  ;;  %v1530_v2 = vmax.f32 %v10953_v42, %v8955_v8  ;;  %v10954_v18 = vld [vmem:[#allocation44_spill] sm:$0xff]  ;;  %3086 = vmatpush.msrb.mxu0 %v2164_v60  ;;  %3227 = vmatpush.msrb.mxu3 %v2452_v47  ;;  %v9087_v46 = vmax.f32 %v1646_v52, 0.0  ;;  %v10959_v52 = vld [vmem:[#allocation53_spill] sm:$0xff]  ;;  %v10960_v41 = vld [vmem:[#allocation54_spill] sm:$0xff] }
 0x208   : > { %v9005_v57 = vpop.f32.mrf.mxu1  ;;  %v1535_v35 = vmax.f32 %v10950_v34, %v8997_v26  ;;  %v1531_v19 = vmax.f32 %v10954_v18, %v8957_v0  ;;  %v9089_v29 = vmax.f32 %v1647_v27, 0.0  ;;  %v1654_v61 = vmax.f32 %v1528_v28, %v1532_v43  ;;  %3133 = vmatpush.msrb.mxu1 %v2260_v51  ;;  %3181 = vmatpush.msrb.mxu2 %v2350_v58  ;;  %v10962_v17 = vld [vmem:[#allocation56_spill] sm:$0xff]  ;;  %v10963_v28 = vld [vmem:[#allocation49_spill] sm:$0xff] }
 0x209   : > { %10955 = vst [vmem:[#allocation28_spill] sm:$0xff] %v9087_v46  ;;  %v1655_v62 = vmax.f32 %v1529_v13, %v1533_v4  ;;  %v9091_v40 = vmax.f32 %v1648_v49, 0.0  ;;  %v9093_v8 = vmax.f32 %v1649_v31, 0.0  ;;  %v1656_v0 = vmax.f32 %v1530_v2, %v1534_v21  ;;  %v10961_v49 = vld [vmem:[#allocation55_spill] sm:$0xff]  ;;  %v2344_v47 = vld [vmem:[#allocation7 + $0x12f0] sm:$0xff]  ;;  %v10966_v2 = vld [vmem:[#allocation52_spill] sm:$0xff] }
 0x20a   : > { %2912 = vmatmul.f32.gmra.mxu0 %v9007_v16  ;;  %10956 = vst [vmem:[#allocation99_spill] sm:$0xff] %v9089_v29  ;;  %v1657_v56 = vmax.f32 %v1531_v19, %v1535_v35  ;;  %v1658_v24 = vadd.f32 %v1654_v61, %v8883_v20  ;;  %v2158_v34 = vld [vmem:[#allocation7 + $0xd20] sm:$0xff]  ;;  %v1536_v32 = vmax.f32 %v10963_v28, %v9003_v6  ;;  %v2440_v51 = vld [vmem:[#allocation7 + $0x15f0] sm:$0xff] }
 0x20b   : > { %2959 = vmatmul.f32.gmra.mxu1 %v9009_v53  ;;  %3006 = vmatmul.f32.gmra.mxu2 %v9011_v55  ;;  %10957 = vst [vmem:[#allocation29_spill] sm:$0xff] %v9091_v40  ;;  %v1659_v7 = vadd.f32 %v1655_v62, %v8885_v44  ;;  %v1660_v45 = vadd.f32 %v1656_v0, %v8887_v12  ;;  %v2446_v35 = vld [vmem:[#allocation7 + $0x1620] sm:$0xff]  ;;  %v2632_v25 = vld [vmem:[#allocation7 + $0x1bf0] sm:$0xff] }
 0x20c   : > { %3053 = vmatmul.f32.gmra.mxu3 %v9013_v38  ;;  %10958 = vst [vmem:[#allocation100_spill] sm:$0xff] %v9093_v8  ;;  %v1661_v4 = vadd.f32 %v1657_v56, %v8889_v14  ;;  %v2254_v36 = vld [vmem:[#allocation7 + $0x1020] sm:$0xff]  ;;  %3087 = vmatpush.msrb.mxu0 %v2158_v34  ;;  %v9123_v61 = vmax.f32 %v1658_v24, 0.0  ;;  %v10971_v24 = vld [vmem:[#allocation61_spill] sm:$0xff]  ;;  %v10974_v34 = vld [vmem:[#allocation58_spill] sm:$0xff] }
 0x20d   : > { %3228 = vmatpush.msrb.mxu3 %v2446_v35  ;;  %3134 = vmatpush.msrb.mxu1 %v2254_v36  ;;  %v2338_v58 = vld [vmem:[#allocation7 + $0x12c0] sm:$0xff]  ;;  %v9125_v62 = vmax.f32 %v1659_v7, 0.0 }
 0x20e   : > { %v9035_v30 = vpop.f32.mrf.mxu2  ;;  %3182 = vmatpush.msrb.mxu2 %v2344_v47  ;;  %10967 = vst [vmem:[#allocation30_spill] sm:$0xff] %v9123_v61  ;;  %v10975_v36 = vld [vmem:[#allocation59_spill] sm:$0xff] }
 0x20f   : > { %v9037_v22 = vpop.f32.mrf.mxu3  ;;  %v9043_v15 = vpop.f32.mrf.mxu0  ;;  %10968 = vst [vmem:[#allocation37_spill] sm:$0xff] %v9125_v62  ;;  %3229 = vmatpush.msrb.mxu3 %v2440_v51  ;;  %v2434_v51 = vld [vmem:[#allocation7 + $0x15c0] sm:$0xff] }
 0x210   : > { %v9045_v63 = vpop.f32.mrf.mxu1  ;;  %v1540_v27 = vmax.f32 %v10959_v52, %v9043_v15  ;;  %v10964_v15 = vld [vmem:[#allocation50_spill] sm:$0xff]  ;;  %v1539_v18 = vmax.f32 %v10966_v2, %v9037_v22  ;;  %v9127_v52 = vmax.f32 %v1660_v45, 0.0  ;;  %3183 = vmatpush.msrb.mxu2 %v2338_v58  ;;  %v10977_v2 = vld [vmem:[#allocation63_spill] sm:$0xff] }
 0x211   : > { %v1541_v43 = vmax.f32 %v10960_v41, %v9045_v63  ;;  %v1537_v13 = vmax.f32 %v10964_v15, %v9005_v57  ;;  %v2248_v57 = vld [vmem:[#allocation7 + $0xff0] sm:$0xff]  ;;  %3230 = vmatpush.msrb.mxu3 %v2434_v51 }
 0x212   : > { %2915 = vmatmul.f32.gmra.mxu0 %v9047_v5  ;;  %v1666_v0 = vmax.f32 %v1536_v32, %v1540_v27  ;;  %10969 = vst [vmem:[#allocation38_spill] sm:$0xff] %v9127_v52  ;;  %3135 = vmatpush.msrb.mxu1 %v2248_v57  ;;  %v10976_v32 = vld [vmem:[#allocation60_spill] sm:$0xff]  ;;  %v2140_v58 = vld [vmem:[#allocation7 + $0xc90] sm:$0xff] }
 0x213   : > { %2962 = vmatmul.f32.gmra.mxu1 %v9049_v39  ;;  %3009 = vmatmul.f32.gmra.mxu2 %v9051_v37  ;;  %v1667_v56 = vmax.f32 %v1537_v13, %v1541_v43  ;;  %v10972_v43 = vld [vmem:[#allocation62_spill] sm:$0xff] }
 0x214   : > { %3056 = vmatmul.f32.gmra.mxu3 %v9053_v23  ;;  %v1670_v7 = vadd.f32 %v1666_v0, %v8883_v20 }
 0x215   : > { %v1671_v27 = vadd.f32 %v1667_v56, %v8885_v44 }
 0x216   : > { %v9075_v10 = vpop.f32.mrf.mxu2  ;;  %v9151_v0 = vmax.f32 %v1670_v7, 0.0 }
 0x217   : > { %v9077_v33 = vpop.f32.mrf.mxu3  ;;  %v9083_v26 = vpop.f32.mrf.mxu0  ;;  %v1542_v31 = vmax.f32 %v10961_v49, %v9075_v10  ;;  %v2152_v10 = vld [vmem:[#allocation7 + $0xcf0] sm:$0xff] }
 0x218   : > { %v9085_v1 = vpop.f32.mrf.mxu1  ;;  %v1543_v21 = vmax.f32 %v10962_v17, %v9077_v33  ;;  %v10965_v33 = vld [vmem:[#allocation51_spill] sm:$0xff]  ;;  %3088 = vmatpush.msrb.mxu0 %v2152_v10  ;;  %v10973_v17 = vld [vmem:[#allocation57_spill] sm:$0xff]  ;;  %10979 = vst [vmem:[#allocation40_spill] sm:$0xff] %v9151_v0 }
 0x219   : > { %v1538_v42 = vmax.f32 %v10965_v33, %v9035_v30  ;;  %v9129_v30 = vmax.f32 %v1661_v4, 0.0  ;;  %v1545_v35 = vmax.f32 %v10974_v34, %v9085_v1  ;;  %v2146_v10 = vld [vmem:[#allocation7 + $0xcc0] sm:$0xff]  ;;  %v2332_v1 = vld [vmem:[#allocation7 + $0x1290] sm:$0xff] }
 0x21a   : > { %2918 = vmatmul.f32.gmra.mxu0 %v9087_v46  ;;  %v1669_v22 = vmax.f32 %v1539_v18, %v1543_v21  ;;  %v1544_v21 = vmax.f32 %v10973_v17, %v9083_v26  ;;  %v2242_v33 = vld [vmem:[#allocation7 + $0xfc0] sm:$0xff]  ;;  %3184 = vmatpush.msrb.mxu2 %v2332_v1  ;;  %v10987_v1 = vld [vmem:[#allocation69_spill] sm:$0xff] }
 0x21b   : > { %2965 = vmatmul.f32.gmra.mxu1 %v9089_v29  ;;  %3012 = vmatmul.f32.gmra.mxu2 %v9091_v40  ;;  %10970 = vst [vmem:[#allocation39_spill] sm:$0xff] %v9129_v30  ;;  %v1668_v41 = vmax.f32 %v1538_v42, %v1542_v31  ;;  %v2422_v34 = vld [vmem:[#allocation7 + $0x1560] sm:$0xff] }
 0x21c   : > { %3059 = vmatmul.f32.gmra.mxu3 %v9093_v8  ;;  %v1673_v31 = vadd.f32 %v1669_v22, %v8889_v14  ;;  %3089 = vmatpush.msrb.mxu0 %v2146_v10 }
 0x21d   : > { %v1672_v4 = vadd.f32 %v1668_v41, %v8887_v12  ;;  %3136 = vmatpush.msrb.mxu1 %v2242_v33 }
 0x21e   : > { %v9115_v63 = vpop.f32.mrf.mxu2  ;;  %v9157_v22 = vmax.f32 %v1673_v31, 0.0  ;;  %3090 = vmatpush.msrb.mxu0 %v2140_v58 }
 0x21f   : > { %v9117_v60 = vpop.f32.mrf.mxu3  ;;  %v1178_v19 = vpop.f32.mrf.mxu0  ;;  %v1546_v28 = vmax.f32 %v10975_v36, %v9115_v63  ;;  %v2428_v63 = vld [vmem:[#allocation7 + $0x1590] sm:$0xff]  ;;  %v9155_v41 = vmax.f32 %v1672_v4, 0.0  ;;  %v2230_v4 = vld [vmem:[#allocation7 + $0xf60] sm:$0xff] }
 0x220   : > { %v1271_v6 = vpop.f32.mrf.mxu1  ;;  %v1548_v49 = vmax.f32 %v10971_v24, %v1178_v19  ;;  %v1547_v15 = vmax.f32 %v10976_v32, %v9117_v60  ;;  %v10978_v19 = vld [vmem:[#allocation64_spill] sm:$0xff]  ;;  %v9153_v60 = vmax.f32 %v1671_v27, 0.0  ;;  %10982 = vst [vmem:[#allocation103_spill] sm:$0xff] %v9157_v22  ;;  %3231 = vmatpush.msrb.mxu3 %v2428_v63  ;;  %v2128_v32 = vld [vmem:[#allocation7 + $0xc30] sm:$0xff] }
 0x221   : > { %v1549_v45 = vmax.f32 %v10972_v43, %v1271_v6  ;;  %10981 = vst [vmem:[#allocation33_spill] sm:$0xff] %v9155_v41  ;;  %v2236_v43 = vld [vmem:[#allocation7 + $0xf90] sm:$0xff]  ;;  %v2134_v27 = vld [vmem:[#allocation7 + $0xc60] sm:$0xff] }
 0x222   : > { %2921 = vmatmul.f32.gmra.mxu0 %v9123_v61  ;;  %v1678_v42 = vmax.f32 %v1544_v21, %v1548_v49  ;;  %10980 = vst [vmem:[#allocation102_spill] sm:$0xff] %v9153_v60  ;;  %3137 = vmatpush.msrb.mxu1 %v2236_v43  ;;  %v2326_v21 = vld [vmem:[#allocation7 + $0x1260] sm:$0xff]  ;;  %v10988_v63 = vld [vmem:[#allocation70_spill] sm:$0xff] }
 0x223   : > { %2968 = vmatmul.f32.gmra.mxu1 %v9125_v62  ;;  %3015 = vmatmul.f32.gmra.mxu2 %v9127_v52  ;;  %v1679_v56 = vmax.f32 %v1545_v35, %v1549_v45  ;;  %v2320_v35 = vld [vmem:[#allocation7 + $0x1230] sm:$0xff] }
 0x224   : > { %3062 = vmatmul.f32.gmra.mxu3 %v9129_v30  ;;  %v1682_v7 = vadd.f32 %v1678_v42, %v8883_v20  ;;  %3091 = vmatpush.msrb.mxu0 %v2134_v27  ;;  %v2416_v42 = vld [vmem:[#allocation7 + $0x1530] sm:$0xff] }
 0x225   : > { %v1683_v45 = vadd.f32 %v1679_v56, %v8885_v44  ;;  %3185 = vmatpush.msrb.mxu2 %v2326_v21  ;;  %3232 = vmatpush.msrb.mxu3 %v2422_v34  ;;  %v10991_v21 = vld [vmem:[#allocation67_spill] sm:$0xff] }
 0x226   : > { %v1364_v13 = vpop.f32.mrf.mxu2  ;;  %3138 = vmatpush.msrb.mxu1 %v2230_v4  ;;  %3092 = vmatpush.msrb.mxu0 %v2128_v32  ;;  %v2410_v4 = vld [vmem:[#allocation7 + $0x1500] sm:$0xff] }
 0x227   : > { %v1457_v47 = vpop.f32.mrf.mxu3  ;;  %v1550_v18 = vmax.f32 %v10977_v2, %v1364_v13  ;;  %v1181_v26 = vpop.f32.mrf.mxu0  ;;  %v9167_v13 = vmax.f32 %v1682_v7, 0.0  ;;  %v2122_v2 = vld [vmem:[#allocation7 + $0xc00] sm:$0xff]  ;;  %3186 = vmatpush.msrb.mxu2 %v2320_v35  ;;  %3233 = vmatpush.msrb.mxu3 %v2416_v42 }
 0x228   : > { %v1551_v6 = vmax.f32 %v10978_v19, %v1457_v47  ;;  %v1274_v57 = vpop.f32.mrf.mxu1  ;;  %v10984_v47 = vld [vmem:[#allocation65_spill] sm:$0xff]  ;;  %v10986_v19 = vld [vmem:[#allocation66_spill] sm:$0xff]  ;;  %3093 = vmatpush.msrb.mxu0 %v2122_v2  ;;  %v10992_v35 = vld [vmem:[#allocation68_spill] sm:$0xff] }
 0x229   : > { %v1680_v24 = vmax.f32 %v1546_v28, %v1550_v18  ;;  %10983 = vst [vmem:[#allocation34_spill] sm:$0xff] %v9167_v13  ;;  %v1552_v10 = vmax.f32 %v10984_v47, %v1181_v26  ;;  %v9170_v18 = vmax.f32 %v1683_v45, 0.0  ;;  %v2218_v26 = vld [vmem:[#allocation7 + $0xf00] sm:$0xff]  ;;  %3234 = vmatpush.msrb.mxu3 %v2410_v4  ;;  %v10999_v4 = vld [vmem:[#allocation73_spill] sm:$0xff] }
 0x22a   : > { %v1681_v49 = vmax.f32 %v1547_v15, %v1551_v6  ;;  %2924 = vmatmul.f32.gmra.mxu0 %v9151_v0  ;;  %v2224_v15 = vld [vmem:[#allocation7 + $0xf30] sm:$0xff]  ;;  %v1553_v6 = vmax.f32 %v10986_v19, %v1274_v57  ;;  %v2314_v45 = vld [vmem:[#allocation7 + $0x1200] sm:$0xff] }
 0x22b   : > { %2971 = vmatmul.f32.gmra.mxu1 %v9153_v60  ;;  %3018 = vmatmul.f32.gmra.mxu2 %v9155_v41  ;;  %v1684_v31 = vadd.f32 %v1680_v24, %v8887_v12  ;;  %10985 = vst [vmem:[#allocation35_spill] sm:$0xff] %v9170_v18 }
 0x22c   : > { %3065 = vmatmul.f32.gmra.mxu3 %v9157_v22  ;;  %v1685_v17 = vadd.f32 %v1681_v49, %v8889_v14  ;;  %3139 = vmatpush.msrb.mxu1 %v2224_v15  ;;  %v10993_v15 = vld [vmem:[#allocation71_spill] sm:$0xff] }
 0x22d   : > { %v9175_v24 = vmax.f32 %v1684_v31, 0.0  ;;  %3187 = vmatpush.msrb.mxu2 %v2314_v45  ;;  %v2782_v45 = vld [vmem:[#allocation7 + $0x20a0] sm:$0xff] }
 0x22e   : > { %v1367_v36 = vpop.f32.mrf.mxu2  ;;  %v9177_v49 = vmax.f32 %v1685_v17, 0.0  ;;  %3140 = vmatpush.msrb.mxu1 %v2218_v26  ;;  %v2596_v26 = vld [vmem:[#allocation7 + $0x1ad0] sm:$0xff] }
 0x22f   : > { %v1460_v28 = vpop.f32.mrf.mxu3  ;;  %v1184_v51 = vpop.f32.mrf.mxu0  ;;  %10989 = vst [vmem:[#allocation36_spill] sm:$0xff] %v9175_v24  ;;  %v1554_v34 = vmax.f32 %v10991_v21, %v1367_v36  ;;  %3266 = vmatpush.msra.mxu0 %v2596_v26 }
 0x230   : > { %v1277_v33 = vpop.f32.mrf.mxu1  ;;  %v1556_v58 = vmax.f32 %v10987_v1, %v1184_v51  ;;  %10990 = vst [vmem:[#allocation45_spill] sm:$0xff] %v9177_v49  ;;  %v1555_v32 = vmax.f32 %v10992_v35, %v1460_v28  ;;  %v2878_v35 = vld [vmem:[#allocation7 + $0x23a0] sm:$0xff] }
 0x231   : > { %v1557_v56 = vmax.f32 %v10988_v63, %v1277_v33 }
 0x232   : > { %v1690_v43 = vmax.f32 %v1552_v10, %v1556_v58  ;;  %2927 = vmatmul.f32.gmra.mxu0 %v9167_v13  ;;  %v10994_v10 = vld [vmem:[#allocation72_spill] sm:$0xff] }
 0x233   : > { %v1691_v7 = vmax.f32 %v1553_v6, %v1557_v56  ;;  %2974 = vmatmul.f32.gmra.mxu1 %v9170_v18  ;;  %3021 = vmatmul.f32.gmra.mxu2 %v9175_v24  ;;  %v2788_v56 = vld [vmem:[#allocation7 + $0x20d0] sm:$0xff] }
 0x234   : > { %3068 = vmatmul.f32.gmra.mxu3 %v9177_v49  ;;  %v1694_v57 = vadd.f32 %v1690_v43, %v8883_v20  ;;  %v2884_v43 = vld [vmem:[#allocation7 + $0x23d0] sm:$0xff]  ;;  %3360 = vmatpush.msra.mxu2 %v2788_v56  ;;  %v11003_v56 = vld [vmem:[#allocation75_spill] sm:$0xff] }
 0x235   : > { %v1695_v27 = vadd.f32 %v1691_v7, %v8885_v44  ;;  %3407 = vmatpush.msra.mxu3 %v2884_v43  ;;  %v2776_v43 = vld [vmem:[#allocation7 + $0x2070] sm:$0xff] }
 0x236   : > { %v1370_v31 = vpop.f32.mrf.mxu2  ;;  %v9189_v2 = vmax.f32 %v1694_v57, 0.0  ;;  %3361 = vmatpush.msra.mxu2 %v2782_v45  ;;  %v11006_v45 = vld [vmem:[#allocation76_spill] sm:$0xff] }
 0x237   : > { %v1463_v17 = vpop.f32.mrf.mxu3  ;;  %v1558_v47 = vmax.f32 %v10993_v15, %v1370_v31  ;;  %v1187_v33 = vpop.f32.mrf.mxu0  ;;  %v9191_v19 = vmax.f32 %v1695_v27, 0.0  ;;  %v2692_v27 = vld [vmem:[#allocation7 + $0x1dd0] sm:$0xff]  ;;  %3408 = vmatpush.msra.mxu3 %v2878_v35  ;;  %v11008_v35 = vld [vmem:[#allocation80_spill] sm:$0xff] }
 0x238   : > { %v1559_v51 = vmax.f32 %v10994_v10, %v1463_v17  ;;  %v1280_v42 = vpop.f32.mrf.mxu1  ;;  %10995 = vst [vmem:[#allocation46_spill] sm:$0xff] %v9189_v2  ;;  %v1560_v31 = vmax.f32 %v10999_v4, %v1187_v33  ;;  %3313 = vmatpush.msra.mxu1 %v2692_v27  ;;  %v2584_v27 = vld [vmem:[#allocation7 + $0x1a70] sm:$0xff]  ;;  %3362 = vmatpush.msra.mxu2 %v2776_v43 }
 0x239   : > { %10996 = vst [vmem:[#allocation47_spill] sm:$0xff] %v9191_v19  ;;  %v1692_v6 = vmax.f32 %v1554_v34, %v1558_v47  ;;  %v2590_v34 = vld [vmem:[#allocation7 + $0x1aa0] sm:$0xff]  ;;  %v11001_v47 = vld [vmem:[#allocation77_spill] sm:$0xff] }
 0x23a   : > { %v1693_v1 = vmax.f32 %v1555_v32, %v1559_v51  ;;  %2930 = vmatmul.f32.gmra.mxu0 %v9189_v2  ;;  %v11000_v32 = vld [vmem:[#allocation74_spill] sm:$0xff] }
 0x23b   : > { %2977 = vmatmul.f32.gmra.mxu1 %v9191_v19  ;;  %v1696_v36 = vadd.f32 %v1692_v6, %v8887_v12  ;;  %v1561_v15 = vmax.f32 %v11000_v32, %v1280_v42  ;;  %v11002_v51 = vld [vmem:[#allocation78_spill] sm:$0xff]  ;;  %3267 = vmatpush.msra.mxu0 %v2590_v34 }
 0x23c   : > { %v1697_v28 = vadd.f32 %v1693_v1, %v8889_v14 }
 0x23d   : > { %v9197_v58 = vmax.f32 %v1696_v36, 0.0  ;;  %3268 = vmatpush.msra.mxu0 %v2584_v27  ;;  %v2674_v27 = vld [vmem:[#allocation7 + $0x1d40] sm:$0xff] }
 0x23e   : > { %v9199_v63 = vmax.f32 %v1697_v28, 0.0  ;;  %v1373_v7 = vpop.f32.mrf.mxu2 }
 0x23f   : > { %10997 = vst [vmem:[#allocation48_spill] sm:$0xff] %v9197_v58  ;;  %v1466_v57 = vpop.f32.mrf.mxu3  ;;  %3024 = vmatmul.f32.gmra.mxu2 %v9197_v58  ;;  %v1190_v17 = vpop.f32.mrf.mxu0  ;;  %v1562_v26 = vmax.f32 %v11003_v56, %v1373_v7  ;;  %v2872_v7 = vld [vmem:[#allocation7 + $0x2370] sm:$0xff] }
 0x240   : > { %10998 = vst [vmem:[#allocation41_spill] sm:$0xff] %v9199_v63  ;;  %3071 = vmatmul.f32.gmra.mxu3 %v9199_v63  ;;  %v1283_v21 = vpop.f32.mrf.mxu1  ;;  %v1564_v10 = vmax.f32 %v11001_v47, %v1190_v17  ;;  %v1563_v34 = vmax.f32 %v11006_v45, %v1466_v57 }
 0x241   : > { %v1565_v6 = vmax.f32 %v11002_v51, %v1283_v21  ;;  %v2686_v21 = vld [vmem:[#allocation7 + $0x1da0] sm:$0xff]  ;;  %3409 = vmatpush.msra.mxu3 %v2872_v7 }
 0x242   : > { %v1702_v1 = vmax.f32 %v1560_v31, %v1564_v10  ;;  %v11007_v31 = vld [vmem:[#allocation79_spill] sm:$0xff]  ;;  %3314 = vmatpush.msra.mxu1 %v2686_v21 }
 0x243   : > { %v1703_v33 = vmax.f32 %v1561_v15, %v1565_v6  ;;  %v2680_v6 = vld [vmem:[#allocation7 + $0x1d70] sm:$0xff]  ;;  %v2758_v7 = vld [vmem:[#allocation7 + $0x1fe0] sm:$0xff] }
 0x244   : > { %v1706_v36 = vadd.f32 %v1702_v1, %v8883_v20  ;;  %3315 = vmatpush.msra.mxu1 %v2680_v6  ;;  %v2566_v6 = vld [vmem:[#allocation7 + $0x19e0] sm:$0xff] }
 0x245   : > { %v1707_v28 = vadd.f32 %v1703_v33, %v8885_v44 }
 0x246   : > { %v9210_v4 = vmax.f32 %v1706_v36, 0.0  ;;  %v1376_v17 = vpop.f32.mrf.mxu2  ;;  %3316 = vmatpush.msra.mxu1 %v2674_v27  ;;  %v2560_v27 = vld [vmem:[#allocation7 + $0x19b0] sm:$0xff] }
 0x247   : > { %v9212_v42 = vmax.f32 %v1707_v28, 0.0  ;;  %v1469_v32 = vpop.f32.mrf.mxu3  ;;  %v1566_v15 = vmax.f32 %v11007_v31, %v1376_v17  ;;  %v9217_v10 = vpop.f32.mrf.mxu0  ;;  %v2770_v17 = vld [vmem:[#allocation7 + $0x2040] sm:$0xff]  ;;  %v2764_v31 = vld [vmem:[#allocation7 + $0x2010] sm:$0xff] }
 0x248   : > { %11004 = vst [vmem:[#allocation42_spill] sm:$0xff] %v9210_v4  ;;  %v1567_v47 = vmax.f32 %v11008_v35, %v1469_v32  ;;  %v9219_v51 = vpop.f32.mrf.mxu1  ;;  %2933 = vmatmul.f32.gmra.mxu0 %v9210_v4  ;;  %v2578_v32 = vld [vmem:[#allocation7 + $0x1a40] sm:$0xff]  ;;  %3363 = vmatpush.msra.mxu2 %v2770_v17  ;;  %v2860_v35 = vld [vmem:[#allocation7 + $0x2310] sm:$0xff] }
 0x249   : > { %11005 = vst [vmem:[#allocation43_spill] sm:$0xff] %v9212_v42  ;;  %2980 = vmatmul.f32.gmra.mxu1 %v9212_v42  ;;  %v1704_v1 = vmax.f32 %v1562_v26, %v1566_v15  ;;  %3269 = vmatpush.msra.mxu0 %v2578_v32  ;;  %v2866_v26 = vld [vmem:[#allocation7 + $0x2340] sm:$0xff]  ;;  %v2572_v15 = vld [vmem:[#allocation7 + $0x1a10] sm:$0xff] }
 0x24a   : > { %v1705_v33 = vmax.f32 %v1563_v34, %v1567_v47  ;;  %v2668_v47 = vld [vmem:[#allocation7 + $0x1d10] sm:$0xff]  ;;  %3410 = vmatpush.msra.mxu3 %v2866_v26  ;;  %3364 = vmatpush.msra.mxu2 %v2764_v31 }
 0x24b   : > { %v1708_v57 = vadd.f32 %v1704_v1, %v8887_v12  ;;  %3270 = vmatpush.msra.mxu0 %v2572_v15  ;;  %v2854_v1 = vld [vmem:[#allocation7 + $0x22e0] sm:$0xff]  ;;  %3317 = vmatpush.msra.mxu1 %v2668_v47  ;;  %v2848_v31 = vld [vmem:[#allocation7 + $0x22b0] sm:$0xff] }
 0x24c   : > { %v1709_v36 = vadd.f32 %v1705_v33, %v8889_v14  ;;  %v2662_v33 = vld [vmem:[#allocation7 + $0x1ce0] sm:$0xff]  ;;  %3411 = vmatpush.msra.mxu3 %v2860_v35  ;;  %3365 = vmatpush.msra.mxu2 %v2758_v7  ;;  %v2656_v15 = vld [vmem:[#allocation7 + $0x1cb0] sm:$0xff] }
 0x24d   : > { %v9225_v28 = vmax.f32 %v1708_v57, 0.0  ;;  %v2752_v57 = vld [vmem:[#allocation7 + $0x1fb0] sm:$0xff]  ;;  %3271 = vmatpush.msra.mxu0 %v2566_v6  ;;  %3318 = vmatpush.msra.mxu1 %v2662_v33  ;;  %v2746_v35 = vld [vmem:[#allocation7 + $0x1f80] sm:$0xff] }
 0x24e   : > { %v9227_v56 = vmax.f32 %v1709_v36, 0.0  ;;  %v9229_v21 = vpop.f32.mrf.mxu2  ;;  %3412 = vmatpush.msra.mxu3 %v2854_v1  ;;  %3366 = vmatpush.msra.mxu2 %v2752_v57  ;;  %v2554_v47 = vld [vmem:[#allocation7 + $0x1980] sm:$0xff] }
 0x24f   : > { %v9231_v43 = vpop.f32.mrf.mxu3  ;;  %3027 = vmatmul.f32.gmra.mxu2 %v9225_v28  ;;  %v9235_v45 = vpop.f32.mrf.mxu0  ;;  %3272 = vmatpush.msra.mxu0 %v2560_v27  ;;  %v2842_v7 = vld [vmem:[#allocation7 + $0x2280] sm:$0xff] }
 0x250   : > { %3074 = vmatmul.f32.gmra.mxu3 %v9227_v56  ;;  %v9237_v34 = vpop.f32.mrf.mxu1  ;;  %3094 = vmatmul.f32.vlgmr.msrb.gmra.mxu0 %v8967_v54  ;;  %v2650_v27 = vld [vmem:[#allocation7 + $0x1c80] sm:$0xff] }
 0x251   : > { %3141 = vmatmul.f32.vlgmr.msrb.gmra.mxu1 %v8969_v50  ;;  %3413 = vmatpush.msra.mxu3 %v2848_v31  ;;  %v2740_v31 = vld [vmem:[#allocation7 + $0x1f50] sm:$0xff] }
 0x252   : > { %3319 = vmatpush.msra.mxu1 %v2656_v15  ;;  %3367 = vmatpush.msra.mxu2 %v2746_v35  ;;  %v2548_v15 = vld [vmem:[#allocation7 + $0x1950] sm:$0xff] }
 0x253   : > { %3273 = vmatpush.msra.mxu0 %v2554_v47  ;;  %3414 = vmatpush.msra.mxu3 %v2842_v7  ;;  %v2836_v35 = vld [vmem:[#allocation7 + $0x2250] sm:$0xff]  ;;  %v2734_v7 = vld [vmem:[#allocation7 + $0x1f20] sm:$0xff] }
 0x254   : > { %3320 = vmatpush.msra.mxu1 %v2650_v27  ;;  %3368 = vmatpush.msra.mxu2 %v2740_v31  ;;  %v2644_v47 = vld [vmem:[#allocation7 + $0x1c50] sm:$0xff]  ;;  %v2542_v27 = vld [vmem:[#allocation7 + $0x1920] sm:$0xff] }
 0x255   : > { %3274 = vmatpush.msra.mxu0 %v2548_v15  ;;  %3415 = vmatpush.msra.mxu3 %v2836_v35  ;;  %v2830_v31 = vld [vmem:[#allocation7 + $0x2220] sm:$0xff]  ;;  %v2728_v35 = vld [vmem:[#allocation7 + $0x1ef0] sm:$0xff] }
 0x256   : > { %v9241_v36 = vpop.f32.mrf.mxu2  ;;  %3321 = vmatpush.msra.mxu1 %v2644_v47  ;;  %3369 = vmatpush.msra.mxu2 %v2734_v7  ;;  %v2638_v15 = vld [vmem:[#allocation7 + $0x1c20] sm:$0xff]  ;;  %v2536_v47 = vld [vmem:[#allocation7 + $0x18f0] sm:$0xff] }
 0x257   : > { %v9243_v17 = vpop.f32.mrf.mxu3  ;;  %3188 = vmatmul.f32.vlgmr.msrb.gmra.mxu2 %v8971_v3  ;;  %v9247_v32 = vpop.f32.mrf.mxu0  ;;  %3275 = vmatpush.msra.mxu0 %v2542_v27  ;;  %v2824_v7 = vld [vmem:[#allocation7 + $0x21f0] sm:$0xff]  ;;  %v2722_v27 = vld [vmem:[#allocation7 + $0x1ec0] sm:$0xff] }
 0x258   : > { %3235 = vmatmul.f32.vlgmr.msrb.gmra.mxu3 %v8973_v11  ;;  %11009 = vst [vmem:[#allocation44_spill] sm:$0xff] %v9247_v32  ;;  %v9249_v26 = vpop.f32.mrf.mxu1  ;;  %3097 = vmatmul.f32.gmra.mxu0 %v9007_v16  ;;  %v1925_v32 = vld [vmem:[#allocation7 + $0x5d8] sm:$0xff] }
 0x259   : > { %11010 = vst [vmem:[#allocation53_spill] sm:$0xff] %v9249_v26  ;;  %3144 = vmatmul.f32.gmra.mxu1 %v9009_v53  ;;  %3416 = vmatpush.msra.mxu3 %v2830_v31  ;;  %v2530_v31 = vld [vmem:[#allocation7 + $0x18c0] sm:$0xff] }
 0x25a   : > { %3322 = vmatpush.msra.mxu1 %v2638_v15  ;;  %3370 = vmatpush.msra.mxu2 %v2728_v35  ;;  %v2818_v15 = vld [vmem:[#allocation7 + $0x21c0] sm:$0xff] }
 0x25b   : > { %3276 = vmatpush.msra.mxu0 %v2536_v47  ;;  %3417 = vmatpush.msra.mxu3 %v2824_v7  ;;  %v2626_v35 = vld [vmem:[#allocation7 + $0x1bc0] sm:$0xff]  ;;  %v2716_v47 = vld [vmem:[#allocation7 + $0x1e90] sm:$0xff] }
 0x25c   : > { %3323 = vmatpush.msra.mxu1 %v2632_v25  ;;  %3371 = vmatpush.msra.mxu2 %v2722_v27  ;;  %v2524_v25 = vld [vmem:[#allocation7 + $0x1890] sm:$0xff] }
 0x25d   : > { %3277 = vmatpush.msra.mxu0 %v2530_v31  ;;  %3418 = vmatpush.msra.mxu3 %v2818_v15  ;;  %v2812_v7 = vld [vmem:[#allocation7 + $0x2190] sm:$0xff]  ;;  %v2710_v31 = vld [vmem:[#allocation7 + $0x1e60] sm:$0xff] }
 0x25e   : > { %v9253_v6 = vpop.f32.mrf.mxu2  ;;  %3324 = vmatpush.msra.mxu1 %v2626_v35  ;;  %3372 = vmatpush.msra.mxu2 %v2716_v47  ;;  %v2620_v27 = vld [vmem:[#allocation7 + $0x1b90] sm:$0xff]  ;;  %v2518_v15 = vld [vmem:[#allocation7 + $0x1860] sm:$0xff] }
 0x25f   : > { %11011 = vst [vmem:[#allocation54_spill] sm:$0xff] %v9253_v6  ;;  %v9255_v1 = vpop.f32.mrf.mxu3  ;;  %3191 = vmatmul.f32.gmra.mxu2 %v9011_v55  ;;  %v9259_v33 = vpop.f32.mrf.mxu0  ;;  %3278 = vmatpush.msra.mxu0 %v2524_v25  ;;  %v2806_v35 = vld [vmem:[#allocation7 + $0x2160] sm:$0xff]  ;;  %v2704_v25 = vld [vmem:[#allocation7 + $0x1e30] sm:$0xff] }
 0x260   : > { %11012 = vst [vmem:[#allocation55_spill] sm:$0xff] %v9255_v1  ;;  %3238 = vmatmul.f32.gmra.mxu3 %v9013_v38  ;;  %v9261_v57 = vpop.f32.mrf.mxu1  ;;  %3100 = vmatmul.f32.gmra.mxu0 %v9047_v5  ;;  %v2614_v47 = vld [vmem:[#allocation7 + $0x1b60] sm:$0xff] }
 0x261   : > { %11013 = vst [vmem:[#allocation56_spill] sm:$0xff] %v9259_v33  ;;  %3147 = vmatmul.f32.gmra.mxu1 %v9049_v39  ;;  %3419 = vmatpush.msra.mxu3 %v2812_v7  ;;  %v2512_v7 = vld [vmem:[#allocation7 + $0x1830] sm:$0xff] }
 0x262   : > { %11014 = vst [vmem:[#allocation49_spill] sm:$0xff] %v9261_v57  ;;  %3325 = vmatpush.msra.mxu1 %v2620_v27  ;;  %3373 = vmatpush.msra.mxu2 %v2710_v31  ;;  %v11025_v57 = vld [vmem:[#allocation82_spill] sm:$0xff] }
 0x263   : > { %3279 = vmatpush.msra.mxu0 %v2518_v15  ;;  %3420 = vmatpush.msra.mxu3 %v2806_v35  ;;  %v2506_v15 = vld [vmem:[#allocation7 + $0x1800] sm:$0xff]  ;;  %v1569_v33 = vmax.f32 %v11025_v57, %v9219_v51 }
 0x264   : > { %3326 = vmatpush.msra.mxu1 %v2614_v47  ;;  %3374 = vmatpush.msra.mxu2 %v2704_v25  ;;  %v2602_v35 = vld [vmem:[#allocation7 + $0x1b00] sm:$0xff]  ;;  %v2800_v47 = vld [vmem:[#allocation7 + $0x2130] sm:$0xff] }
 0x265   : > { %3280 = vmatpush.msra.mxu0 %v2512_v7  ;;  %v2698_v25 = vld [vmem:[#allocation7 + $0x1e00] sm:$0xff]  ;;  %3421 = vmatpush.msra.mxu3 %v2800_v47  ;;  %v2117_v47 = vld [vmem:[#allocation7 + $0xbd8] sm:$0xff] }
 0x266   : > { %v9265_v11 = vpop.f32.mrf.mxu2  ;;  %v2794_v7 = vld [vmem:[#allocation7 + $0x2100] sm:$0xff]  ;;  %3375 = vmatpush.msra.mxu2 %v2698_v25  ;;  %v11022_v25 = vld [vmem:[#allocation85_spill] sm:$0xff] }
 0x267   : > { %11015 = vst [vmem:[#allocation50_spill] sm:$0xff] %v9265_v11  ;;  %v9267_v3 = vpop.f32.mrf.mxu3  ;;  %3194 = vmatmul.f32.gmra.mxu2 %v9051_v37  ;;  %v1205_v50 = vpop.f32.mrf.mxu0  ;;  %3281 = vmatpush.msra.mxu0 %v2506_v15  ;;  %v2021_v15 = vld [vmem:[#allocation7 + $0x8d8] sm:$0xff]  ;;  %v11028_v51 = vld [vmem:[#allocation88_spill] sm:$0xff] }
 0x268   : > { %11016 = vst [vmem:[#allocation51_spill] sm:$0xff] %v9267_v3  ;;  %3241 = vmatmul.f32.gmra.mxu3 %v9053_v23  ;;  %v1298_v54 = vpop.f32.mrf.mxu1  ;;  %3103 = vmatmul.f32.gmra.mxu0 %v9087_v46  ;;  %v11023_v11 = vld [vmem:[#allocation86_spill] sm:$0xff] }
 0x269   : > { %3150 = vmatmul.f32.gmra.mxu1 %v9089_v29  ;;  %3422 = vmatpush.msra.mxu3 %v2794_v7  ;;  %v1572_v7 = vmax.f32 %v11022_v25, %v9235_v45  ;;  %v1573_v26 = vmax.f32 %v11023_v11, %v9237_v34  ;;  %v2105_v25 = vld [vmem:[#allocation7 + $0xb78] sm:$0xff] }
 0x26a   : > { %3548 = vmatpush.msrb.mxu2 %v2021_v15 }
 0x26b   : > { %3595 = vmatpush.msrb.mxu3 %v2117_v47  ;;  %v1817_v47 = vld [vmem:[#allocation7 + $0x278] sm:$0xff] }
 0x26e   : > { %v1391_v50 = vpop.f32.mrf.mxu2 }
 0x26f   : > { %v1484_v54 = vpop.f32.mrf.mxu3  ;;  %3197 = vmatmul.f32.gmra.mxu2 %v9091_v40  ;;  %v1207_v48 = vpop.f32.mrf.mxu0 }
 0x270   : > { %3244 = vmatmul.f32.gmra.mxu3 %v9093_v8  ;;  %v1300_v9 = vpop.f32.mrf.mxu1  ;;  %3106 = vmatmul.f32.gmra.mxu0 %v9123_v61 }
 0x271   : > { %3153 = vmatmul.f32.gmra.mxu1 %v9125_v62 }
 0x276   : > { %v1393_v48 = vpop.f32.mrf.mxu2 }
 0x277   : > { %v1486_v9 = vpop.f32.mrf.mxu3  ;;  %3200 = vmatmul.f32.gmra.mxu2 %v9127_v52  ;;  %v9279_v50 = vpop.f32.mrf.mxu0  ;;  %v2608_v48 = vld [vmem:[#allocation7 + $0x1b30] sm:$0xff] }
 0x278   : > { %3247 = vmatmul.f32.gmra.mxu3 %v9129_v30  ;;  %v9281_v54 = vpop.f32.mrf.mxu1  ;;  %3109 = vmatmul.f32.gmra.mxu0 %v9151_v0 }
 0x279   : > { %3156 = vmatmul.f32.gmra.mxu1 %v9153_v60 }
 0x27a   : > { %3327 = vmatpush.msra.mxu1 %v2608_v48 }
 0x27c   : > { %3328 = vmatpush.msra.mxu1 %v2602_v35  ;;  %v1829_v35 = vld [vmem:[#allocation7 + $0x2d8] sm:$0xff] }
 0x27d   : > { %3454 = vmatpush.msrb.mxu0 %v1829_v35  ;;  %v2009_v35 = vld [vmem:[#allocation7 + $0x878] sm:$0xff] }
 0x27e   : > { %v9285_v9 = vpop.f32.mrf.mxu2  ;;  %3501 = vmatpush.msrb.mxu1 %v1925_v32 }
 0x27f   : > { %v9287_v59 = vpop.f32.mrf.mxu3  ;;  %3203 = vmatmul.f32.gmra.mxu2 %v9155_v41  ;;  %v9291_v27 = vpop.f32.mrf.mxu0 }
 0x280   : > { %3250 = vmatmul.f32.gmra.mxu3 %v9157_v22  ;;  %v9293_v31 = vpop.f32.mrf.mxu1  ;;  %3112 = vmatmul.f32.gmra.mxu0 %v9167_v13 }
 0x281   : > { %11017 = vst [vmem:[#allocation52_spill] sm:$0xff] %v9293_v31  ;;  %3159 = vmatmul.f32.gmra.mxu1 %v9170_v18  ;;  %v1715_v31 = vmax.f32 %v1569_v33, %v1573_v26  ;;  %v1575_v26 = vmax.f32 %v11028_v51, %v9243_v17  ;;  %v1919_v33 = vld [vmem:[#allocation7 + $0x5a8] sm:$0xff]  ;;  %v1913_v17 = vld [vmem:[#allocation7 + $0x578] sm:$0xff] }
 0x282   : > { %3502 = vmatpush.msrb.mxu1 %v1919_v33  ;;  %v2099_v33 = vld [vmem:[#allocation7 + $0xb48] sm:$0xff] }
 0x283   : > { %v1719_v15 = vadd.f32 %v1715_v31, %v8885_v44 }
 0x284   : > { %3503 = vmatpush.msrb.mxu1 %v1913_v17 }
 0x286   : > { %v9297_v48 = vpop.f32.mrf.mxu2 }
 0x287   : > { %11018 = vst [vmem:[#allocation61_spill] sm:$0xff] %v9297_v48  ;;  %v9299_v1 = vpop.f32.mrf.mxu3  ;;  %3206 = vmatmul.f32.gmra.mxu2 %v9175_v24  ;;  %v9303_v6 = vpop.f32.mrf.mxu0 }
 0x288   : > { %11019 = vst [vmem:[#allocation62_spill] sm:$0xff] %v9299_v1  ;;  %3253 = vmatmul.f32.gmra.mxu3 %v9177_v49  ;;  %v9305_v3 = vpop.f32.mrf.mxu1  ;;  %3115 = vmatmul.f32.gmra.mxu0 %v9189_v2  ;;  %v2015_v1 = vld [vmem:[#allocation7 + $0x8a8] sm:$0xff] }
 0x289   : > { %11020 = vst [vmem:[#allocation57_spill] sm:$0xff] %v9303_v6  ;;  %3162 = vmatmul.f32.gmra.mxu1 %v9191_v19  ;;  %3549 = vmatpush.msrb.mxu2 %v2015_v1  ;;  %v2111_v1 = vld [vmem:[#allocation7 + $0xba8] sm:$0xff] }
 0x28a   : > { %11021 = vst [vmem:[#allocation58_spill] sm:$0xff] %v9305_v3  ;;  %v11024_v3 = vld [vmem:[#allocation81_spill] sm:$0xff]  ;;  %3596 = vmatpush.msrb.mxu3 %v2111_v1 }
 0x28b   : > { %v1568_v6 = vmax.f32 %v11024_v3, %v9217_v10  ;;  %v11027_v3 = vld [vmem:[#allocation87_spill] sm:$0xff]  ;;  %3550 = vmatpush.msrb.mxu2 %v2009_v35  ;;  %v1907_v35 = vld [vmem:[#allocation7 + $0x548] sm:$0xff] }
 0x28c   : > { %v1574_v10 = vmax.f32 %v11027_v3, %v9241_v36  ;;  %v11030_v36 = vld [vmem:[#allocation84_spill] sm:$0xff]  ;;  %3597 = vmatpush.msrb.mxu3 %v2105_v25  ;;  %v1805_v25 = vld [vmem:[#allocation7 + $0x218] sm:$0xff]  ;;  %3504 = vmatpush.msrb.mxu1 %v1907_v35 }
 0x28d   : > { %v1714_v48 = vmax.f32 %v1568_v6, %v1572_v7  ;;  %v1823_v6 = vld [vmem:[#allocation7 + $0x2a8] sm:$0xff]  ;;  %v11029_v7 = vld [vmem:[#allocation83_spill] sm:$0xff]  ;;  %v1571_v3 = vmax.f32 %v11030_v36, %v9231_v43 }
 0x28e   : > { %v9323_v34 = vpop.f32.mrf.mxu2  ;;  %3455 = vmatpush.msrb.mxu0 %v1823_v6  ;;  %v9341_v6 = vmax.f32 %v1719_v15, 0.0  ;;  %3598 = vmatpush.msrb.mxu3 %v2099_v33  ;;  %v2087_v33 = vld [vmem:[#allocation7 + $0xae8] sm:$0xff] }
 0x28f   : > { %3209 = vmatmul.f32.gmra.mxu2 %v9197_v58  ;;  %v9319_v11 = vpop.f32.mrf.mxu0  ;;  %v9325_v32 = vpop.f32.mrf.mxu3  ;;  %v1718_v57 = vadd.f32 %v1714_v48, %v8883_v20  ;;  %v1717_v48 = vmax.f32 %v1571_v3, %v1575_v26  ;;  %v1811_v26 = vld [vmem:[#allocation7 + $0x248] sm:$0xff] }
 0x290   : > { %3256 = vmatmul.f32.gmra.mxu3 %v9199_v63  ;;  %v9321_v45 = vpop.f32.mrf.mxu1  ;;  %3118 = vmatmul.f32.gmra.mxu0 %v9210_v4  ;;  %v1895_v35 = vld [vmem:[#allocation7 + $0x4e8] sm:$0xff] }
 0x291   : > { %11026 = vst [vmem:[#allocation59_spill] sm:$0xff] %v9321_v45  ;;  %3165 = vmatmul.f32.gmra.mxu1 %v9212_v42  ;;  %v1570_v45 = vmax.f32 %v11029_v7, %v9229_v21  ;;  %3456 = vmatpush.msrb.mxu0 %v1817_v47  ;;  %v9339_v31 = vmax.f32 %v1718_v57, 0.0  ;;  %v1997_v47 = vld [vmem:[#allocation7 + $0x818] sm:$0xff] }
 0x292   : > { %v2093_v7 = vld [vmem:[#allocation7 + $0xb18] sm:$0xff] }
 0x293   : > { %v1716_v51 = vmax.f32 %v1570_v45, %v1574_v10  ;;  %v1721_v45 = vadd.f32 %v1717_v48, %v8889_v14  ;;  %v2003_v10 = vld [vmem:[#allocation7 + $0x848] sm:$0xff]  ;;  %3457 = vmatpush.msrb.mxu0 %v1811_v26  ;;  %3599 = vmatpush.msrb.mxu3 %v2093_v7  ;;  %v1901_v48 = vld [vmem:[#allocation7 + $0x518] sm:$0xff] }
 0x294   : > { %3551 = vmatpush.msrb.mxu2 %v2003_v10  ;;  %v1991_v10 = vld [vmem:[#allocation7 + $0x7e8] sm:$0xff]  ;;  %3505 = vmatpush.msrb.mxu1 %v1901_v48  ;;  %v2081_v7 = vld [vmem:[#allocation7 + $0xab8] sm:$0xff] }
 0x295   : > { %v1720_v43 = vadd.f32 %v1716_v51, %v8887_v12  ;;  %3458 = vmatpush.msrb.mxu0 %v1805_v25  ;;  %v9359_v3 = vmax.f32 %v1721_v45, 0.0  ;;  %v1799_v26 = vld [vmem:[#allocation7 + $0x1e8] sm:$0xff]  ;;  %3600 = vmatpush.msrb.mxu3 %v2087_v33  ;;  %v1793_v25 = vld [vmem:[#allocation7 + $0x1b8] sm:$0xff] }
 0x296   : > { %v9353_v57 = vpop.f32.mrf.mxu2  ;;  %3552 = vmatpush.msrb.mxu2 %v1997_v47  ;;  %v1985_v47 = vld [vmem:[#allocation7 + $0x7b8] sm:$0xff]  ;;  %3506 = vmatpush.msrb.mxu1 %v1895_v35  ;;  %v2075_v33 = vld [vmem:[#allocation7 + $0xa88] sm:$0xff] }
 0x297   : > { %3212 = vmatmul.f32.gmra.mxu2 %v9225_v28  ;;  %v9345_v21 = vpop.f32.mrf.mxu0  ;;  %v9355_v15 = vpop.f32.mrf.mxu3  ;;  %v9357_v36 = vmax.f32 %v1720_v43, 0.0  ;;  %11032 = vst [vmem:[#allocation63_spill] sm:$0xff] %v9359_v3  ;;  %3459 = vmatpush.msrb.mxu0 %v1799_v26  ;;  %v1889_v48 = vld [vmem:[#allocation7 + $0x4b8] sm:$0xff]  ;;  %v1787_v26 = vld [vmem:[#allocation7 + $0x188] sm:$0xff] }
 0x298   : > { %3259 = vmatmul.f32.gmra.mxu3 %v9227_v56  ;;  %v9347_v1 = vpop.f32.mrf.mxu1  ;;  %3121 = vmatmul.f32.gmra.mxu0 %v9339_v31  ;;  %v1883_v35 = vld [vmem:[#allocation7 + $0x488] sm:$0xff] }
 0x299   : > { %3168 = vmatmul.f32.gmra.mxu1 %v9341_v6  ;;  %11031 = vst [vmem:[#allocation60_spill] sm:$0xff] %v9357_v36  ;;  %3553 = vmatpush.msrb.mxu2 %v1991_v10  ;;  %v1979_v10 = vld [vmem:[#allocation7 + $0x788] sm:$0xff] }
 0x29a   : > { %3460 = vmatpush.msrb.mxu0 %v1793_v25  ;;  %3601 = vmatpush.msrb.mxu3 %v2081_v7  ;;  %v1781_v25 = vld [vmem:[#allocation7 + $0x158] sm:$0xff] }
 0x29b   : > { %3554 = vmatpush.msrb.mxu2 %v1985_v47  ;;  %3507 = vmatpush.msrb.mxu1 %v1889_v48  ;;  %v1973_v47 = vld [vmem:[#allocation7 + $0x758] sm:$0xff] }
 0x29c   : > { %3461 = vmatpush.msrb.mxu0 %v1787_v26  ;;  %3602 = vmatpush.msrb.mxu3 %v2075_v33  ;;  %v2069_v7 = vld [vmem:[#allocation7 + $0xa58] sm:$0xff]  ;;  %v1967_v33 = vld [vmem:[#allocation7 + $0x728] sm:$0xff] }
 0x29d   : > { %3555 = vmatpush.msrb.mxu2 %v1979_v10  ;;  %3508 = vmatpush.msrb.mxu1 %v1883_v35  ;;  %v1877_v26 = vld [vmem:[#allocation7 + $0x458] sm:$0xff]  ;;  %v1775_v35 = vld [vmem:[#allocation7 + $0x128] sm:$0xff] }
 0x29e   : > { %v9369_v43 = vpop.f32.mrf.mxu2  ;;  %3462 = vmatpush.msrb.mxu0 %v1781_v25  ;;  %3603 = vmatpush.msrb.mxu3 %v2069_v7  ;;  %v1871_v25 = vld [vmem:[#allocation7 + $0x428] sm:$0xff]  ;;  %v1961_v7 = vld [vmem:[#allocation7 + $0x6f8] sm:$0xff] }
 0x29f   : > { %3215 = vmatmul.f32.gmra.mxu2 %v9357_v36  ;;  %v9363_v17 = vpop.f32.mrf.mxu0  ;;  %v9371_v45 = vpop.f32.mrf.mxu3  ;;  %3509 = vmatpush.msrb.mxu1 %v1877_v26 }
 0x2a0   : > { %3262 = vmatmul.f32.gmra.mxu3 %v9359_v3  ;;  %v9365_v51 = vpop.f32.mrf.mxu1  ;;  %3282 = vmatmul.f32.vlgmr.msra.gmra.mxu0 %v9007_v16 }
 0x2a1   : > { %3329 = vmatmul.f32.vlgmr.msra.gmra.mxu1 %v9009_v53  ;;  %3556 = vmatpush.msrb.mxu2 %v1973_v47  ;;  %v2063_v47 = vld [vmem:[#allocation7 + $0xa28] sm:$0xff] }
 0x2a2   : > { %3463 = vmatpush.msrb.mxu0 %v1775_v35  ;;  %3604 = vmatpush.msrb.mxu3 %v2063_v47  ;;  %v1955_v35 = vld [vmem:[#allocation7 + $0x6c8] sm:$0xff] }
 0x2a3   : > { %3557 = vmatpush.msrb.mxu2 %v1967_v33  ;;  %3510 = vmatpush.msrb.mxu1 %v1871_v25  ;;  %v1763_v47 = vld [vmem:[#allocation7 + $0xc8] sm:$0xff] }
 0x2a4   : > { %v2051_v25 = vld [vmem:[#allocation7 + $0x9c8] sm:$0xff] }
 0x2a5   : > { %3558 = vmatpush.msrb.mxu2 %v1961_v7 }
 0x2a7   : > { %3376 = vmatmul.f32.vlgmr.msra.gmra.mxu2 %v9011_v55  ;;  %v9377_v53 = vpop.f32.mrf.mxu0 }
 0x2a8   : > { %3423 = vmatmul.f32.vlgmr.msra.gmra.mxu3 %v9013_v38  ;;  %3285 = vmatmul.f32.gmra.mxu0 %v9047_v5  ;;  %v9379_v16 = vpop.f32.mrf.mxu1  ;;  %v9381_v38 = vpop.f32.mrf.mxu2 }
 0x2a9   : > { %3332 = vmatmul.f32.gmra.mxu1 %v9049_v39  ;;  %v9383_v5 = vpop.f32.mrf.mxu3  ;;  %3559 = vmatpush.msrb.mxu2 %v1955_v35  ;;  %v1943_v35 = vld [vmem:[#allocation7 + $0x668] sm:$0xff] }
 0x2af   : > { %3379 = vmatmul.f32.gmra.mxu2 %v9051_v37  ;;  %v9389_v48 = vpop.f32.mrf.mxu0 }
 0x2b0   : > { %3426 = vmatmul.f32.gmra.mxu3 %v9053_v23  ;;  %3288 = vmatmul.f32.gmra.mxu0 %v9087_v46  ;;  %v9391_v10 = vpop.f32.mrf.mxu1  ;;  %v1865_v23 = vld [vmem:[#allocation7 + $0x3f8] sm:$0xff] }
 0x2b1   : > { %3335 = vmatmul.f32.gmra.mxu1 %v9089_v29  ;;  %v9395_v29 = vpop.f32.mrf.mxu2  ;;  %v9397_v46 = vpop.f32.mrf.mxu3 }
 0x2b2   : > { %3511 = vmatpush.msrb.mxu1 %v1865_v23  ;;  %v1853_v23 = vld [vmem:[#allocation7 + $0x398] sm:$0xff] }
 0x2b7   : > { %3382 = vmatmul.f32.gmra.mxu2 %v9091_v40  ;;  %v9401_v26 = vpop.f32.mrf.mxu0  ;;  %v2057_v40 = vld [vmem:[#allocation7 + $0x9f8] sm:$0xff] }
 0x2b8   : > { %3429 = vmatmul.f32.gmra.mxu3 %v9093_v8  ;;  %3291 = vmatmul.f32.gmra.mxu0 %v9123_v61  ;;  %v9403_v33 = vpop.f32.mrf.mxu1  ;;  %v1769_v8 = vld [vmem:[#allocation7 + $0xf8] sm:$0xff] }
 0x2b9   : > { %3338 = vmatmul.f32.gmra.mxu1 %v9125_v62  ;;  %3464 = vmatpush.msrb.mxu0 %v1769_v8  ;;  %v9409_v7 = vpop.f32.mrf.mxu2  ;;  %v9411_v62 = vpop.f32.mrf.mxu3  ;;  %v1949_v61 = vld [vmem:[#allocation7 + $0x698] sm:$0xff] }
 0x2ba   : > { %3605 = vmatpush.msrb.mxu3 %v2057_v40  ;;  %3560 = vmatpush.msrb.mxu2 %v1949_v61  ;;  %v1751_v61 = vld [vmem:[#allocation7 + $0x68] sm:$0xff] }
 0x2bb   : > { %3465 = vmatpush.msrb.mxu0 %v1763_v47 }
 0x2bc   : > { %3606 = vmatpush.msrb.mxu3 %v2051_v25  ;;  %3561 = vmatpush.msrb.mxu2 %v1943_v35 }
 0x2bf   : > { %3385 = vmatmul.f32.gmra.mxu2 %v9127_v52  ;;  %v1859_v52 = vld [vmem:[#allocation7 + $0x3c8] sm:$0xff] }
 0x2c0   : > { %3432 = vmatmul.f32.gmra.mxu3 %v9129_v30  ;;  %3294 = vmatmul.f32.gmra.mxu0 %v9151_v0  ;;  %v1757_v0 = vld [vmem:[#allocation7 + $0x98] sm:$0xff] }
 0x2c1   : > { %3341 = vmatmul.f32.gmra.mxu1 %v9153_v60  ;;  %v2045_v30 = vld [vmem:[#allocation7 + $0x998] sm:$0xff]  ;;  %3466 = vmatpush.msrb.mxu0 %v1757_v0 }
 0x2c2   : > { %3512 = vmatpush.msrb.mxu1 %v1859_v52  ;;  %3607 = vmatpush.msrb.mxu3 %v2045_v30  ;;  %v9417_v47 = vpop.f32.mrf.mxu2  ;;  %v1847_v52 = vld [vmem:[#allocation7 + $0x368] sm:$0xff]  ;;  %v1937_v60 = vld [vmem:[#allocation7 + $0x638] sm:$0xff] }
 0x2c3   : > { %v9419_v25 = vpop.f32.mrf.mxu3  ;;  %3467 = vmatpush.msrb.mxu0 %v1751_v61  ;;  %3562 = vmatpush.msrb.mxu2 %v1937_v60  ;;  %v1745_v30 = vld [vmem:[#allocation7 + $0x38] sm:$0xff] }
 0x2c4   : > { %11033 = vst [vmem:[#allocation64_spill] sm:$0xff] %v9419_v25  ;;  %3513 = vmatpush.msrb.mxu1 %v1853_v23  ;;  %v1841_v0 = vld [vmem:[#allocation7 + $0x338] sm:$0xff]  ;;  %v1931_v25 = vld [vmem:[#allocation7 + $0x608] sm:$0xff] }
 0x2c5   : > { %v2934_v40 = vpop.f32.mrf.mxu0  ;;  %v2033_v23 = vld [vmem:[#allocation7 + $0x938] sm:$0xff]  ;;  %3468 = vmatpush.msrb.mxu0 %v1745_v30  ;;  %3563 = vmatpush.msrb.mxu2 %v1931_v25 }
 0x2c6   : > { %v2981_v8 = vpop.f32.mrf.mxu1  ;;  %3514 = vmatpush.msrb.mxu1 %v1847_v52 }
 0x2c7   : > { %3388 = vmatmul.f32.gmra.mxu2 %v9155_v41  ;;  %v2982_v35 = vadd.f32 %v2981_v8, %v2934_v40  ;;  %v2027_v40 = vld [vmem:[#allocation7 + $0x908] sm:$0xff] }
 0x2c8   : > { %3435 = vmatmul.f32.gmra.mxu3 %v9157_v22  ;;  %3297 = vmatmul.f32.gmra.mxu0 %v9167_v13  ;;  %v2955_v22 = vadd.f32 %v9281_v54, %v9279_v50  ;;  %v1739_v50 = vld [vmem:[#allocation7 + $0x8] sm:$0xff] }
 0x2c9   : > { %3344 = vmatmul.f32.gmra.mxu1 %v9170_v18  ;;  %v2039_v18 = vld [vmem:[#allocation7 + $0x968] sm:$0xff]  ;;  %3469 = vmatpush.msrb.mxu0 %v1739_v50 }
 0x2ca   : > { %3608 = vmatpush.msrb.mxu3 %v2039_v18  ;;  %v3002_v37 = vadd.f32 %v9285_v9, %v2955_v22  ;;  %v1835_v54 = vld [vmem:[#allocation7 + $0x308] sm:$0xff]  ;;  %3515 = vmatpush.msrb.mxu1 %v1841_v0 }
 0x2cb   : > { %v11034_v9 = vld [vmem:[#allocation52_spill] sm:$0xff]  ;;  %v11036_v8 = vld [vmem:[#allocation61_spill] sm:$0xff] }
 0x2cc   : > { %3609 = vmatpush.msrb.mxu3 %v2033_v23  ;;  %v3049_v61 = vadd.f32 %v9287_v59, %v3002_v37  ;;  %3516 = vmatpush.msrb.mxu1 %v1835_v54  ;;  %v2958_v52 = vadd.f32 %v11034_v9, %v9291_v27  ;;  %v2405_v59 = vld [vmem:[#allocation7 + $0x14d8] sm:$0xff]  ;;  %v11037_v0 = vld [vmem:[#allocation56_spill] sm:$0xff]  ;;  %v11038_v23 = vld [vmem:[#allocation93_spill] sm:$0xff] }
 0x2cd   : > { %v3095_v13 = vpop.f32.mrf.mxu0  ;;  %v2213_v37 = vld [vmem:[#allocation7 + $0xed8] sm:$0xff]  ;;  %3736 = vmatpush.msra.mxu2 %v2405_v59  ;;  %v1580_v25 = vmax.f32 %v11038_v23, %v11037_v0  ;;  %v11039_v50 = vld [vmem:[#allocation49_spill] sm:$0xff] }
 0x2ce   : > { %v3142_v41 = vpop.f32.mrf.mxu1  ;;  %3610 = vmatpush.msrb.mxu3 %v2027_v40  ;;  %v3005_v30 = vadd.f32 %v11036_v8, %v2958_v52  ;;  %3642 = vmatpush.msra.mxu0 %v2213_v37  ;;  %v11040_v54 = vld [vmem:[#allocation94_spill] sm:$0xff]  ;;  %v11042_v52 = vld [vmem:[#allocation44_spill] sm:$0xff]  ;;  %v11043_v40 = vld [vmem:[#allocation89_spill] sm:$0xff] }
 0x2cf   : > { %3391 = vmatmul.f32.gmra.mxu2 %v9175_v24  ;;  %v1576_v8 = vmax.f32 %v11043_v40, %v11042_v52  ;;  %v11047_v59 = vld [vmem:[#allocation58_spill] sm:$0xff] }
 0x2d0   : > { %3438 = vmatmul.f32.gmra.mxu3 %v9177_v49  ;;  %3300 = vmatmul.f32.gmra.mxu0 %v9189_v2  ;;  %v3096_v2 = vadd.f32 %v3095_v13, %v3049_v61  ;;  %v2501_v13 = vld [vmem:[#allocation7 + $0x17d8] sm:$0xff] }
 0x2d1   : > { %3347 = vmatmul.f32.gmra.mxu1 %v9191_v19  ;;  %3783 = vmatpush.msra.mxu3 %v2501_v13  ;;  %v11041_v61 = vld [vmem:[#allocation62_spill] sm:$0xff]  ;;  %v1726_v13 = vmax.f32 %v1576_v8, %v1580_v25  ;;  %v11050_v25 = vld [vmem:[#allocation51_spill] sm:$0xff] }
 0x2d2   : > { %v3028_v18 = vpop.f32.mrf.mxu2  ;;  %v3143_v27 = vadd.f32 %v3142_v41, %v3096_v2  ;;  %v11046_v2 = vld [vmem:[#allocation57_spill] sm:$0xff] }
 0x2d3   : > { %v3075_v60 = vpop.f32.mrf.mxu3  ;;  %v3029_v22 = vadd.f32 %v3028_v18, %v2982_v35  ;;  %v1581_v35 = vmax.f32 %v11040_v54, %v11039_v50  ;;  %v2961_v37 = vadd.f32 %v11047_v59, %v11046_v2  ;;  %v2309_v54 = vld [vmem:[#allocation7 + $0x11d8] sm:$0xff]  ;;  %v1730_v40 = vadd.f32 %v1726_v13, %v8883_v20 }
 0x2d4   : > { %3689 = vmatpush.msra.mxu1 %v2309_v54  ;;  %v11054_v59 = vld [vmem:[#allocation55_spill] sm:$0xff] }
 0x2d5   : > { %v9431_v49 = vadd.f32 %v3075_v60, %v3029_v22  ;;  %v3098_v19 = vpop.f32.mrf.mxu0  ;;  %v3052_v22 = vadd.f32 %v11041_v61, %v3005_v30  ;;  %v3008_v30 = vadd.f32 %v9323_v34, %v2961_v37  ;;  %v2393_v34 = vld [vmem:[#allocation7 + $0x1478] sm:$0xff]  ;;  %v11055_v37 = vld [vmem:[#allocation92_spill] sm:$0xff] }
 0x2d6   : > { %v3145_v24 = vpop.f32.mrf.mxu1  ;;  %v1579_v54 = vmax.f32 %v11055_v37, %v11054_v59  ;;  %v2489_v13 = vld [vmem:[#allocation7 + $0x1778] sm:$0xff]  ;;  %v2291_v37 = vld [vmem:[#allocation7 + $0x1148] sm:$0xff] }
 0x2d7   : > { %11035 = vst [vmem:[#allocation65_spill] sm:$0xff] %v9431_v49  ;;  %3394 = vmatmul.f32.gmra.mxu2 %v9197_v58  ;;  %v2399_v58 = vld [vmem:[#allocation7 + $0x14a8] sm:$0xff] }
 0x2d8   : > { %3441 = vmatmul.f32.gmra.mxu3 %v9199_v63  ;;  %3303 = vmatmul.f32.gmra.mxu0 %v9210_v4  ;;  %v11045_v4 = vld [vmem:[#allocation90_spill] sm:$0xff]  ;;  %v3099_v63 = vadd.f32 %v3098_v19, %v3052_v22  ;;  %v2207_v19 = vld [vmem:[#allocation7 + $0xea8] sm:$0xff] }
 0x2d9   : > { %3350 = vmatmul.f32.gmra.mxu1 %v9212_v42  ;;  %v11044_v42 = vld [vmem:[#allocation53_spill] sm:$0xff]  ;;  %3737 = vmatpush.msra.mxu2 %v2399_v58  ;;  %v11052_v22 = vld [vmem:[#allocation54_spill] sm:$0xff] }
 0x2da   : > { %v3189_v18 = vpop.f32.mrf.mxu2  ;;  %v1577_v41 = vmax.f32 %v11045_v4, %v11044_v42  ;;  %v11048_v4 = vld [vmem:[#allocation50_spill] sm:$0xff]  ;;  %v11049_v42 = vld [vmem:[#allocation95_spill] sm:$0xff]  ;;  %v3146_v58 = vadd.f32 %v3145_v24, %v3099_v63  ;;  %3643 = vmatpush.msra.mxu0 %v2207_v19 }
 0x2db   : > { %v3236_v60 = vpop.f32.mrf.mxu3  ;;  %v3190_v9 = vadd.f32 %v3189_v18, %v3143_v27  ;;  %v1582_v27 = vmax.f32 %v11049_v42, %v11048_v4  ;;  %v2495_v18 = vld [vmem:[#allocation7 + $0x17a8] sm:$0xff]  ;;  %3738 = vmatpush.msra.mxu2 %v2393_v34  ;;  %v3055_v4 = vadd.f32 %v9325_v32, %v3008_v30  ;;  %v11056_v19 = vld [vmem:[#allocation59_spill] sm:$0xff] }
 0x2dc   : > { %v1727_v49 = vmax.f32 %v1577_v41, %v1581_v35  ;;  %v11051_v35 = vld [vmem:[#allocation96_spill] sm:$0xff]  ;;  %3784 = vmatpush.msra.mxu3 %v2495_v18  ;;  %v2964_v18 = vadd.f32 %v11056_v19, %v9319_v11  ;;  %v2297_v32 = vld [vmem:[#allocation7 + $0x1178] sm:$0xff] }
 0x2dd   : > { %v9449_v0 = vadd.f32 %v3236_v60, %v3190_v9  ;;  %v3101_v23 = vpop.f32.mrf.mxu0  ;;  %v2303_v60 = vld [vmem:[#allocation7 + $0x11a8] sm:$0xff]  ;;  %v1583_v61 = vmax.f32 %v11051_v35, %v11050_v25  ;;  %v11053_v9 = vld [vmem:[#allocation91_spill] sm:$0xff] }
 0x2de   : > { %v3148_v50 = vpop.f32.mrf.mxu1  ;;  %v1578_v52 = vmax.f32 %v11053_v9, %v11052_v22  ;;  %v1731_v8 = vadd.f32 %v1727_v49, %v8885_v44  ;;  %3690 = vmatpush.msra.mxu1 %v2303_v60  ;;  %v3102_v25 = vadd.f32 %v3101_v23, %v3055_v4  ;;  %v2201_v49 = vld [vmem:[#allocation7 + $0xe78] sm:$0xff]  ;;  %v9471_v60 = vmax.f32 %v1730_v40, 0.0  ;;  %3785 = vmatpush.msra.mxu3 %v2489_v13  ;;  %v2387_v23 = vld [vmem:[#allocation7 + $0x1448] sm:$0xff] }
 0x2df   : > { %3397 = vmatmul.f32.gmra.mxu2 %v9225_v28  ;;  %v1729_v42 = vmax.f32 %v1579_v54, %v1583_v61  ;;  %3644 = vmatpush.msra.mxu0 %v2201_v49  ;;  %v3011_v30 = vadd.f32 %v9353_v57, %v2964_v18  ;;  %v2483_v61 = vld [vmem:[#allocation7 + $0x1748] sm:$0xff]  ;;  %v2381_v54 = vld [vmem:[#allocation7 + $0x1418] sm:$0xff]  ;;  %v2970_v49 = vadd.f32 %v9365_v51, %v9363_v17 }
 0x2e0   : > { %3444 = vmatmul.f32.gmra.mxu3 %v9227_v56  ;;  %3306 = vmatmul.f32.gmra.mxu0 %v9339_v31  ;;  %v1728_v63 = vmax.f32 %v1578_v52, %v1582_v27  ;;  %11057 = vst [vmem:[#allocation66_spill] sm:$0xff] %v9471_v60  ;;  %v9473_v34 = vmax.f32 %v1731_v8, 0.0  ;;  %v2195_v27 = vld [vmem:[#allocation7 + $0xe48] sm:$0xff]  ;;  %v3149_v22 = vadd.f32 %v3148_v50, %v3102_v25  ;;  %v2189_v4 = vld [vmem:[#allocation7 + $0xe18] sm:$0xff] }
 0x2e1   : > { %3353 = vmatmul.f32.gmra.mxu1 %v9341_v6  ;;  %3739 = vmatpush.msra.mxu2 %v2387_v23  ;;  %v3058_v52 = vadd.f32 %v9355_v15, %v3011_v30  ;;  %v2183_v23 = vld [vmem:[#allocation7 + $0xde8] sm:$0xff]  ;;  %v2177_v51 = vld [vmem:[#allocation7 + $0xdb8] sm:$0xff] }
 0x2e2   : > { %v3192_v41 = vpop.f32.mrf.mxu2  ;;  %11058 = vst [vmem:[#allocation69_spill] sm:$0xff] %v9473_v34  ;;  %v1732_v11 = vadd.f32 %v1728_v63, %v8887_v12  ;;  %3691 = vmatpush.msra.mxu1 %v2297_v32  ;;  %3645 = vmatpush.msra.mxu0 %v2195_v27  ;;  %v11061_v63 = vld [vmem:[#allocation104_spill] sm:$0xff]  ;;  %v11066_v17 = vld [vmem:[#allocation109_spill] sm:$0xff] }
 0x2e3   : > { %v3239_v2 = vpop.f32.mrf.mxu3  ;;  %v3193_v24 = vadd.f32 %v3192_v41, %v3146_v58  ;;  %v1733_v58 = vadd.f32 %v1729_v42, %v8889_v14  ;;  %3786 = vmatpush.msra.mxu3 %v2483_v61  ;;  %v2967_v41 = vadd.f32 %v9347_v1, %v9345_v21  ;;  %3740 = vmatpush.msra.mxu2 %v2381_v54  ;;  %v11062_v21 = vld [vmem:[#allocation105_spill] sm:$0xff]  ;;  %v2285_v1 = vld [vmem:[#allocation7 + $0x1118] sm:$0xff] }
 0x2e4   : > { %v9483_v12 = vmax.f32 %v1732_v11, 0.0  ;;  %3692 = vmatpush.msra.mxu1 %v2291_v37  ;;  %v2375_v42 = vld [vmem:[#allocation7 + $0x13e8] sm:$0xff]  ;;  %3646 = vmatpush.msra.mxu0 %v2189_v4  ;;  %v2369_v61 = vld [vmem:[#allocation7 + $0x13b8] sm:$0xff]  ;;  %v2973_v37 = vadd.f32 %v9379_v16, %v9377_v53 }
 0x2e5   : > { %v9469_v35 = vadd.f32 %v3239_v2, %v3193_v24  ;;  %v3104_v20 = vpop.f32.mrf.mxu0  ;;  %v9485_v8 = vmax.f32 %v1733_v58, 0.0  ;;  %v2477_v24 = vld [vmem:[#allocation7 + $0x1718] sm:$0xff]  ;;  %v3014_v15 = vadd.f32 %v9369_v43, %v2967_v41  ;;  %3741 = vmatpush.msra.mxu2 %v2375_v42  ;;  %v2471_v27 = vld [vmem:[#allocation7 + $0x16e8] sm:$0xff]  ;;  %v3017_v58 = vadd.f32 %v9381_v38, %v2970_v49 }
 0x2e6   : > { %v3151_v44 = vpop.f32.mrf.mxu1  ;;  %11059 = vst [vmem:[#allocation70_spill] sm:$0xff] %v9483_v12  ;;  %v3105_v2 = vadd.f32 %v3104_v20, %v3058_v52  ;;  %3787 = vmatpush.msra.mxu3 %v2477_v24  ;;  %3693 = vmatpush.msra.mxu1 %v2285_v1  ;;  %v2273_v52 = vld [vmem:[#allocation7 + $0x10b8] sm:$0xff]  ;;  %v2363_v1 = vld [vmem:[#allocation7 + $0x1388] sm:$0xff] }
 0x2e7   : > { %3400 = vmatmul.f32.gmra.mxu2 %v9357_v36  ;;  %11060 = vst [vmem:[#allocation67_spill] sm:$0xff] %v9485_v8  ;;  %v3061_v20 = vadd.f32 %v9371_v45, %v3014_v15  ;;  %3647 = vmatpush.msra.mxu0 %v2183_v23  ;;  %v11064_v45 = vld [vmem:[#allocation107_spill] sm:$0xff]  ;;  %v3064_v38 = vadd.f32 %v9383_v5, %v3017_v58  ;;  %v2459_v42 = vld [vmem:[#allocation7 + $0x1688] sm:$0xff] }
 0x2e8   : > { %3447 = vmatmul.f32.gmra.mxu3 %v9359_v3  ;;  %3309 = vmatmul.f32.gmra.mxu0 %v9471_v60  ;;  %v3152_v19 = vadd.f32 %v3151_v44, %v3105_v2  ;;  %v2279_v44 = vld [vmem:[#allocation7 + $0x10e8] sm:$0xff]  ;;  %v11068_v5 = vld [vmem:[#allocation111_spill] sm:$0xff] }
 0x2e9   : > { %3356 = vmatmul.f32.gmra.mxu1 %v9473_v34  ;;  %3788 = vmatpush.msra.mxu3 %v2471_v27  ;;  %v2267_v16 = vld [vmem:[#allocation7 + $0x1088] sm:$0xff]  ;;  %v2357_v53 = vld [vmem:[#allocation7 + $0x1358] sm:$0xff] }
 0x2ea   : > { %v3195_v9 = vpop.f32.mrf.mxu2  ;;  %3694 = vmatpush.msra.mxu1 %v2279_v44  ;;  %3742 = vmatpush.msra.mxu2 %v2369_v61  ;;  %v2976_v44 = vadd.f32 %v9391_v10, %v9389_v48  ;;  %v2159_v48 = vld [vmem:[#allocation7 + $0xd28] sm:$0xff]  ;;  %v2861_v34 = vld [vmem:[#allocation7 + $0x2318] sm:$0xff] }
 0x2eb   : > { %v3242_v57 = vpop.f32.mrf.mxu3  ;;  %v3196_v40 = vadd.f32 %v3195_v9, %v3149_v22  ;;  %v11063_v22 = vld [vmem:[#allocation106_spill] sm:$0xff]  ;;  %v11065_v9 = vld [vmem:[#allocation108_spill] sm:$0xff]  ;;  %3648 = vmatpush.msra.mxu0 %v2177_v51 }
 0x2ec   : > { %3695 = vmatpush.msra.mxu1 %v2273_v52  ;;  %3743 = vmatpush.msra.mxu2 %v2363_v1  ;;  %v2351_v52 = vld [vmem:[#allocation7 + $0x1328] sm:$0xff]  ;;  %v2979_v1 = vadd.f32 %v9403_v33, %v9401_v26 }
 0x2ed   : > { %v9489_v59 = vadd.f32 %v3242_v57, %v3196_v40  ;;  %v3107_v14 = vpop.f32.mrf.mxu0  ;;  %v2465_v57 = vld [vmem:[#allocation7 + $0x16b8] sm:$0xff]  ;;  %v2447_v10 = vld [vmem:[#allocation7 + $0x1628] sm:$0xff] }
 0x2ee   : > { %v3154_v50 = vpop.f32.mrf.mxu1  ;;  %v3108_v13 = vadd.f32 %v3107_v14, %v3061_v20  ;;  %3789 = vmatpush.msra.mxu3 %v2465_v57  ;;  %v11070_v20 = vld [vmem:[#allocation101_spill] sm:$0xff]  ;;  %3696 = vmatpush.msra.mxu1 %v2267_v16 }
 0x2ef   : > { %3403 = vmatmul.f32.gmra.mxu2 %v9483_v12  ;;  %v2339_v26 = vld [vmem:[#allocation7 + $0x12c8] sm:$0xff]  ;;  %v2573_v12 = vld [vmem:[#allocation7 + $0x1a18] sm:$0xff] }
 0x2f0   : > { %3450 = vmatmul.f32.gmra.mxu3 %v9485_v8  ;;  %3470 = vmatmul.f32.vlgmr.msrb.gmra.mxu0 %v11061_v63  ;;  %v3155_v40 = vadd.f32 %v3154_v50, %v3108_v13  ;;  %v2171_v50 = vld [vmem:[#allocation7 + $0xd88] sm:$0xff]  ;;  %v2453_v13 = vld [vmem:[#allocation7 + $0x1658] sm:$0xff] }
 0x2f1   : > { %3517 = vmatmul.f32.vlgmr.msrb.gmra.mxu1 %v11062_v21  ;;  %3649 = vmatpush.msra.mxu0 %v2171_v50  ;;  %v2147_v33 = vld [vmem:[#allocation7 + $0xcc8] sm:$0xff]  ;;  %v2681_v21 = vld [vmem:[#allocation7 + $0x1d78] sm:$0xff] }
 0x2f2   : > { %v3198_v18 = vpop.f32.mrf.mxu2  ;;  %3790 = vmatpush.msra.mxu3 %v2459_v42  ;;  %3744 = vmatpush.msra.mxu2 %v2357_v53  ;;  %v2153_v53 = vld [vmem:[#allocation7 + $0xcf8] sm:$0xff]  ;;  %v11097_v63 = vld [vmem:[#allocation48_spill] sm:$0xff] }
 0x2f3   : > { %v3245_v25 = vpop.f32.mrf.mxu3  ;;  %v3199_v43 = vadd.f32 %v3198_v18, %v3152_v19  ;;  %v3020_v19 = vadd.f32 %v9395_v29, %v2973_v37  ;;  %v11067_v18 = vld [vmem:[#allocation110_spill] sm:$0xff] }
 0x2f4   : > { %3791 = vmatpush.msra.mxu3 %v2453_v13  ;;  %3745 = vmatpush.msra.mxu2 %v2351_v52  ;;  %v11073_v13 = vld [vmem:[#allocation27_spill] sm:$0xff]  ;;  %v11099_v8 = vld [vmem:[#allocation42_spill] sm:$0xff] }
 0x2f5   : > { %v9499_v32 = vadd.f32 %v3245_v25, %v3199_v43  ;;  %v3110_v30 = vpop.f32.mrf.mxu0  ;;  %v11069_v25 = vld [vmem:[#allocation31_spill] sm:$0xff]  ;;  %v3067_v29 = vadd.f32 %v9397_v46, %v3020_v19  ;;  %v11072_v46 = vld [vmem:[#allocation97_spill] sm:$0xff] }
 0x2f6   : > { %v3157_v11 = vpop.f32.mrf.mxu1  ;;  %v3111_v54 = vadd.f32 %v3110_v30, %v3064_v38  ;;  %v2165_v43 = vld [vmem:[#allocation7 + $0xd58] sm:$0xff]  ;;  %3792 = vmatpush.msra.mxu3 %v2447_v10 }
 0x2f7   : > { %3564 = vmatmul.f32.vlgmr.msrb.gmra.mxu2 %v11063_v22  ;;  %3650 = vmatpush.msra.mxu0 %v2165_v43  ;;  %v2249_v43 = vld [vmem:[#allocation7 + $0xff8] sm:$0xff] }
 0x2f8   : > { %3611 = vmatmul.f32.vlgmr.msrb.gmra.mxu3 %v11064_v45  ;;  %3473 = vmatmul.f32.gmra.mxu0 %v11065_v9  ;;  %v3158_v49 = vadd.f32 %v3157_v11, %v3111_v54  ;;  %v2261_v11 = vld [vmem:[#allocation7 + $0x1058] sm:$0xff] }
 0x2f9   : > { %3520 = vmatmul.f32.gmra.mxu1 %v11066_v17  ;;  %3651 = vmatpush.msra.mxu0 %v2159_v48  ;;  %v11095_v45 = vld [vmem:[#allocation47_spill] sm:$0xff] }
 0x2fa   : > { %v3201_v41 = vpop.f32.mrf.mxu2  ;;  %3697 = vmatpush.msra.mxu1 %v2261_v11 }
 0x2fb   : > { %v3248_v2 = vpop.f32.mrf.mxu3  ;;  %v3202_v14 = vadd.f32 %v3201_v41, %v3155_v40  ;;  %v3023_v40 = vadd.f32 %v9409_v7, %v2976_v44  ;;  %v11071_v41 = vld [vmem:[#allocation32_spill] sm:$0xff]  ;;  %3652 = vmatpush.msra.mxu0 %v2153_v53  ;;  %v2237_v53 = vld [vmem:[#allocation7 + $0xf98] sm:$0xff] }
 0x2fd   : > { %v9509_v4 = vadd.f32 %v3248_v2, %v3202_v14  ;;  %v3113_v24 = vpop.f32.mrf.mxu0  ;;  %v2255_v2 = vld [vmem:[#allocation7 + $0x1028] sm:$0xff]  ;;  %v2345_v14 = vld [vmem:[#allocation7 + $0x12f8] sm:$0xff]  ;;  %v3070_v7 = vadd.f32 %v9411_v62, %v3023_v40  ;;  %3653 = vmatpush.msra.mxu0 %v2147_v33 }
 0x2fe   : > { %v3160_v15 = vpop.f32.mrf.mxu1  ;;  %v3114_v61 = vadd.f32 %v3113_v24, %v3067_v29  ;;  %3698 = vmatpush.msra.mxu1 %v2255_v2  ;;  %3746 = vmatpush.msra.mxu2 %v2345_v14  ;;  %v11075_v62 = vld [vmem:[#allocation28_spill] sm:$0xff]  ;;  %v11078_v14 = vld [vmem:[#allocation65_spill] sm:$0xff] }
 0x2ff   : > { %3567 = vmatmul.f32.gmra.mxu2 %v11067_v18  ;;  %v2435_v29 = vld [vmem:[#allocation7 + $0x15c8] sm:$0xff] }
 0x300   : > { %3614 = vmatmul.f32.gmra.mxu3 %v11068_v5  ;;  %3476 = vmatmul.f32.gmra.mxu0 %v11069_v25  ;;  %v3161_v38 = vadd.f32 %v3160_v15, %v3114_v61  ;;  %v2441_v15 = vld [vmem:[#allocation7 + $0x15f8] sm:$0xff]  ;;  %v2243_v2 = vld [vmem:[#allocation7 + $0xfc8] sm:$0xff] }
 0x301   : > { %3523 = vmatmul.f32.gmra.mxu1 %v11070_v20  ;;  %3793 = vmatpush.msra.mxu3 %v2441_v15  ;;  %v2327_v15 = vld [vmem:[#allocation7 + $0x1268] sm:$0xff] }
 0x302   : > { %v3204_v30 = vpop.f32.mrf.mxu2  ;;  %3699 = vmatpush.msra.mxu1 %v2249_v43  ;;  %3747 = vmatpush.msra.mxu2 %v2339_v26 }
 0x303   : > { %v3251_v23 = vpop.f32.mrf.mxu3  ;;  %v3205_v27 = vadd.f32 %v3204_v30, %v3158_v49  ;;  %v3026_v49 = vadd.f32 %v9417_v47, %v2979_v1  ;;  %v11074_v30 = vld [vmem:[#allocation98_spill] sm:$0xff]  ;;  %3794 = vmatpush.msra.mxu3 %v2435_v29  ;;  %v2135_v29 = vld [vmem:[#allocation7 + $0xc68] sm:$0xff] }
 0x304   : > { %3700 = vmatpush.msra.mxu1 %v2243_v2  ;;  %v11084_v2 = vld [vmem:[#allocation39_spill] sm:$0xff] }
 0x305   : > { %v9519_v58 = vadd.f32 %v3251_v23, %v3205_v27  ;;  %v3116_v51 = vpop.f32.mrf.mxu0  ;;  %v11076_v23 = vld [vmem:[#allocation99_spill] sm:$0xff] }
 0x306   : > { %v3163_v57 = vpop.f32.mrf.mxu1  ;;  %v3117_v50 = vadd.f32 %v3116_v51, %v3070_v7  ;;  %v11077_v51 = vld [vmem:[#allocation64_spill] sm:$0xff]  ;;  %v11079_v7 = vld [vmem:[#allocation29_spill] sm:$0xff]  ;;  %3701 = vmatpush.msra.mxu1 %v2237_v53 }
 0x307   : > { %3570 = vmatmul.f32.gmra.mxu2 %v9011_v55  ;;  %v3073_v47 = vadd.f32 %v11077_v51, %v3026_v49  ;;  %v2219_v53 = vld [vmem:[#allocation7 + $0xf08] sm:$0xff] }
 0x308   : > { %3617 = vmatmul.f32.gmra.mxu3 %v11071_v41  ;;  %3479 = vmatmul.f32.gmra.mxu0 %v11072_v46  ;;  %v3164_v27 = vadd.f32 %v3163_v57, %v3117_v50  ;;  %v2141_v57 = vld [vmem:[#allocation7 + $0xc98] sm:$0xff] }
 0x309   : > { %3526 = vmatmul.f32.gmra.mxu1 %v9049_v39  ;;  %v11081_v50 = vld [vmem:[#allocation30_spill] sm:$0xff]  ;;  %3654 = vmatpush.msra.mxu0 %v2141_v57 }
 0x30a   : > { %v3207_v37 = vpop.f32.mrf.mxu2  ;;  %v2417_v57 = vld [vmem:[#allocation7 + $0x1538] sm:$0xff] }
 0x30b   : > { %v3254_v54 = vpop.f32.mrf.mxu3  ;;  %v3208_v24 = vadd.f32 %v3207_v37, %v3161_v38  ;;  %v2333_v38 = vld [vmem:[#allocation7 + $0x1298] sm:$0xff]  ;;  %3655 = vmatpush.msra.mxu0 %v2135_v29  ;;  %v2315_v29 = vld [vmem:[#allocation7 + $0x1208] sm:$0xff] }
 0x30c   : > { %3748 = vmatpush.msra.mxu2 %v2333_v38 }
 0x30d   : > { %v9529_v42 = vadd.f32 %v3254_v54, %v3208_v24  ;;  %v3119_v19 = vpop.f32.mrf.mxu0  ;;  %v2429_v54 = vld [vmem:[#allocation7 + $0x1598] sm:$0xff]  ;;  %v11080_v24 = vld [vmem:[#allocation100_spill] sm:$0xff] }
 0x30e   : > { %v3166_v16 = vpop.f32.mrf.mxu1  ;;  %v3120_v52 = vadd.f32 %v3119_v19, %v3073_v47  ;;  %v11082_v19 = vld [vmem:[#allocation37_spill] sm:$0xff]  ;;  %3795 = vmatpush.msra.mxu3 %v2429_v54  ;;  %3749 = vmatpush.msra.mxu2 %v2327_v15 }
 0x30f   : > { %3573 = vmatmul.f32.gmra.mxu2 %v11073_v13  ;;  %v2423_v47 = vld [vmem:[#allocation7 + $0x1568] sm:$0xff] }
 0x310   : > { %3620 = vmatmul.f32.gmra.mxu3 %v11074_v30  ;;  %3482 = vmatmul.f32.gmra.mxu0 %v11075_v62  ;;  %v3167_v43 = vadd.f32 %v3166_v16, %v3120_v52  ;;  %v2129_v16 = vld [vmem:[#allocation7 + $0xc38] sm:$0xff]  ;;  %v2123_v54 = vld [vmem:[#allocation7 + $0xc08] sm:$0xff] }
 0x311   : > { %3529 = vmatmul.f32.gmra.mxu1 %v11076_v23  ;;  %3796 = vmatpush.msra.mxu3 %v2423_v47  ;;  %v2225_v52 = vld [vmem:[#allocation7 + $0xf38] sm:$0xff] }
 0x312   : > { %v3210_v44 = vpop.f32.mrf.mxu2  ;;  %3656 = vmatpush.msra.mxu0 %v2129_v16  ;;  %v11088_v47 = vld [vmem:[#allocation103_spill] sm:$0xff] }
 0x313   : > { %v3257_v61 = vpop.f32.mrf.mxu3  ;;  %v3211_v11 = vadd.f32 %v3210_v44, %v3164_v27  ;;  %v2231_v27 = vld [vmem:[#allocation7 + $0xf68] sm:$0xff]  ;;  %3797 = vmatpush.msra.mxu3 %v2417_v57  ;;  %v2789_v16 = vld [vmem:[#allocation7 + $0x20d8] sm:$0xff] }
 0x314   : > { %3702 = vmatpush.msra.mxu1 %v2231_v27  ;;  %3657 = vmatpush.msra.mxu0 %v2123_v54  ;;  %v2411_v27 = vld [vmem:[#allocation7 + $0x1508] sm:$0xff]  ;;  %v2885_v57 = vld [vmem:[#allocation7 + $0x23d8] sm:$0xff] }
 0x315   : > { %v9537_v40 = vadd.f32 %v3257_v61, %v3211_v11  ;;  %v3122_v48 = vpop.f32.mrf.mxu0  ;;  %v2321_v11 = vld [vmem:[#allocation7 + $0x1238] sm:$0xff]  ;;  %3798 = vmatpush.msra.mxu3 %v2411_v27  ;;  %v11092_v27 = vld [vmem:[#allocation36_spill] sm:$0xff] }
 0x316   : > { %v3169_v10 = vpop.f32.mrf.mxu1  ;;  %v3123_v37 = vadd.f32 %v3122_v48, %v11078_v14  ;;  %3750 = vmatpush.msra.mxu2 %v2321_v11  ;;  %v11085_v14 = vld [vmem:[#allocation40_spill] sm:$0xff]  ;;  %3703 = vmatpush.msra.mxu1 %v2225_v52  ;;  %v2597_v52 = vld [vmem:[#allocation7 + $0x1ad8] sm:$0xff] }
 0x317   : > { %3576 = vmatmul.f32.gmra.mxu2 %v11079_v7  ;;  %3830 = vmatpush.msrb.mxu0 %v2597_v52  ;;  %v11094_v52 = vld [vmem:[#allocation46_spill] sm:$0xff] }
 0x318   : > { %3623 = vmatmul.f32.gmra.mxu3 %v11080_v24  ;;  %v3170_v1 = vadd.f32 %v3169_v10, %v3123_v37  ;;  %3485 = vmatmul.f32.gmra.mxu0 %v11081_v50  ;;  %v11083_v10 = vld [vmem:[#allocation38_spill] sm:$0xff] }
 0x319   : > { %3532 = vmatmul.f32.gmra.mxu1 %v11082_v19  ;;  %v11086_v37 = vld [vmem:[#allocation102_spill] sm:$0xff]  ;;  %3751 = vmatpush.msra.mxu2 %v2315_v29  ;;  %v2783_v29 = vld [vmem:[#allocation7 + $0x20a8] sm:$0xff] }
 0x31a   : > { %v3213_v49 = vpop.f32.mrf.mxu2  ;;  %3704 = vmatpush.msra.mxu1 %v2219_v53  ;;  %3971 = vmatpush.msrb.mxu3 %v2885_v57  ;;  %v2879_v57 = vld [vmem:[#allocation7 + $0x23a8] sm:$0xff] }
 0x31b   : > { %v3260_v26 = vpop.f32.mrf.mxu3  ;;  %v3214_v33 = vadd.f32 %v3213_v49, %v3167_v43  ;;  %3924 = vmatpush.msrb.mxu2 %v2789_v16 }
 0x31c   : > { %3972 = vmatpush.msrb.mxu3 %v2879_v57 }
 0x31d   : > { %v9544_v44 = vadd.f32 %v3260_v26, %v3214_v33  ;;  %v3283_v61 = vpop.f32.mrf.mxu0  ;;  %3925 = vmatpush.msrb.mxu2 %v2783_v29 }
 0x31e   : > { %v3330_v51 = vpop.f32.mrf.mxu1  ;;  %v3284_v48 = vadd.f32 %v3283_v61, %v9449_v0 }
 0x31f   : > { %3579 = vmatmul.f32.gmra.mxu2 %v11083_v10 }
 0x320   : > { %3626 = vmatmul.f32.gmra.mxu3 %v11084_v2  ;;  %v3331_v38 = vadd.f32 %v3330_v51, %v3284_v48  ;;  %3488 = vmatmul.f32.gmra.mxu0 %v11085_v14  ;;  %v11087_v51 = vld [vmem:[#allocation33_spill] sm:$0xff]  ;;  %v11089_v48 = vld [vmem:[#allocation34_spill] sm:$0xff] }
 0x321   : > { %3535 = vmatmul.f32.gmra.mxu1 %v11086_v37 }
 0x322   : > { %v3216_v15 = vpop.f32.mrf.mxu2 }
 0x323   : > { %v3263_v0 = vpop.f32.mrf.mxu3  ;;  %v3217_v43 = vadd.f32 %v3216_v15, %v3170_v1  ;;  %v11090_v1 = vld [vmem:[#allocation35_spill] sm:$0xff] }
 0x325   : > { %v9551_v49 = vadd.f32 %v3263_v0, %v3217_v43  ;;  %v3286_v26 = vpop.f32.mrf.mxu0 }
 0x326   : > { %v3333_v33 = vpop.f32.mrf.mxu1  ;;  %v3287_v61 = vadd.f32 %v3286_v26, %v9469_v35  ;;  %v2693_v26 = vld [vmem:[#allocation7 + $0x1dd8] sm:$0xff] }
 0x327   : > { %3582 = vmatmul.f32.gmra.mxu2 %v11087_v51  ;;  %3877 = vmatpush.msrb.mxu1 %v2693_v26 }
 0x328   : > { %3629 = vmatmul.f32.gmra.mxu3 %v11088_v47  ;;  %v3334_v11 = vadd.f32 %v3333_v33, %v3287_v61  ;;  %3491 = vmatmul.f32.gmra.mxu0 %v11089_v48  ;;  %v11093_v61 = vld [vmem:[#allocation45_spill] sm:$0xff] }
 0x329   : > { %3538 = vmatmul.f32.gmra.mxu1 %v11090_v1 }
 0x32a   : > { %v3377_v54 = vpop.f32.mrf.mxu2 }
 0x32b   : > { %v3424_v53 = vpop.f32.mrf.mxu3  ;;  %v3378_v35 = vadd.f32 %v3377_v54, %v3331_v38  ;;  %v2591_v38 = vld [vmem:[#allocation7 + $0x1aa8] sm:$0xff] }
 0x32c   : > { %v2687_v54 = vld [vmem:[#allocation7 + $0x1da8] sm:$0xff]  ;;  %3831 = vmatpush.msrb.mxu0 %v2591_v38 }
 0x32d   : > { %v9558_v15 = vadd.f32 %v3424_v53, %v3378_v35  ;;  %v3289_v0 = vpop.f32.mrf.mxu0  ;;  %v2777_v53 = vld [vmem:[#allocation7 + $0x2078] sm:$0xff]  ;;  %3878 = vmatpush.msrb.mxu1 %v2687_v54  ;;  %v11098_v38 = vld [vmem:[#allocation41_spill] sm:$0xff] }
 0x32e   : > { %v3336_v43 = vpop.f32.mrf.mxu1  ;;  %v3290_v33 = vadd.f32 %v3289_v0, %v9489_v59  ;;  %3926 = vmatpush.msrb.mxu2 %v2777_v53  ;;  %v11100_v54 = vld [vmem:[#allocation43_spill] sm:$0xff]  ;;  %v2867_v53 = vld [vmem:[#allocation7 + $0x2348] sm:$0xff] }
 0x32f   : > { %11091 = vst [vmem:[#allocation68_spill] sm:$0xff] %v9558_v15  ;;  %3585 = vmatmul.f32.gmra.mxu2 %v11092_v27  ;;  %3879 = vmatpush.msrb.mxu1 %v2681_v21 }
 0x330   : > { %3632 = vmatmul.f32.gmra.mxu3 %v11093_v61  ;;  %v3337_v16 = vadd.f32 %v3336_v43, %v3290_v33  ;;  %3494 = vmatmul.f32.gmra.mxu0 %v11094_v52  ;;  %v2585_v43 = vld [vmem:[#allocation7 + $0x1a78] sm:$0xff] }
 0x331   : > { %3541 = vmatmul.f32.gmra.mxu1 %v11095_v45  ;;  %v2873_v33 = vld [vmem:[#allocation7 + $0x2378] sm:$0xff]  ;;  %3832 = vmatpush.msrb.mxu0 %v2585_v43 }
 0x332   : > { %v3380_v35 = vpop.f32.mrf.mxu2  ;;  %3973 = vmatpush.msrb.mxu3 %v2873_v33 }
 0x333   : > { %v3427_v15 = vpop.f32.mrf.mxu3  ;;  %v3381_v59 = vadd.f32 %v3380_v35, %v3334_v11  ;;  %v2771_v11 = vld [vmem:[#allocation7 + $0x2048] sm:$0xff] }
 0x334   : > { %3927 = vmatpush.msrb.mxu2 %v2771_v11  ;;  %3974 = vmatpush.msrb.mxu3 %v2867_v53  ;;  %v2759_v11 = vld [vmem:[#allocation7 + $0x1fe8] sm:$0xff] }
 0x335   : > { %v9565_v0 = vadd.f32 %v3427_v15, %v3381_v59  ;;  %v3292_v26 = vpop.f32.mrf.mxu0  ;;  %v2579_v15 = vld [vmem:[#allocation7 + $0x1a48] sm:$0xff] }
 0x336   : > { %v3339_v29 = vpop.f32.mrf.mxu1  ;;  %v3293_v22 = vadd.f32 %v3292_v26, %v9499_v32  ;;  %3833 = vmatpush.msrb.mxu0 %v2579_v15  ;;  %3975 = vmatpush.msrb.mxu3 %v2861_v34 }
 0x337   : > { %11096 = vst [vmem:[#allocation71_spill] sm:$0xff] %v9565_v0  ;;  %3588 = vmatmul.f32.gmra.mxu2 %v11097_v63  ;;  %v2675_v0 = vld [vmem:[#allocation7 + $0x1d48] sm:$0xff] }
 0x338   : > { %3635 = vmatmul.f32.gmra.mxu3 %v11098_v38  ;;  %v3340_v57 = vadd.f32 %v3339_v29, %v3293_v22  ;;  %3497 = vmatmul.f32.gmra.mxu0 %v11099_v8  ;;  %v2765_v22 = vld [vmem:[#allocation7 + $0x2018] sm:$0xff] }
 0x339   : > { %3544 = vmatmul.f32.gmra.mxu1 %v11100_v54  ;;  %3928 = vmatpush.msrb.mxu2 %v2765_v22  ;;  %v2663_v22 = vld [vmem:[#allocation7 + $0x1ce8] sm:$0xff] }
 0x33a   : > { %v3383_v35 = vpop.f32.mrf.mxu2  ;;  %3880 = vmatpush.msrb.mxu1 %v2675_v0  ;;  %3834 = vmatpush.msrb.mxu0 %v2573_v12  ;;  %v2561_v12 = vld [vmem:[#allocation7 + $0x19b8] sm:$0xff] }
 0x33b   : > { %v3430_v59 = vpop.f32.mrf.mxu3  ;;  %v3384_v32 = vadd.f32 %v3383_v35, %v3337_v16  ;;  %v2669_v16 = vld [vmem:[#allocation7 + $0x1d18] sm:$0xff]  ;;  %3929 = vmatpush.msrb.mxu2 %v2759_v11 }
 0x33c   : > { %3881 = vmatpush.msrb.mxu1 %v2669_v16  ;;  %v2657_v16 = vld [vmem:[#allocation7 + $0x1cb8] sm:$0xff] }
 0x33d   : > { %v9572_v26 = vadd.f32 %v3430_v59, %v3384_v32  ;;  %v3295_v43 = vpop.f32.mrf.mxu0  ;;  %v2567_v32 = vld [vmem:[#allocation7 + $0x19e8] sm:$0xff] }
 0x33e   : > { %v3342_v33 = vpop.f32.mrf.mxu1  ;;  %v3296_v29 = vadd.f32 %v3295_v43, %v9509_v4  ;;  %v2855_v43 = vld [vmem:[#allocation7 + $0x22e8] sm:$0xff]  ;;  %3835 = vmatpush.msrb.mxu0 %v2567_v32  ;;  %3882 = vmatpush.msrb.mxu1 %v2663_v22  ;;  %v2741_v22 = vld [vmem:[#allocation7 + $0x1f58] sm:$0xff] }
 0x33f   : > { %11101 = vst [vmem:[#allocation72_spill] sm:$0xff] %v9572_v26  ;;  %3591 = vmatmul.f32.gmra.mxu2 %v9225_v28  ;;  %3976 = vmatpush.msrb.mxu3 %v2855_v43  ;;  %v2555_v32 = vld [vmem:[#allocation7 + $0x1988] sm:$0xff]  ;;  %v2076_v26 = vld [vmem:[#allocation7 + $0xa90] sm:$0xff] }
 0x340   : > { %3638 = vmatmul.f32.gmra.mxu3 %v9227_v56  ;;  %v3343_v21 = vadd.f32 %v3342_v33, %v3296_v29  ;;  %3658 = vmatmul.f32.vlgmr.msra.gmra.mxu0 %v11065_v9  ;;  %v2753_v29 = vld [vmem:[#allocation7 + $0x1fb8] sm:$0xff] }
 0x341   : > { %3705 = vmatmul.f32.vlgmr.msra.gmra.mxu1 %v11066_v17  ;;  %3930 = vmatpush.msrb.mxu2 %v2753_v29 }
 0x342   : > { %v3386_v15 = vpop.f32.mrf.mxu2  ;;  %3836 = vmatpush.msrb.mxu0 %v2561_v12  ;;  %3883 = vmatpush.msrb.mxu1 %v2657_v16  ;;  %v2837_v12 = vld [vmem:[#allocation7 + $0x2258] sm:$0xff] }
 0x343   : > { %v3433_v53 = vpop.f32.mrf.mxu3  ;;  %v3387_v4 = vadd.f32 %v3386_v15, %v3340_v57  ;;  %v2849_v57 = vld [vmem:[#allocation7 + $0x22b8] sm:$0xff] }
 0x344   : > { %3977 = vmatpush.msrb.mxu3 %v2849_v57  ;;  %3837 = vmatpush.msrb.mxu0 %v2555_v32  ;;  %v2543_v32 = vld [vmem:[#allocation7 + $0x1928] sm:$0xff] }
 0x345   : > { %v9579_v0 = vadd.f32 %v3433_v53, %v3387_v4  ;;  %v3298_v35 = vpop.f32.mrf.mxu0 }
 0x346   : > { %v3345_v59 = vpop.f32.mrf.mxu1  ;;  %v3299_v33 = vadd.f32 %v3298_v35, %v9519_v58 }
 0x347   : > { %11102 = vst [vmem:[#allocation73_spill] sm:$0xff] %v9579_v0  ;;  %3752 = vmatmul.f32.vlgmr.msra.gmra.mxu2 %v11067_v18  ;;  %v2651_v0 = vld [vmem:[#allocation7 + $0x1c88] sm:$0xff] }
 0x348   : > { %3799 = vmatmul.f32.vlgmr.msra.gmra.mxu3 %v11068_v5  ;;  %v3346_v34 = vadd.f32 %v3345_v59, %v3299_v33  ;;  %3661 = vmatmul.f32.gmra.mxu0 %v11069_v25  ;;  %v2747_v59 = vld [vmem:[#allocation7 + $0x1f88] sm:$0xff] }
 0x349   : > { %3708 = vmatmul.f32.gmra.mxu1 %v11070_v20  ;;  %3931 = vmatpush.msrb.mxu2 %v2747_v59  ;;  %v2843_v33 = vld [vmem:[#allocation7 + $0x2288] sm:$0xff] }
 0x34a   : > { %v3389_v11 = vpop.f32.mrf.mxu2  ;;  %3978 = vmatpush.msrb.mxu3 %v2843_v33  ;;  %3884 = vmatpush.msrb.mxu1 %v2651_v0  ;;  %v2639_v0 = vld [vmem:[#allocation7 + $0x1c28] sm:$0xff] }
 0x34b   : > { %v3436_v58 = vpop.f32.mrf.mxu3  ;;  %v3390_v15 = vadd.f32 %v3389_v11, %v3343_v21  ;;  %v2549_v21 = vld [vmem:[#allocation7 + $0x1958] sm:$0xff]  ;;  %3932 = vmatpush.msrb.mxu2 %v2741_v22 }
 0x34c   : > { %3838 = vmatpush.msrb.mxu0 %v2549_v21  ;;  %3979 = vmatpush.msrb.mxu3 %v2837_v12 }
 0x34d   : > { %v9586_v53 = vadd.f32 %v3436_v58, %v3390_v15  ;;  %v3301_v4 = vpop.f32.mrf.mxu0 }
 0x34e   : > { %v3348_v35 = vpop.f32.mrf.mxu1  ;;  %v3302_v43 = vadd.f32 %v3301_v4, %v9529_v42  ;;  %v2645_v4 = vld [vmem:[#allocation7 + $0x1c58] sm:$0xff]  ;;  %3839 = vmatpush.msrb.mxu0 %v2543_v32  ;;  %v2819_v32 = vld [vmem:[#allocation7 + $0x21c8] sm:$0xff] }
 0x34f   : > { %11103 = vst [vmem:[#allocation74_spill] sm:$0xff] %v9586_v53  ;;  %3755 = vmatmul.f32.gmra.mxu2 %v9011_v55  ;;  %3885 = vmatpush.msrb.mxu1 %v2645_v4  ;;  %v2633_v4 = vld [vmem:[#allocation7 + $0x1bf8] sm:$0xff]  ;;  %v1986_v53 = vld [vmem:[#allocation7 + $0x7c0] sm:$0xff] }
 0x350   : > { %3802 = vmatmul.f32.gmra.mxu3 %v11071_v41  ;;  %v3349_v29 = vadd.f32 %v3348_v35, %v3302_v43  ;;  %3664 = vmatmul.f32.gmra.mxu0 %v11072_v46  ;;  %v2735_v35 = vld [vmem:[#allocation7 + $0x1f28] sm:$0xff] }
 0x351   : > { %3711 = vmatmul.f32.gmra.mxu1 %v9049_v39  ;;  %3933 = vmatpush.msrb.mxu2 %v2735_v35  ;;  %v2831_v43 = vld [vmem:[#allocation7 + $0x2228] sm:$0xff] }
 0x352   : > { %v3392_v57 = vpop.f32.mrf.mxu2  ;;  %3980 = vmatpush.msrb.mxu3 %v2831_v43  ;;  %3886 = vmatpush.msrb.mxu1 %v2639_v0  ;;  %v2723_v35 = vld [vmem:[#allocation7 + $0x1ec8] sm:$0xff] }
 0x353   : > { %v3439_v42 = vpop.f32.mrf.mxu3  ;;  %v3393_v16 = vadd.f32 %v3392_v57, %v3346_v34  ;;  %v2729_v34 = vld [vmem:[#allocation7 + $0x1ef8] sm:$0xff] }
 0x354   : > { %3934 = vmatpush.msrb.mxu2 %v2729_v34  ;;  %3887 = vmatpush.msrb.mxu1 %v2633_v4  ;;  %v2711_v4 = vld [vmem:[#allocation7 + $0x1e68] sm:$0xff] }
 0x355   : > { %v9593_v11 = vadd.f32 %v3439_v42, %v3393_v16  ;;  %v3304_v58 = vpop.f32.mrf.mxu0  ;;  %v2537_v16 = vld [vmem:[#allocation7 + $0x18f8] sm:$0xff] }
 0x356   : > { %v3351_v15 = vpop.f32.mrf.mxu1  ;;  %v3305_v59 = vadd.f32 %v3304_v58, %v9537_v40  ;;  %v2825_v58 = vld [vmem:[#allocation7 + $0x21f8] sm:$0xff]  ;;  %3840 = vmatpush.msrb.mxu0 %v2537_v16  ;;  %3935 = vmatpush.msrb.mxu2 %v2723_v35 }
 0x357   : > { %11104 = vst [vmem:[#allocation77_spill] sm:$0xff] %v9593_v11  ;;  %3758 = vmatmul.f32.gmra.mxu2 %v11073_v13  ;;  %3981 = vmatpush.msrb.mxu3 %v2825_v58  ;;  %v2813_v58 = vld [vmem:[#allocation7 + $0x2198] sm:$0xff]  ;;  %v2094_v11 = vld [vmem:[#allocation7 + $0xb20] sm:$0xff] }
 0x358   : > { %3805 = vmatmul.f32.gmra.mxu3 %v11074_v30  ;;  %v3352_v33 = vadd.f32 %v3351_v15, %v3305_v59  ;;  %3667 = vmatmul.f32.gmra.mxu0 %v11075_v62  ;;  %v2531_v59 = vld [vmem:[#allocation7 + $0x18c8] sm:$0xff] }
 0x359   : > { %3714 = vmatmul.f32.gmra.mxu1 %v11076_v23  ;;  %3841 = vmatpush.msrb.mxu0 %v2531_v59 }
 0x35a   : > { %v3395_v22 = vpop.f32.mrf.mxu2  ;;  %3982 = vmatpush.msrb.mxu3 %v2819_v32  ;;  %v2519_v32 = vld [vmem:[#allocation7 + $0x1868] sm:$0xff] }
 0x35b   : > { %v3442_v21 = vpop.f32.mrf.mxu3  ;;  %v3396_v40 = vadd.f32 %v3395_v22, %v3349_v29 }
 0x35c   : > { %3983 = vmatpush.msrb.mxu3 %v2813_v58  ;;  %v2603_v58 = vld [vmem:[#allocation7 + $0x1b08] sm:$0xff] }
 0x35d   : > { %v9600_v12 = vadd.f32 %v3442_v21, %v3396_v40  ;;  %v3307_v57 = vpop.f32.mrf.mxu0  ;;  %v2627_v40 = vld [vmem:[#allocation7 + $0x1bc8] sm:$0xff] }
 0x35e   : > { %v3354_v42 = vpop.f32.mrf.mxu1  ;;  %v3308_v15 = vadd.f32 %v3307_v57, %v9544_v44  ;;  %v2717_v57 = vld [vmem:[#allocation7 + $0x1e98] sm:$0xff]  ;;  %3888 = vmatpush.msrb.mxu1 %v2627_v40 }
 0x35f   : > { %11105 = vst [vmem:[#allocation78_spill] sm:$0xff] %v9600_v12  ;;  %3761 = vmatmul.f32.gmra.mxu2 %v11079_v7  ;;  %v2705_v40 = vld [vmem:[#allocation7 + $0x1e38] sm:$0xff]  ;;  %v2004_v12 = vld [vmem:[#allocation7 + $0x850] sm:$0xff] }
 0x360   : > { %3808 = vmatmul.f32.gmra.mxu3 %v11080_v24  ;;  %v3355_v43 = vadd.f32 %v3354_v42, %v3308_v15  ;;  %3670 = vmatmul.f32.gmra.mxu0 %v11081_v50  ;;  %v2525_v42 = vld [vmem:[#allocation7 + $0x1898] sm:$0xff] }
 0x361   : > { %3717 = vmatmul.f32.gmra.mxu1 %v11082_v19  ;;  %3936 = vmatpush.msrb.mxu2 %v2717_v57  ;;  %v2621_v15 = vld [vmem:[#allocation7 + $0x1b98] sm:$0xff] }
 0x362   : > { %v3398_v29 = vpop.f32.mrf.mxu2  ;;  %3842 = vmatpush.msrb.mxu0 %v2525_v42  ;;  %3889 = vmatpush.msrb.mxu1 %v2621_v15  ;;  %v2513_v57 = vld [vmem:[#allocation7 + $0x1838] sm:$0xff] }
 0x363   : > { %v3445_v0 = vpop.f32.mrf.mxu3  ;;  %v3399_v44 = vadd.f32 %v3398_v29, %v3352_v33  ;;  %3937 = vmatpush.msrb.mxu2 %v2711_v4  ;;  %v2615_v29 = vld [vmem:[#allocation7 + $0x1b68] sm:$0xff]  ;;  %v2801_v42 = vld [vmem:[#allocation7 + $0x2138] sm:$0xff] }
 0x364   : > { %3843 = vmatpush.msrb.mxu0 %v2519_v32  ;;  %3890 = vmatpush.msrb.mxu1 %v2615_v29  ;;  %v2699_v29 = vld [vmem:[#allocation7 + $0x1e08] sm:$0xff] }
 0x365   : > { %v9607_v34 = vadd.f32 %v3445_v0, %v3399_v44  ;;  %v3310_v22 = vpop.f32.mrf.mxu0  ;;  %3938 = vmatpush.msrb.mxu2 %v2705_v40  ;;  %v2022_v40 = vld [vmem:[#allocation7 + $0x8e0] sm:$0xff] }
 0x366   : > { %v3357_v21 = vpop.f32.mrf.mxu1  ;;  %v3311_v16 = vadd.f32 %v3310_v22, %v9551_v49  ;;  %3844 = vmatpush.msrb.mxu0 %v2513_v57  ;;  %v2118_v57 = vld [vmem:[#allocation7 + $0xbe0] sm:$0xff] }
 0x367   : > { %11106 = vst [vmem:[#allocation75_spill] sm:$0xff] %v9607_v34  ;;  %3764 = vmatmul.f32.gmra.mxu2 %v11083_v10  ;;  %v1914_v34 = vld [vmem:[#allocation7 + $0x580] sm:$0xff] }
 0x368   : > { %3811 = vmatmul.f32.gmra.mxu3 %v11084_v2  ;;  %v3358_v35 = vadd.f32 %v3357_v21, %v3311_v16  ;;  %3673 = vmatmul.f32.gmra.mxu0 %v11085_v14  ;;  %v2807_v21 = vld [vmem:[#allocation7 + $0x2168] sm:$0xff]  ;;  %v2609_v16 = vld [vmem:[#allocation7 + $0x1b38] sm:$0xff] }
 0x369   : > { %3720 = vmatmul.f32.gmra.mxu1 %v11086_v37  ;;  %3984 = vmatpush.msrb.mxu3 %v2807_v21  ;;  %v2795_v21 = vld [vmem:[#allocation7 + $0x2108] sm:$0xff] }
 0x36a   : > { %v3401_v33 = vpop.f32.mrf.mxu2  ;;  %3891 = vmatpush.msrb.mxu1 %v2609_v16  ;;  %3939 = vmatpush.msrb.mxu2 %v2699_v29  ;;  %v1926_v29 = vld [vmem:[#allocation7 + $0x5e0] sm:$0xff] }
 0x36b   : > { %v3448_v59 = vpop.f32.mrf.mxu3  ;;  %v3402_v49 = vadd.f32 %v3401_v33, %v3355_v43  ;;  %v2507_v43 = vld [vmem:[#allocation7 + $0x1808] sm:$0xff]  ;;  %3985 = vmatpush.msrb.mxu3 %v2801_v42 }
 0x36c   : > { %3845 = vmatpush.msrb.mxu0 %v2507_v43  ;;  %3892 = vmatpush.msrb.mxu1 %v2603_v58 }
 0x36d   : > { %v9614_v0 = vadd.f32 %v3448_v59, %v3402_v49  ;;  %v3471_v44 = vpop.f32.mrf.mxu0  ;;  %3986 = vmatpush.msrb.mxu3 %v2795_v21  ;;  %4112 = vmatpush.msra.mxu2 %v2022_v40  ;;  %v2016_v21 = vld [vmem:[#allocation7 + $0x8b0] sm:$0xff] }
 0x36e   : > { %v3518_v22 = vpop.f32.mrf.mxu1  ;;  %4065 = vmatpush.msra.mxu1 %v1926_v29  ;;  %v1818_v29 = vld [vmem:[#allocation7 + $0x280] sm:$0xff] }
 0x36f   : > { %11107 = vst [vmem:[#allocation76_spill] sm:$0xff] %v9614_v0  ;;  %3767 = vmatmul.f32.gmra.mxu2 %v11087_v51  ;;  %v3519_v16 = vadd.f32 %v3518_v22, %v3471_v44  ;;  %4159 = vmatpush.msra.mxu3 %v2118_v57  ;;  %v2112_v0 = vld [vmem:[#allocation7 + $0xbb0] sm:$0xff]  ;;  %v2010_v22 = vld [vmem:[#allocation7 + $0x880] sm:$0xff] }
 0x370   : > { %3814 = vmatmul.f32.gmra.mxu3 %v11088_v47  ;;  %3676 = vmatmul.f32.gmra.mxu0 %v11089_v48  ;;  %v1920_v44 = vld [vmem:[#allocation7 + $0x5b0] sm:$0xff] }
 0x371   : > { %3723 = vmatmul.f32.gmra.mxu1 %v11090_v1  ;;  %4113 = vmatpush.msra.mxu2 %v2016_v21  ;;  %v2106_v21 = vld [vmem:[#allocation7 + $0xb80] sm:$0xff] }
 0x372   : > { %v3404_v15 = vpop.f32.mrf.mxu2  ;;  %4160 = vmatpush.msra.mxu3 %v2112_v0  ;;  %4066 = vmatpush.msra.mxu1 %v1920_v44  ;;  %v1812_v0 = vld [vmem:[#allocation7 + $0x250] sm:$0xff] }
 0x373   : > { %v3451_v4 = vpop.f32.mrf.mxu3  ;;  %v3405_v33 = vadd.f32 %v3404_v15, %v3358_v35  ;;  %v1830_v35 = vld [vmem:[#allocation7 + $0x2e0] sm:$0xff]  ;;  %4114 = vmatpush.msra.mxu2 %v2010_v22 }
 0x374   : > { %4018 = vmatpush.msra.mxu0 %v1830_v35  ;;  %4161 = vmatpush.msra.mxu3 %v2106_v21  ;;  %v1806_v21 = vld [vmem:[#allocation7 + $0x220] sm:$0xff] }
 0x375   : > { %v9620_v59 = vadd.f32 %v3451_v4, %v3405_v33  ;;  %v3474_v49 = vpop.f32.mrf.mxu0  ;;  %4067 = vmatpush.msra.mxu1 %v1914_v34  ;;  %4115 = vmatpush.msra.mxu2 %v2004_v12  ;;  %v1902_v12 = vld [vmem:[#allocation7 + $0x520] sm:$0xff]  ;;  %v1992_v34 = vld [vmem:[#allocation7 + $0x7f0] sm:$0xff] }
 0x376   : > { %v3521_v32 = vpop.f32.mrf.mxu1 }
 0x377   : > { %11108 = vst [vmem:[#allocation79_spill] sm:$0xff] %v9620_v59  ;;  %3770 = vmatmul.f32.gmra.mxu2 %v11092_v27  ;;  %v1824_v59 = vld [vmem:[#allocation7 + $0x2b0] sm:$0xff]  ;;  %v3522_v40 = vadd.f32 %v3521_v32, %v3474_v49 }
 0x378   : > { %3817 = vmatmul.f32.gmra.mxu3 %v11093_v61  ;;  %3679 = vmatmul.f32.gmra.mxu0 %v11094_v52 }
 0x379   : > { %3726 = vmatmul.f32.gmra.mxu1 %v11095_v45  ;;  %4019 = vmatpush.msra.mxu0 %v1824_v59  ;;  %v2100_v59 = vld [vmem:[#allocation7 + $0xb50] sm:$0xff] }
 0x37a   : > { %v3565_v42 = vpop.f32.mrf.mxu2  ;;  %4162 = vmatpush.msra.mxu3 %v2100_v59 }
 0x37b   : > { %v3612_v43 = vpop.f32.mrf.mxu3  ;;  %v3566_v58 = vadd.f32 %v3565_v42, %v3519_v16  ;;  %4020 = vmatpush.msra.mxu0 %v1818_v29  ;;  %v1998_v29 = vld [vmem:[#allocation7 + $0x820] sm:$0xff] }
 0x37c   : > { %4116 = vmatpush.msra.mxu2 %v1998_v29  ;;  %4163 = vmatpush.msra.mxu3 %v2094_v11  ;;  %v1896_v29 = vld [vmem:[#allocation7 + $0x4f0] sm:$0xff]  ;;  %v1794_v11 = vld [vmem:[#allocation7 + $0x1c0] sm:$0xff] }
 0x37d   : > { %v9626_v15 = vadd.f32 %v3612_v43, %v3566_v58  ;;  %v3477_v4 = vpop.f32.mrf.mxu0  ;;  %4021 = vmatpush.msra.mxu0 %v1812_v0 }
 0x37e   : > { %v3524_v33 = vpop.f32.mrf.mxu1  ;;  %4117 = vmatpush.msra.mxu2 %v1992_v34 }
 0x37f   : > { %3773 = vmatmul.f32.gmra.mxu2 %v11097_v63  ;;  %v3525_v49 = vadd.f32 %v3524_v33, %v3477_v4  ;;  %4022 = vmatpush.msra.mxu0 %v1806_v21 }
 0x380   : > { %3820 = vmatmul.f32.gmra.mxu3 %v11098_v38  ;;  %3682 = vmatmul.f32.gmra.mxu0 %v11099_v8 }
 0x381   : > { %3729 = vmatmul.f32.gmra.mxu1 %v11100_v54  ;;  %4118 = vmatpush.msra.mxu2 %v1986_v53  ;;  %v1884_v53 = vld [vmem:[#allocation7 + $0x490] sm:$0xff] }
 0x382   : > { %v3568_v35 = vpop.f32.mrf.mxu2 }
 0x383   : > { %v3615_v57 = vpop.f32.mrf.mxu3  ;;  %v3569_v16 = vadd.f32 %v3568_v35, %v3522_v40 }
 0x385   : > { %v9632_v42 = vadd.f32 %v3615_v57, %v3569_v16  ;;  %v3480_v43 = vpop.f32.mrf.mxu0  ;;  %v1908_v16 = vld [vmem:[#allocation7 + $0x550] sm:$0xff] }
 0x386   : > { %v3527_v58 = vpop.f32.mrf.mxu1  ;;  %4068 = vmatpush.msra.mxu1 %v1908_v16  ;;  %v2088_v16 = vld [vmem:[#allocation7 + $0xaf0] sm:$0xff] }
 0x387   : > { %3776 = vmatmul.f32.gmra.mxu2 %v9225_v28  ;;  %v3528_v4 = vadd.f32 %v3527_v58, %v3480_v43  ;;  %4164 = vmatpush.msra.mxu3 %v2088_v16  ;;  %v2082_v43 = vld [vmem:[#allocation7 + $0xac0] sm:$0xff]  ;;  %v1788_v16 = vld [vmem:[#allocation7 + $0x190] sm:$0xff] }
 0x388   : > { %3823 = vmatmul.f32.gmra.mxu3 %v9227_v56  ;;  %3685 = vmatmul.f32.gmra.mxu0 %v9339_v31  ;;  %v1890_v58 = vld [vmem:[#allocation7 + $0x4c0] sm:$0xff] }
 0x389   : > { %3732 = vmatmul.f32.gmra.mxu1 %v9341_v6  ;;  %4165 = vmatpush.msra.mxu3 %v2082_v43 }
 0x38a   : > { %v3571_v32 = vpop.f32.mrf.mxu2  ;;  %4069 = vmatpush.msra.mxu1 %v1902_v12 }
 0x38b   : > { %v3618_v44 = vpop.f32.mrf.mxu3  ;;  %v3572_v22 = vadd.f32 %v3571_v32, %v3525_v49  ;;  %4166 = vmatpush.msra.mxu3 %v2076_v26  ;;  %v1776_v26 = vld [vmem:[#allocation7 + $0x130] sm:$0xff] }
 0x38c   : > { %4070 = vmatpush.msra.mxu1 %v1896_v29 }
 0x38d   : > { %v9638_v40 = vadd.f32 %v3618_v44, %v3572_v22  ;;  %v3483_v35 = vpop.f32.mrf.mxu0  ;;  %v1800_v22 = vld [vmem:[#allocation7 + $0x1f0] sm:$0xff] }
 0x38e   : > { %v3530_v57 = vpop.f32.mrf.mxu1  ;;  %4023 = vmatpush.msra.mxu0 %v1800_v22  ;;  %4071 = vmatpush.msra.mxu1 %v1890_v58  ;;  %v1980_v22 = vld [vmem:[#allocation7 + $0x790] sm:$0xff] }
 0x38f   : > { %3779 = vmatmul.f32.gmra.mxu2 %v9357_v36  ;;  %v3531_v21 = vadd.f32 %v3530_v57, %v3483_v35  ;;  %v1974_v35 = vld [vmem:[#allocation7 + $0x760] sm:$0xff] }
 0x390   : > { %3826 = vmatmul.f32.gmra.mxu3 %v9359_v3  ;;  %3846 = vmatmul.f32.vlgmr.msrb.gmra.mxu0 %v11069_v25  ;;  %v1782_v57 = vld [vmem:[#allocation7 + $0x160] sm:$0xff] }
 0x391   : > { %3893 = vmatmul.f32.vlgmr.msrb.gmra.mxu1 %v11070_v20  ;;  %4024 = vmatpush.msra.mxu0 %v1794_v11  ;;  %v2070_v11 = vld [vmem:[#allocation7 + $0xa60] sm:$0xff] }
 0x392   : > { %v3574_v33 = vpop.f32.mrf.mxu2  ;;  %4119 = vmatpush.msra.mxu2 %v1980_v22  ;;  %4072 = vmatpush.msra.mxu1 %v1884_v53  ;;  %v1878_v22 = vld [vmem:[#allocation7 + $0x460] sm:$0xff] }
 0x393   : > { %v3621_v0 = vpop.f32.mrf.mxu3  ;;  %v3575_v59 = vadd.f32 %v3574_v33, %v3528_v4  ;;  %4025 = vmatpush.msra.mxu0 %v1788_v16  ;;  %4167 = vmatpush.msra.mxu3 %v2070_v11  ;;  %v1968_v16 = vld [vmem:[#allocation7 + $0x730] sm:$0xff] }
 0x394   : > { %4120 = vmatpush.msra.mxu2 %v1974_v35  ;;  %4073 = vmatpush.msra.mxu1 %v1878_v22  ;;  %v1962_v35 = vld [vmem:[#allocation7 + $0x700] sm:$0xff] }
 0x395   : > { %v9644_v49 = vadd.f32 %v3621_v0, %v3575_v59  ;;  %v3486_v32 = vpop.f32.mrf.mxu0  ;;  %4026 = vmatpush.msra.mxu0 %v1782_v57  ;;  %v1770_v22 = vld [vmem:[#allocation7 + $0x100] sm:$0xff] }
 0x396   : > { %v3533_v44 = vpop.f32.mrf.mxu1  ;;  %4121 = vmatpush.msra.mxu2 %v1968_v16  ;;  %v2058_v16 = vld [vmem:[#allocation7 + $0xa00] sm:$0xff] }
 0x397   : > { %3940 = vmatmul.f32.vlgmr.msrb.gmra.mxu2 %v9011_v55  ;;  %v3534_v29 = vadd.f32 %v3533_v44, %v3486_v32  ;;  %v2064_v32 = vld [vmem:[#allocation7 + $0xa30] sm:$0xff]  ;;  %4027 = vmatpush.msra.mxu0 %v1776_v26 }
 0x398   : > { %3987 = vmatmul.f32.vlgmr.msrb.gmra.mxu3 %v11071_v41  ;;  %3849 = vmatmul.f32.gmra.mxu0 %v11072_v46  ;;  %v1872_v44 = vld [vmem:[#allocation7 + $0x430] sm:$0xff] }
 0x399   : > { %3896 = vmatmul.f32.gmra.mxu1 %v9049_v39  ;;  %4168 = vmatpush.msra.mxu3 %v2064_v32  ;;  %v2052_v26 = vld [vmem:[#allocation7 + $0x9d0] sm:$0xff] }
 0x39a   : > { %v3577_v12 = vpop.f32.mrf.mxu2  ;;  %4074 = vmatpush.msra.mxu1 %v1872_v44  ;;  %4122 = vmatpush.msra.mxu2 %v1962_v35 }
 0x39b   : > { %v3624_v34 = vpop.f32.mrf.mxu3  ;;  %v3578_v4 = vadd.f32 %v3577_v12, %v3531_v21  ;;  %4028 = vmatpush.msra.mxu0 %v1770_v22  ;;  %4169 = vmatpush.msra.mxu3 %v2058_v16  ;;  %v1860_v22 = vld [vmem:[#allocation7 + $0x3d0] sm:$0xff]  ;;  %v1950_v16 = vld [vmem:[#allocation7 + $0x6a0] sm:$0xff] }
 0x39d   : > { %v9650_v33 = vadd.f32 %v3624_v34, %v3578_v4  ;;  %v3489_v0 = vpop.f32.mrf.mxu0  ;;  %4170 = vmatpush.msra.mxu3 %v2052_v26 }
 0x39e   : > { %v3536_v59 = vpop.f32.mrf.mxu1 }
 0x39f   : > { %3943 = vmatmul.f32.gmra.mxu2 %v11073_v13  ;;  %v3537_v53 = vadd.f32 %v3536_v59, %v3489_v0  ;;  %v1956_v0 = vld [vmem:[#allocation7 + $0x6d0] sm:$0xff] }
 0x3a0   : > { %3990 = vmatmul.f32.gmra.mxu3 %v11074_v30  ;;  %3852 = vmatmul.f32.gmra.mxu0 %v11075_v62  ;;  %v1764_v59 = vld [vmem:[#allocation7 + $0xd0] sm:$0xff] }
 0x3a1   : > { %3899 = vmatmul.f32.gmra.mxu1 %v11076_v23  ;;  %4123 = vmatpush.msra.mxu2 %v1956_v0 }
 0x3a2   : > { %v3580_v43 = vpop.f32.mrf.mxu2  ;;  %4029 = vmatpush.msra.mxu0 %v1764_v59 }
 0x3a3   : > { %v3627_v58 = vpop.f32.mrf.mxu3  ;;  %v3581_v21 = vadd.f32 %v3580_v43, %v3534_v29  ;;  %4124 = vmatpush.msra.mxu2 %v1950_v16  ;;  %v2040_v16 = vld [vmem:[#allocation7 + $0x970] sm:$0xff] }
 0x3a5   : > { %v9656_v12 = vadd.f32 %v3627_v58, %v3581_v21  ;;  %v3492_v34 = vpop.f32.mrf.mxu0 }
 0x3a6   : > { %v3539_v4 = vpop.f32.mrf.mxu1 }
 0x3a7   : > { %3946 = vmatmul.f32.gmra.mxu2 %v11079_v7  ;;  %v3540_v32 = vadd.f32 %v3539_v4, %v3492_v34  ;;  %v1944_v34 = vld [vmem:[#allocation7 + $0x670] sm:$0xff] }
 0x3a8   : > { %3993 = vmatmul.f32.gmra.mxu3 %v11080_v24  ;;  %3855 = vmatmul.f32.gmra.mxu0 %v11081_v50 }
 0x3a9   : > { %3902 = vmatmul.f32.gmra.mxu1 %v11082_v19  ;;  %v1866_v19 = vld [vmem:[#allocation7 + $0x400] sm:$0xff]  ;;  %4125 = vmatpush.msra.mxu2 %v1944_v34  ;;  %v1836_v34 = vld [vmem:[#allocation7 + $0x310] sm:$0xff] }
 0x3aa   : > { %v3583_v57 = vpop.f32.mrf.mxu2  ;;  %4075 = vmatpush.msra.mxu1 %v1866_v19  ;;  %v1854_v19 = vld [vmem:[#allocation7 + $0x3a0] sm:$0xff] }
 0x3ab   : > { %v3630_v29 = vpop.f32.mrf.mxu3  ;;  %v3584_v11 = vadd.f32 %v3583_v57, %v3537_v53 }
 0x3ac   : > { %4076 = vmatpush.msra.mxu1 %v1860_v22 }
 0x3ad   : > { %v9662_v43 = vadd.f32 %v3630_v29, %v3584_v11  ;;  %v3495_v58 = vpop.f32.mrf.mxu0 }
 0x3ae   : > { %v3542_v21 = vpop.f32.mrf.mxu1  ;;  %4077 = vmatpush.msra.mxu1 %v1854_v19  ;;  %v1740_v19 = vld [vmem:[#allocation7 + $0x10] sm:$0xff] }
 0x3af   : > { %3949 = vmatmul.f32.gmra.mxu2 %v11083_v10  ;;  %v3543_v4 = vadd.f32 %v3542_v21, %v3495_v58  ;;  %v2034_v21 = vld [vmem:[#allocation7 + $0x940] sm:$0xff] }
 0x3b0   : > { %3996 = vmatmul.f32.gmra.mxu3 %v11084_v2  ;;  %3858 = vmatmul.f32.gmra.mxu0 %v11085_v14  ;;  %v2046_v14 = vld [vmem:[#allocation7 + $0x9a0] sm:$0xff] }
 0x3b1   : > { %3905 = vmatmul.f32.gmra.mxu1 %v11086_v37  ;;  %v1758_v37 = vld [vmem:[#allocation7 + $0xa0] sm:$0xff]  ;;  %4171 = vmatpush.msra.mxu3 %v2046_v14 }
 0x3b2   : > { %v3586_v44 = vpop.f32.mrf.mxu2  ;;  %4030 = vmatpush.msra.mxu0 %v1758_v37  ;;  %v1746_v14 = vld [vmem:[#allocation7 + $0x40] sm:$0xff] }
 0x3b3   : > { %v3633_v53 = vpop.f32.mrf.mxu3  ;;  %v3587_v35 = vadd.f32 %v3586_v44, %v3540_v32  ;;  %v1752_v32 = vld [vmem:[#allocation7 + $0x70] sm:$0xff]  ;;  %4172 = vmatpush.msra.mxu3 %v2040_v16  ;;  %v1842_v37 = vld [vmem:[#allocation7 + $0x340] sm:$0xff] }
 0x3b4   : > { %v1848_v44 = vld [vmem:[#allocation7 + $0x370] sm:$0xff]  ;;  %4031 = vmatpush.msra.mxu0 %v1752_v32  ;;  %v2502_v16 = vld [vmem:[#allocation7 + $0x17e0] sm:$0xff] }
 0x3b5   : > { %v9668_v57 = vadd.f32 %v3633_v53, %v3587_v35  ;;  %v3498_v29 = vpop.f32.mrf.mxu0  ;;  %4078 = vmatpush.msra.mxu1 %v1848_v44  ;;  %4173 = vmatpush.msra.mxu3 %v2034_v21  ;;  %v1932_v32 = vld [vmem:[#allocation7 + $0x610] sm:$0xff] }
 0x3b6   : > { %v3545_v11 = vpop.f32.mrf.mxu1  ;;  %4032 = vmatpush.msra.mxu0 %v1746_v14  ;;  %v2028_v44 = vld [vmem:[#allocation7 + $0x910] sm:$0xff] }
 0x3b7   : > { %3952 = vmatmul.f32.gmra.mxu2 %v11087_v51  ;;  %4079 = vmatpush.msra.mxu1 %v1842_v37 }
 0x3b8   : > { %3999 = vmatmul.f32.gmra.mxu3 %v11088_v47  ;;  %3861 = vmatmul.f32.gmra.mxu0 %v11089_v48 }
 0x3b9   : > { %3908 = vmatmul.f32.gmra.mxu1 %v11090_v1  ;;  %v1938_v1 = vld [vmem:[#allocation7 + $0x640] sm:$0xff]  ;;  %4033 = vmatpush.msra.mxu0 %v1740_v19 }
 0x3ba   : > { %v3589_v0 = vpop.f32.mrf.mxu2  ;;  %4126 = vmatpush.msra.mxu2 %v1938_v1  ;;  %4080 = vmatpush.msra.mxu1 %v1836_v34 }
 0x3bb   : > { %v3636_v59 = vpop.f32.mrf.mxu3  ;;  %v3590_v26 = vadd.f32 %v3589_v0, %v3543_v4  ;;  %v3546_v4 = vadd.f32 %v3545_v11, %v3498_v29  ;;  %4174 = vmatpush.msra.mxu3 %v2028_v44  ;;  %v2406_v11 = vld [vmem:[#allocation7 + $0x14e0] sm:$0xff] }
 0x3bc   : > { %4127 = vmatpush.msra.mxu2 %v1932_v32  ;;  %v2394_v32 = vld [vmem:[#allocation7 + $0x1480] sm:$0xff] }
 0x3bd   : > { %v9674_v53 = vadd.f32 %v3636_v59, %v3590_v26  ;;  %v3659_v35 = vpop.f32.mrf.mxu0  ;;  %4347 = vmatpush.msrb.mxu3 %v2502_v16 }
 0x3be   : > { %v3706_v22 = vpop.f32.mrf.mxu1  ;;  %v3660_v48 = vadd.f32 %v3659_v35, %v9626_v15  ;;  %4300 = vmatpush.msrb.mxu2 %v2406_v11 }
 0x3bf   : > { %3955 = vmatmul.f32.gmra.mxu2 %v11092_v27 }
 0x3c0   : > { %4002 = vmatmul.f32.gmra.mxu3 %v11093_v61  ;;  %v3707_v58 = vadd.f32 %v3706_v22, %v3660_v48  ;;  %3864 = vmatmul.f32.gmra.mxu0 %v11094_v52  ;;  %v2214_v22 = vld [vmem:[#allocation7 + $0xee0] sm:$0xff] }
 0x3c1   : > { %3911 = vmatmul.f32.gmra.mxu1 %v11095_v45  ;;  %4206 = vmatpush.msrb.mxu0 %v2214_v22 }
 0x3c2   : > { %v3592_v15 = vpop.f32.mrf.mxu2 }
 0x3c3   : > { %v3639_v0 = vpop.f32.mrf.mxu3  ;;  %v3593_v1 = vadd.f32 %v3592_v15, %v3546_v4  ;;  %v2310_v4 = vld [vmem:[#allocation7 + $0x11e0] sm:$0xff]  ;;  %v2400_v15 = vld [vmem:[#allocation7 + $0x14b0] sm:$0xff] }
 0x3c4   : > { %4253 = vmatpush.msrb.mxu1 %v2310_v4  ;;  %4301 = vmatpush.msrb.mxu2 %v2400_v15  ;;  %v11109_v4 = vld [vmem:[#allocation69_spill] sm:$0xff] }
 0x3c5   : > { %v9681_v59 = vadd.f32 %v3639_v0, %v3593_v1  ;;  %v3662_v26 = vpop.f32.mrf.mxu0  ;;  %v2196_v15 = vld [vmem:[#allocation7 + $0xe50] sm:$0xff] }
 0x3c6   : > { %v3709_v48 = vpop.f32.mrf.mxu1  ;;  %v3663_v35 = vadd.f32 %v3662_v26, %v9632_v42  ;;  %v2496_v26 = vld [vmem:[#allocation7 + $0x17b0] sm:$0xff]  ;;  %4302 = vmatpush.msrb.mxu2 %v2394_v32 }
 0x3c7   : > { %3958 = vmatmul.f32.gmra.mxu2 %v11097_v63  ;;  %4348 = vmatpush.msrb.mxu3 %v2496_v26 }
 0x3c8   : > { %4005 = vmatmul.f32.gmra.mxu3 %v11098_v38  ;;  %v3710_v29 = vadd.f32 %v3709_v48, %v3663_v35  ;;  %3867 = vmatmul.f32.gmra.mxu0 %v11099_v8  ;;  %v2304_v48 = vld [vmem:[#allocation7 + $0x11b0] sm:$0xff] }
 0x3c9   : > { %3914 = vmatmul.f32.gmra.mxu1 %v11100_v54 }
 0x3ca   : > { %v3753_v14 = vpop.f32.mrf.mxu2  ;;  %4254 = vmatpush.msrb.mxu1 %v2304_v48 }
 0x3cb   : > { %v3800_v37 = vpop.f32.mrf.mxu3  ;;  %v3754_v42 = vadd.f32 %v3753_v14, %v3707_v58  ;;  %v2208_v58 = vld [vmem:[#allocation7 + $0xeb0] sm:$0xff]  ;;  %v2202_v14 = vld [vmem:[#allocation7 + $0xe80] sm:$0xff] }
 0x3cc   : > { %4207 = vmatpush.msrb.mxu0 %v2208_v58 }
 0x3cd   : > { %v9688_v21 = vadd.f32 %v3800_v37, %v3754_v42  ;;  %v3665_v19 = vpop.f32.mrf.mxu0  ;;  %v2490_v37 = vld [vmem:[#allocation7 + $0x1780] sm:$0xff] }
 0x3ce   : > { %v3712_v34 = vpop.f32.mrf.mxu1  ;;  %v3666_v0 = vadd.f32 %v3665_v19, %v9638_v40  ;;  %4208 = vmatpush.msrb.mxu0 %v2202_v14  ;;  %4349 = vmatpush.msrb.mxu3 %v2490_v37  ;;  %v2298_v19 = vld [vmem:[#allocation7 + $0x1180] sm:$0xff]  ;;  %v11110_v37 = vld [vmem:[#allocation70_spill] sm:$0xff] }
 0x3cf   : > { %3961 = vmatmul.f32.gmra.mxu2 %v9225_v28  ;;  %4255 = vmatpush.msrb.mxu1 %v2298_v19  ;;  %v2478_v14 = vld [vmem:[#allocation7 + $0x1720] sm:$0xff] }
 0x3d0   : > { %4008 = vmatmul.f32.gmra.mxu3 %v9227_v56  ;;  %v3713_v1 = vadd.f32 %v3712_v34, %v3666_v0  ;;  %3870 = vmatmul.f32.gmra.mxu0 %v9339_v31  ;;  %v2484_v0 = vld [vmem:[#allocation7 + $0x1750] sm:$0xff] }
 0x3d1   : > { %3917 = vmatmul.f32.gmra.mxu1 %v9341_v6  ;;  %4209 = vmatpush.msrb.mxu0 %v2196_v15  ;;  %v2286_v15 = vld [vmem:[#allocation7 + $0x1120] sm:$0xff] }
 0x3d2   : > { %v3756_v44 = vpop.f32.mrf.mxu2  ;;  %4350 = vmatpush.msrb.mxu3 %v2484_v0  ;;  %v2376_v0 = vld [vmem:[#allocation7 + $0x13f0] sm:$0xff] }
 0x3d3   : > { %v3803_v35 = vpop.f32.mrf.mxu3  ;;  %v3757_v40 = vadd.f32 %v3756_v44, %v3710_v29  ;;  %v2388_v29 = vld [vmem:[#allocation7 + $0x1450] sm:$0xff] }
 0x3d4   : > { %4303 = vmatpush.msrb.mxu2 %v2388_v29  ;;  %v11112_v29 = vld [vmem:[#allocation104_spill] sm:$0xff]  ;;  %4351 = vmatpush.msrb.mxu3 %v2478_v14 }
 0x3d5   : > { %v9695_v11 = vadd.f32 %v3803_v35, %v3757_v40  ;;  %v3668_v22 = vpop.f32.mrf.mxu0  ;;  %v2292_v35 = vld [vmem:[#allocation7 + $0x1150] sm:$0xff]  ;;  %v2382_v40 = vld [vmem:[#allocation7 + $0x1420] sm:$0xff] }
 0x3d6   : > { %v3715_v16 = vpop.f32.mrf.mxu1  ;;  %v3669_v42 = vadd.f32 %v3668_v22, %v9644_v49  ;;  %4256 = vmatpush.msrb.mxu1 %v2292_v35  ;;  %4304 = vmatpush.msrb.mxu2 %v2382_v40  ;;  %v2184_v40 = vld [vmem:[#allocation7 + $0xdf0] sm:$0xff] }
 0x3d7   : > { %3964 = vmatmul.f32.gmra.mxu2 %v9357_v36 }
 0x3d8   : > { %4011 = vmatmul.f32.gmra.mxu3 %v9359_v3  ;;  %v3716_v34 = vadd.f32 %v3715_v16, %v3669_v42  ;;  %3873 = vmatmul.f32.gmra.mxu0 %v9471_v60  ;;  %v2190_v16 = vld [vmem:[#allocation7 + $0xe20] sm:$0xff] }
 0x3d9   : > { %3920 = vmatmul.f32.gmra.mxu1 %v11109_v4  ;;  %v11111_v42 = vld [vmem:[#allocation67_spill] sm:$0xff]  ;;  %4210 = vmatpush.msrb.mxu0 %v2190_v16  ;;  %v2784_v4 = vld [vmem:[#allocation7 + $0x20b0] sm:$0xff] }
 0x3da   : > { %v3759_v58 = vpop.f32.mrf.mxu2  ;;  %4257 = vmatpush.msrb.mxu1 %v2286_v15  ;;  %4305 = vmatpush.msrb.mxu2 %v2376_v0  ;;  %v11115_v16 = vld [vmem:[#allocation107_spill] sm:$0xff] }
 0x3db   : > { %v3806_v26 = vpop.f32.mrf.mxu3  ;;  %v3760_v49 = vadd.f32 %v3759_v58, %v3713_v1  ;;  %v11113_v1 = vld [vmem:[#allocation105_spill] sm:$0xff]  ;;  %4211 = vmatpush.msrb.mxu0 %v2184_v40  ;;  %v2466_v15 = vld [vmem:[#allocation7 + $0x16c0] sm:$0xff] }
 0x3dc   : > { %v2274_v0 = vld [vmem:[#allocation7 + $0x10c0] sm:$0xff]  ;;  %v2172_v40 = vld [vmem:[#allocation7 + $0xd90] sm:$0xff] }
 0x3dd   : > { %v9702_v48 = vadd.f32 %v3806_v26, %v3760_v49  ;;  %v3671_v32 = vpop.f32.mrf.mxu0 }
 0x3de   : > { %v3718_v44 = vpop.f32.mrf.mxu1  ;;  %v3672_v22 = vadd.f32 %v3671_v32, %v9650_v33 }
 0x3df   : > { %3967 = vmatmul.f32.gmra.mxu2 %v11110_v37 }
 0x3e0   : > { %4014 = vmatmul.f32.gmra.mxu3 %v11111_v42  ;;  %v3719_v19 = vadd.f32 %v3718_v44, %v3672_v22  ;;  %4034 = vmatmul.f32.vlgmr.msra.gmra.mxu0 %v11112_v29  ;;  %v2472_v42 = vld [vmem:[#allocation7 + $0x16f0] sm:$0xff] }
 0x3e1   : > { %4081 = vmatmul.f32.vlgmr.msra.gmra.mxu1 %v11113_v1  ;;  %4352 = vmatpush.msrb.mxu3 %v2472_v42  ;;  %v2280_v22 = vld [vmem:[#allocation7 + $0x10f0] sm:$0xff]  ;;  %v2370_v1 = vld [vmem:[#allocation7 + $0x13c0] sm:$0xff] }
 0x3e2   : > { %v3762_v58 = vpop.f32.mrf.mxu2  ;;  %v11114_v29 = vld [vmem:[#allocation106_spill] sm:$0xff]  ;;  %4258 = vmatpush.msrb.mxu1 %v2280_v22  ;;  %4306 = vmatpush.msrb.mxu2 %v2370_v1  ;;  %v2358_v22 = vld [vmem:[#allocation7 + $0x1360] sm:$0xff] }
 0x3e3   : > { %v3809_v26 = vpop.f32.mrf.mxu3  ;;  %v3763_v33 = vadd.f32 %v3762_v58, %v3716_v34  ;;  %v2178_v34 = vld [vmem:[#allocation7 + $0xdc0] sm:$0xff]  ;;  %4353 = vmatpush.msrb.mxu3 %v2466_v15 }
 0x3e4   : > { %4212 = vmatpush.msrb.mxu0 %v2178_v34  ;;  %4259 = vmatpush.msrb.mxu1 %v2274_v0  ;;  %v2166_v34 = vld [vmem:[#allocation7 + $0xd60] sm:$0xff] }
 0x3e5   : > { %v9709_v49 = vadd.f32 %v3809_v26, %v3763_v33  ;;  %v3674_v32 = vpop.f32.mrf.mxu0  ;;  %v2454_v15 = vld [vmem:[#allocation7 + $0x1660] sm:$0xff] }
 0x3e6   : > { %v3721_v35 = vpop.f32.mrf.mxu1  ;;  %v3675_v44 = vadd.f32 %v3674_v32, %v9656_v12  ;;  %4213 = vmatpush.msrb.mxu0 %v2172_v40 }
 0x3e7   : > { %4128 = vmatmul.f32.vlgmr.msra.gmra.mxu2 %v11114_v29 }
 0x3e8   : > { %4175 = vmatmul.f32.vlgmr.msra.gmra.mxu3 %v11115_v16  ;;  %v3722_v14 = vadd.f32 %v3721_v35, %v3675_v44  ;;  %4037 = vmatmul.f32.gmra.mxu0 %v11065_v9  ;;  %v2364_v35 = vld [vmem:[#allocation7 + $0x1390] sm:$0xff] }
 0x3e9   : > { %4084 = vmatmul.f32.gmra.mxu1 %v11066_v17  ;;  %4307 = vmatpush.msrb.mxu2 %v2364_v35  ;;  %v2460_v16 = vld [vmem:[#allocation7 + $0x1690] sm:$0xff] }
 0x3ea   : > { %v3765_v58 = vpop.f32.mrf.mxu2  ;;  %4354 = vmatpush.msrb.mxu3 %v2460_v16  ;;  %4214 = vmatpush.msrb.mxu0 %v2166_v34  ;;  %v2352_v35 = vld [vmem:[#allocation7 + $0x1330] sm:$0xff] }
 0x3eb   : > { %v3812_v12 = vpop.f32.mrf.mxu3  ;;  %v3766_v42 = vadd.f32 %v3765_v58, %v3719_v19  ;;  %v2268_v19 = vld [vmem:[#allocation7 + $0x1090] sm:$0xff]  ;;  %4308 = vmatpush.msrb.mxu2 %v2358_v22  ;;  %v2346_v22 = vld [vmem:[#allocation7 + $0x1300] sm:$0xff] }
 0x3ec   : > { %4260 = vmatpush.msrb.mxu1 %v2268_v19  ;;  %4355 = vmatpush.msrb.mxu3 %v2454_v15  ;;  %v2256_v19 = vld [vmem:[#allocation7 + $0x1030] sm:$0xff] }
 0x3ed   : > { %v9716_v26 = vadd.f32 %v3812_v12, %v3766_v42  ;;  %v3677_v33 = vpop.f32.mrf.mxu0  ;;  %4309 = vmatpush.msrb.mxu2 %v2352_v35  ;;  %v2250_v35 = vld [vmem:[#allocation7 + $0x1000] sm:$0xff] }
 0x3ee   : > { %v3724_v32 = vpop.f32.mrf.mxu1  ;;  %v3678_v44 = vadd.f32 %v3677_v33, %v9662_v43 }
 0x3ef   : > { %4131 = vmatmul.f32.gmra.mxu2 %v11067_v18 }
 0x3f0   : > { %4178 = vmatmul.f32.gmra.mxu3 %v11068_v5  ;;  %v3725_v1 = vadd.f32 %v3724_v32, %v3678_v44  ;;  %4040 = vmatmul.f32.gmra.mxu0 %v11069_v25  ;;  %v2262_v32 = vld [vmem:[#allocation7 + $0x1060] sm:$0xff]  ;;  %v2448_v44 = vld [vmem:[#allocation7 + $0x1630] sm:$0xff] }
 0x3f1   : > { %4087 = vmatmul.f32.gmra.mxu1 %v11070_v20  ;;  %4356 = vmatpush.msrb.mxu3 %v2448_v44  ;;  %v2436_v44 = vld [vmem:[#allocation7 + $0x15d0] sm:$0xff] }
 0x3f2   : > { %v3768_v0 = vpop.f32.mrf.mxu2  ;;  %4261 = vmatpush.msrb.mxu1 %v2262_v32  ;;  %4310 = vmatpush.msrb.mxu2 %v2346_v22 }
 0x3f3   : > { %v3815_v43 = vpop.f32.mrf.mxu3  ;;  %v3769_v58 = vadd.f32 %v3768_v0, %v3722_v14  ;;  %v2160_v14 = vld [vmem:[#allocation7 + $0xd30] sm:$0xff] }
 0x3f4   : > { %4215 = vmatpush.msrb.mxu0 %v2160_v14  ;;  %4262 = vmatpush.msrb.mxu1 %v2256_v19  ;;  %v2148_v14 = vld [vmem:[#allocation7 + $0xcd0] sm:$0xff] }
 0x3f5   : > { %v9723_v12 = vadd.f32 %v3815_v43, %v3769_v58  ;;  %v3680_v42 = vpop.f32.mrf.mxu0 }
 0x3f6   : > { %v3727_v33 = vpop.f32.mrf.mxu1  ;;  %v3681_v40 = vadd.f32 %v3680_v42, %v9668_v57  ;;  %v2154_v42 = vld [vmem:[#allocation7 + $0xd00] sm:$0xff]  ;;  %4263 = vmatpush.msrb.mxu1 %v2250_v35 }
 0x3f7   : > { %4134 = vmatmul.f32.gmra.mxu2 %v9011_v55  ;;  %4216 = vmatpush.msrb.mxu0 %v2154_v42 }
 0x3f8   : > { %4181 = vmatmul.f32.gmra.mxu3 %v11071_v41  ;;  %v3728_v16 = vadd.f32 %v3727_v33, %v3681_v40  ;;  %4043 = vmatmul.f32.gmra.mxu0 %v11072_v46  ;;  %v2442_v33 = vld [vmem:[#allocation7 + $0x1600] sm:$0xff] }
 0x3f9   : > { %4090 = vmatmul.f32.gmra.mxu1 %v9049_v39  ;;  %4357 = vmatpush.msrb.mxu3 %v2442_v33  ;;  %v2142_v33 = vld [vmem:[#allocation7 + $0xca0] sm:$0xff] }
 0x3fa   : > { %v3771_v34 = vpop.f32.mrf.mxu2  ;;  %4217 = vmatpush.msrb.mxu0 %v2148_v14  ;;  %v2328_v14 = vld [vmem:[#allocation7 + $0x1270] sm:$0xff] }
 0x3fb   : > { %v3818_v15 = vpop.f32.mrf.mxu3  ;;  %v3772_v57 = vadd.f32 %v3771_v34, %v3725_v1  ;;  %v2340_v1 = vld [vmem:[#allocation7 + $0x12d0] sm:$0xff]  ;;  %4358 = vmatpush.msrb.mxu3 %v2436_v44 }
 0x3fc   : > { %4311 = vmatpush.msrb.mxu2 %v2340_v1  ;;  %v2238_v1 = vld [vmem:[#allocation7 + $0xfa0] sm:$0xff]  ;;  %4218 = vmatpush.msrb.mxu0 %v2142_v33 }
 0x3fd   : > { %v9730_v0 = vadd.f32 %v3818_v15, %v3772_v57  ;;  %v3683_v43 = vpop.f32.mrf.mxu0  ;;  %v2130_v33 = vld [vmem:[#allocation7 + $0xc40] sm:$0xff] }
 0x3fe   : > { %v3730_v58 = vpop.f32.mrf.mxu1  ;;  %v3684_v32 = vadd.f32 %v3683_v43, %v9674_v53  ;;  %v2244_v43 = vld [vmem:[#allocation7 + $0xfd0] sm:$0xff] }
 0x3ff   : > { %4137 = vmatmul.f32.gmra.mxu2 %v11073_v13  ;;  %4264 = vmatpush.msrb.mxu1 %v2244_v43 }
 0x400   : > { %4184 = vmatmul.f32.gmra.mxu3 %v11074_v30  ;;  %v3731_v40 = vadd.f32 %v3730_v58, %v3684_v32  ;;  %4046 = vmatmul.f32.gmra.mxu0 %v11075_v62  ;;  %v2334_v58 = vld [vmem:[#allocation7 + $0x12a0] sm:$0xff] }
 0x401   : > { %4093 = vmatmul.f32.gmra.mxu1 %v11076_v23  ;;  %4312 = vmatpush.msrb.mxu2 %v2334_v58  ;;  %v2430_v32 = vld [vmem:[#allocation7 + $0x15a0] sm:$0xff]  ;;  %v2424_v58 = vld [vmem:[#allocation7 + $0x1570] sm:$0xff] }
 0x402   : > { %v3774_v19 = vpop.f32.mrf.mxu2  ;;  %4359 = vmatpush.msrb.mxu3 %v2430_v32  ;;  %4265 = vmatpush.msrb.mxu1 %v2238_v1  ;;  %v2226_v32 = vld [vmem:[#allocation7 + $0xf40] sm:$0xff] }
 0x403   : > { %v3821_v22 = vpop.f32.mrf.mxu3  ;;  %v3775_v53 = vadd.f32 %v3774_v19, %v3728_v16  ;;  %v11116_v16 = vld [vmem:[#allocation37_spill] sm:$0xff]  ;;  %4313 = vmatpush.msrb.mxu2 %v2328_v14  ;;  %v11117_v1 = vld [vmem:[#allocation40_spill] sm:$0xff]  ;;  %v11118_v14 = vld [vmem:[#allocation102_spill] sm:$0xff] }
 0x404   : > { %4360 = vmatpush.msrb.mxu3 %v2424_v58 }
 0x405   : > { %v9737_v34 = vadd.f32 %v3821_v22, %v3775_v53  ;;  %v3686_v15 = vpop.f32.mrf.mxu0  ;;  %v2136_v22 = vld [vmem:[#allocation7 + $0xc70] sm:$0xff] }
 0x406   : > { %v3733_v57 = vpop.f32.mrf.mxu1  ;;  %v3687_v42 = vadd.f32 %v3686_v15, %v9681_v59  ;;  %v2232_v53 = vld [vmem:[#allocation7 + $0xf70] sm:$0xff]  ;;  %4219 = vmatpush.msrb.mxu0 %v2136_v22 }
 0x407   : > { %4140 = vmatmul.f32.gmra.mxu2 %v11079_v7  ;;  %4266 = vmatpush.msrb.mxu1 %v2232_v53 }
 0x408   : > { %4187 = vmatmul.f32.gmra.mxu3 %v11080_v24  ;;  %v3734_v35 = vadd.f32 %v3733_v57, %v3687_v42  ;;  %4049 = vmatmul.f32.gmra.mxu0 %v11081_v50  ;;  %v2322_v42 = vld [vmem:[#allocation7 + $0x1240] sm:$0xff] }
 0x409   : > { %4096 = vmatmul.f32.gmra.mxu1 %v11116_v16  ;;  %4314 = vmatpush.msrb.mxu2 %v2322_v42 }
 0x40a   : > { %v3777_v44 = vpop.f32.mrf.mxu2  ;;  %4220 = vmatpush.msrb.mxu0 %v2130_v33  ;;  %4267 = vmatpush.msrb.mxu1 %v2226_v32  ;;  %v11119_v32 = vld [vmem:[#allocation34_spill] sm:$0xff] }
 0x40b   : > { %v3824_v19 = vpop.f32.mrf.mxu3  ;;  %v3778_v59 = vadd.f32 %v3777_v44, %v3731_v40  ;;  %v2418_v44 = vld [vmem:[#allocation7 + $0x1540] sm:$0xff] }
 0x40c   : > { %4361 = vmatpush.msrb.mxu3 %v2418_v44  ;;  %v2790_v44 = vld [vmem:[#allocation7 + $0x20e0] sm:$0xff] }
 0x40d   : > { %v9744_v15 = vadd.f32 %v3824_v19, %v3778_v59  ;;  %v3847_v57 = vpop.f32.mrf.mxu0  ;;  %v2124_v19 = vld [vmem:[#allocation7 + $0xc10] sm:$0xff] }
 0x40e   : > { %v3894_v43 = vpop.f32.mrf.mxu1  ;;  %v3848_v29 = vadd.f32 %v3847_v57, %v9688_v21  ;;  %v2220_v59 = vld [vmem:[#allocation7 + $0xf10] sm:$0xff]  ;;  %4221 = vmatpush.msrb.mxu0 %v2124_v19  ;;  %v2598_v19 = vld [vmem:[#allocation7 + $0x1ae0] sm:$0xff] }
 0x40f   : > { %4143 = vmatmul.f32.gmra.mxu2 %v11083_v10  ;;  %4268 = vmatpush.msrb.mxu1 %v2220_v59  ;;  %v2886_v59 = vld [vmem:[#allocation7 + $0x23e0] sm:$0xff] }
 0x410   : > { %4190 = vmatmul.f32.gmra.mxu3 %v11084_v2  ;;  %v3895_v40 = vadd.f32 %v3894_v43, %v3848_v29  ;;  %4052 = vmatmul.f32.gmra.mxu0 %v11117_v1  ;;  %v2316_v29 = vld [vmem:[#allocation7 + $0x1210] sm:$0xff] }
 0x411   : > { %4099 = vmatmul.f32.gmra.mxu1 %v11118_v14  ;;  %v2412_v43 = vld [vmem:[#allocation7 + $0x1510] sm:$0xff]  ;;  %4315 = vmatpush.msrb.mxu2 %v2316_v29 }
 0x412   : > { %v3780_v22 = vpop.f32.mrf.mxu2  ;;  %4362 = vmatpush.msrb.mxu3 %v2412_v43  ;;  %4394 = vmatpush.msra.mxu0 %v2598_v19  ;;  %v2694_v43 = vld [vmem:[#allocation7 + $0x1de0] sm:$0xff]  ;;  %v2688_v19 = vld [vmem:[#allocation7 + $0x1db0] sm:$0xff] }
 0x413   : > { %v3827_v21 = vpop.f32.mrf.mxu3  ;;  %v3781_v53 = vadd.f32 %v3780_v22, %v3734_v35  ;;  %v11120_v35 = vld [vmem:[#allocation35_spill] sm:$0xff]  ;;  %4488 = vmatpush.msra.mxu2 %v2790_v44  ;;  %4441 = vmatpush.msra.mxu1 %v2694_v43  ;;  %v2880_v44 = vld [vmem:[#allocation7 + $0x23b0] sm:$0xff] }
 0x414   : > { %4535 = vmatpush.msra.mxu3 %v2886_v59  ;;  %v2778_v59 = vld [vmem:[#allocation7 + $0x2080] sm:$0xff] }
 0x415   : > { %v9751_v57 = vadd.f32 %v3827_v21, %v3781_v53  ;;  %v3850_v58 = vpop.f32.mrf.mxu0  ;;  %4489 = vmatpush.msra.mxu2 %v2784_v4  ;;  %4442 = vmatpush.msra.mxu1 %v2688_v19  ;;  %v2874_v43 = vld [vmem:[#allocation7 + $0x2380] sm:$0xff]  ;;  %v2868_v19 = vld [vmem:[#allocation7 + $0x2350] sm:$0xff] }
 0x416   : > { %v3897_v42 = vpop.f32.mrf.mxu1  ;;  %v3851_v37 = vadd.f32 %v3850_v58, %v9695_v11  ;;  %4536 = vmatpush.msra.mxu3 %v2880_v44  ;;  %v2580_v44 = vld [vmem:[#allocation7 + $0x1a50] sm:$0xff] }
 0x417   : > { %4146 = vmatmul.f32.gmra.mxu2 %v11087_v51 }
 0x418   : > { %4193 = vmatmul.f32.gmra.mxu3 %v11088_v47  ;;  %v3898_v33 = vadd.f32 %v3897_v42, %v3851_v37  ;;  %4055 = vmatmul.f32.gmra.mxu0 %v11119_v32 }
 0x419   : > { %4102 = vmatmul.f32.gmra.mxu1 %v11120_v35  ;;  %4490 = vmatpush.msra.mxu2 %v2778_v59 }
 0x41a   : > { %v3941_v22 = vpop.f32.mrf.mxu2  ;;  %4537 = vmatpush.msra.mxu3 %v2874_v43 }
 0x41b   : > { %v3988_v21 = vpop.f32.mrf.mxu3  ;;  %v3942_v11 = vadd.f32 %v3941_v22, %v3895_v40  ;;  %v2592_v40 = vld [vmem:[#allocation7 + $0x1ab0] sm:$0xff] }
 0x41c   : > { %4395 = vmatpush.msra.mxu0 %v2592_v40  ;;  %4538 = vmatpush.msra.mxu3 %v2868_v19 }
 0x41d   : > { %v9758_v53 = vadd.f32 %v3988_v21, %v3942_v11  ;;  %v3853_v58 = vpop.f32.mrf.mxu0 }
 0x41e   : > { %v3900_v29 = vpop.f32.mrf.mxu1  ;;  %v3854_v37 = vadd.f32 %v3853_v58, %v9702_v48 }
 0x41f   : > { %11121 = vst [vmem:[#allocation80_spill] sm:$0xff] %v9758_v53  ;;  %4149 = vmatmul.f32.gmra.mxu2 %v11092_v27  ;;  %v2682_v53 = vld [vmem:[#allocation7 + $0x1d80] sm:$0xff] }
 0x420   : > { %4196 = vmatmul.f32.gmra.mxu3 %v11093_v61  ;;  %v3901_v42 = vadd.f32 %v3900_v29, %v3854_v37  ;;  %4058 = vmatmul.f32.gmra.mxu0 %v11094_v52  ;;  %v2586_v29 = vld [vmem:[#allocation7 + $0x1a80] sm:$0xff] }
 0x421   : > { %4105 = vmatmul.f32.gmra.mxu1 %v11095_v45  ;;  %4396 = vmatpush.msra.mxu0 %v2586_v29  ;;  %v2676_v29 = vld [vmem:[#allocation7 + $0x1d50] sm:$0xff] }
 0x422   : > { %v3944_v22 = vpop.f32.mrf.mxu2  ;;  %4443 = vmatpush.msra.mxu1 %v2682_v53 }
 0x423   : > { %v3991_v21 = vpop.f32.mrf.mxu3  ;;  %v3945_v4 = vadd.f32 %v3944_v22, %v3898_v33  ;;  %v2772_v33 = vld [vmem:[#allocation7 + $0x2050] sm:$0xff]  ;;  %4397 = vmatpush.msra.mxu0 %v2580_v44 }
 0x424   : > { %4491 = vmatpush.msra.mxu2 %v2772_v33  ;;  %4444 = vmatpush.msra.mxu1 %v2676_v29  ;;  %v2760_v33 = vld [vmem:[#allocation7 + $0x1ff0] sm:$0xff] }
 0x425   : > { %v9765_v48 = vadd.f32 %v3991_v21, %v3945_v4  ;;  %v3856_v11 = vpop.f32.mrf.mxu0  ;;  %v2856_v29 = vld [vmem:[#allocation7 + $0x22f0] sm:$0xff] }
 0x426   : > { %v3903_v58 = vpop.f32.mrf.mxu1  ;;  %v3857_v37 = vadd.f32 %v3856_v11, %v9709_v49 }
 0x427   : > { %11122 = vst [vmem:[#allocation85_spill] sm:$0xff] %v9765_v48  ;;  %4152 = vmatmul.f32.gmra.mxu2 %v11097_v63  ;;  %v2862_v48 = vld [vmem:[#allocation7 + $0x2320] sm:$0xff] }
 0x428   : > { %4199 = vmatmul.f32.gmra.mxu3 %v11098_v38  ;;  %v3904_v40 = vadd.f32 %v3903_v58, %v3857_v37  ;;  %4061 = vmatmul.f32.gmra.mxu0 %v11099_v8  ;;  %v2766_v58 = vld [vmem:[#allocation7 + $0x2020] sm:$0xff] }
 0x429   : > { %4108 = vmatmul.f32.gmra.mxu1 %v11100_v54  ;;  %4492 = vmatpush.msra.mxu2 %v2766_v58  ;;  %v2574_v37 = vld [vmem:[#allocation7 + $0x1a20] sm:$0xff]  ;;  %v2664_v58 = vld [vmem:[#allocation7 + $0x1cf0] sm:$0xff] }
 0x42a   : > { %v3947_v59 = vpop.f32.mrf.mxu2  ;;  %4398 = vmatpush.msra.mxu0 %v2574_v37  ;;  %4539 = vmatpush.msra.mxu3 %v2862_v48  ;;  %v2850_v37 = vld [vmem:[#allocation7 + $0x22c0] sm:$0xff] }
 0x42b   : > { %v3994_v22 = vpop.f32.mrf.mxu3  ;;  %v3948_v49 = vadd.f32 %v3947_v59, %v3901_v42  ;;  %v2670_v42 = vld [vmem:[#allocation7 + $0x1d20] sm:$0xff]  ;;  %4493 = vmatpush.msra.mxu2 %v2760_v33 }
 0x42c   : > { %4445 = vmatpush.msra.mxu1 %v2670_v42  ;;  %4540 = vmatpush.msra.mxu3 %v2856_v29  ;;  %v2658_v42 = vld [vmem:[#allocation7 + $0x1cc0] sm:$0xff] }
 0x42d   : > { %v9772_v21 = vadd.f32 %v3994_v22, %v3948_v49  ;;  %v3859_v4 = vpop.f32.mrf.mxu0 }
 0x42e   : > { %v3906_v11 = vpop.f32.mrf.mxu1  ;;  %v3860_v43 = vadd.f32 %v3859_v4, %v9716_v26  ;;  %v2568_v4 = vld [vmem:[#allocation7 + $0x19f0] sm:$0xff]  ;;  %4446 = vmatpush.msra.mxu1 %v2664_v58  ;;  %4541 = vmatpush.msra.mxu3 %v2850_v37  ;;  %v2742_v58 = vld [vmem:[#allocation7 + $0x1f60] sm:$0xff] }
 0x42f   : > { %11123 = vst [vmem:[#allocation86_spill] sm:$0xff] %v9772_v21  ;;  %4155 = vmatmul.f32.gmra.mxu2 %v9225_v28  ;;  %4399 = vmatpush.msra.mxu0 %v2568_v4  ;;  %v2556_v4 = vld [vmem:[#allocation7 + $0x1990] sm:$0xff]  ;;  %v2077_v21 = vld [vmem:[#allocation7 + $0xa98] sm:$0xff] }
 0x430   : > { %4202 = vmatmul.f32.gmra.mxu3 %v9227_v56  ;;  %v3907_v53 = vadd.f32 %v3906_v11, %v3860_v43  ;;  %4222 = vmatmul.f32.vlgmr.msrb.gmra.mxu0 %v11065_v9  ;;  %v2754_v43 = vld [vmem:[#allocation7 + $0x1fc0] sm:$0xff] }
 0x431   : > { %4269 = vmatmul.f32.vlgmr.msrb.gmra.mxu1 %v11066_v17  ;;  %4494 = vmatpush.msra.mxu2 %v2754_v43 }
 0x432   : > { %v3950_v44 = vpop.f32.mrf.mxu2  ;;  %4447 = vmatpush.msra.mxu1 %v2658_v42 }
 0x433   : > { %v3997_v19 = vpop.f32.mrf.mxu3  ;;  %v3951_v26 = vadd.f32 %v3950_v44, %v3904_v40  ;;  %v2562_v40 = vld [vmem:[#allocation7 + $0x19c0] sm:$0xff] }
 0x434   : > { %4400 = vmatpush.msra.mxu0 %v2562_v40  ;;  %v2838_v40 = vld [vmem:[#allocation7 + $0x2260] sm:$0xff] }
 0x435   : > { %v9779_v59 = vadd.f32 %v3997_v19, %v3951_v26  ;;  %v3862_v22 = vpop.f32.mrf.mxu0 }
 0x436   : > { %v3909_v49 = vpop.f32.mrf.mxu1  ;;  %v3863_v11 = vadd.f32 %v3862_v22, %v9723_v12  ;;  %4401 = vmatpush.msra.mxu0 %v2556_v4  ;;  %v2544_v4 = vld [vmem:[#allocation7 + $0x1930] sm:$0xff] }
 0x437   : > { %11124 = vst [vmem:[#allocation81_spill] sm:$0xff] %v9779_v59  ;;  %4316 = vmatmul.f32.vlgmr.msrb.gmra.mxu2 %v11067_v18  ;;  %v2652_v59 = vld [vmem:[#allocation7 + $0x1c90] sm:$0xff] }
 0x438   : > { %4363 = vmatmul.f32.vlgmr.msrb.gmra.mxu3 %v11068_v5  ;;  %v3910_v48 = vadd.f32 %v3909_v49, %v3863_v11  ;;  %4225 = vmatmul.f32.gmra.mxu0 %v11069_v25  ;;  %v2748_v49 = vld [vmem:[#allocation7 + $0x1f90] sm:$0xff] }
 0x439   : > { %4272 = vmatmul.f32.gmra.mxu1 %v11070_v20  ;;  %4495 = vmatpush.msra.mxu2 %v2748_v49  ;;  %v2844_v11 = vld [vmem:[#allocation7 + $0x2290] sm:$0xff] }
 0x43a   : > { %v3953_v33 = vpop.f32.mrf.mxu2  ;;  %4542 = vmatpush.msra.mxu3 %v2844_v11  ;;  %4448 = vmatpush.msra.mxu1 %v2652_v59  ;;  %v2640_v59 = vld [vmem:[#allocation7 + $0x1c30] sm:$0xff] }
 0x43b   : > { %v4000_v12 = vpop.f32.mrf.mxu3  ;;  %v3954_v44 = vadd.f32 %v3953_v33, %v3907_v53  ;;  %v2550_v53 = vld [vmem:[#allocation7 + $0x1960] sm:$0xff]  ;;  %4496 = vmatpush.msra.mxu2 %v2742_v58 }
 0x43c   : > { %4402 = vmatpush.msra.mxu0 %v2550_v53  ;;  %4543 = vmatpush.msra.mxu3 %v2838_v40 }
 0x43d   : > { %v9786_v19 = vadd.f32 %v4000_v12, %v3954_v44  ;;  %v3865_v26 = vpop.f32.mrf.mxu0 }
 0x43e   : > { %v3912_v22 = vpop.f32.mrf.mxu1  ;;  %v3866_v29 = vadd.f32 %v3865_v26, %v9730_v0  ;;  %v2646_v26 = vld [vmem:[#allocation7 + $0x1c60] sm:$0xff]  ;;  %4403 = vmatpush.msra.mxu0 %v2544_v4  ;;  %v2820_v4 = vld [vmem:[#allocation7 + $0x21d0] sm:$0xff] }
 0x43f   : > { %11125 = vst [vmem:[#allocation82_spill] sm:$0xff] %v9786_v19  ;;  %4319 = vmatmul.f32.gmra.mxu2 %v9011_v55  ;;  %4449 = vmatpush.msra.mxu1 %v2646_v26  ;;  %v2634_v26 = vld [vmem:[#allocation7 + $0x1c00] sm:$0xff]  ;;  %v1987_v19 = vld [vmem:[#allocation7 + $0x7c8] sm:$0xff] }
 0x440   : > { %4366 = vmatmul.f32.gmra.mxu3 %v11071_v41  ;;  %v3913_v43 = vadd.f32 %v3912_v22, %v3866_v29  ;;  %4228 = vmatmul.f32.gmra.mxu0 %v11072_v46  ;;  %v2736_v22 = vld [vmem:[#allocation7 + $0x1f30] sm:$0xff] }
 0x441   : > { %4275 = vmatmul.f32.gmra.mxu1 %v9049_v39  ;;  %4497 = vmatpush.msra.mxu2 %v2736_v22  ;;  %v2832_v29 = vld [vmem:[#allocation7 + $0x2230] sm:$0xff] }
 0x442   : > { %v3956_v37 = vpop.f32.mrf.mxu2  ;;  %4544 = vmatpush.msra.mxu3 %v2832_v29  ;;  %4450 = vmatpush.msra.mxu1 %v2640_v59  ;;  %v2724_v22 = vld [vmem:[#allocation7 + $0x1ed0] sm:$0xff] }
 0x443   : > { %v4003_v0 = vpop.f32.mrf.mxu3  ;;  %v3957_v42 = vadd.f32 %v3956_v37, %v3910_v48  ;;  %v2730_v48 = vld [vmem:[#allocation7 + $0x1f00] sm:$0xff] }
 0x444   : > { %4498 = vmatpush.msra.mxu2 %v2730_v48  ;;  %4451 = vmatpush.msra.mxu1 %v2634_v26  ;;  %v2712_v26 = vld [vmem:[#allocation7 + $0x1e70] sm:$0xff] }
 0x445   : > { %v9793_v33 = vadd.f32 %v4003_v0, %v3957_v42  ;;  %v3868_v12 = vpop.f32.mrf.mxu0  ;;  %v2538_v42 = vld [vmem:[#allocation7 + $0x1900] sm:$0xff] }
 0x446   : > { %v3915_v44 = vpop.f32.mrf.mxu1  ;;  %v3869_v49 = vadd.f32 %v3868_v12, %v9737_v34  ;;  %v2826_v12 = vld [vmem:[#allocation7 + $0x2200] sm:$0xff]  ;;  %4404 = vmatpush.msra.mxu0 %v2538_v42  ;;  %4499 = vmatpush.msra.mxu2 %v2724_v22 }
 0x447   : > { %11126 = vst [vmem:[#allocation87_spill] sm:$0xff] %v9793_v33  ;;  %4322 = vmatmul.f32.gmra.mxu2 %v11073_v13  ;;  %4545 = vmatpush.msra.mxu3 %v2826_v12  ;;  %v2814_v12 = vld [vmem:[#allocation7 + $0x21a0] sm:$0xff]  ;;  %v2095_v33 = vld [vmem:[#allocation7 + $0xb28] sm:$0xff] }
 0x448   : > { %4369 = vmatmul.f32.gmra.mxu3 %v11074_v30  ;;  %v3916_v11 = vadd.f32 %v3915_v44, %v3869_v49  ;;  %4231 = vmatmul.f32.gmra.mxu0 %v11075_v62  ;;  %v2532_v49 = vld [vmem:[#allocation7 + $0x18d0] sm:$0xff] }
 0x449   : > { %4278 = vmatmul.f32.gmra.mxu1 %v11076_v23  ;;  %4405 = vmatpush.msra.mxu0 %v2532_v49 }
 0x44a   : > { %v3959_v58 = vpop.f32.mrf.mxu2  ;;  %4546 = vmatpush.msra.mxu3 %v2820_v4  ;;  %v2520_v4 = vld [vmem:[#allocation7 + $0x1870] sm:$0xff] }
 0x44b   : > { %v4006_v53 = vpop.f32.mrf.mxu3  ;;  %v3960_v34 = vadd.f32 %v3959_v58, %v3913_v43 }
 0x44c   : > { %4547 = vmatpush.msra.mxu3 %v2814_v12  ;;  %v2604_v12 = vld [vmem:[#allocation7 + $0x1b10] sm:$0xff] }
 0x44d   : > { %v9800_v40 = vadd.f32 %v4006_v53, %v3960_v34  ;;  %v3871_v37 = vpop.f32.mrf.mxu0  ;;  %v2628_v34 = vld [vmem:[#allocation7 + $0x1bd0] sm:$0xff] }
 0x44e   : > { %v3918_v0 = vpop.f32.mrf.mxu1  ;;  %v3872_v44 = vadd.f32 %v3871_v37, %v9744_v15  ;;  %v2718_v37 = vld [vmem:[#allocation7 + $0x1ea0] sm:$0xff]  ;;  %4452 = vmatpush.msra.mxu1 %v2628_v34 }
 0x44f   : > { %11127 = vst [vmem:[#allocation88_spill] sm:$0xff] %v9800_v40  ;;  %4325 = vmatmul.f32.gmra.mxu2 %v11079_v7  ;;  %v2706_v34 = vld [vmem:[#allocation7 + $0x1e40] sm:$0xff]  ;;  %v2005_v40 = vld [vmem:[#allocation7 + $0x858] sm:$0xff] }
 0x450   : > { %4372 = vmatmul.f32.gmra.mxu3 %v11080_v24  ;;  %v3919_v29 = vadd.f32 %v3918_v0, %v3872_v44  ;;  %4234 = vmatmul.f32.gmra.mxu0 %v11081_v50  ;;  %v2526_v0 = vld [vmem:[#allocation7 + $0x18a0] sm:$0xff] }
 0x451   : > { %4281 = vmatmul.f32.gmra.mxu1 %v11116_v16  ;;  %4500 = vmatpush.msra.mxu2 %v2718_v37  ;;  %v2622_v44 = vld [vmem:[#allocation7 + $0x1ba0] sm:$0xff] }
 0x452   : > { %v3962_v43 = vpop.f32.mrf.mxu2  ;;  %4406 = vmatpush.msra.mxu0 %v2526_v0  ;;  %4453 = vmatpush.msra.mxu1 %v2622_v44  ;;  %v2514_v37 = vld [vmem:[#allocation7 + $0x1840] sm:$0xff] }
 0x453   : > { %v4009_v59 = vpop.f32.mrf.mxu3  ;;  %v3963_v15 = vadd.f32 %v3962_v43, %v3916_v11  ;;  %4501 = vmatpush.msra.mxu2 %v2712_v26  ;;  %v2616_v43 = vld [vmem:[#allocation7 + $0x1b70] sm:$0xff]  ;;  %v2802_v0 = vld [vmem:[#allocation7 + $0x2140] sm:$0xff] }
 0x454   : > { %4407 = vmatpush.msra.mxu0 %v2520_v4  ;;  %4454 = vmatpush.msra.mxu1 %v2616_v43  ;;  %v2700_v43 = vld [vmem:[#allocation7 + $0x1e10] sm:$0xff] }
 0x455   : > { %v9807_v48 = vadd.f32 %v4009_v59, %v3963_v15  ;;  %v3874_v58 = vpop.f32.mrf.mxu0  ;;  %4502 = vmatpush.msra.mxu2 %v2706_v34  ;;  %v2023_v34 = vld [vmem:[#allocation7 + $0x8e8] sm:$0xff] }
 0x456   : > { %v3921_v53 = vpop.f32.mrf.mxu1  ;;  %v3875_v42 = vadd.f32 %v3874_v58, %v9751_v57  ;;  %4408 = vmatpush.msra.mxu0 %v2514_v37  ;;  %v2119_v37 = vld [vmem:[#allocation7 + $0xbe8] sm:$0xff] }
 0x457   : > { %11128 = vst [vmem:[#allocation83_spill] sm:$0xff] %v9807_v48  ;;  %4328 = vmatmul.f32.gmra.mxu2 %v11083_v10  ;;  %v1915_v48 = vld [vmem:[#allocation7 + $0x588] sm:$0xff] }
 0x458   : > { %4375 = vmatmul.f32.gmra.mxu3 %v11084_v2  ;;  %v3922_v22 = vadd.f32 %v3921_v53, %v3875_v42  ;;  %4237 = vmatmul.f32.gmra.mxu0 %v11117_v1  ;;  %v2808_v53 = vld [vmem:[#allocation7 + $0x2170] sm:$0xff]  ;;  %v2610_v42 = vld [vmem:[#allocation7 + $0x1b40] sm:$0xff] }
 0x459   : > { %4284 = vmatmul.f32.gmra.mxu1 %v11118_v14  ;;  %4548 = vmatpush.msra.mxu3 %v2808_v53  ;;  %v2796_v53 = vld [vmem:[#allocation7 + $0x2110] sm:$0xff] }
 0x45a   : > { %v3965_v11 = vpop.f32.mrf.mxu2  ;;  %4455 = vmatpush.msra.mxu1 %v2610_v42  ;;  %4503 = vmatpush.msra.mxu2 %v2700_v43  ;;  %v1927_v43 = vld [vmem:[#allocation7 + $0x5e8] sm:$0xff] }
 0x45b   : > { %v4012_v49 = vpop.f32.mrf.mxu3  ;;  %v3966_v57 = vadd.f32 %v3965_v11, %v3919_v29  ;;  %v2508_v29 = vld [vmem:[#allocation7 + $0x1810] sm:$0xff]  ;;  %4549 = vmatpush.msra.mxu3 %v2802_v0 }
 0x45c   : > { %4409 = vmatpush.msra.mxu0 %v2508_v29  ;;  %4456 = vmatpush.msra.mxu1 %v2604_v12 }
 0x45d   : > { %v9814_v59 = vadd.f32 %v4012_v49, %v3966_v57  ;;  %v4035_v15 = vpop.f32.mrf.mxu0  ;;  %4550 = vmatpush.msra.mxu3 %v2796_v53  ;;  %4676 = vmatpush.msrb.mxu2 %v2023_v34  ;;  %v2017_v53 = vld [vmem:[#allocation7 + $0x8b8] sm:$0xff] }
 0x45e   : > { %v4082_v58 = vpop.f32.mrf.mxu1  ;;  %4629 = vmatpush.msrb.mxu1 %v1927_v43  ;;  %v1819_v43 = vld [vmem:[#allocation7 + $0x288] sm:$0xff] }
 0x45f   : > { %11129 = vst [vmem:[#allocation84_spill] sm:$0xff] %v9814_v59  ;;  %4331 = vmatmul.f32.gmra.mxu2 %v11087_v51  ;;  %v4083_v42 = vadd.f32 %v4082_v58, %v4035_v15  ;;  %4723 = vmatpush.msrb.mxu3 %v2119_v37  ;;  %v2113_v59 = vld [vmem:[#allocation7 + $0xbb8] sm:$0xff]  ;;  %v2011_v58 = vld [vmem:[#allocation7 + $0x888] sm:$0xff] }
 0x460   : > { %4378 = vmatmul.f32.gmra.mxu3 %v11088_v47  ;;  %4240 = vmatmul.f32.gmra.mxu0 %v11119_v32  ;;  %v1921_v15 = vld [vmem:[#allocation7 + $0x5b8] sm:$0xff] }
 0x461   : > { %4287 = vmatmul.f32.gmra.mxu1 %v11120_v35  ;;  %4677 = vmatpush.msrb.mxu2 %v2017_v53  ;;  %v2107_v53 = vld [vmem:[#allocation7 + $0xb88] sm:$0xff] }
 0x462   : > { %v3968_v44 = vpop.f32.mrf.mxu2  ;;  %4724 = vmatpush.msrb.mxu3 %v2113_v59  ;;  %4630 = vmatpush.msrb.mxu1 %v1921_v15  ;;  %v1813_v59 = vld [vmem:[#allocation7 + $0x258] sm:$0xff] }
 0x463   : > { %v4015_v26 = vpop.f32.mrf.mxu3  ;;  %v3969_v11 = vadd.f32 %v3968_v44, %v3922_v22  ;;  %v1831_v22 = vld [vmem:[#allocation7 + $0x2e8] sm:$0xff]  ;;  %4678 = vmatpush.msrb.mxu2 %v2011_v58 }
 0x464   : > { %4582 = vmatpush.msrb.mxu0 %v1831_v22  ;;  %4725 = vmatpush.msrb.mxu3 %v2107_v53  ;;  %v1807_v53 = vld [vmem:[#allocation7 + $0x228] sm:$0xff] }
 0x465   : > { %v9820_v49 = vadd.f32 %v4015_v26, %v3969_v11  ;;  %v4038_v57 = vpop.f32.mrf.mxu0  ;;  %4631 = vmatpush.msrb.mxu1 %v1915_v48  ;;  %4679 = vmatpush.msrb.mxu2 %v2005_v40  ;;  %v1903_v40 = vld [vmem:[#allocation7 + $0x528] sm:$0xff]  ;;  %v1993_v48 = vld [vmem:[#allocation7 + $0x7f8] sm:$0xff] }
 0x466   : > { %v4085_v4 = vpop.f32.mrf.mxu1 }
 0x467   : > { %11130 = vst [vmem:[#allocation52_spill] sm:$0xff] %v9820_v49  ;;  %4334 = vmatmul.f32.gmra.mxu2 %v11092_v27  ;;  %v1825_v49 = vld [vmem:[#allocation7 + $0x2b8] sm:$0xff]  ;;  %v4086_v34 = vadd.f32 %v4085_v4, %v4038_v57 }
 0x468   : > { %4381 = vmatmul.f32.gmra.mxu3 %v11093_v61  ;;  %4243 = vmatmul.f32.gmra.mxu0 %v11094_v52 }
 0x469   : > { %4290 = vmatmul.f32.gmra.mxu1 %v11095_v45  ;;  %4583 = vmatpush.msrb.mxu0 %v1825_v49  ;;  %v2101_v49 = vld [vmem:[#allocation7 + $0xb58] sm:$0xff] }
 0x46a   : > { %v4129_v0 = vpop.f32.mrf.mxu2  ;;  %4726 = vmatpush.msrb.mxu3 %v2101_v49 }
 0x46b   : > { %v4176_v29 = vpop.f32.mrf.mxu3  ;;  %v4130_v12 = vadd.f32 %v4129_v0, %v4083_v42  ;;  %4584 = vmatpush.msrb.mxu0 %v1819_v43  ;;  %v1999_v43 = vld [vmem:[#allocation7 + $0x828] sm:$0xff] }
 0x46c   : > { %4680 = vmatpush.msrb.mxu2 %v1999_v43  ;;  %4727 = vmatpush.msrb.mxu3 %v2095_v33  ;;  %v1897_v43 = vld [vmem:[#allocation7 + $0x4f8] sm:$0xff]  ;;  %v1795_v33 = vld [vmem:[#allocation7 + $0x1c8] sm:$0xff] }
 0x46d   : > { %v9826_v44 = vadd.f32 %v4176_v29, %v4130_v12  ;;  %v4041_v26 = vpop.f32.mrf.mxu0  ;;  %4585 = vmatpush.msrb.mxu0 %v1813_v59 }
 0x46e   : > { %v4088_v11 = vpop.f32.mrf.mxu1  ;;  %4681 = vmatpush.msrb.mxu2 %v1993_v48 }
 0x46f   : > { %4337 = vmatmul.f32.gmra.mxu2 %v11097_v63  ;;  %v4089_v57 = vadd.f32 %v4088_v11, %v4041_v26  ;;  %4586 = vmatpush.msrb.mxu0 %v1807_v53 }
 0x470   : > { %4384 = vmatmul.f32.gmra.mxu3 %v11098_v38  ;;  %4246 = vmatmul.f32.gmra.mxu0 %v11099_v8 }
 0x471   : > { %4293 = vmatmul.f32.gmra.mxu1 %v11100_v54  ;;  %4682 = vmatpush.msrb.mxu2 %v1987_v19  ;;  %v1885_v19 = vld [vmem:[#allocation7 + $0x498] sm:$0xff] }
 0x472   : > { %v4132_v22 = vpop.f32.mrf.mxu2 }
 0x473   : > { %v4179_v37 = vpop.f32.mrf.mxu3  ;;  %v4133_v42 = vadd.f32 %v4132_v22, %v4086_v34 }
 0x475   : > { %v9832_v0 = vadd.f32 %v4179_v37, %v4133_v42  ;;  %v4044_v29 = vpop.f32.mrf.mxu0  ;;  %v1909_v42 = vld [vmem:[#allocation7 + $0x558] sm:$0xff] }
 0x476   : > { %v4091_v12 = vpop.f32.mrf.mxu1  ;;  %4632 = vmatpush.msrb.mxu1 %v1909_v42  ;;  %v2089_v42 = vld [vmem:[#allocation7 + $0xaf8] sm:$0xff] }
 0x477   : > { %4340 = vmatmul.f32.gmra.mxu2 %v9225_v28  ;;  %v4092_v26 = vadd.f32 %v4091_v12, %v4044_v29  ;;  %4728 = vmatpush.msrb.mxu3 %v2089_v42  ;;  %v2083_v29 = vld [vmem:[#allocation7 + $0xac8] sm:$0xff]  ;;  %v1789_v42 = vld [vmem:[#allocation7 + $0x198] sm:$0xff] }
 0x478   : > { %4387 = vmatmul.f32.gmra.mxu3 %v9227_v56  ;;  %4249 = vmatmul.f32.gmra.mxu0 %v9339_v31  ;;  %v1891_v12 = vld [vmem:[#allocation7 + $0x4c8] sm:$0xff] }
 0x479   : > { %4296 = vmatmul.f32.gmra.mxu1 %v9341_v6  ;;  %4729 = vmatpush.msrb.mxu3 %v2083_v29 }
 0x47a   : > { %v4135_v4 = vpop.f32.mrf.mxu2  ;;  %4633 = vmatpush.msrb.mxu1 %v1903_v40 }
 0x47b   : > { %v4182_v15 = vpop.f32.mrf.mxu3  ;;  %v4136_v58 = vadd.f32 %v4135_v4, %v4089_v57  ;;  %4730 = vmatpush.msrb.mxu3 %v2077_v21  ;;  %v1777_v21 = vld [vmem:[#allocation7 + $0x138] sm:$0xff] }
 0x47c   : > { %4634 = vmatpush.msrb.mxu1 %v1897_v43 }
 0x47d   : > { %v9838_v34 = vadd.f32 %v4182_v15, %v4136_v58  ;;  %v4047_v22 = vpop.f32.mrf.mxu0  ;;  %v1801_v58 = vld [vmem:[#allocation7 + $0x1f8] sm:$0xff] }
 0x47e   : > { %v4094_v37 = vpop.f32.mrf.mxu1  ;;  %4587 = vmatpush.msrb.mxu0 %v1801_v58  ;;  %4635 = vmatpush.msrb.mxu1 %v1891_v12  ;;  %v1981_v58 = vld [vmem:[#allocation7 + $0x798] sm:$0xff] }
 0x47f   : > { %4343 = vmatmul.f32.gmra.mxu2 %v9357_v36  ;;  %v4095_v53 = vadd.f32 %v4094_v37, %v4047_v22  ;;  %v1975_v22 = vld [vmem:[#allocation7 + $0x768] sm:$0xff] }
 0x480   : > { %4390 = vmatmul.f32.gmra.mxu3 %v9359_v3  ;;  %4410 = vmatmul.f32.vlgmr.msra.gmra.mxu0 %v11069_v25  ;;  %v1783_v37 = vld [vmem:[#allocation7 + $0x168] sm:$0xff] }
 0x481   : > { %4457 = vmatmul.f32.vlgmr.msra.gmra.mxu1 %v11070_v20  ;;  %4588 = vmatpush.msrb.mxu0 %v1795_v33  ;;  %v2071_v33 = vld [vmem:[#allocation7 + $0xa68] sm:$0xff] }
 0x482   : > { %v4138_v11 = vpop.f32.mrf.mxu2  ;;  %4683 = vmatpush.msrb.mxu2 %v1981_v58  ;;  %4636 = vmatpush.msrb.mxu1 %v1885_v19  ;;  %v1879_v58 = vld [vmem:[#allocation7 + $0x468] sm:$0xff] }
 0x483   : > { %v4185_v59 = vpop.f32.mrf.mxu3  ;;  %v4139_v49 = vadd.f32 %v4138_v11, %v4092_v26  ;;  %4589 = vmatpush.msrb.mxu0 %v1789_v42  ;;  %4731 = vmatpush.msrb.mxu3 %v2071_v33  ;;  %v1969_v42 = vld [vmem:[#allocation7 + $0x738] sm:$0xff] }
 0x484   : > { %4684 = vmatpush.msrb.mxu2 %v1975_v22  ;;  %4637 = vmatpush.msrb.mxu1 %v1879_v58  ;;  %v1963_v22 = vld [vmem:[#allocation7 + $0x708] sm:$0xff] }
 0x485   : > { %v9844_v57 = vadd.f32 %v4185_v59, %v4139_v49  ;;  %v4050_v4 = vpop.f32.mrf.mxu0  ;;  %4590 = vmatpush.msrb.mxu0 %v1783_v37  ;;  %v1771_v58 = vld [vmem:[#allocation7 + $0x108] sm:$0xff] }
 0x486   : > { %v4097_v15 = vpop.f32.mrf.mxu1  ;;  %4685 = vmatpush.msrb.mxu2 %v1969_v42  ;;  %v2059_v42 = vld [vmem:[#allocation7 + $0xa08] sm:$0xff] }
 0x487   : > { %4504 = vmatmul.f32.vlgmr.msra.gmra.mxu2 %v9011_v55  ;;  %v4098_v43 = vadd.f32 %v4097_v15, %v4050_v4  ;;  %v2065_v4 = vld [vmem:[#allocation7 + $0xa38] sm:$0xff]  ;;  %4591 = vmatpush.msrb.mxu0 %v1777_v21 }
 0x488   : > { %4551 = vmatmul.f32.vlgmr.msra.gmra.mxu3 %v11071_v41  ;;  %4413 = vmatmul.f32.gmra.mxu0 %v11072_v46  ;;  %v1873_v15 = vld [vmem:[#allocation7 + $0x438] sm:$0xff] }
 0x489   : > { %4460 = vmatmul.f32.gmra.mxu1 %v9049_v39  ;;  %4732 = vmatpush.msrb.mxu3 %v2065_v4  ;;  %v2053_v21 = vld [vmem:[#allocation7 + $0x9d8] sm:$0xff] }
 0x48a   : > { %v4141_v40 = vpop.f32.mrf.mxu2  ;;  %4638 = vmatpush.msrb.mxu1 %v1873_v15  ;;  %4686 = vmatpush.msrb.mxu2 %v1963_v22 }
 0x48b   : > { %v4188_v48 = vpop.f32.mrf.mxu3  ;;  %v4142_v26 = vadd.f32 %v4141_v40, %v4095_v53  ;;  %4592 = vmatpush.msrb.mxu0 %v1771_v58  ;;  %4733 = vmatpush.msrb.mxu3 %v2059_v42  ;;  %v1861_v58 = vld [vmem:[#allocation7 + $0x3d8] sm:$0xff]  ;;  %v1951_v42 = vld [vmem:[#allocation7 + $0x6a8] sm:$0xff] }
 0x48d   : > { %v9850_v11 = vadd.f32 %v4188_v48, %v4142_v26  ;;  %v4053_v59 = vpop.f32.mrf.mxu0  ;;  %4734 = vmatpush.msrb.mxu3 %v2053_v21 }
 0x48e   : > { %v4100_v49 = vpop.f32.mrf.mxu1 }
 0x48f   : > { %4507 = vmatmul.f32.gmra.mxu2 %v11073_v13  ;;  %v4101_v19 = vadd.f32 %v4100_v49, %v4053_v59  ;;  %v1957_v59 = vld [vmem:[#allocation7 + $0x6d8] sm:$0xff] }
 0x490   : > { %4554 = vmatmul.f32.gmra.mxu3 %v11074_v30  ;;  %4416 = vmatmul.f32.gmra.mxu0 %v11075_v62  ;;  %v1765_v49 = vld [vmem:[#allocation7 + $0xd8] sm:$0xff] }
 0x491   : > { %4463 = vmatmul.f32.gmra.mxu1 %v11076_v23  ;;  %4687 = vmatpush.msrb.mxu2 %v1957_v59 }
 0x492   : > { %v4144_v29 = vpop.f32.mrf.mxu2  ;;  %4593 = vmatpush.msrb.mxu0 %v1765_v49 }
 0x493   : > { %v4191_v12 = vpop.f32.mrf.mxu3  ;;  %v4145_v53 = vadd.f32 %v4144_v29, %v4098_v43  ;;  %4688 = vmatpush.msrb.mxu2 %v1951_v42  ;;  %v2041_v42 = vld [vmem:[#allocation7 + $0x978] sm:$0xff] }
 0x495   : > { %v9856_v40 = vadd.f32 %v4191_v12, %v4145_v53  ;;  %v4056_v48 = vpop.f32.mrf.mxu0 }
 0x496   : > { %v4103_v26 = vpop.f32.mrf.mxu1 }
 0x497   : > { %4510 = vmatmul.f32.gmra.mxu2 %v11079_v7  ;;  %v4104_v4 = vadd.f32 %v4103_v26, %v4056_v48  ;;  %v1945_v48 = vld [vmem:[#allocation7 + $0x678] sm:$0xff] }
 0x498   : > { %4557 = vmatmul.f32.gmra.mxu3 %v11080_v24  ;;  %4419 = vmatmul.f32.gmra.mxu0 %v11081_v50 }
 0x499   : > { %4466 = vmatmul.f32.gmra.mxu1 %v11116_v16  ;;  %v1867_v16 = vld [vmem:[#allocation7 + $0x408] sm:$0xff]  ;;  %4689 = vmatpush.msrb.mxu2 %v1945_v48  ;;  %v1837_v48 = vld [vmem:[#allocation7 + $0x318] sm:$0xff] }
 0x49a   : > { %v4147_v37 = vpop.f32.mrf.mxu2  ;;  %4639 = vmatpush.msrb.mxu1 %v1867_v16  ;;  %v1855_v16 = vld [vmem:[#allocation7 + $0x3a8] sm:$0xff] }
 0x49b   : > { %v4194_v43 = vpop.f32.mrf.mxu3  ;;  %v4148_v33 = vadd.f32 %v4147_v37, %v4101_v19 }
 0x49c   : > { %4640 = vmatpush.msrb.mxu1 %v1861_v58 }
 0x49d   : > { %v9862_v29 = vadd.f32 %v4194_v43, %v4148_v33  ;;  %v4059_v12 = vpop.f32.mrf.mxu0 }
 0x49e   : > { %v4106_v53 = vpop.f32.mrf.mxu1  ;;  %4641 = vmatpush.msrb.mxu1 %v1855_v16  ;;  %v1741_v16 = vld [vmem:[#allocation7 + $0x18] sm:$0xff] }
 0x49f   : > { %4513 = vmatmul.f32.gmra.mxu2 %v11083_v10  ;;  %v4107_v26 = vadd.f32 %v4106_v53, %v4059_v12  ;;  %v2035_v53 = vld [vmem:[#allocation7 + $0x948] sm:$0xff] }
 0x4a0   : > { %4560 = vmatmul.f32.gmra.mxu3 %v11084_v2  ;;  %4422 = vmatmul.f32.gmra.mxu0 %v11117_v1  ;;  %v2047_v1 = vld [vmem:[#allocation7 + $0x9a8] sm:$0xff] }
 0x4a1   : > { %4469 = vmatmul.f32.gmra.mxu1 %v11118_v14  ;;  %v1759_v14 = vld [vmem:[#allocation7 + $0xa8] sm:$0xff]  ;;  %4735 = vmatpush.msrb.mxu3 %v2047_v1 }
 0x4a2   : > { %v4150_v15 = vpop.f32.mrf.mxu2  ;;  %4594 = vmatpush.msrb.mxu0 %v1759_v14  ;;  %v1747_v1 = vld [vmem:[#allocation7 + $0x48] sm:$0xff] }
 0x4a3   : > { %v4197_v19 = vpop.f32.mrf.mxu3  ;;  %v4151_v22 = vadd.f32 %v4150_v15, %v4104_v4  ;;  %v1753_v4 = vld [vmem:[#allocation7 + $0x78] sm:$0xff]  ;;  %4736 = vmatpush.msrb.mxu3 %v2041_v42  ;;  %v1843_v14 = vld [vmem:[#allocation7 + $0x348] sm:$0xff] }
 0x4a4   : > { %v1849_v15 = vld [vmem:[#allocation7 + $0x378] sm:$0xff]  ;;  %4595 = vmatpush.msrb.mxu0 %v1753_v4  ;;  %v2503_v42 = vld [vmem:[#allocation7 + $0x17e8] sm:$0xff] }
 0x4a5   : > { %v9868_v37 = vadd.f32 %v4197_v19, %v4151_v22  ;;  %v4062_v43 = vpop.f32.mrf.mxu0  ;;  %4642 = vmatpush.msrb.mxu1 %v1849_v15  ;;  %4737 = vmatpush.msrb.mxu3 %v2035_v53  ;;  %v1933_v4 = vld [vmem:[#allocation7 + $0x618] sm:$0xff] }
 0x4a6   : > { %v4109_v33 = vpop.f32.mrf.mxu1  ;;  %4596 = vmatpush.msrb.mxu0 %v1747_v1  ;;  %v2029_v15 = vld [vmem:[#allocation7 + $0x918] sm:$0xff] }
 0x4a7   : > { %4516 = vmatmul.f32.gmra.mxu2 %v11087_v51  ;;  %4643 = vmatpush.msrb.mxu1 %v1843_v14 }
 0x4a8   : > { %4563 = vmatmul.f32.gmra.mxu3 %v11088_v47  ;;  %4425 = vmatmul.f32.gmra.mxu0 %v11119_v32 }
 0x4a9   : > { %4472 = vmatmul.f32.gmra.mxu1 %v11120_v35  ;;  %v1939_v35 = vld [vmem:[#allocation7 + $0x648] sm:$0xff]  ;;  %4597 = vmatpush.msrb.mxu0 %v1741_v16 }
 0x4aa   : > { %v4153_v59 = vpop.f32.mrf.mxu2  ;;  %4690 = vmatpush.msrb.mxu2 %v1939_v35  ;;  %4644 = vmatpush.msrb.mxu1 %v1837_v48 }
 0x4ab   : > { %v4200_v49 = vpop.f32.mrf.mxu3  ;;  %v4154_v21 = vadd.f32 %v4153_v59, %v4107_v26  ;;  %v4110_v26 = vadd.f32 %v4109_v33, %v4062_v43  ;;  %4738 = vmatpush.msrb.mxu3 %v2029_v15  ;;  %v2407_v33 = vld [vmem:[#allocation7 + $0x14e8] sm:$0xff] }
 0x4ac   : > { %4691 = vmatpush.msrb.mxu2 %v1933_v4  ;;  %v2395_v4 = vld [vmem:[#allocation7 + $0x1488] sm:$0xff] }
 0x4ad   : > { %v9874_v19 = vadd.f32 %v4200_v49, %v4154_v21  ;;  %v4223_v22 = vpop.f32.mrf.mxu0  ;;  %4911 = vmatpush.msra.mxu3 %v2503_v42 }
 0x4ae   : > { %v4270_v58 = vpop.f32.mrf.mxu1  ;;  %v4224_v32 = vadd.f32 %v4223_v22, %v9826_v44  ;;  %4864 = vmatpush.msra.mxu2 %v2407_v33 }
 0x4af   : > { %4519 = vmatmul.f32.gmra.mxu2 %v11092_v27 }
 0x4b0   : > { %4566 = vmatmul.f32.gmra.mxu3 %v11093_v61  ;;  %v4271_v12 = vadd.f32 %v4270_v58, %v4224_v32  ;;  %4428 = vmatmul.f32.gmra.mxu0 %v11094_v52  ;;  %v2215_v58 = vld [vmem:[#allocation7 + $0xee8] sm:$0xff] }
 0x4b1   : > { %4475 = vmatmul.f32.gmra.mxu1 %v11095_v45  ;;  %4770 = vmatpush.msra.mxu0 %v2215_v58 }
 0x4b2   : > { %v4156_v44 = vpop.f32.mrf.mxu2 }
 0x4b3   : > { %v4203_v59 = vpop.f32.mrf.mxu3  ;;  %v4157_v35 = vadd.f32 %v4156_v44, %v4110_v26  ;;  %v2311_v26 = vld [vmem:[#allocation7 + $0x11e8] sm:$0xff]  ;;  %v2401_v44 = vld [vmem:[#allocation7 + $0x14b8] sm:$0xff] }
 0x4b4   : > { %4817 = vmatpush.msra.mxu1 %v2311_v26  ;;  %4865 = vmatpush.msra.mxu2 %v2401_v44  ;;  %v11131_v26 = vld [vmem:[#allocation69_spill] sm:$0xff]  ;;  %v2197_v44 = vld [vmem:[#allocation7 + $0xe58] sm:$0xff] }
 0x4b5   : > { %v9881_v49 = vadd.f32 %v4203_v59, %v4157_v35  ;;  %v4226_v21 = vpop.f32.mrf.mxu0 }
 0x4b6   : > { %v4273_v32 = vpop.f32.mrf.mxu1  ;;  %v4227_v22 = vadd.f32 %v4226_v21, %v9832_v0  ;;  %v2497_v21 = vld [vmem:[#allocation7 + $0x17b8] sm:$0xff]  ;;  %4866 = vmatpush.msra.mxu2 %v2395_v4 }
 0x4b7   : > { %4522 = vmatmul.f32.gmra.mxu2 %v11097_v63  ;;  %4912 = vmatpush.msra.mxu3 %v2497_v21 }
 0x4b8   : > { %4569 = vmatmul.f32.gmra.mxu3 %v11098_v38  ;;  %v4274_v43 = vadd.f32 %v4273_v32, %v4227_v22  ;;  %4431 = vmatmul.f32.gmra.mxu0 %v11099_v8  ;;  %v2305_v32 = vld [vmem:[#allocation7 + $0x11b8] sm:$0xff] }
 0x4b9   : > { %4478 = vmatmul.f32.gmra.mxu1 %v11100_v54 }
 0x4ba   : > { %v4317_v1 = vpop.f32.mrf.mxu2  ;;  %4818 = vmatpush.msra.mxu1 %v2305_v32 }
 0x4bb   : > { %v4364_v14 = vpop.f32.mrf.mxu3  ;;  %v4318_v0 = vadd.f32 %v4317_v1, %v4271_v12  ;;  %v2209_v12 = vld [vmem:[#allocation7 + $0xeb8] sm:$0xff]  ;;  %v2203_v1 = vld [vmem:[#allocation7 + $0xe88] sm:$0xff] }
 0x4bc   : > { %4771 = vmatpush.msra.mxu0 %v2209_v12 }
 0x4bd   : > { %v9888_v53 = vadd.f32 %v4364_v14, %v4318_v0  ;;  %v4229_v16 = vpop.f32.mrf.mxu0  ;;  %v2491_v14 = vld [vmem:[#allocation7 + $0x1788] sm:$0xff] }
 0x4be   : > { %v4276_v48 = vpop.f32.mrf.mxu1  ;;  %v4230_v59 = vadd.f32 %v4229_v16, %v9838_v34  ;;  %4772 = vmatpush.msra.mxu0 %v2203_v1  ;;  %4913 = vmatpush.msra.mxu3 %v2491_v14  ;;  %v2299_v16 = vld [vmem:[#allocation7 + $0x1188] sm:$0xff]  ;;  %v11132_v14 = vld [vmem:[#allocation70_spill] sm:$0xff] }
 0x4bf   : > { %4525 = vmatmul.f32.gmra.mxu2 %v9225_v28  ;;  %4819 = vmatpush.msra.mxu1 %v2299_v16  ;;  %v2479_v1 = vld [vmem:[#allocation7 + $0x1728] sm:$0xff] }
 0x4c0   : > { %4572 = vmatmul.f32.gmra.mxu3 %v9227_v56  ;;  %v4277_v35 = vadd.f32 %v4276_v48, %v4230_v59  ;;  %4434 = vmatmul.f32.gmra.mxu0 %v9339_v31  ;;  %v2485_v59 = vld [vmem:[#allocation7 + $0x1758] sm:$0xff] }
 0x4c1   : > { %4481 = vmatmul.f32.gmra.mxu1 %v9341_v6  ;;  %4773 = vmatpush.msra.mxu0 %v2197_v44  ;;  %v2287_v44 = vld [vmem:[#allocation7 + $0x1128] sm:$0xff] }
 0x4c2   : > { %v4320_v15 = vpop.f32.mrf.mxu2  ;;  %4914 = vmatpush.msra.mxu3 %v2485_v59  ;;  %v2377_v59 = vld [vmem:[#allocation7 + $0x13f8] sm:$0xff] }
 0x4c3   : > { %v4367_v22 = vpop.f32.mrf.mxu3  ;;  %v4321_v34 = vadd.f32 %v4320_v15, %v4274_v43  ;;  %v2389_v43 = vld [vmem:[#allocation7 + $0x1458] sm:$0xff] }
 0x4c4   : > { %4867 = vmatpush.msra.mxu2 %v2389_v43  ;;  %v11134_v43 = vld [vmem:[#allocation104_spill] sm:$0xff]  ;;  %4915 = vmatpush.msra.mxu3 %v2479_v1 }
 0x4c5   : > { %v9895_v33 = vadd.f32 %v4367_v22, %v4321_v34  ;;  %v4232_v58 = vpop.f32.mrf.mxu0  ;;  %v2293_v22 = vld [vmem:[#allocation7 + $0x1158] sm:$0xff]  ;;  %v2383_v34 = vld [vmem:[#allocation7 + $0x1428] sm:$0xff] }
 0x4c6   : > { %v4279_v42 = vpop.f32.mrf.mxu1  ;;  %v4233_v0 = vadd.f32 %v4232_v58, %v9844_v57  ;;  %4820 = vmatpush.msra.mxu1 %v2293_v22  ;;  %4868 = vmatpush.msra.mxu2 %v2383_v34  ;;  %v2185_v34 = vld [vmem:[#allocation7 + $0xdf8] sm:$0xff] }
 0x4c7   : > { %4528 = vmatmul.f32.gmra.mxu2 %v9357_v36 }
 0x4c8   : > { %4575 = vmatmul.f32.gmra.mxu3 %v9359_v3  ;;  %v4280_v48 = vadd.f32 %v4279_v42, %v4233_v0  ;;  %4437 = vmatmul.f32.gmra.mxu0 %v9471_v60  ;;  %v2191_v42 = vld [vmem:[#allocation7 + $0xe28] sm:$0xff]  ;;  %v11133_v0 = vld [vmem:[#allocation67_spill] sm:$0xff] }
 0x4c9   : > { %4484 = vmatmul.f32.gmra.mxu1 %v11131_v26  ;;  %4774 = vmatpush.msra.mxu0 %v2191_v42  ;;  %v11137_v42 = vld [vmem:[#allocation107_spill] sm:$0xff] }
 0x4ca   : > { %v4323_v12 = vpop.f32.mrf.mxu2  ;;  %4821 = vmatpush.msra.mxu1 %v2287_v44  ;;  %4869 = vmatpush.msra.mxu2 %v2377_v59  ;;  %v2467_v44 = vld [vmem:[#allocation7 + $0x16c8] sm:$0xff]  ;;  %v2785_v26 = vld [vmem:[#allocation7 + $0x20b8] sm:$0xff] }
 0x4cb   : > { %v4370_v21 = vpop.f32.mrf.mxu3  ;;  %v4324_v57 = vadd.f32 %v4323_v12, %v4277_v35  ;;  %v11135_v35 = vld [vmem:[#allocation105_spill] sm:$0xff]  ;;  %4775 = vmatpush.msra.mxu0 %v2185_v34  ;;  %v2173_v34 = vld [vmem:[#allocation7 + $0xd98] sm:$0xff] }
 0x4cc   : > { %v2275_v59 = vld [vmem:[#allocation7 + $0x10c8] sm:$0xff] }
 0x4cd   : > { %v9902_v32 = vadd.f32 %v4370_v21, %v4324_v57  ;;  %v4235_v4 = vpop.f32.mrf.mxu0 }
 0x4ce   : > { %v4282_v15 = vpop.f32.mrf.mxu1  ;;  %v4236_v58 = vadd.f32 %v4235_v4, %v9850_v11 }
 0x4cf   : > { %4531 = vmatmul.f32.gmra.mxu2 %v11132_v14 }
 0x4d0   : > { %4578 = vmatmul.f32.gmra.mxu3 %v11133_v0  ;;  %v4283_v16 = vadd.f32 %v4282_v15, %v4236_v58  ;;  %4598 = vmatmul.f32.vlgmr.msrb.gmra.mxu0 %v11134_v43  ;;  %v2473_v0 = vld [vmem:[#allocation7 + $0x16f8] sm:$0xff] }
 0x4d1   : > { %4645 = vmatmul.f32.vlgmr.msrb.gmra.mxu1 %v11135_v35  ;;  %4916 = vmatpush.msra.mxu3 %v2473_v0  ;;  %v2281_v58 = vld [vmem:[#allocation7 + $0x10f8] sm:$0xff]  ;;  %v2371_v35 = vld [vmem:[#allocation7 + $0x13c8] sm:$0xff] }
 0x4d2   : > { %v4326_v12 = vpop.f32.mrf.mxu2  ;;  %v11136_v43 = vld [vmem:[#allocation106_spill] sm:$0xff]  ;;  %4822 = vmatpush.msra.mxu1 %v2281_v58  ;;  %4870 = vmatpush.msra.mxu2 %v2371_v35  ;;  %v2359_v58 = vld [vmem:[#allocation7 + $0x1368] sm:$0xff] }
 0x4d3   : > { %v4373_v21 = vpop.f32.mrf.mxu3  ;;  %v4327_v11 = vadd.f32 %v4326_v12, %v4280_v48  ;;  %v2179_v48 = vld [vmem:[#allocation7 + $0xdc8] sm:$0xff]  ;;  %4917 = vmatpush.msra.mxu3 %v2467_v44 }
 0x4d4   : > { %4776 = vmatpush.msra.mxu0 %v2179_v48  ;;  %4823 = vmatpush.msra.mxu1 %v2275_v59  ;;  %v2167_v48 = vld [vmem:[#allocation7 + $0xd68] sm:$0xff] }
 0x4d5   : > { %v9909_v57 = vadd.f32 %v4373_v21, %v4327_v11  ;;  %v4238_v4 = vpop.f32.mrf.mxu0  ;;  %v2455_v44 = vld [vmem:[#allocation7 + $0x1668] sm:$0xff] }
 0x4d6   : > { %v4285_v22 = vpop.f32.mrf.mxu1  ;;  %v4239_v15 = vadd.f32 %v4238_v4, %v9856_v40  ;;  %4777 = vmatpush.msra.mxu0 %v2173_v34 }
 0x4d7   : > { %4692 = vmatmul.f32.vlgmr.msrb.gmra.mxu2 %v11136_v43 }
 0x4d8   : > { %4739 = vmatmul.f32.vlgmr.msrb.gmra.mxu3 %v11137_v42  ;;  %v4286_v1 = vadd.f32 %v4285_v22, %v4239_v15  ;;  %4601 = vmatmul.f32.gmra.mxu0 %v11065_v9  ;;  %v2365_v22 = vld [vmem:[#allocation7 + $0x1398] sm:$0xff] }
 0x4d9   : > { %4648 = vmatmul.f32.gmra.mxu1 %v11066_v17  ;;  %4871 = vmatpush.msra.mxu2 %v2365_v22  ;;  %v2461_v42 = vld [vmem:[#allocation7 + $0x1698] sm:$0xff] }
 0x4da   : > { %v4329_v12 = vpop.f32.mrf.mxu2  ;;  %4918 = vmatpush.msra.mxu3 %v2461_v42  ;;  %4778 = vmatpush.msra.mxu0 %v2167_v48  ;;  %v2353_v22 = vld [vmem:[#allocation7 + $0x1338] sm:$0xff] }
 0x4db   : > { %v4376_v40 = vpop.f32.mrf.mxu3  ;;  %v4330_v0 = vadd.f32 %v4329_v12, %v4283_v16  ;;  %v2269_v16 = vld [vmem:[#allocation7 + $0x1098] sm:$0xff]  ;;  %4872 = vmatpush.msra.mxu2 %v2359_v58  ;;  %v2347_v58 = vld [vmem:[#allocation7 + $0x1308] sm:$0xff] }
 0x4dc   : > { %4824 = vmatpush.msra.mxu1 %v2269_v16  ;;  %4919 = vmatpush.msra.mxu3 %v2455_v44  ;;  %v2257_v16 = vld [vmem:[#allocation7 + $0x1038] sm:$0xff] }
 0x4dd   : > { %v9916_v21 = vadd.f32 %v4376_v40, %v4330_v0  ;;  %v4241_v11 = vpop.f32.mrf.mxu0  ;;  %4873 = vmatpush.msra.mxu2 %v2353_v22  ;;  %v2251_v22 = vld [vmem:[#allocation7 + $0x1008] sm:$0xff] }
 0x4de   : > { %v4288_v4 = vpop.f32.mrf.mxu1  ;;  %v4242_v15 = vadd.f32 %v4241_v11, %v9862_v29 }
 0x4df   : > { %4695 = vmatmul.f32.gmra.mxu2 %v11067_v18 }
 0x4e0   : > { %4742 = vmatmul.f32.gmra.mxu3 %v11068_v5  ;;  %v4289_v35 = vadd.f32 %v4288_v4, %v4242_v15  ;;  %4604 = vmatmul.f32.gmra.mxu0 %v11069_v25  ;;  %v2263_v4 = vld [vmem:[#allocation7 + $0x1068] sm:$0xff]  ;;  %v2449_v15 = vld [vmem:[#allocation7 + $0x1638] sm:$0xff] }
 0x4e1   : > { %4651 = vmatmul.f32.gmra.mxu1 %v11070_v20  ;;  %4920 = vmatpush.msra.mxu3 %v2449_v15  ;;  %v2437_v15 = vld [vmem:[#allocation7 + $0x15d8] sm:$0xff] }
 0x4e2   : > { %v4332_v59 = vpop.f32.mrf.mxu2  ;;  %4825 = vmatpush.msra.mxu1 %v2263_v4  ;;  %4874 = vmatpush.msra.mxu2 %v2347_v58 }
 0x4e3   : > { %v4379_v29 = vpop.f32.mrf.mxu3  ;;  %v4333_v12 = vadd.f32 %v4332_v59, %v4286_v1  ;;  %v2161_v1 = vld [vmem:[#allocation7 + $0xd38] sm:$0xff] }
 0x4e4   : > { %4779 = vmatpush.msra.mxu0 %v2161_v1  ;;  %4826 = vmatpush.msra.mxu1 %v2257_v16  ;;  %v2149_v1 = vld [vmem:[#allocation7 + $0xcd8] sm:$0xff] }
 0x4e5   : > { %v9923_v40 = vadd.f32 %v4379_v29, %v4333_v12  ;;  %v4244_v0 = vpop.f32.mrf.mxu0 }
 0x4e6   : > { %v4291_v11 = vpop.f32.mrf.mxu1  ;;  %v4245_v34 = vadd.f32 %v4244_v0, %v9868_v37  ;;  %v2155_v0 = vld [vmem:[#allocation7 + $0xd08] sm:$0xff]  ;;  %4827 = vmatpush.msra.mxu1 %v2251_v22 }
 0x4e7   : > { %4698 = vmatmul.f32.gmra.mxu2 %v9011_v55  ;;  %4780 = vmatpush.msra.mxu0 %v2155_v0 }
 0x4e8   : > { %4745 = vmatmul.f32.gmra.mxu3 %v11071_v41  ;;  %v4292_v42 = vadd.f32 %v4291_v11, %v4245_v34  ;;  %4607 = vmatmul.f32.gmra.mxu0 %v11072_v46  ;;  %v2443_v11 = vld [vmem:[#allocation7 + $0x1608] sm:$0xff] }
 0x4e9   : > { %4654 = vmatmul.f32.gmra.mxu1 %v9049_v39  ;;  %4921 = vmatpush.msra.mxu3 %v2443_v11  ;;  %v2143_v11 = vld [vmem:[#allocation7 + $0xca8] sm:$0xff] }
 0x4ea   : > { %v4335_v48 = vpop.f32.mrf.mxu2  ;;  %4781 = vmatpush.msra.mxu0 %v2149_v1  ;;  %v2329_v1 = vld [vmem:[#allocation7 + $0x1278] sm:$0xff] }
 0x4eb   : > { %v4382_v44 = vpop.f32.mrf.mxu3  ;;  %v4336_v37 = vadd.f32 %v4335_v48, %v4289_v35  ;;  %v2341_v35 = vld [vmem:[#allocation7 + $0x12d8] sm:$0xff]  ;;  %4922 = vmatpush.msra.mxu3 %v2437_v15 }
 0x4ec   : > { %4875 = vmatpush.msra.mxu2 %v2341_v35  ;;  %v2239_v35 = vld [vmem:[#allocation7 + $0xfa8] sm:$0xff]  ;;  %4782 = vmatpush.msra.mxu0 %v2143_v11 }
 0x4ed   : > { %v9930_v59 = vadd.f32 %v4382_v44, %v4336_v37  ;;  %v4247_v29 = vpop.f32.mrf.mxu0  ;;  %v2131_v11 = vld [vmem:[#allocation7 + $0xc48] sm:$0xff] }
 0x4ee   : > { %v4294_v12 = vpop.f32.mrf.mxu1  ;;  %v4248_v4 = vadd.f32 %v4247_v29, %v9874_v19  ;;  %v2245_v29 = vld [vmem:[#allocation7 + $0xfd8] sm:$0xff] }
 0x4ef   : > { %4701 = vmatmul.f32.gmra.mxu2 %v11073_v13  ;;  %4828 = vmatpush.msra.mxu1 %v2245_v29 }
 0x4f0   : > { %4748 = vmatmul.f32.gmra.mxu3 %v11074_v30  ;;  %v4295_v34 = vadd.f32 %v4294_v12, %v4248_v4  ;;  %4610 = vmatmul.f32.gmra.mxu0 %v11075_v62  ;;  %v2335_v12 = vld [vmem:[#allocation7 + $0x12a8] sm:$0xff] }
 0x4f1   : > { %4657 = vmatmul.f32.gmra.mxu1 %v11076_v23  ;;  %4876 = vmatpush.msra.mxu2 %v2335_v12  ;;  %v2431_v4 = vld [vmem:[#allocation7 + $0x15a8] sm:$0xff]  ;;  %v2425_v12 = vld [vmem:[#allocation7 + $0x1578] sm:$0xff] }
 0x4f2   : > { %v4338_v16 = vpop.f32.mrf.mxu2  ;;  %4923 = vmatpush.msra.mxu3 %v2431_v4  ;;  %4829 = vmatpush.msra.mxu1 %v2239_v35  ;;  %v2227_v4 = vld [vmem:[#allocation7 + $0xf48] sm:$0xff] }
 0x4f3   : > { %v4385_v58 = vpop.f32.mrf.mxu3  ;;  %v4339_v19 = vadd.f32 %v4338_v16, %v4292_v42  ;;  %v11138_v42 = vld [vmem:[#allocation37_spill] sm:$0xff]  ;;  %4877 = vmatpush.msra.mxu2 %v2329_v1  ;;  %v11139_v35 = vld [vmem:[#allocation40_spill] sm:$0xff]  ;;  %v11140_v1 = vld [vmem:[#allocation102_spill] sm:$0xff] }
 0x4f4   : > { %4924 = vmatpush.msra.mxu3 %v2425_v12 }
 0x4f5   : > { %v9937_v48 = vadd.f32 %v4385_v58, %v4339_v19  ;;  %v4250_v44 = vpop.f32.mrf.mxu0  ;;  %v2137_v58 = vld [vmem:[#allocation7 + $0xc78] sm:$0xff] }
 0x4f6   : > { %v4297_v37 = vpop.f32.mrf.mxu1  ;;  %v4251_v0 = vadd.f32 %v4250_v44, %v9881_v49  ;;  %v2233_v19 = vld [vmem:[#allocation7 + $0xf78] sm:$0xff]  ;;  %4783 = vmatpush.msra.mxu0 %v2137_v58 }
 0x4f7   : > { %4704 = vmatmul.f32.gmra.mxu2 %v11079_v7  ;;  %4830 = vmatpush.msra.mxu1 %v2233_v19 }
 0x4f8   : > { %4751 = vmatmul.f32.gmra.mxu3 %v11080_v24  ;;  %v4298_v22 = vadd.f32 %v4297_v37, %v4251_v0  ;;  %4613 = vmatmul.f32.gmra.mxu0 %v11081_v50  ;;  %v2323_v0 = vld [vmem:[#allocation7 + $0x1248] sm:$0xff] }
 0x4f9   : > { %4660 = vmatmul.f32.gmra.mxu1 %v11138_v42  ;;  %4878 = vmatpush.msra.mxu2 %v2323_v0 }
 0x4fa   : > { %v4341_v15 = vpop.f32.mrf.mxu2  ;;  %4784 = vmatpush.msra.mxu0 %v2131_v11  ;;  %4831 = vmatpush.msra.mxu1 %v2227_v4  ;;  %v11141_v4 = vld [vmem:[#allocation34_spill] sm:$0xff] }
 0x4fb   : > { %v4388_v16 = vpop.f32.mrf.mxu3  ;;  %v4342_v49 = vadd.f32 %v4341_v15, %v4295_v34  ;;  %v2419_v15 = vld [vmem:[#allocation7 + $0x1548] sm:$0xff] }
 0x4fc   : > { %4925 = vmatpush.msra.mxu3 %v2419_v15  ;;  %v2791_v15 = vld [vmem:[#allocation7 + $0x20e8] sm:$0xff] }
 0x4fd   : > { %v9944_v44 = vadd.f32 %v4388_v16, %v4342_v49  ;;  %v4411_v37 = vpop.f32.mrf.mxu0  ;;  %v2125_v16 = vld [vmem:[#allocation7 + $0xc18] sm:$0xff] }
 0x4fe   : > { %v4458_v29 = vpop.f32.mrf.mxu1  ;;  %v4412_v43 = vadd.f32 %v4411_v37, %v9888_v53  ;;  %v2221_v49 = vld [vmem:[#allocation7 + $0xf18] sm:$0xff]  ;;  %4785 = vmatpush.msra.mxu0 %v2125_v16  ;;  %v2599_v16 = vld [vmem:[#allocation7 + $0x1ae8] sm:$0xff] }
 0x4ff   : > { %4707 = vmatmul.f32.gmra.mxu2 %v11083_v10  ;;  %4832 = vmatpush.msra.mxu1 %v2221_v49  ;;  %v2887_v49 = vld [vmem:[#allocation7 + $0x23e8] sm:$0xff] }
 0x500   : > { %4754 = vmatmul.f32.gmra.mxu3 %v11084_v2  ;;  %v4459_v34 = vadd.f32 %v4458_v29, %v4412_v43  ;;  %4616 = vmatmul.f32.gmra.mxu0 %v11139_v35  ;;  %v2317_v43 = vld [vmem:[#allocation7 + $0x1218] sm:$0xff] }
 0x501   : > { %4663 = vmatmul.f32.gmra.mxu1 %v11140_v1  ;;  %v2413_v29 = vld [vmem:[#allocation7 + $0x1518] sm:$0xff]  ;;  %4879 = vmatpush.msra.mxu2 %v2317_v43 }
 0x502   : > { %v4344_v58 = vpop.f32.mrf.mxu2  ;;  %4926 = vmatpush.msra.mxu3 %v2413_v29  ;;  %4958 = vmatpush.msrb.mxu0 %v2599_v16  ;;  %v2695_v29 = vld [vmem:[#allocation7 + $0x1de8] sm:$0xff]  ;;  %v2689_v16 = vld [vmem:[#allocation7 + $0x1db8] sm:$0xff] }
 0x503   : > { %v4391_v53 = vpop.f32.mrf.mxu3  ;;  %v4345_v19 = vadd.f32 %v4344_v58, %v4298_v22  ;;  %v11142_v22 = vld [vmem:[#allocation35_spill] sm:$0xff]  ;;  %5052 = vmatpush.msrb.mxu2 %v2791_v15  ;;  %5005 = vmatpush.msrb.mxu1 %v2695_v29  ;;  %v2875_v29 = vld [vmem:[#allocation7 + $0x2388] sm:$0xff] }
 0x504   : > { %5099 = vmatpush.msrb.mxu3 %v2887_v49  ;;  %v2881_v15 = vld [vmem:[#allocation7 + $0x23b8] sm:$0xff]  ;;  %v2779_v49 = vld [vmem:[#allocation7 + $0x2088] sm:$0xff] }
 0x505   : > { %v9951_v37 = vadd.f32 %v4391_v53, %v4345_v19  ;;  %v4414_v12 = vpop.f32.mrf.mxu0  ;;  %5053 = vmatpush.msrb.mxu2 %v2785_v26  ;;  %5006 = vmatpush.msrb.mxu1 %v2689_v16  ;;  %v2869_v16 = vld [vmem:[#allocation7 + $0x2358] sm:$0xff] }
 0x506   : > { %v4461_v0 = vpop.f32.mrf.mxu1  ;;  %v4415_v14 = vadd.f32 %v4414_v12, %v9895_v33  ;;  %5100 = vmatpush.msrb.mxu3 %v2881_v15  ;;  %v2581_v15 = vld [vmem:[#allocation7 + $0x1a58] sm:$0xff] }
 0x507   : > { %4710 = vmatmul.f32.gmra.mxu2 %v11087_v51 }
 0x508   : > { %4757 = vmatmul.f32.gmra.mxu3 %v11088_v47  ;;  %v4462_v11 = vadd.f32 %v4461_v0, %v4415_v14  ;;  %4619 = vmatmul.f32.gmra.mxu0 %v11141_v4 }
 0x509   : > { %4666 = vmatmul.f32.gmra.mxu1 %v11142_v22  ;;  %5054 = vmatpush.msrb.mxu2 %v2779_v49 }
 0x50a   : > { %v4505_v58 = vpop.f32.mrf.mxu2  ;;  %5101 = vmatpush.msrb.mxu3 %v2875_v29 }
 0x50b   : > { %v4552_v53 = vpop.f32.mrf.mxu3  ;;  %v4506_v33 = vadd.f32 %v4505_v58, %v4459_v34  ;;  %v2593_v34 = vld [vmem:[#allocation7 + $0x1ab8] sm:$0xff] }
 0x50c   : > { %4959 = vmatpush.msrb.mxu0 %v2593_v34  ;;  %5102 = vmatpush.msrb.mxu3 %v2869_v16 }
 0x50d   : > { %v9958_v19 = vadd.f32 %v4552_v53, %v4506_v33  ;;  %v4417_v12 = vpop.f32.mrf.mxu0 }
 0x50e   : > { %v4464_v43 = vpop.f32.mrf.mxu1  ;;  %v4418_v14 = vadd.f32 %v4417_v12, %v9902_v32 }
 0x50f   : > { %11143 = vst [vmem:[#allocation61_spill] sm:$0xff] %v9958_v19  ;;  %4713 = vmatmul.f32.gmra.mxu2 %v11092_v27  ;;  %v2683_v19 = vld [vmem:[#allocation7 + $0x1d88] sm:$0xff] }
 0x510   : > { %4760 = vmatmul.f32.gmra.mxu3 %v11093_v61  ;;  %v4465_v0 = vadd.f32 %v4464_v43, %v4418_v14  ;;  %4622 = vmatmul.f32.gmra.mxu0 %v11094_v52  ;;  %v2587_v43 = vld [vmem:[#allocation7 + $0x1a88] sm:$0xff] }
 0x511   : > { %4669 = vmatmul.f32.gmra.mxu1 %v11095_v45  ;;  %4960 = vmatpush.msrb.mxu0 %v2587_v43  ;;  %v2677_v43 = vld [vmem:[#allocation7 + $0x1d58] sm:$0xff] }
 0x512   : > { %v4508_v58 = vpop.f32.mrf.mxu2  ;;  %5007 = vmatpush.msrb.mxu1 %v2683_v19 }
 0x513   : > { %v4555_v53 = vpop.f32.mrf.mxu3  ;;  %v4509_v26 = vadd.f32 %v4508_v58, %v4462_v11  ;;  %v2773_v11 = vld [vmem:[#allocation7 + $0x2058] sm:$0xff]  ;;  %4961 = vmatpush.msrb.mxu0 %v2581_v15 }
 0x514   : > { %5055 = vmatpush.msrb.mxu2 %v2773_v11  ;;  %5008 = vmatpush.msrb.mxu1 %v2677_v43  ;;  %v2761_v11 = vld [vmem:[#allocation7 + $0x1ff8] sm:$0xff] }
 0x515   : > { %v9965_v32 = vadd.f32 %v4555_v53, %v4509_v26  ;;  %v4420_v33 = vpop.f32.mrf.mxu0  ;;  %v2857_v43 = vld [vmem:[#allocation7 + $0x22f8] sm:$0xff] }
 0x516   : > { %v4467_v12 = vpop.f32.mrf.mxu1  ;;  %v4421_v14 = vadd.f32 %v4420_v33, %v9909_v57 }
 0x517   : > { %11144 = vst [vmem:[#allocation56_spill] sm:$0xff] %v9965_v32  ;;  %4716 = vmatmul.f32.gmra.mxu2 %v11097_v63  ;;  %v2863_v32 = vld [vmem:[#allocation7 + $0x2328] sm:$0xff] }
 0x518   : > { %4763 = vmatmul.f32.gmra.mxu3 %v11098_v38  ;;  %v4468_v34 = vadd.f32 %v4467_v12, %v4421_v14  ;;  %4625 = vmatmul.f32.gmra.mxu0 %v11099_v8  ;;  %v2767_v12 = vld [vmem:[#allocation7 + $0x2028] sm:$0xff] }
 0x519   : > { %4672 = vmatmul.f32.gmra.mxu1 %v11100_v54  ;;  %5056 = vmatpush.msrb.mxu2 %v2767_v12  ;;  %v2575_v14 = vld [vmem:[#allocation7 + $0x1a28] sm:$0xff]  ;;  %v2665_v12 = vld [vmem:[#allocation7 + $0x1cf8] sm:$0xff] }
 0x51a   : > { %v4511_v49 = vpop.f32.mrf.mxu2  ;;  %4962 = vmatpush.msrb.mxu0 %v2575_v14  ;;  %5103 = vmatpush.msrb.mxu3 %v2863_v32  ;;  %v2851_v14 = vld [vmem:[#allocation7 + $0x22c8] sm:$0xff] }
 0x51b   : > { %v4558_v58 = vpop.f32.mrf.mxu3  ;;  %v4512_v57 = vadd.f32 %v4511_v49, %v4465_v0  ;;  %v2671_v0 = vld [vmem:[#allocation7 + $0x1d28] sm:$0xff]  ;;  %5057 = vmatpush.msrb.mxu2 %v2761_v11 }
 0x51c   : > { %5009 = vmatpush.msrb.mxu1 %v2671_v0  ;;  %5104 = vmatpush.msrb.mxu3 %v2857_v43  ;;  %v2659_v0 = vld [vmem:[#allocation7 + $0x1cc8] sm:$0xff] }
 0x51d   : > { %v9972_v53 = vadd.f32 %v4558_v58, %v4512_v57  ;;  %v4423_v26 = vpop.f32.mrf.mxu0 }
 0x51e   : > { %v4470_v33 = vpop.f32.mrf.mxu1  ;;  %v4424_v29 = vadd.f32 %v4423_v26, %v9916_v21  ;;  %v2569_v26 = vld [vmem:[#allocation7 + $0x19f8] sm:$0xff]  ;;  %5010 = vmatpush.msrb.mxu1 %v2665_v12  ;;  %5105 = vmatpush.msrb.mxu3 %v2851_v14  ;;  %v2743_v12 = vld [vmem:[#allocation7 + $0x1f68] sm:$0xff] }
 0x51f   : > { %11145 = vst [vmem:[#allocation93_spill] sm:$0xff] %v9972_v53  ;;  %4719 = vmatmul.f32.gmra.mxu2 %v9225_v28  ;;  %4963 = vmatpush.msrb.mxu0 %v2569_v26  ;;  %v2557_v26 = vld [vmem:[#allocation7 + $0x1998] sm:$0xff]  ;;  %v2078_v53 = vld [vmem:[#allocation7 + $0xaa0] sm:$0xff] }
 0x520   : > { %4766 = vmatmul.f32.gmra.mxu3 %v9227_v56  ;;  %v4471_v19 = vadd.f32 %v4470_v33, %v4424_v29  ;;  %4786 = vmatmul.f32.vlgmr.msra.gmra.mxu0 %v11065_v9  ;;  %v2755_v29 = vld [vmem:[#allocation7 + $0x1fc8] sm:$0xff] }
 0x521   : > { %4833 = vmatmul.f32.vlgmr.msra.gmra.mxu1 %v11066_v17  ;;  %5058 = vmatpush.msrb.mxu2 %v2755_v29 }
 0x522   : > { %v4514_v15 = vpop.f32.mrf.mxu2  ;;  %5011 = vmatpush.msrb.mxu1 %v2659_v0 }
 0x523   : > { %v4561_v16 = vpop.f32.mrf.mxu3  ;;  %v4515_v21 = vadd.f32 %v4514_v15, %v4468_v34  ;;  %v2563_v34 = vld [vmem:[#allocation7 + $0x19c8] sm:$0xff] }
 0x524   : > { %4964 = vmatpush.msrb.mxu0 %v2563_v34  ;;  %v2839_v34 = vld [vmem:[#allocation7 + $0x2268] sm:$0xff] }
 0x525   : > { %v9979_v49 = vadd.f32 %v4561_v16, %v4515_v21  ;;  %v4426_v58 = vpop.f32.mrf.mxu0 }
 0x526   : > { %v4473_v57 = vpop.f32.mrf.mxu1  ;;  %v4427_v33 = vadd.f32 %v4426_v58, %v9923_v40  ;;  %4965 = vmatpush.msrb.mxu0 %v2557_v26  ;;  %v2545_v26 = vld [vmem:[#allocation7 + $0x1938] sm:$0xff] }
 0x527   : > { %11146 = vst [vmem:[#allocation49_spill] sm:$0xff] %v9979_v49  ;;  %4880 = vmatmul.f32.vlgmr.msra.gmra.mxu2 %v11067_v18  ;;  %v2653_v49 = vld [vmem:[#allocation7 + $0x1c98] sm:$0xff] }
 0x528   : > { %4927 = vmatmul.f32.vlgmr.msra.gmra.mxu3 %v11068_v5  ;;  %v4474_v32 = vadd.f32 %v4473_v57, %v4427_v33  ;;  %4789 = vmatmul.f32.gmra.mxu0 %v11069_v25  ;;  %v2749_v57 = vld [vmem:[#allocation7 + $0x1f98] sm:$0xff] }
 0x529   : > { %4836 = vmatmul.f32.gmra.mxu1 %v11070_v20  ;;  %5059 = vmatpush.msrb.mxu2 %v2749_v57  ;;  %v2845_v33 = vld [vmem:[#allocation7 + $0x2298] sm:$0xff] }
 0x52a   : > { %v4517_v11 = vpop.f32.mrf.mxu2  ;;  %5106 = vmatpush.msrb.mxu3 %v2845_v33  ;;  %5012 = vmatpush.msrb.mxu1 %v2653_v49  ;;  %v2641_v49 = vld [vmem:[#allocation7 + $0x1c38] sm:$0xff] }
 0x52b   : > { %v4564_v40 = vpop.f32.mrf.mxu3  ;;  %v4518_v15 = vadd.f32 %v4517_v11, %v4471_v19  ;;  %v2551_v19 = vld [vmem:[#allocation7 + $0x1968] sm:$0xff]  ;;  %5060 = vmatpush.msrb.mxu2 %v2743_v12 }
 0x52c   : > { %4966 = vmatpush.msrb.mxu0 %v2551_v19  ;;  %5107 = vmatpush.msrb.mxu3 %v2839_v34 }
 0x52d   : > { %v9986_v16 = vadd.f32 %v4564_v40, %v4518_v15  ;;  %v4429_v21 = vpop.f32.mrf.mxu0 }
 0x52e   : > { %v4476_v58 = vpop.f32.mrf.mxu1  ;;  %v4430_v43 = vadd.f32 %v4429_v21, %v9930_v59  ;;  %v2647_v21 = vld [vmem:[#allocation7 + $0x1c68] sm:$0xff]  ;;  %4967 = vmatpush.msrb.mxu0 %v2545_v26  ;;  %v2821_v26 = vld [vmem:[#allocation7 + $0x21d8] sm:$0xff] }
 0x52f   : > { %11147 = vst [vmem:[#allocation94_spill] sm:$0xff] %v9986_v16  ;;  %4883 = vmatmul.f32.gmra.mxu2 %v9011_v55  ;;  %5013 = vmatpush.msrb.mxu1 %v2647_v21  ;;  %v2635_v21 = vld [vmem:[#allocation7 + $0x1c08] sm:$0xff]  ;;  %v1988_v16 = vld [vmem:[#allocation7 + $0x7d0] sm:$0xff] }
 0x530   : > { %4930 = vmatmul.f32.gmra.mxu3 %v11071_v41  ;;  %v4477_v29 = vadd.f32 %v4476_v58, %v4430_v43  ;;  %4792 = vmatmul.f32.gmra.mxu0 %v11072_v46  ;;  %v2737_v58 = vld [vmem:[#allocation7 + $0x1f38] sm:$0xff] }
 0x531   : > { %4839 = vmatmul.f32.gmra.mxu1 %v9049_v39  ;;  %5061 = vmatpush.msrb.mxu2 %v2737_v58  ;;  %v2833_v43 = vld [vmem:[#allocation7 + $0x2238] sm:$0xff] }
 0x532   : > { %v4520_v14 = vpop.f32.mrf.mxu2  ;;  %5108 = vmatpush.msrb.mxu3 %v2833_v43  ;;  %5014 = vmatpush.msrb.mxu1 %v2641_v49  ;;  %v2725_v58 = vld [vmem:[#allocation7 + $0x1ed8] sm:$0xff] }
 0x533   : > { %v4567_v59 = vpop.f32.mrf.mxu3  ;;  %v4521_v0 = vadd.f32 %v4520_v14, %v4474_v32  ;;  %v2731_v32 = vld [vmem:[#allocation7 + $0x1f08] sm:$0xff] }
 0x534   : > { %5062 = vmatpush.msrb.mxu2 %v2731_v32  ;;  %5015 = vmatpush.msrb.mxu1 %v2635_v21  ;;  %v2713_v21 = vld [vmem:[#allocation7 + $0x1e78] sm:$0xff] }
 0x535   : > { %v9993_v11 = vadd.f32 %v4567_v59, %v4521_v0  ;;  %v4432_v40 = vpop.f32.mrf.mxu0  ;;  %v2539_v0 = vld [vmem:[#allocation7 + $0x1908] sm:$0xff] }
 0x536   : > { %v4479_v15 = vpop.f32.mrf.mxu1  ;;  %v4433_v57 = vadd.f32 %v4432_v40, %v9937_v48  ;;  %v2827_v40 = vld [vmem:[#allocation7 + $0x2208] sm:$0xff]  ;;  %4968 = vmatpush.msrb.mxu0 %v2539_v0  ;;  %5063 = vmatpush.msrb.mxu2 %v2725_v58 }
 0x537   : > { %11148 = vst [vmem:[#allocation62_spill] sm:$0xff] %v9993_v11  ;;  %4886 = vmatmul.f32.gmra.mxu2 %v11073_v13  ;;  %5109 = vmatpush.msrb.mxu3 %v2827_v40  ;;  %v2815_v40 = vld [vmem:[#allocation7 + $0x21a8] sm:$0xff]  ;;  %v2096_v11 = vld [vmem:[#allocation7 + $0xb30] sm:$0xff] }
 0x538   : > { %4933 = vmatmul.f32.gmra.mxu3 %v11074_v30  ;;  %v4480_v33 = vadd.f32 %v4479_v15, %v4433_v57  ;;  %4795 = vmatmul.f32.gmra.mxu0 %v11075_v62  ;;  %v2533_v57 = vld [vmem:[#allocation7 + $0x18d8] sm:$0xff] }
 0x539   : > { %4842 = vmatmul.f32.gmra.mxu1 %v11076_v23  ;;  %4969 = vmatpush.msrb.mxu0 %v2533_v57 }
 0x53a   : > { %v4523_v12 = vpop.f32.mrf.mxu2  ;;  %5110 = vmatpush.msrb.mxu3 %v2821_v26  ;;  %v2521_v26 = vld [vmem:[#allocation7 + $0x1878] sm:$0xff] }
 0x53b   : > { %v4570_v19 = vpop.f32.mrf.mxu3  ;;  %v4524_v48 = vadd.f32 %v4523_v12, %v4477_v29 }
 0x53c   : > { %5111 = vmatpush.msrb.mxu3 %v2815_v40  ;;  %v2605_v40 = vld [vmem:[#allocation7 + $0x1b18] sm:$0xff] }
 0x53d   : > { %v10000_v34 = vadd.f32 %v4570_v19, %v4524_v48  ;;  %v4435_v14 = vpop.f32.mrf.mxu0  ;;  %v2629_v48 = vld [vmem:[#allocation7 + $0x1bd8] sm:$0xff] }
 0x53e   : > { %v4482_v59 = vpop.f32.mrf.mxu1  ;;  %v4436_v15 = vadd.f32 %v4435_v14, %v9944_v44  ;;  %v2719_v14 = vld [vmem:[#allocation7 + $0x1ea8] sm:$0xff]  ;;  %5016 = vmatpush.msrb.mxu1 %v2629_v48 }
 0x53f   : > { %11149 = vst [vmem:[#allocation44_spill] sm:$0xff] %v10000_v34  ;;  %4889 = vmatmul.f32.gmra.mxu2 %v11079_v7  ;;  %v2707_v48 = vld [vmem:[#allocation7 + $0x1e48] sm:$0xff]  ;;  %v2006_v34 = vld [vmem:[#allocation7 + $0x860] sm:$0xff] }
 0x540   : > { %4936 = vmatmul.f32.gmra.mxu3 %v11080_v24  ;;  %v4483_v43 = vadd.f32 %v4482_v59, %v4436_v15  ;;  %4798 = vmatmul.f32.gmra.mxu0 %v11081_v50  ;;  %v2527_v59 = vld [vmem:[#allocation7 + $0x18a8] sm:$0xff] }
 0x541   : > { %4845 = vmatmul.f32.gmra.mxu1 %v11138_v42  ;;  %5064 = vmatpush.msrb.mxu2 %v2719_v14  ;;  %v2623_v15 = vld [vmem:[#allocation7 + $0x1ba8] sm:$0xff] }
 0x542   : > { %v4526_v29 = vpop.f32.mrf.mxu2  ;;  %4970 = vmatpush.msrb.mxu0 %v2527_v59  ;;  %5017 = vmatpush.msrb.mxu1 %v2623_v15  ;;  %v2515_v14 = vld [vmem:[#allocation7 + $0x1848] sm:$0xff] }
 0x543   : > { %v4573_v49 = vpop.f32.mrf.mxu3  ;;  %v4527_v44 = vadd.f32 %v4526_v29, %v4480_v33  ;;  %5065 = vmatpush.msrb.mxu2 %v2713_v21  ;;  %v2617_v29 = vld [vmem:[#allocation7 + $0x1b78] sm:$0xff]  ;;  %v2803_v59 = vld [vmem:[#allocation7 + $0x2148] sm:$0xff] }
 0x544   : > { %4971 = vmatpush.msrb.mxu0 %v2521_v26  ;;  %5018 = vmatpush.msrb.mxu1 %v2617_v29  ;;  %v2701_v29 = vld [vmem:[#allocation7 + $0x1e18] sm:$0xff] }
 0x545   : > { %v10007_v32 = vadd.f32 %v4573_v49, %v4527_v44  ;;  %v4438_v12 = vpop.f32.mrf.mxu0  ;;  %5066 = vmatpush.msrb.mxu2 %v2707_v48  ;;  %v2024_v48 = vld [vmem:[#allocation7 + $0x8f0] sm:$0xff] }
 0x546   : > { %v4485_v19 = vpop.f32.mrf.mxu1  ;;  %v4439_v0 = vadd.f32 %v4438_v12, %v9951_v37  ;;  %4972 = vmatpush.msrb.mxu0 %v2515_v14  ;;  %v2120_v14 = vld [vmem:[#allocation7 + $0xbf0] sm:$0xff] }
 0x547   : > { %11150 = vst [vmem:[#allocation89_spill] sm:$0xff] %v10007_v32  ;;  %4892 = vmatmul.f32.gmra.mxu2 %v11083_v10  ;;  %v1916_v32 = vld [vmem:[#allocation7 + $0x590] sm:$0xff] }
 0x548   : > { %4939 = vmatmul.f32.gmra.mxu3 %v11084_v2  ;;  %v4486_v58 = vadd.f32 %v4485_v19, %v4439_v0  ;;  %4801 = vmatmul.f32.gmra.mxu0 %v11139_v35  ;;  %v2809_v19 = vld [vmem:[#allocation7 + $0x2178] sm:$0xff]  ;;  %v2611_v0 = vld [vmem:[#allocation7 + $0x1b48] sm:$0xff] }
 0x549   : > { %4848 = vmatmul.f32.gmra.mxu1 %v11140_v1  ;;  %5112 = vmatpush.msrb.mxu3 %v2809_v19  ;;  %v2797_v19 = vld [vmem:[#allocation7 + $0x2118] sm:$0xff] }
 0x54a   : > { %v4529_v33 = vpop.f32.mrf.mxu2  ;;  %5019 = vmatpush.msrb.mxu1 %v2611_v0  ;;  %5067 = vmatpush.msrb.mxu2 %v2701_v29  ;;  %v1928_v29 = vld [vmem:[#allocation7 + $0x5f0] sm:$0xff] }
 0x54b   : > { %v4576_v57 = vpop.f32.mrf.mxu3  ;;  %v4530_v37 = vadd.f32 %v4529_v33, %v4483_v43  ;;  %v2509_v43 = vld [vmem:[#allocation7 + $0x1818] sm:$0xff]  ;;  %5113 = vmatpush.msrb.mxu3 %v2803_v59 }
 0x54c   : > { %4973 = vmatpush.msrb.mxu0 %v2509_v43  ;;  %5020 = vmatpush.msrb.mxu1 %v2605_v40 }
 0x54d   : > { %v10014_v49 = vadd.f32 %v4576_v57, %v4530_v37  ;;  %v4599_v44 = vpop.f32.mrf.mxu0  ;;  %5114 = vmatpush.msrb.mxu3 %v2797_v19  ;;  %5240 = vmatpush.msra.mxu2 %v2024_v48  ;;  %v2018_v19 = vld [vmem:[#allocation7 + $0x8c0] sm:$0xff] }
 0x54e   : > { %v4646_v12 = vpop.f32.mrf.mxu1  ;;  %5193 = vmatpush.msra.mxu1 %v1928_v29  ;;  %v1820_v29 = vld [vmem:[#allocation7 + $0x290] sm:$0xff] }
 0x54f   : > { %11151 = vst [vmem:[#allocation53_spill] sm:$0xff] %v10014_v49  ;;  %4895 = vmatmul.f32.gmra.mxu2 %v11087_v51  ;;  %v4647_v0 = vadd.f32 %v4646_v12, %v4599_v44  ;;  %5287 = vmatpush.msra.mxu3 %v2120_v14  ;;  %v2114_v49 = vld [vmem:[#allocation7 + $0xbc0] sm:$0xff]  ;;  %v2012_v12 = vld [vmem:[#allocation7 + $0x890] sm:$0xff] }
 0x550   : > { %4942 = vmatmul.f32.gmra.mxu3 %v11088_v47  ;;  %4804 = vmatmul.f32.gmra.mxu0 %v11141_v4  ;;  %v1922_v44 = vld [vmem:[#allocation7 + $0x5c0] sm:$0xff] }
 0x551   : > { %4851 = vmatmul.f32.gmra.mxu1 %v11142_v22  ;;  %5241 = vmatpush.msra.mxu2 %v2018_v19  ;;  %v2108_v19 = vld [vmem:[#allocation7 + $0xb90] sm:$0xff] }
 0x552   : > { %v4532_v15 = vpop.f32.mrf.mxu2  ;;  %5288 = vmatpush.msra.mxu3 %v2114_v49  ;;  %5194 = vmatpush.msra.mxu1 %v1922_v44  ;;  %v1814_v49 = vld [vmem:[#allocation7 + $0x260] sm:$0xff] }
 0x553   : > { %v4579_v21 = vpop.f32.mrf.mxu3  ;;  %v4533_v33 = vadd.f32 %v4532_v15, %v4486_v58  ;;  %v1832_v58 = vld [vmem:[#allocation7 + $0x2f0] sm:$0xff]  ;;  %5242 = vmatpush.msra.mxu2 %v2012_v12 }
 0x554   : > { %5146 = vmatpush.msra.mxu0 %v1832_v58  ;;  %5289 = vmatpush.msra.mxu3 %v2108_v19  ;;  %v1808_v19 = vld [vmem:[#allocation7 + $0x230] sm:$0xff] }
 0x555   : > { %v10020_v57 = vadd.f32 %v4579_v21, %v4533_v33  ;;  %v4602_v37 = vpop.f32.mrf.mxu0  ;;  %5195 = vmatpush.msra.mxu1 %v1916_v32  ;;  %5243 = vmatpush.msra.mxu2 %v2006_v34  ;;  %v1904_v34 = vld [vmem:[#allocation7 + $0x530] sm:$0xff]  ;;  %v1994_v32 = vld [vmem:[#allocation7 + $0x800] sm:$0xff] }
 0x556   : > { %v4649_v26 = vpop.f32.mrf.mxu1 }
 0x557   : > { %11152 = vst [vmem:[#allocation90_spill] sm:$0xff] %v10020_v57  ;;  %4898 = vmatmul.f32.gmra.mxu2 %v11092_v27  ;;  %v1826_v57 = vld [vmem:[#allocation7 + $0x2c0] sm:$0xff]  ;;  %v4650_v48 = vadd.f32 %v4649_v26, %v4602_v37 }
 0x558   : > { %4945 = vmatmul.f32.gmra.mxu3 %v11093_v61  ;;  %4807 = vmatmul.f32.gmra.mxu0 %v11094_v52 }
 0x559   : > { %4854 = vmatmul.f32.gmra.mxu1 %v11095_v45  ;;  %5147 = vmatpush.msra.mxu0 %v1826_v57  ;;  %v2102_v57 = vld [vmem:[#allocation7 + $0xb60] sm:$0xff] }
 0x55a   : > { %v4693_v59 = vpop.f32.mrf.mxu2  ;;  %5290 = vmatpush.msra.mxu3 %v2102_v57 }
 0x55b   : > { %v4740_v43 = vpop.f32.mrf.mxu3  ;;  %v4694_v40 = vadd.f32 %v4693_v59, %v4647_v0  ;;  %5148 = vmatpush.msra.mxu0 %v1820_v29  ;;  %v2000_v29 = vld [vmem:[#allocation7 + $0x830] sm:$0xff] }
 0x55c   : > { %5244 = vmatpush.msra.mxu2 %v2000_v29  ;;  %5291 = vmatpush.msra.mxu3 %v2096_v11  ;;  %v1898_v29 = vld [vmem:[#allocation7 + $0x500] sm:$0xff]  ;;  %v1796_v11 = vld [vmem:[#allocation7 + $0x1d0] sm:$0xff] }
 0x55d   : > { %v10026_v15 = vadd.f32 %v4740_v43, %v4694_v40  ;;  %v4605_v21 = vpop.f32.mrf.mxu0  ;;  %5149 = vmatpush.msra.mxu0 %v1814_v49 }
 0x55e   : > { %v4652_v33 = vpop.f32.mrf.mxu1  ;;  %5245 = vmatpush.msra.mxu2 %v1994_v32 }
 0x55f   : > { %4901 = vmatmul.f32.gmra.mxu2 %v11097_v63  ;;  %v4653_v37 = vadd.f32 %v4652_v33, %v4605_v21  ;;  %5150 = vmatpush.msra.mxu0 %v1808_v19 }
 0x560   : > { %4948 = vmatmul.f32.gmra.mxu3 %v11098_v38  ;;  %4810 = vmatmul.f32.gmra.mxu0 %v11099_v8 }
 0x561   : > { %4857 = vmatmul.f32.gmra.mxu1 %v11100_v54  ;;  %5246 = vmatpush.msra.mxu2 %v1988_v16  ;;  %v1886_v16 = vld [vmem:[#allocation7 + $0x4a0] sm:$0xff] }
 0x562   : > { %v4696_v58 = vpop.f32.mrf.mxu2 }
 0x563   : > { %v4743_v14 = vpop.f32.mrf.mxu3  ;;  %v4697_v0 = vadd.f32 %v4696_v58, %v4650_v48 }
 0x565   : > { %v10032_v59 = vadd.f32 %v4743_v14, %v4697_v0  ;;  %v4608_v43 = vpop.f32.mrf.mxu0  ;;  %v1910_v0 = vld [vmem:[#allocation7 + $0x560] sm:$0xff] }
 0x566   : > { %v4655_v40 = vpop.f32.mrf.mxu1  ;;  %5196 = vmatpush.msra.mxu1 %v1910_v0  ;;  %v2090_v0 = vld [vmem:[#allocation7 + $0xb00] sm:$0xff] }
 0x567   : > { %4904 = vmatmul.f32.gmra.mxu2 %v9225_v28  ;;  %v4656_v21 = vadd.f32 %v4655_v40, %v4608_v43  ;;  %5292 = vmatpush.msra.mxu3 %v2090_v0  ;;  %v2084_v43 = vld [vmem:[#allocation7 + $0xad0] sm:$0xff]  ;;  %v1790_v0 = vld [vmem:[#allocation7 + $0x1a0] sm:$0xff] }
 0x568   : > { %4951 = vmatmul.f32.gmra.mxu3 %v9227_v56  ;;  %4813 = vmatmul.f32.gmra.mxu0 %v9339_v31  ;;  %v1892_v40 = vld [vmem:[#allocation7 + $0x4d0] sm:$0xff] }
 0x569   : > { %4860 = vmatmul.f32.gmra.mxu1 %v9341_v6  ;;  %5293 = vmatpush.msra.mxu3 %v2084_v43 }
 0x56a   : > { %v4699_v26 = vpop.f32.mrf.mxu2  ;;  %5197 = vmatpush.msra.mxu1 %v1904_v34 }
 0x56b   : > { %v4746_v44 = vpop.f32.mrf.mxu3  ;;  %v4700_v12 = vadd.f32 %v4699_v26, %v4653_v37  ;;  %5294 = vmatpush.msra.mxu3 %v2078_v53  ;;  %v1778_v53 = vld [vmem:[#allocation7 + $0x140] sm:$0xff] }
 0x56c   : > { %5198 = vmatpush.msra.mxu1 %v1898_v29 }
 0x56d   : > { %v10038_v48 = vadd.f32 %v4746_v44, %v4700_v12  ;;  %v4611_v58 = vpop.f32.mrf.mxu0  ;;  %v1802_v12 = vld [vmem:[#allocation7 + $0x200] sm:$0xff] }
 0x56e   : > { %v4658_v14 = vpop.f32.mrf.mxu1  ;;  %5151 = vmatpush.msra.mxu0 %v1802_v12  ;;  %5199 = vmatpush.msra.mxu1 %v1892_v40  ;;  %v1982_v12 = vld [vmem:[#allocation7 + $0x7a0] sm:$0xff] }
 0x56f   : > { %4907 = vmatmul.f32.gmra.mxu2 %v9357_v36  ;;  %v4659_v19 = vadd.f32 %v4658_v14, %v4611_v58  ;;  %v1976_v58 = vld [vmem:[#allocation7 + $0x770] sm:$0xff] }
 0x570   : > { %4954 = vmatmul.f32.gmra.mxu3 %v9359_v3  ;;  %4974 = vmatmul.f32.vlgmr.msrb.gmra.mxu0 %v11069_v25  ;;  %v1784_v14 = vld [vmem:[#allocation7 + $0x170] sm:$0xff] }
 0x571   : > { %5021 = vmatmul.f32.vlgmr.msrb.gmra.mxu1 %v11070_v20  ;;  %5152 = vmatpush.msra.mxu0 %v1796_v11  ;;  %v2072_v11 = vld [vmem:[#allocation7 + $0xa70] sm:$0xff] }
 0x572   : > { %v4702_v33 = vpop.f32.mrf.mxu2  ;;  %5247 = vmatpush.msra.mxu2 %v1982_v12  ;;  %5200 = vmatpush.msra.mxu1 %v1886_v16  ;;  %v1880_v12 = vld [vmem:[#allocation7 + $0x470] sm:$0xff] }
 0x573   : > { %v4749_v49 = vpop.f32.mrf.mxu3  ;;  %v4703_v57 = vadd.f32 %v4702_v33, %v4656_v21  ;;  %5153 = vmatpush.msra.mxu0 %v1790_v0  ;;  %5295 = vmatpush.msra.mxu3 %v2072_v11  ;;  %v1970_v0 = vld [vmem:[#allocation7 + $0x740] sm:$0xff] }
 0x574   : > { %5248 = vmatpush.msra.mxu2 %v1976_v58  ;;  %5201 = vmatpush.msra.mxu1 %v1880_v12  ;;  %v1964_v58 = vld [vmem:[#allocation7 + $0x710] sm:$0xff] }
 0x575   : > { %v10044_v37 = vadd.f32 %v4749_v49, %v4703_v57  ;;  %v4614_v26 = vpop.f32.mrf.mxu0  ;;  %5154 = vmatpush.msra.mxu0 %v1784_v14  ;;  %v1772_v12 = vld [vmem:[#allocation7 + $0x110] sm:$0xff] }
 0x576   : > { %v4661_v44 = vpop.f32.mrf.mxu1  ;;  %5249 = vmatpush.msra.mxu2 %v1970_v0  ;;  %v2060_v0 = vld [vmem:[#allocation7 + $0xa10] sm:$0xff] }
 0x577   : > { %5068 = vmatmul.f32.vlgmr.msrb.gmra.mxu2 %v9011_v55  ;;  %v4662_v29 = vadd.f32 %v4661_v44, %v4614_v26  ;;  %v2066_v26 = vld [vmem:[#allocation7 + $0xa40] sm:$0xff]  ;;  %5155 = vmatpush.msra.mxu0 %v1778_v53 }
 0x578   : > { %5115 = vmatmul.f32.vlgmr.msrb.gmra.mxu3 %v11071_v41  ;;  %4977 = vmatmul.f32.gmra.mxu0 %v11072_v46  ;;  %v1874_v44 = vld [vmem:[#allocation7 + $0x440] sm:$0xff] }
 0x579   : > { %5024 = vmatmul.f32.gmra.mxu1 %v9049_v39  ;;  %5296 = vmatpush.msra.mxu3 %v2066_v26  ;;  %v2054_v53 = vld [vmem:[#allocation7 + $0x9e0] sm:$0xff] }
 0x57a   : > { %v4705_v34 = vpop.f32.mrf.mxu2  ;;  %5202 = vmatpush.msra.mxu1 %v1874_v44  ;;  %5250 = vmatpush.msra.mxu2 %v1964_v58 }
 0x57b   : > { %v4752_v32 = vpop.f32.mrf.mxu3  ;;  %v4706_v21 = vadd.f32 %v4705_v34, %v4659_v19  ;;  %5156 = vmatpush.msra.mxu0 %v1772_v12  ;;  %5297 = vmatpush.msra.mxu3 %v2060_v0  ;;  %v1862_v12 = vld [vmem:[#allocation7 + $0x3e0] sm:$0xff]  ;;  %v1952_v0 = vld [vmem:[#allocation7 + $0x6b0] sm:$0xff] }
 0x57d   : > { %v10050_v33 = vadd.f32 %v4752_v32, %v4706_v21  ;;  %v4617_v49 = vpop.f32.mrf.mxu0  ;;  %5298 = vmatpush.msra.mxu3 %v2054_v53 }
 0x57e   : > { %v4664_v57 = vpop.f32.mrf.mxu1 }
 0x57f   : > { %5071 = vmatmul.f32.gmra.mxu2 %v11073_v13  ;;  %v4665_v16 = vadd.f32 %v4664_v57, %v4617_v49  ;;  %v1958_v49 = vld [vmem:[#allocation7 + $0x6e0] sm:$0xff] }
 0x580   : > { %5118 = vmatmul.f32.gmra.mxu3 %v11074_v30  ;;  %4980 = vmatmul.f32.gmra.mxu0 %v11075_v62  ;;  %v1766_v57 = vld [vmem:[#allocation7 + $0xe0] sm:$0xff] }
 0x581   : > { %5027 = vmatmul.f32.gmra.mxu1 %v11076_v23  ;;  %5251 = vmatpush.msra.mxu2 %v1958_v49 }
 0x582   : > { %v4708_v43 = vpop.f32.mrf.mxu2  ;;  %5157 = vmatpush.msra.mxu0 %v1766_v57 }
 0x583   : > { %v4755_v40 = vpop.f32.mrf.mxu3  ;;  %v4709_v19 = vadd.f32 %v4708_v43, %v4662_v29  ;;  %5252 = vmatpush.msra.mxu2 %v1952_v0  ;;  %v2042_v0 = vld [vmem:[#allocation7 + $0x980] sm:$0xff] }
 0x585   : > { %v10056_v34 = vadd.f32 %v4755_v40, %v4709_v19  ;;  %v4620_v32 = vpop.f32.mrf.mxu0 }
 0x586   : > { %v4667_v21 = vpop.f32.mrf.mxu1 }
 0x587   : > { %5074 = vmatmul.f32.gmra.mxu2 %v11079_v7  ;;  %v4668_v26 = vadd.f32 %v4667_v21, %v4620_v32  ;;  %v1946_v32 = vld [vmem:[#allocation7 + $0x680] sm:$0xff] }
 0x588   : > { %5121 = vmatmul.f32.gmra.mxu3 %v11080_v24  ;;  %4983 = vmatmul.f32.gmra.mxu0 %v11081_v50 }
 0x589   : > { %5030 = vmatmul.f32.gmra.mxu1 %v11138_v42  ;;  %v1868_v42 = vld [vmem:[#allocation7 + $0x410] sm:$0xff]  ;;  %5253 = vmatpush.msra.mxu2 %v1946_v32  ;;  %v1838_v32 = vld [vmem:[#allocation7 + $0x320] sm:$0xff] }
 0x58a   : > { %v4711_v14 = vpop.f32.mrf.mxu2  ;;  %5203 = vmatpush.msra.mxu1 %v1868_v42  ;;  %v1856_v42 = vld [vmem:[#allocation7 + $0x3b0] sm:$0xff] }
 0x58b   : > { %v4758_v29 = vpop.f32.mrf.mxu3  ;;  %v4712_v11 = vadd.f32 %v4711_v14, %v4665_v16 }
 0x58c   : > { %5204 = vmatpush.msra.mxu1 %v1862_v12 }
 0x58d   : > { %v10062_v43 = vadd.f32 %v4758_v29, %v4712_v11  ;;  %v4623_v40 = vpop.f32.mrf.mxu0 }
 0x58e   : > { %v4670_v19 = vpop.f32.mrf.mxu1  ;;  %5205 = vmatpush.msra.mxu1 %v1856_v42  ;;  %v1742_v42 = vld [vmem:[#allocation7 + $0x20] sm:$0xff] }
 0x58f   : > { %5077 = vmatmul.f32.gmra.mxu2 %v11083_v10  ;;  %v4671_v21 = vadd.f32 %v4670_v19, %v4623_v40  ;;  %v2036_v19 = vld [vmem:[#allocation7 + $0x950] sm:$0xff] }
 0x590   : > { %5124 = vmatmul.f32.gmra.mxu3 %v11084_v2  ;;  %4986 = vmatmul.f32.gmra.mxu0 %v11139_v35  ;;  %v2048_v35 = vld [vmem:[#allocation7 + $0x9b0] sm:$0xff] }
 0x591   : > { %5033 = vmatmul.f32.gmra.mxu1 %v11140_v1  ;;  %v1760_v1 = vld [vmem:[#allocation7 + $0xb0] sm:$0xff]  ;;  %5299 = vmatpush.msra.mxu3 %v2048_v35 }
 0x592   : > { %v4714_v44 = vpop.f32.mrf.mxu2  ;;  %5158 = vmatpush.msra.mxu0 %v1760_v1  ;;  %v1748_v35 = vld [vmem:[#allocation7 + $0x50] sm:$0xff] }
 0x593   : > { %v4761_v16 = vpop.f32.mrf.mxu3  ;;  %v4715_v58 = vadd.f32 %v4714_v44, %v4668_v26  ;;  %v1754_v26 = vld [vmem:[#allocation7 + $0x80] sm:$0xff]  ;;  %5300 = vmatpush.msra.mxu3 %v2042_v0  ;;  %v1844_v1 = vld [vmem:[#allocation7 + $0x350] sm:$0xff] }
 0x594   : > { %v1850_v44 = vld [vmem:[#allocation7 + $0x380] sm:$0xff]  ;;  %5159 = vmatpush.msra.mxu0 %v1754_v26  ;;  %v2504_v0 = vld [vmem:[#allocation7 + $0x17f0] sm:$0xff] }
 0x595   : > { %v10068_v14 = vadd.f32 %v4761_v16, %v4715_v58  ;;  %v4626_v29 = vpop.f32.mrf.mxu0  ;;  %5206 = vmatpush.msra.mxu1 %v1850_v44  ;;  %5301 = vmatpush.msra.mxu3 %v2036_v19  ;;  %v1934_v26 = vld [vmem:[#allocation7 + $0x620] sm:$0xff] }
 0x596   : > { %v4673_v11 = vpop.f32.mrf.mxu1  ;;  %5160 = vmatpush.msra.mxu0 %v1748_v35  ;;  %v2030_v44 = vld [vmem:[#allocation7 + $0x920] sm:$0xff] }
 0x597   : > { %5080 = vmatmul.f32.gmra.mxu2 %v11087_v51  ;;  %5207 = vmatpush.msra.mxu1 %v1844_v1 }
 0x598   : > { %5127 = vmatmul.f32.gmra.mxu3 %v11088_v47  ;;  %4989 = vmatmul.f32.gmra.mxu0 %v11141_v4 }
 0x599   : > { %5036 = vmatmul.f32.gmra.mxu1 %v11142_v22  ;;  %v1940_v22 = vld [vmem:[#allocation7 + $0x650] sm:$0xff]  ;;  %5161 = vmatpush.msra.mxu0 %v1742_v42 }
 0x59a   : > { %v4717_v49 = vpop.f32.mrf.mxu2  ;;  %5254 = vmatpush.msra.mxu2 %v1940_v22  ;;  %5208 = vmatpush.msra.mxu1 %v1838_v32 }
 0x59b   : > { %v4764_v57 = vpop.f32.mrf.mxu3  ;;  %v4718_v53 = vadd.f32 %v4717_v49, %v4671_v21  ;;  %v4674_v21 = vadd.f32 %v4673_v11, %v4626_v29  ;;  %5302 = vmatpush.msra.mxu3 %v2030_v44  ;;  %v2408_v11 = vld [vmem:[#allocation7 + $0x14f0] sm:$0xff] }
 0x59c   : > { %5255 = vmatpush.msra.mxu2 %v1934_v26  ;;  %v2396_v26 = vld [vmem:[#allocation7 + $0x1490] sm:$0xff] }
 0x59d   : > { %v10074_v16 = vadd.f32 %v4764_v57, %v4718_v53  ;;  %v4787_v58 = vpop.f32.mrf.mxu0  ;;  %5475 = vmatpush.msrb.mxu3 %v2504_v0 }
 0x59e   : > { %v4834_v12 = vpop.f32.mrf.mxu1  ;;  %v4788_v4 = vadd.f32 %v4787_v58, %v10026_v15  ;;  %5428 = vmatpush.msrb.mxu2 %v2408_v11 }
 0x59f   : > { %5083 = vmatmul.f32.gmra.mxu2 %v11092_v27 }
 0x5a0   : > { %5130 = vmatmul.f32.gmra.mxu3 %v11093_v61  ;;  %v4835_v40 = vadd.f32 %v4834_v12, %v4788_v4  ;;  %4992 = vmatmul.f32.gmra.mxu0 %v11094_v52  ;;  %v2216_v12 = vld [vmem:[#allocation7 + $0xef0] sm:$0xff] }
 0x5a1   : > { %5039 = vmatmul.f32.gmra.mxu1 %v11095_v45  ;;  %5334 = vmatpush.msrb.mxu0 %v2216_v12 }
 0x5a2   : > { %v4720_v15 = vpop.f32.mrf.mxu2 }
 0x5a3   : > { %v4767_v49 = vpop.f32.mrf.mxu3  ;;  %v4721_v22 = vadd.f32 %v4720_v15, %v4674_v21  ;;  %v2312_v21 = vld [vmem:[#allocation7 + $0x11f0] sm:$0xff]  ;;  %v2402_v15 = vld [vmem:[#allocation7 + $0x14c0] sm:$0xff] }
 0x5a4   : > { %5381 = vmatpush.msrb.mxu1 %v2312_v21  ;;  %5429 = vmatpush.msrb.mxu2 %v2402_v15  ;;  %v11153_v21 = vld [vmem:[#allocation69_spill] sm:$0xff]  ;;  %v2198_v15 = vld [vmem:[#allocation7 + $0xe60] sm:$0xff] }
 0x5a5   : > { %v10081_v57 = vadd.f32 %v4767_v49, %v4721_v22  ;;  %v4790_v53 = vpop.f32.mrf.mxu0 }
 0x5a6   : > { %v4837_v4 = vpop.f32.mrf.mxu1  ;;  %v4791_v58 = vadd.f32 %v4790_v53, %v10032_v59  ;;  %v2498_v53 = vld [vmem:[#allocation7 + $0x17c0] sm:$0xff]  ;;  %5430 = vmatpush.msrb.mxu2 %v2396_v26 }
 0x5a7   : > { %5086 = vmatmul.f32.gmra.mxu2 %v11097_v63  ;;  %5476 = vmatpush.msrb.mxu3 %v2498_v53 }
 0x5a8   : > { %5133 = vmatmul.f32.gmra.mxu3 %v11098_v38  ;;  %v4838_v29 = vadd.f32 %v4837_v4, %v4791_v58  ;;  %4995 = vmatmul.f32.gmra.mxu0 %v11099_v8  ;;  %v2306_v4 = vld [vmem:[#allocation7 + $0x11c0] sm:$0xff] }
 0x5a9   : > { %5042 = vmatmul.f32.gmra.mxu1 %v11100_v54 }
 0x5aa   : > { %v4881_v35 = vpop.f32.mrf.mxu2  ;;  %5382 = vmatpush.msrb.mxu1 %v2306_v4 }
 0x5ab   : > { %v4928_v1 = vpop.f32.mrf.mxu3  ;;  %v4882_v59 = vadd.f32 %v4881_v35, %v4835_v40  ;;  %v2210_v40 = vld [vmem:[#allocation7 + $0xec0] sm:$0xff]  ;;  %v2204_v35 = vld [vmem:[#allocation7 + $0xe90] sm:$0xff] }
 0x5ac   : > { %5335 = vmatpush.msrb.mxu0 %v2210_v40 }
 0x5ad   : > { %v10088_v19 = vadd.f32 %v4928_v1, %v4882_v59  ;;  %v4793_v42 = vpop.f32.mrf.mxu0  ;;  %v2492_v1 = vld [vmem:[#allocation7 + $0x1790] sm:$0xff] }
 0x5ae   : > { %v4840_v32 = vpop.f32.mrf.mxu1  ;;  %v4794_v49 = vadd.f32 %v4793_v42, %v10038_v48  ;;  %5336 = vmatpush.msrb.mxu0 %v2204_v35  ;;  %5477 = vmatpush.msrb.mxu3 %v2492_v1  ;;  %v2300_v42 = vld [vmem:[#allocation7 + $0x1190] sm:$0xff] }
 0x5af   : > { %5089 = vmatmul.f32.gmra.mxu2 %v9225_v28  ;;  %5383 = vmatpush.msrb.mxu1 %v2300_v42  ;;  %v2480_v35 = vld [vmem:[#allocation7 + $0x1730] sm:$0xff] }
 0x5b0   : > { %5136 = vmatmul.f32.gmra.mxu3 %v9227_v56  ;;  %v4841_v22 = vadd.f32 %v4840_v32, %v4794_v49  ;;  %4998 = vmatmul.f32.gmra.mxu0 %v9339_v31  ;;  %v2486_v49 = vld [vmem:[#allocation7 + $0x1760] sm:$0xff]  ;;  %v11154_v1 = vld [vmem:[#allocation70_spill] sm:$0xff] }
 0x5b1   : > { %5045 = vmatmul.f32.gmra.mxu1 %v9341_v6  ;;  %5337 = vmatpush.msrb.mxu0 %v2198_v15  ;;  %v2288_v15 = vld [vmem:[#allocation7 + $0x1130] sm:$0xff] }
 0x5b2   : > { %v4884_v44 = vpop.f32.mrf.mxu2  ;;  %5478 = vmatpush.msrb.mxu3 %v2486_v49  ;;  %v2378_v49 = vld [vmem:[#allocation7 + $0x1400] sm:$0xff] }
 0x5b3   : > { %v4931_v58 = vpop.f32.mrf.mxu3  ;;  %v4885_v48 = vadd.f32 %v4884_v44, %v4838_v29  ;;  %v2390_v29 = vld [vmem:[#allocation7 + $0x1460] sm:$0xff] }
 0x5b4   : > { %5431 = vmatpush.msrb.mxu2 %v2390_v29  ;;  %v11156_v29 = vld [vmem:[#allocation104_spill] sm:$0xff]  ;;  %5479 = vmatpush.msrb.mxu3 %v2480_v35 }
 0x5b5   : > { %v10095_v11 = vadd.f32 %v4931_v58, %v4885_v48  ;;  %v4796_v12 = vpop.f32.mrf.mxu0  ;;  %v2294_v58 = vld [vmem:[#allocation7 + $0x1160] sm:$0xff]  ;;  %v2384_v48 = vld [vmem:[#allocation7 + $0x1430] sm:$0xff] }
 0x5b6   : > { %v4843_v0 = vpop.f32.mrf.mxu1  ;;  %v4797_v59 = vadd.f32 %v4796_v12, %v10044_v37  ;;  %5384 = vmatpush.msrb.mxu1 %v2294_v58  ;;  %5432 = vmatpush.msrb.mxu2 %v2384_v48  ;;  %v2186_v48 = vld [vmem:[#allocation7 + $0xe00] sm:$0xff] }
 0x5b7   : > { %5092 = vmatmul.f32.gmra.mxu2 %v9357_v36 }
 0x5b8   : > { %5139 = vmatmul.f32.gmra.mxu3 %v9359_v3  ;;  %v4844_v32 = vadd.f32 %v4843_v0, %v4797_v59  ;;  %5001 = vmatmul.f32.gmra.mxu0 %v9471_v60  ;;  %v2192_v0 = vld [vmem:[#allocation7 + $0xe30] sm:$0xff]  ;;  %v11155_v59 = vld [vmem:[#allocation67_spill] sm:$0xff] }
 0x5b9   : > { %5048 = vmatmul.f32.gmra.mxu1 %v11153_v21  ;;  %5338 = vmatpush.msrb.mxu0 %v2192_v0  ;;  %v11159_v0 = vld [vmem:[#allocation107_spill] sm:$0xff] }
 0x5ba   : > { %v4887_v40 = vpop.f32.mrf.mxu2  ;;  %5385 = vmatpush.msrb.mxu1 %v2288_v15  ;;  %5433 = vmatpush.msrb.mxu2 %v2378_v49  ;;  %v2468_v15 = vld [vmem:[#allocation7 + $0x16d0] sm:$0xff]  ;;  %v2318_v21 = vld [vmem:[#allocation7 + $0x1220] sm:$0xff] }
 0x5bb   : > { %v4934_v53 = vpop.f32.mrf.mxu3  ;;  %v4888_v37 = vadd.f32 %v4887_v40, %v4841_v22  ;;  %v11157_v22 = vld [vmem:[#allocation105_spill] sm:$0xff]  ;;  %5339 = vmatpush.msrb.mxu0 %v2186_v48  ;;  %v2174_v48 = vld [vmem:[#allocation7 + $0xda0] sm:$0xff] }
 0x5bc   : > { %v2276_v49 = vld [vmem:[#allocation7 + $0x10d0] sm:$0xff]  ;;  %v2414_v60 = vld [vmem:[#allocation7 + $0x1520] sm:$0xff] }
 0x5bd   : > { %v10102_v4 = vadd.f32 %v4934_v53, %v4888_v37  ;;  %v4799_v26 = vpop.f32.mrf.mxu0 }
 0x5be   : > { %v4846_v44 = vpop.f32.mrf.mxu1  ;;  %v4800_v12 = vadd.f32 %v4799_v26, %v10050_v33 }
 0x5bf   : > { %5095 = vmatmul.f32.gmra.mxu2 %v11154_v1 }
 0x5c0   : > { %5142 = vmatmul.f32.gmra.mxu3 %v11155_v59  ;;  %v4847_v42 = vadd.f32 %v4846_v44, %v4800_v12  ;;  %5162 = vmatmul.f32.vlgmr.msra.gmra.mxu0 %v11156_v29  ;;  %v2474_v59 = vld [vmem:[#allocation7 + $0x1700] sm:$0xff]  ;;  %v11158_v29 = vld [vmem:[#allocation106_spill] sm:$0xff] }
 0x5c1   : > { %5209 = vmatmul.f32.vlgmr.msra.gmra.mxu1 %v11157_v22  ;;  %5480 = vmatpush.msrb.mxu3 %v2474_v59  ;;  %v2282_v12 = vld [vmem:[#allocation7 + $0x1100] sm:$0xff]  ;;  %v2372_v22 = vld [vmem:[#allocation7 + $0x13d0] sm:$0xff] }
 0x5c2   : > { %v4890_v40 = vpop.f32.mrf.mxu2  ;;  %5386 = vmatpush.msrb.mxu1 %v2282_v12  ;;  %5434 = vmatpush.msrb.mxu2 %v2372_v22  ;;  %v2360_v12 = vld [vmem:[#allocation7 + $0x1370] sm:$0xff] }
 0x5c3   : > { %v4937_v53 = vpop.f32.mrf.mxu3  ;;  %v4891_v33 = vadd.f32 %v4890_v40, %v4844_v32  ;;  %v2180_v32 = vld [vmem:[#allocation7 + $0xdd0] sm:$0xff]  ;;  %5481 = vmatpush.msrb.mxu3 %v2468_v15 }
 0x5c4   : > { %5340 = vmatpush.msrb.mxu0 %v2180_v32  ;;  %5387 = vmatpush.msrb.mxu1 %v2276_v49  ;;  %v2168_v32 = vld [vmem:[#allocation7 + $0xd70] sm:$0xff] }
 0x5c5   : > { %v10109_v37 = vadd.f32 %v4937_v53, %v4891_v33  ;;  %v4802_v26 = vpop.f32.mrf.mxu0  ;;  %v2456_v15 = vld [vmem:[#allocation7 + $0x1670] sm:$0xff] }
 0x5c6   : > { %v4849_v58 = vpop.f32.mrf.mxu1  ;;  %v4803_v44 = vadd.f32 %v4802_v26, %v10056_v34  ;;  %5341 = vmatpush.msrb.mxu0 %v2174_v48 }
 0x5c7   : > { %5256 = vmatmul.f32.vlgmr.msra.gmra.mxu2 %v11158_v29  ;;  %v2420_v29 = vld [vmem:[#allocation7 + $0x1550] sm:$0xff] }
 0x5c8   : > { %5303 = vmatmul.f32.vlgmr.msra.gmra.mxu3 %v11159_v0  ;;  %v4850_v35 = vadd.f32 %v4849_v58, %v4803_v44  ;;  %5165 = vmatmul.f32.gmra.mxu0 %v11065_v9  ;;  %v2366_v58 = vld [vmem:[#allocation7 + $0x13a0] sm:$0xff] }
 0x5c9   : > { %5212 = vmatmul.f32.gmra.mxu1 %v11066_v17  ;;  %5435 = vmatpush.msrb.mxu2 %v2366_v58  ;;  %v2462_v0 = vld [vmem:[#allocation7 + $0x16a0] sm:$0xff] }
 0x5ca   : > { %v4893_v40 = vpop.f32.mrf.mxu2  ;;  %5482 = vmatpush.msrb.mxu3 %v2462_v0  ;;  %5342 = vmatpush.msrb.mxu0 %v2168_v32  ;;  %v2354_v58 = vld [vmem:[#allocation7 + $0x1340] sm:$0xff] }
 0x5cb   : > { %v4940_v34 = vpop.f32.mrf.mxu3  ;;  %v4894_v59 = vadd.f32 %v4893_v40, %v4847_v42  ;;  %v2270_v42 = vld [vmem:[#allocation7 + $0x10a0] sm:$0xff]  ;;  %5436 = vmatpush.msrb.mxu2 %v2360_v12  ;;  %v2348_v12 = vld [vmem:[#allocation7 + $0x1310] sm:$0xff] }
 0x5cc   : > { %5388 = vmatpush.msrb.mxu1 %v2270_v42  ;;  %5483 = vmatpush.msrb.mxu3 %v2456_v15  ;;  %v2258_v42 = vld [vmem:[#allocation7 + $0x1040] sm:$0xff] }
 0x5cd   : > { %v10116_v53 = vadd.f32 %v4940_v34, %v4894_v59  ;;  %v4805_v33 = vpop.f32.mrf.mxu0  ;;  %5437 = vmatpush.msrb.mxu2 %v2354_v58  ;;  %v2252_v58 = vld [vmem:[#allocation7 + $0x1010] sm:$0xff] }
 0x5ce   : > { %v4852_v26 = vpop.f32.mrf.mxu1  ;;  %v4806_v44 = vadd.f32 %v4805_v33, %v10062_v43 }
 0x5cf   : > { %5259 = vmatmul.f32.gmra.mxu2 %v11067_v18 }
 0x5d0   : > { %5306 = vmatmul.f32.gmra.mxu3 %v11068_v5  ;;  %v4853_v22 = vadd.f32 %v4852_v26, %v4806_v44  ;;  %5168 = vmatmul.f32.gmra.mxu0 %v11069_v25  ;;  %v2264_v26 = vld [vmem:[#allocation7 + $0x1070] sm:$0xff]  ;;  %v2450_v44 = vld [vmem:[#allocation7 + $0x1640] sm:$0xff] }
 0x5d1   : > { %5215 = vmatmul.f32.gmra.mxu1 %v11070_v20  ;;  %5484 = vmatpush.msrb.mxu3 %v2450_v44  ;;  %v2438_v44 = vld [vmem:[#allocation7 + $0x15e0] sm:$0xff] }
 0x5d2   : > { %v4896_v49 = vpop.f32.mrf.mxu2  ;;  %5389 = vmatpush.msrb.mxu1 %v2264_v26  ;;  %5438 = vmatpush.msrb.mxu2 %v2348_v12  ;;  %v2444_v26 = vld [vmem:[#allocation7 + $0x1610] sm:$0xff] }
 0x5d3   : > { %v4943_v43 = vpop.f32.mrf.mxu3  ;;  %v4897_v40 = vadd.f32 %v4896_v49, %v4850_v35  ;;  %v2162_v35 = vld [vmem:[#allocation7 + $0xd40] sm:$0xff]  ;;  %5485 = vmatpush.msrb.mxu3 %v2444_v26  ;;  %v2240_v26 = vld [vmem:[#allocation7 + $0xfb0] sm:$0xff] }
 0x5d4   : > { %5343 = vmatpush.msrb.mxu0 %v2162_v35  ;;  %5390 = vmatpush.msrb.mxu1 %v2258_v42  ;;  %v2342_v35 = vld [vmem:[#allocation7 + $0x12e0] sm:$0xff] }
 0x5d5   : > { %v10123_v34 = vadd.f32 %v4943_v43, %v4897_v40  ;;  %v4808_v59 = vpop.f32.mrf.mxu0  ;;  %5439 = vmatpush.msrb.mxu2 %v2342_v35  ;;  %5486 = vmatpush.msrb.mxu3 %v2438_v44  ;;  %v2138_v44 = vld [vmem:[#allocation7 + $0xc80] sm:$0xff] }
 0x5d6   : > { %v4855_v33 = vpop.f32.mrf.mxu1  ;;  %v4809_v48 = vadd.f32 %v4808_v59, %v10068_v14  ;;  %5391 = vmatpush.msrb.mxu1 %v2252_v58 }
 0x5d7   : > { %5262 = vmatmul.f32.gmra.mxu2 %v9011_v55 }
 0x5d8   : > { %5309 = vmatmul.f32.gmra.mxu3 %v11071_v41  ;;  %v4856_v0 = vadd.f32 %v4855_v33, %v4809_v48  ;;  %5171 = vmatmul.f32.gmra.mxu0 %v11072_v46  ;;  %v2156_v33 = vld [vmem:[#allocation7 + $0xd10] sm:$0xff] }
 0x5d9   : > { %5218 = vmatmul.f32.gmra.mxu1 %v9049_v39  ;;  %5344 = vmatpush.msrb.mxu0 %v2156_v33  ;;  %v11160_v33 = vld [vmem:[#allocation37_spill] sm:$0xff] }
 0x5da   : > { %v4899_v32 = vpop.f32.mrf.mxu2 }
 0x5db   : > { %v4946_v15 = vpop.f32.mrf.mxu3  ;;  %v4900_v14 = vadd.f32 %v4899_v32, %v4853_v22  ;;  %v2150_v22 = vld [vmem:[#allocation7 + $0xce0] sm:$0xff] }
 0x5dc   : > { %5345 = vmatpush.msrb.mxu0 %v2150_v22 }
 0x5dd   : > { %v10130_v49 = vadd.f32 %v4946_v15, %v4900_v14  ;;  %v4811_v43 = vpop.f32.mrf.mxu0 }
 0x5de   : > { %v4858_v40 = vpop.f32.mrf.mxu1  ;;  %v4812_v59 = vadd.f32 %v4811_v43, %v10074_v16 }
 0x5df   : > { %5265 = vmatmul.f32.gmra.mxu2 %v11073_v13 }
 0x5e0   : > { %5312 = vmatmul.f32.gmra.mxu3 %v11074_v30  ;;  %v4859_v48 = vadd.f32 %v4858_v40, %v4812_v59  ;;  %5174 = vmatmul.f32.gmra.mxu0 %v11075_v62  ;;  %v2246_v40 = vld [vmem:[#allocation7 + $0xfe0] sm:$0xff] }
 0x5e1   : > { %5221 = vmatmul.f32.gmra.mxu1 %v11076_v23 }
 0x5e2   : > { %v4902_v42 = vpop.f32.mrf.mxu2  ;;  %5392 = vmatpush.msrb.mxu1 %v2246_v40  ;;  %v2330_v40 = vld [vmem:[#allocation7 + $0x1280] sm:$0xff] }
 0x5e3   : > { %v4949_v12 = vpop.f32.mrf.mxu3  ;;  %v4903_v16 = vadd.f32 %v4902_v42, %v4856_v0  ;;  %v2144_v0 = vld [vmem:[#allocation7 + $0xcb0] sm:$0xff] }
 0x5e4   : > { %5346 = vmatpush.msrb.mxu0 %v2144_v0  ;;  %5393 = vmatpush.msrb.mxu1 %v2240_v26  ;;  %v2132_v0 = vld [vmem:[#allocation7 + $0xc50] sm:$0xff] }
 0x5e5   : > { %v10137_v32 = vadd.f32 %v4949_v12, %v4903_v16  ;;  %v4814_v15 = vpop.f32.mrf.mxu0  ;;  %v2228_v26 = vld [vmem:[#allocation7 + $0xf50] sm:$0xff] }
 0x5e6   : > { %v4861_v14 = vpop.f32.mrf.mxu1  ;;  %v4815_v43 = vadd.f32 %v4814_v15, %v10081_v57  ;;  %v2234_v57 = vld [vmem:[#allocation7 + $0xf80] sm:$0xff]  ;;  %5347 = vmatpush.msrb.mxu0 %v2138_v44  ;;  %v2336_v15 = vld [vmem:[#allocation7 + $0x12b0] sm:$0xff] }
 0x5e7   : > { %5268 = vmatmul.f32.gmra.mxu2 %v11079_v7  ;;  %5394 = vmatpush.msrb.mxu1 %v2234_v57  ;;  %v2324_v44 = vld [vmem:[#allocation7 + $0x1250] sm:$0xff]  ;;  %v2222_v57 = vld [vmem:[#allocation7 + $0xf20] sm:$0xff] }
 0x5e8   : > { %5315 = vmatmul.f32.gmra.mxu3 %v11080_v24  ;;  %v4862_v59 = vadd.f32 %v4861_v14, %v4815_v43  ;;  %5177 = vmatmul.f32.gmra.mxu0 %v11081_v50  ;;  %v2432_v14 = vld [vmem:[#allocation7 + $0x15b0] sm:$0xff] }
 0x5e9   : > { %5224 = vmatmul.f32.gmra.mxu1 %v11160_v33  ;;  %5440 = vmatpush.msrb.mxu2 %v2336_v15 }
 0x5ea   : > { %v4905_v58 = vpop.f32.mrf.mxu2  ;;  %5487 = vmatpush.msrb.mxu3 %v2432_v14  ;;  %5348 = vmatpush.msrb.mxu0 %v2132_v0 }
 0x5eb   : > { %v4952_v35 = vpop.f32.mrf.mxu3  ;;  %v4906_v22 = vadd.f32 %v4905_v58, %v4859_v48  ;;  %v2426_v48 = vld [vmem:[#allocation7 + $0x1580] sm:$0xff]  ;;  %5441 = vmatpush.msrb.mxu2 %v2330_v40  ;;  %5395 = vmatpush.msrb.mxu1 %v2228_v26 }
 0x5ec   : > { %5488 = vmatpush.msrb.mxu3 %v2426_v48 }
 0x5ed   : > { %v10144_v42 = vadd.f32 %v4952_v35, %v4906_v22  ;;  %v4975_v12 = vpop.f32.mrf.mxu0  ;;  %v11161_v35 = vld [vmem:[#allocation40_spill] sm:$0xff]  ;;  %v11162_v22 = vld [vmem:[#allocation102_spill] sm:$0xff]  ;;  %5442 = vmatpush.msrb.mxu2 %v2324_v44  ;;  %5396 = vmatpush.msrb.mxu1 %v2222_v57 }
 0x5ee   : > { %v5022_v16 = vpop.f32.mrf.mxu1  ;;  %v4976_v43 = vadd.f32 %v4975_v12, %v10088_v19  ;;  %v2126_v19 = vld [vmem:[#allocation7 + $0xc20] sm:$0xff]  ;;  %5489 = vmatpush.msrb.mxu3 %v2420_v29 }
 0x5ef   : > { %5271 = vmatmul.f32.gmra.mxu2 %v11083_v10  ;;  %5349 = vmatpush.msrb.mxu0 %v2126_v19  ;;  %v11164_v29 = vld [vmem:[#allocation35_spill] sm:$0xff] }
 0x5f0   : > { %5318 = vmatmul.f32.gmra.mxu3 %v11084_v2  ;;  %v5023_v58 = vadd.f32 %v5022_v16, %v4976_v43  ;;  %5180 = vmatmul.f32.gmra.mxu0 %v11161_v35 }
 0x5f1   : > { %5227 = vmatmul.f32.gmra.mxu1 %v11162_v22  ;;  %5443 = vmatpush.msrb.mxu2 %v2318_v21  ;;  %v11165_v21 = vld [vmem:[#allocation68_spill] sm:$0xff] }
 0x5f2   : > { %v4908_v12 = vpop.f32.mrf.mxu2  ;;  %5490 = vmatpush.msrb.mxu3 %v2414_v60  ;;  %v2888_v60 = vld [vmem:[#allocation7 + $0x23f0] sm:$0xff] }
 0x5f3   : > { %v4955_v15 = vpop.f32.mrf.mxu3  ;;  %v4909_v14 = vadd.f32 %v4908_v12, %v4862_v59  ;;  %v11163_v59 = vld [vmem:[#allocation34_spill] sm:$0xff] }
 0x5f4   : > { %5663 = vmatpush.msra.mxu3 %v2888_v60 }
 0x5f5   : > { %v10151_v16 = vadd.f32 %v4955_v15, %v4909_v14  ;;  %v4978_v43 = vpop.f32.mrf.mxu0  ;;  %v2792_v15 = vld [vmem:[#allocation7 + $0x20f0] sm:$0xff] }
 0x5f6   : > { %v5025_v1 = vpop.f32.mrf.mxu1  ;;  %v4979_v40 = vadd.f32 %v4978_v43, %v10095_v11  ;;  %v2600_v14 = vld [vmem:[#allocation7 + $0x1af0] sm:$0xff]  ;;  %5616 = vmatpush.msra.mxu2 %v2792_v15 }
 0x5f7   : > { %5274 = vmatmul.f32.gmra.mxu2 %v11087_v51  ;;  %5522 = vmatpush.msra.mxu0 %v2600_v14 }
 0x5f8   : > { %5321 = vmatmul.f32.gmra.mxu3 %v11088_v47  ;;  %v5026_v48 = vadd.f32 %v5025_v1, %v4979_v40  ;;  %5183 = vmatmul.f32.gmra.mxu0 %v11163_v59  ;;  %v2696_v1 = vld [vmem:[#allocation7 + $0x1df0] sm:$0xff]  ;;  %v2786_v40 = vld [vmem:[#allocation7 + $0x20c0] sm:$0xff] }
 0x5f9   : > { %5230 = vmatmul.f32.gmra.mxu1 %v11164_v29  ;;  %5617 = vmatpush.msra.mxu2 %v2786_v40 }
 0x5fa   : > { %v5069_v0 = vpop.f32.mrf.mxu2  ;;  %5569 = vmatpush.msra.mxu1 %v2696_v1 }
 0x5fb   : > { %v5116_v26 = vpop.f32.mrf.mxu3  ;;  %v5070_v44 = vadd.f32 %v5069_v0, %v5023_v58  ;;  %v2594_v58 = vld [vmem:[#allocation7 + $0x1ac0] sm:$0xff] }
 0x5fc   : > { %v2882_v0 = vld [vmem:[#allocation7 + $0x23c0] sm:$0xff]  ;;  %5523 = vmatpush.msra.mxu0 %v2594_v58 }
 0x5fd   : > { %v5117_v19 = vadd.f32 %v5116_v26, %v5070_v44  ;;  %v4981_v57 = vpop.f32.mrf.mxu0  ;;  %v2690_v26 = vld [vmem:[#allocation7 + $0x1dc0] sm:$0xff]  ;;  %5664 = vmatpush.msra.mxu3 %v2882_v0 }
 0x5fe   : > { %v5028_v12 = vpop.f32.mrf.mxu1  ;;  %v4982_v11 = vadd.f32 %v4981_v57, %v10102_v4  ;;  %v2780_v4 = vld [vmem:[#allocation7 + $0x2090] sm:$0xff]  ;;  %5570 = vmatpush.msra.mxu1 %v2690_v26 }
 0x5ff   : > { %v6274_v43 = vmax.f32 %v11165_v21, %v5117_v19  ;;  %5277 = vmatmul.f32.gmra.mxu2 %v11092_v27  ;;  %v11166_v21 = vld [vmem:[#allocation71_spill] sm:$0xff] }
 0x600   : > { %5324 = vmatmul.f32.gmra.mxu3 %v11093_v61  ;;  %v5029_v3 = vadd.f32 %v5028_v12, %v4982_v11  ;;  %5186 = vmatmul.f32.gmra.mxu0 %v11094_v52 }
 0x601   : > { %5233 = vmatmul.f32.gmra.mxu1 %v11095_v45  ;;  %5618 = vmatpush.msra.mxu2 %v2780_v4 }
 0x602   : > { %v5072_v44 = vpop.f32.mrf.mxu2 }
 0x603   : > { %v5119_v57 = vpop.f32.mrf.mxu3  ;;  %v5073_v19 = vadd.f32 %v5072_v44, %v5026_v48  ;;  %v2876_v44 = vld [vmem:[#allocation7 + $0x2390] sm:$0xff] }
 0x604   : > { %5665 = vmatpush.msra.mxu3 %v2876_v44 }
 0x605   : > { %v5120_v15 = vadd.f32 %v5119_v57, %v5073_v19  ;;  %v4984_v12 = vpop.f32.mrf.mxu0  ;;  %v2684_v19 = vld [vmem:[#allocation7 + $0x1d90] sm:$0xff] }
 0x606   : > { %v5031_v14 = vpop.f32.mrf.mxu1  ;;  %v4985_v11 = vadd.f32 %v4984_v12, %v10109_v37  ;;  %v2588_v37 = vld [vmem:[#allocation7 + $0x1a90] sm:$0xff]  ;;  %v11168_v12 = vld [vmem:[#allocation72_spill] sm:$0xff]  ;;  %5571 = vmatpush.msra.mxu1 %v2684_v19 }
 0x607   : > { %v6277_v36 = vmax.f32 %v11166_v21, %v5120_v15  ;;  %5280 = vmatmul.f32.gmra.mxu2 %v11097_v63  ;;  %5524 = vmatpush.msra.mxu0 %v2588_v37  ;;  %v2774_v15 = vld [vmem:[#allocation7 + $0x2060] sm:$0xff]  ;;  %v2768_v21 = vld [vmem:[#allocation7 + $0x2030] sm:$0xff] }
 0x608   : > { %5327 = vmatmul.f32.gmra.mxu3 %v11098_v38  ;;  %v5032_v60 = vadd.f32 %v5031_v14, %v4985_v11  ;;  %5189 = vmatmul.f32.gmra.mxu0 %v11099_v8  ;;  %v2678_v11 = vld [vmem:[#allocation7 + $0x1d60] sm:$0xff] }
 0x609   : > { %5236 = vmatmul.f32.gmra.mxu1 %v11100_v54  ;;  %v10170_v48 = vmax.f32 %v6274_v43, %v6277_v36  ;;  %v2582_v36 = vld [vmem:[#allocation7 + $0x1a60] sm:$0xff]  ;;  %5619 = vmatpush.msra.mxu2 %v2774_v15  ;;  %v11169_v15 = vld [vmem:[#allocation73_spill] sm:$0xff] }
 0x60a   : > { %v5075_v1 = vpop.f32.mrf.mxu2  ;;  %v2870_v43 = vld [vmem:[#allocation7 + $0x2360] sm:$0xff]  ;;  %5525 = vmatpush.msra.mxu0 %v2582_v36  ;;  %5572 = vmatpush.msra.mxu1 %v2678_v11 }
 0x60b   : > { %11167 = vst [vmem:[#allocation57_spill] sm:$0xff] %v10170_v48  ;;  %v5122_v40 = vpop.f32.mrf.mxu3  ;;  %v5076_v58 = vadd.f32 %v5075_v1, %v5029_v3  ;;  %v2864_v1 = vld [vmem:[#allocation7 + $0x2330] sm:$0xff]  ;;  %5666 = vmatpush.msra.mxu3 %v2870_v43  ;;  %5620 = vmatpush.msra.mxu2 %v2768_v21  ;;  %v1869_v48 = vld [vmem:[#allocation7 + $0x418] sm:$0xff] }
 0x60d   : > { %v5123_v0 = vadd.f32 %v5122_v40, %v5076_v58  ;;  %v4987_v26 = vpop.f32.mrf.mxu0  ;;  %5667 = vmatpush.msra.mxu3 %v2864_v1 }
 0x60e   : > { %v5034_v4 = vpop.f32.mrf.mxu1  ;;  %v4988_v57 = vadd.f32 %v4987_v26, %v10116_v53  ;;  %v2576_v53 = vld [vmem:[#allocation7 + $0x1a30] sm:$0xff]  ;;  %v2762_v26 = vld [vmem:[#allocation7 + $0x2000] sm:$0xff] }
 0x60f   : > { %v6280_v14 = vmax.f32 %v11168_v12, %v5123_v0  ;;  %5283 = vmatmul.f32.gmra.mxu2 %v9225_v28  ;;  %v2672_v0 = vld [vmem:[#allocation7 + $0x1d30] sm:$0xff]  ;;  %5526 = vmatpush.msra.mxu0 %v2576_v53 }
 0x610   : > { %5330 = vmatmul.f32.gmra.mxu3 %v9227_v56  ;;  %v5035_v3 = vadd.f32 %v5034_v4, %v4988_v57  ;;  %5350 = vmatmul.f32.vlgmr.msrb.gmra.mxu0 %v11065_v9 }
 0x611   : > { %5397 = vmatmul.f32.vlgmr.msrb.gmra.mxu1 %v11066_v17  ;;  %5621 = vmatpush.msra.mxu2 %v2762_v26  ;;  %v2666_v26 = vld [vmem:[#allocation7 + $0x1d00] sm:$0xff] }
 0x612   : > { %v5078_v40 = vpop.f32.mrf.mxu2  ;;  %5573 = vmatpush.msra.mxu1 %v2672_v0 }
 0x613   : > { %v5125_v58 = vpop.f32.mrf.mxu3  ;;  %v5079_v37 = vadd.f32 %v5078_v40, %v5032_v60 }
 0x614   : > { %5574 = vmatpush.msra.mxu1 %v2666_v26  ;;  %v6304_v26 = vld [vmem:[#allocation8] sm:$0x7] }
 0x615   : > { %v5126_v4 = vadd.f32 %v5125_v58, %v5079_v37  ;;  %v4990_v44 = vpop.f32.mrf.mxu0  ;;  %v2858_v58 = vld [vmem:[#allocation7 + $0x2300] sm:$0xff]  ;;  %v2756_v37 = vld [vmem:[#allocation7 + $0x1fd0] sm:$0xff] }
 0x616   : > { %v5037_v57 = vpop.f32.mrf.mxu1  ;;  %v4991_v19 = vadd.f32 %v4990_v44, %v10123_v34  ;;  %v2570_v34 = vld [vmem:[#allocation7 + $0x1a00] sm:$0xff]  ;;  %5668 = vmatpush.msra.mxu3 %v2858_v58  ;;  %5622 = vmatpush.msra.mxu2 %v2756_v37 }
 0x617   : > { %v6283_v12 = vmax.f32 %v11169_v15, %v5126_v4  ;;  %5444 = vmatmul.f32.vlgmr.msrb.gmra.mxu2 %v11067_v18  ;;  %5527 = vmatpush.msra.mxu0 %v2570_v34  ;;  %v11171_v4 = vld [vmem:[#allocation74_spill] sm:$0xff]  ;;  %v2750_v15 = vld [vmem:[#allocation7 + $0x1fa0] sm:$0xff] }
 0x618   : > { %5491 = vmatmul.f32.vlgmr.msrb.gmra.mxu3 %v11068_v5  ;;  %v5038_v36 = vadd.f32 %v5037_v57, %v4991_v19  ;;  %5353 = vmatmul.f32.gmra.mxu0 %v11069_v25  ;;  %v2852_v57 = vld [vmem:[#allocation7 + $0x22d0] sm:$0xff] }
 0x619   : > { %5400 = vmatmul.f32.gmra.mxu1 %v11070_v20  ;;  %v10184_v60 = vmax.f32 %v6280_v14, %v6283_v12  ;;  %v2564_v14 = vld [vmem:[#allocation7 + $0x19d0] sm:$0xff]  ;;  %v2846_v12 = vld [vmem:[#allocation7 + $0x22a0] sm:$0xff]  ;;  %5669 = vmatpush.msra.mxu3 %v2852_v57 }
 0x61a   : > { %v5081_v43 = vpop.f32.mrf.mxu2  ;;  %v2660_v19 = vld [vmem:[#allocation7 + $0x1cd0] sm:$0xff]  ;;  %5528 = vmatpush.msra.mxu0 %v2564_v14  ;;  %5623 = vmatpush.msra.mxu2 %v2750_v15 }
 0x61b   : > { %11170 = vst [vmem:[#allocation58_spill] sm:$0xff] %v10184_v60  ;;  %v5128_v11 = vpop.f32.mrf.mxu3  ;;  %v5082_v21 = vadd.f32 %v5081_v43, %v5035_v3  ;;  %5575 = vmatpush.msra.mxu1 %v2660_v19  ;;  %v2840_v34 = vld [vmem:[#allocation7 + $0x2270] sm:$0xff]  ;;  %5670 = vmatpush.msra.mxu3 %v2846_v12  ;;  %v10198_v19 = vperm.slane %v6304_v26, 0  ;;  %v1989_v60 = vld [vmem:[#allocation7 + $0x7d8] sm:$0xff] }
 0x61c   : > { %v11172_v14 = vld [vmem:[#allocation77_spill] sm:$0xff] }
 0x61d   : > { %v5129_v53 = vadd.f32 %v5128_v11, %v5082_v21  ;;  %v4993_v1 = vpop.f32.mrf.mxu0  ;;  %v2654_v21 = vld [vmem:[#allocation7 + $0x1ca0] sm:$0xff]  ;;  %5671 = vmatpush.msra.mxu3 %v2840_v34  ;;  %11173 = vst [vmem:[#allocation50_spill] sm:$0xff] %v10198_v19 }
 0x61e   : > { %v5040_v40 = vpop.f32.mrf.mxu1  ;;  %v4994_v0 = vadd.f32 %v4993_v1, %v10130_v49  ;;  %v2558_v49 = vld [vmem:[#allocation7 + $0x19a0] sm:$0xff]  ;;  %5576 = vmatpush.msra.mxu1 %v2654_v21 }
 0x61f   : > { %v6286_v44 = vmax.f32 %v11171_v4, %v5129_v53  ;;  %5447 = vmatmul.f32.gmra.mxu2 %v9011_v55  ;;  %v2744_v53 = vld [vmem:[#allocation7 + $0x1f70] sm:$0xff]  ;;  %5529 = vmatpush.msra.mxu0 %v2558_v49 }
 0x620   : > { %5494 = vmatmul.f32.gmra.mxu3 %v11071_v41  ;;  %v5041_v3 = vadd.f32 %v5040_v40, %v4994_v0  ;;  %5356 = vmatmul.f32.gmra.mxu0 %v11072_v46  ;;  %v2552_v40 = vld [vmem:[#allocation7 + $0x1970] sm:$0xff] }
 0x621   : > { %5403 = vmatmul.f32.gmra.mxu1 %v9049_v39  ;;  %5624 = vmatpush.msra.mxu2 %v2744_v53 }
 0x622   : > { %v5084_v43 = vpop.f32.mrf.mxu2  ;;  %5530 = vmatpush.msra.mxu0 %v2552_v40  ;;  %v2738_v40 = vld [vmem:[#allocation7 + $0x1f40] sm:$0xff] }
 0x623   : > { %v5131_v11 = vpop.f32.mrf.mxu3  ;;  %v5085_v1 = vadd.f32 %v5084_v43, %v5038_v36  ;;  %5625 = vmatpush.msra.mxu2 %v2738_v40 }
 0x625   : > { %v5132_v58 = vadd.f32 %v5131_v11, %v5085_v1  ;;  %v4996_v0 = vpop.f32.mrf.mxu0  ;;  %v2648_v1 = vld [vmem:[#allocation7 + $0x1c70] sm:$0xff] }
 0x626   : > { %v5043_v4 = vpop.f32.mrf.mxu1  ;;  %v4997_v37 = vadd.f32 %v4996_v0, %v10137_v32  ;;  %5577 = vmatpush.msra.mxu1 %v2648_v1  ;;  %v2834_v0 = vld [vmem:[#allocation7 + $0x2240] sm:$0xff] }
 0x627   : > { %v6289_v57 = vmax.f32 %v11172_v14, %v5132_v58  ;;  %5450 = vmatmul.f32.gmra.mxu2 %v11073_v13  ;;  %v2546_v58 = vld [vmem:[#allocation7 + $0x1940] sm:$0xff]  ;;  %v2540_v14 = vld [vmem:[#allocation7 + $0x1910] sm:$0xff]  ;;  %5672 = vmatpush.msra.mxu3 %v2834_v0 }
 0x628   : > { %5497 = vmatmul.f32.gmra.mxu3 %v11074_v30  ;;  %v5044_v36 = vadd.f32 %v5043_v4, %v4997_v37  ;;  %5359 = vmatmul.f32.gmra.mxu0 %v11075_v62  ;;  %v11175_v4 = vld [vmem:[#allocation78_spill] sm:$0xff] }
 0x629   : > { %5406 = vmatmul.f32.gmra.mxu1 %v11076_v23  ;;  %v6330_v15 = vmax.f32 %v6286_v44, %v6289_v57  ;;  %v2642_v44 = vld [vmem:[#allocation7 + $0x1c40] sm:$0xff]  ;;  %v2732_v37 = vld [vmem:[#allocation7 + $0x1f10] sm:$0xff]  ;;  %5531 = vmatpush.msra.mxu0 %v2546_v58 }
 0x62a   : > { %v5087_v49 = vpop.f32.mrf.mxu2  ;;  %v2828_v57 = vld [vmem:[#allocation7 + $0x2210] sm:$0xff]  ;;  %5578 = vmatpush.msra.mxu1 %v2642_v44  ;;  %5626 = vmatpush.msra.mxu2 %v2732_v37  ;;  %v11176_v37 = vld [vmem:[#allocation75_spill] sm:$0xff] }
 0x62b   : > { %v5134_v12 = vpop.f32.mrf.mxu3  ;;  %v10201_v32 = vadd.f32 %v6330_v15, %v10198_v19  ;;  %v5088_v43 = vadd.f32 %v5087_v49, %v5041_v3  ;;  %v2726_v15 = vld [vmem:[#allocation7 + $0x1ee0] sm:$0xff]  ;;  %5532 = vmatpush.msra.mxu0 %v2540_v14  ;;  %5673 = vmatpush.msra.mxu3 %v2828_v57  ;;  %v2720_v58 = vld [vmem:[#allocation7 + $0x1eb0] sm:$0xff] }
 0x62c   : > { %5627 = vmatpush.msra.mxu2 %v2726_v15  ;;  %v2816_v44 = vld [vmem:[#allocation7 + $0x21b0] sm:$0xff]  ;;  %v2714_v14 = vld [vmem:[#allocation7 + $0x1e80] sm:$0xff] }
 0x62d   : > { %11174 = vst [vmem:[#allocation95_spill] sm:$0xff] %v10201_v32  ;;  %v5135_v11 = vadd.f32 %v5134_v12, %v5088_v43  ;;  %v4999_v21 = vpop.f32.mrf.mxu0  ;;  %v2534_v43 = vld [vmem:[#allocation7 + $0x18e0] sm:$0xff] }
 0x62e   : > { %v5046_v53 = vpop.f32.mrf.mxu1  ;;  %v5000_v34 = vadd.f32 %v4999_v21, %v10144_v42  ;;  %v2636_v42 = vld [vmem:[#allocation7 + $0x1c10] sm:$0xff]  ;;  %5533 = vmatpush.msra.mxu0 %v2534_v43  ;;  %5628 = vmatpush.msra.mxu2 %v2720_v58  ;;  %v2522_v43 = vld [vmem:[#allocation7 + $0x1880] sm:$0xff] }
 0x62f   : > { %v6292_v26 = vmax.f32 %v11175_v4, %v5135_v11  ;;  %5453 = vmatmul.f32.gmra.mxu2 %v11079_v7  ;;  %v2822_v11 = vld [vmem:[#allocation7 + $0x21e0] sm:$0xff]  ;;  %5579 = vmatpush.msra.mxu1 %v2636_v42  ;;  %v2528_v4 = vld [vmem:[#allocation7 + $0x18b0] sm:$0xff] }
 0x630   : > { %5500 = vmatmul.f32.gmra.mxu3 %v11080_v24  ;;  %v5047_v3 = vadd.f32 %v5046_v53, %v5000_v34  ;;  %5362 = vmatmul.f32.gmra.mxu0 %v11081_v50  ;;  %v2630_v34 = vld [vmem:[#allocation7 + $0x1be0] sm:$0xff] }
 0x631   : > { %5409 = vmatmul.f32.gmra.mxu1 %v11160_v33  ;;  %5674 = vmatpush.msra.mxu3 %v2822_v11  ;;  %v2618_v11 = vld [vmem:[#allocation7 + $0x1b80] sm:$0xff] }
 0x632   : > { %v5090_v49 = vpop.f32.mrf.mxu2  ;;  %5580 = vmatpush.msra.mxu1 %v2630_v34  ;;  %5534 = vmatpush.msra.mxu0 %v2528_v4  ;;  %v2708_v34 = vld [vmem:[#allocation7 + $0x1e50] sm:$0xff]  ;;  %v11178_v58 = vld [vmem:[#allocation76_spill] sm:$0xff] }
 0x633   : > { %v5137_v12 = vpop.f32.mrf.mxu3  ;;  %v5091_v21 = vadd.f32 %v5090_v49, %v5044_v36  ;;  %v2624_v36 = vld [vmem:[#allocation7 + $0x1bb0] sm:$0xff]  ;;  %5675 = vmatpush.msra.mxu3 %v2816_v44  ;;  %5629 = vmatpush.msra.mxu2 %v2714_v14  ;;  %v2510_v4 = vld [vmem:[#allocation7 + $0x1820] sm:$0xff] }
 0x634   : > { %5581 = vmatpush.msra.mxu1 %v2624_v36  ;;  %5535 = vmatpush.msra.mxu0 %v2522_v43  ;;  %v2606_v44 = vld [vmem:[#allocation7 + $0x1b20] sm:$0xff] }
 0x635   : > { %v5138_v53 = vadd.f32 %v5137_v12, %v5091_v21  ;;  %v5002_v1 = vpop.f32.mrf.mxu0  ;;  %5630 = vmatpush.msra.mxu2 %v2708_v34  ;;  %v2798_v43 = vld [vmem:[#allocation7 + $0x2120] sm:$0xff]  ;;  %v2121_v34 = vld [vmem:[#allocation7 + $0xbf8] sm:$0xff] }
 0x636   : > { %v5049_v40 = vpop.f32.mrf.mxu1  ;;  %v5003_v0 = vadd.f32 %v5002_v1, %v10151_v16  ;;  %5582 = vmatpush.msra.mxu1 %v2618_v11  ;;  %v11179_v11 = vld [vmem:[#allocation79_spill] sm:$0xff] }
 0x637   : > { %v6295_v32 = vmax.f32 %v11176_v37, %v5138_v53  ;;  %5456 = vmatmul.f32.gmra.mxu2 %v11083_v10 }
 0x638   : > { %5503 = vmatmul.f32.gmra.mxu3 %v11084_v2  ;;  %v5050_v57 = vadd.f32 %v5049_v40, %v5003_v0  ;;  %5365 = vmatmul.f32.gmra.mxu0 %v11161_v35  ;;  %v2810_v40 = vld [vmem:[#allocation7 + $0x2180] sm:$0xff] }
 0x639   : > { %5412 = vmatmul.f32.gmra.mxu1 %v11162_v22  ;;  %v6339_v42 = vmax.f32 %v6292_v26, %v6295_v32  ;;  %5676 = vmatpush.msra.mxu3 %v2810_v40  ;;  %v2516_v32 = vld [vmem:[#allocation7 + $0x1850] sm:$0xff]  ;;  %v2025_v40 = vld [vmem:[#allocation7 + $0x8f8] sm:$0xff] }
 0x63a   : > { %v5093_v16 = vpop.f32.mrf.mxu2  ;;  %v2612_v26 = vld [vmem:[#allocation7 + $0x1b50] sm:$0xff]  ;;  %5536 = vmatpush.msra.mxu0 %v2516_v32 }
 0x63b   : > { %v5140_v15 = vpop.f32.mrf.mxu3  ;;  %v10216_v49 = vadd.f32 %v6339_v42, %v10198_v19  ;;  %v5094_v12 = vadd.f32 %v5093_v16, %v5047_v3  ;;  %v2804_v3 = vld [vmem:[#allocation7 + $0x2150] sm:$0xff]  ;;  %5583 = vmatpush.msra.mxu1 %v2612_v26 }
 0x63c   : > { %5677 = vmatpush.msra.mxu3 %v2804_v3  ;;  %5537 = vmatpush.msra.mxu0 %v2510_v4 }
 0x63d   : > { %11177 = vst [vmem:[#allocation51_spill] sm:$0xff] %v10216_v49  ;;  %v5141_v21 = vadd.f32 %v5140_v15, %v5094_v12  ;;  %v5163_v53 = vpop.f32.mrf.mxu0  ;;  %5584 = vmatpush.msra.mxu1 %v2606_v44  ;;  %v2702_v12 = vld [vmem:[#allocation7 + $0x1e20] sm:$0xff]  ;;  %v1899_v49 = vld [vmem:[#allocation7 + $0x508] sm:$0xff] }
 0x63e   : > { %v5210_v1 = vpop.f32.mrf.mxu1  ;;  %5631 = vmatpush.msra.mxu2 %v2702_v12  ;;  %5678 = vmatpush.msra.mxu3 %v2798_v43  ;;  %v2019_v12 = vld [vmem:[#allocation7 + $0x8c8] sm:$0xff] }
 0x63f   : > { %v6298_v0 = vmax.f32 %v11178_v58, %v5141_v21  ;;  %5459 = vmatmul.f32.gmra.mxu2 %v11087_v51  ;;  %v5211_v32 = vadd.f32 %v5210_v1, %v5163_v53  ;;  %v1827_v43 = vld [vmem:[#allocation7 + $0x2c8] sm:$0xff] }
 0x640   : > { %5506 = vmatmul.f32.gmra.mxu3 %v11088_v47  ;;  %5368 = vmatmul.f32.gmra.mxu0 %v11163_v59  ;;  %v2115_v53 = vld [vmem:[#allocation7 + $0xbc8] sm:$0xff] }
 0x641   : > { %5415 = vmatmul.f32.gmra.mxu1 %v11164_v29  ;;  %5804 = vmatpush.msrb.mxu2 %v2025_v40  ;;  %v1923_v1 = vld [vmem:[#allocation7 + $0x5c8] sm:$0xff] }
 0x642   : > { %v5096_v37 = vpop.f32.mrf.mxu2  ;;  %5851 = vmatpush.msrb.mxu3 %v2121_v34 }
 0x643   : > { %v5143_v36 = vpop.f32.mrf.mxu3  ;;  %v5097_v14 = vadd.f32 %v5096_v37, %v5050_v57  ;;  %v1833_v57 = vld [vmem:[#allocation7 + $0x2f8] sm:$0xff]  ;;  %5805 = vmatpush.msrb.mxu2 %v2019_v12 }
 0x644   : > { %5710 = vmatpush.msrb.mxu0 %v1833_v57  ;;  %5852 = vmatpush.msrb.mxu3 %v2115_v53 }
 0x645   : > { %v5144_v42 = vadd.f32 %v5143_v36, %v5097_v14  ;;  %v5166_v16 = vpop.f32.mrf.mxu0 }
 0x646   : > { %v5213_v15 = vpop.f32.mrf.mxu1  ;;  %5711 = vmatpush.msrb.mxu0 %v1827_v43 }
 0x647   : > { %v6301_v21 = vmax.f32 %v11179_v11, %v5144_v42  ;;  %5462 = vmatmul.f32.gmra.mxu2 %v11092_v27  ;;  %v1929_v42 = vld [vmem:[#allocation7 + $0x5f8] sm:$0xff]  ;;  %v5214_v11 = vadd.f32 %v5213_v15, %v5166_v16  ;;  %v1815_v16 = vld [vmem:[#allocation7 + $0x268] sm:$0xff] }
 0x648   : > { %5509 = vmatmul.f32.gmra.mxu3 %v11093_v61  ;;  %5371 = vmatmul.f32.gmra.mxu0 %v11094_v52  ;;  %v2103_v15 = vld [vmem:[#allocation7 + $0xb68] sm:$0xff] }
 0x649   : > { %5418 = vmatmul.f32.gmra.mxu1 %v11095_v45  ;;  %v6348_v26 = vmax.f32 %v6298_v0, %v6301_v21  ;;  %v2013_v0 = vld [vmem:[#allocation7 + $0x898] sm:$0xff] }
 0x64a   : > { %v5257_v58 = vpop.f32.mrf.mxu2  ;;  %5757 = vmatpush.msrb.mxu1 %v1929_v42  ;;  %5806 = vmatpush.msrb.mxu2 %v2013_v0  ;;  %v2007_v42 = vld [vmem:[#allocation7 + $0x868] sm:$0xff] }
 0x64b   : > { %v5304_v3 = vpop.f32.mrf.mxu3  ;;  %v10229_v4 = vadd.f32 %v6348_v26, %v10198_v19  ;;  %v5258_v44 = vadd.f32 %v5257_v58, %v5211_v32  ;;  %v1821_v58 = vld [vmem:[#allocation7 + $0x298] sm:$0xff]  ;;  %v2079_v19 = vld [vmem:[#allocation7 + $0xaa8] sm:$0xff] }
 0x64c   : > { %5758 = vmatpush.msrb.mxu1 %v1923_v1  ;;  %5712 = vmatpush.msrb.mxu0 %v1821_v58  ;;  %v1809_v58 = vld [vmem:[#allocation7 + $0x238] sm:$0xff] }
 0x64d   : > { %11180 = vst [vmem:[#allocation96_spill] sm:$0xff] %v10229_v4  ;;  %v10231_v37 = vadd.f32 %v5304_v3, %v5258_v44  ;;  %v5169_v36 = vpop.f32.mrf.mxu0  ;;  %v2109_v3 = vld [vmem:[#allocation7 + $0xb98] sm:$0xff]  ;;  %5807 = vmatpush.msrb.mxu2 %v2007_v42  ;;  %v11181_v4 = vld [vmem:[#allocation60_spill] sm:$0xff] }
 0x64e   : > { %v5216_v14 = vpop.f32.mrf.mxu1  ;;  %5853 = vmatpush.msrb.mxu3 %v2109_v3  ;;  %v1917_v44 = vld [vmem:[#allocation7 + $0x598] sm:$0xff]  ;;  %5713 = vmatpush.msrb.mxu0 %v1815_v16 }
 0x64f   : > { %5465 = vmatmul.f32.gmra.mxu2 %v11097_v63  ;;  %v5217_v12 = vadd.f32 %v5216_v14, %v5169_v36  ;;  %5759 = vmatpush.msrb.mxu1 %v1917_v44  ;;  %v2097_v3 = vld [vmem:[#allocation7 + $0xb38] sm:$0xff]  ;;  %v1995_v44 = vld [vmem:[#allocation7 + $0x808] sm:$0xff] }
 0x650   : > { %5512 = vmatmul.f32.gmra.mxu3 %v11098_v38  ;;  %5374 = vmatmul.f32.gmra.mxu0 %v11099_v8  ;;  %v11182_v36 = vld [vmem:[#allocation63_spill] sm:$0xff] }
 0x651   : > { %5421 = vmatmul.f32.gmra.mxu1 %v11100_v54  ;;  %5854 = vmatpush.msrb.mxu3 %v2103_v15  ;;  %v1905_v14 = vld [vmem:[#allocation7 + $0x538] sm:$0xff] }
 0x652   : > { %v5260_v21 = vpop.f32.mrf.mxu2  ;;  %5714 = vmatpush.msrb.mxu0 %v1809_v58  ;;  %v1893_v58 = vld [vmem:[#allocation7 + $0x4d8] sm:$0xff] }
 0x653   : > { %v5307_v40 = vpop.f32.mrf.mxu3  ;;  %v5261_v57 = vadd.f32 %v5260_v21, %v5214_v11  ;;  %5855 = vmatpush.msrb.mxu3 %v2097_v3 }
 0x655   : > { %v10237_v34 = vadd.f32 %v5307_v40, %v5261_v57  ;;  %v5172_v32 = vpop.f32.mrf.mxu0  ;;  %v1911_v40 = vld [vmem:[#allocation7 + $0x568] sm:$0xff]  ;;  %v2001_v57 = vld [vmem:[#allocation7 + $0x838] sm:$0xff] }
 0x656   : > { %v5219_v26 = vpop.f32.mrf.mxu1  ;;  %5760 = vmatpush.msrb.mxu1 %v1911_v40  ;;  %5808 = vmatpush.msrb.mxu2 %v2001_v57  ;;  %v1803_v40 = vld [vmem:[#allocation7 + $0x208] sm:$0xff] }
 0x657   : > { %5468 = vmatmul.f32.gmra.mxu2 %v9225_v28  ;;  %v5220_v42 = vadd.f32 %v5219_v26, %v5172_v32  ;;  %v2091_v57 = vld [vmem:[#allocation7 + $0xb08] sm:$0xff]  ;;  %5715 = vmatpush.msrb.mxu0 %v1803_v40  ;;  %v1797_v32 = vld [vmem:[#allocation7 + $0x1d8] sm:$0xff] }
 0x658   : > { %5515 = vmatmul.f32.gmra.mxu3 %v9227_v56  ;;  %5377 = vmatmul.f32.gmra.mxu0 %v9339_v31  ;;  %v2085_v26 = vld [vmem:[#allocation7 + $0xad8] sm:$0xff]  ;;  %v1983_v40 = vld [vmem:[#allocation7 + $0x7a8] sm:$0xff] }
 0x659   : > { %5424 = vmatmul.f32.gmra.mxu1 %v9341_v6  ;;  %5809 = vmatpush.msrb.mxu2 %v1995_v44 }
 0x65a   : > { %v5263_v43 = vpop.f32.mrf.mxu2  ;;  %5761 = vmatpush.msrb.mxu1 %v1905_v14  ;;  %5856 = vmatpush.msrb.mxu3 %v2091_v57  ;;  %v1791_v57 = vld [vmem:[#allocation7 + $0x1a8] sm:$0xff] }
 0x65b   : > { %v5310_v53 = vpop.f32.mrf.mxu3  ;;  %v5264_v1 = vadd.f32 %v5263_v43, %v5217_v12  ;;  %5810 = vmatpush.msrb.mxu2 %v1989_v60  ;;  %5716 = vmatpush.msrb.mxu0 %v1797_v32  ;;  %v1887_v60 = vld [vmem:[#allocation7 + $0x4a8] sm:$0xff]  ;;  %v2073_v32 = vld [vmem:[#allocation7 + $0xa78] sm:$0xff] }
 0x65c   : > { %5762 = vmatpush.msrb.mxu1 %v1899_v49  ;;  %5857 = vmatpush.msrb.mxu3 %v2085_v26  ;;  %v1977_v49 = vld [vmem:[#allocation7 + $0x778] sm:$0xff] }
 0x65d   : > { %v10243_v0 = vadd.f32 %v5310_v53, %v5264_v1  ;;  %v5175_v11 = vpop.f32.mrf.mxu0  ;;  %5811 = vmatpush.msrb.mxu2 %v1983_v40  ;;  %5717 = vmatpush.msrb.mxu0 %v1791_v57  ;;  %v1881_v40 = vld [vmem:[#allocation7 + $0x478] sm:$0xff]  ;;  %v1971_v57 = vld [vmem:[#allocation7 + $0x748] sm:$0xff] }
 0x65e   : > { %v5222_v21 = vpop.f32.mrf.mxu1  ;;  %5763 = vmatpush.msrb.mxu1 %v1893_v58  ;;  %5858 = vmatpush.msrb.mxu3 %v2079_v19  ;;  %v1779_v19 = vld [vmem:[#allocation7 + $0x148] sm:$0xff] }
 0x65f   : > { %5471 = vmatmul.f32.gmra.mxu2 %v11181_v4  ;;  %v5223_v3 = vadd.f32 %v5222_v21, %v5175_v11  ;;  %v1785_v11 = vld [vmem:[#allocation7 + $0x178] sm:$0xff] }
 0x660   : > { %5518 = vmatmul.f32.gmra.mxu3 %v11182_v36  ;;  %5538 = vmatmul.f32.vlgmr.msra.gmra.mxu0 %v11069_v25 }
 0x661   : > { %5585 = vmatmul.f32.vlgmr.msra.gmra.mxu1 %v11070_v20  ;;  %5812 = vmatpush.msrb.mxu2 %v1977_v49  ;;  %v1965_v49 = vld [vmem:[#allocation7 + $0x718] sm:$0xff] }
 0x662   : > { %v5266_v16 = vpop.f32.mrf.mxu2  ;;  %5764 = vmatpush.msrb.mxu1 %v1887_v60  ;;  %5718 = vmatpush.msrb.mxu0 %v1785_v11 }
 0x663   : > { %v5313_v15 = vpop.f32.mrf.mxu3  ;;  %v5267_v12 = vadd.f32 %v5266_v16, %v5220_v42  ;;  %5859 = vmatpush.msrb.mxu3 %v2073_v32  ;;  %5813 = vmatpush.msrb.mxu2 %v1971_v57  ;;  %v2061_v57 = vld [vmem:[#allocation7 + $0xa18] sm:$0xff] }
 0x664   : > { %5765 = vmatpush.msrb.mxu1 %v1881_v40  ;;  %5719 = vmatpush.msrb.mxu0 %v1779_v19  ;;  %v1773_v40 = vld [vmem:[#allocation7 + $0x118] sm:$0xff]  ;;  %v2055_v19 = vld [vmem:[#allocation7 + $0x9e8] sm:$0xff] }
 0x665   : > { %v10249_v43 = vadd.f32 %v5313_v15, %v5267_v12  ;;  %v5178_v53 = vpop.f32.mrf.mxu0  ;;  %5814 = vmatpush.msrb.mxu2 %v1965_v49 }
 0x666   : > { %v5225_v1 = vpop.f32.mrf.mxu1  ;;  %5720 = vmatpush.msrb.mxu0 %v1773_v40  ;;  %v1863_v40 = vld [vmem:[#allocation7 + $0x3e8] sm:$0xff] }
 0x667   : > { %5632 = vmatmul.f32.vlgmr.msra.gmra.mxu2 %v9011_v55  ;;  %v5226_v21 = vadd.f32 %v5225_v1, %v5178_v53  ;;  %v2067_v53 = vld [vmem:[#allocation7 + $0xa48] sm:$0xff] }
 0x668   : > { %5679 = vmatmul.f32.vlgmr.msra.gmra.mxu3 %v11071_v41  ;;  %5541 = vmatmul.f32.gmra.mxu0 %v11072_v46  ;;  %v1875_v1 = vld [vmem:[#allocation7 + $0x448] sm:$0xff] }
 0x669   : > { %5588 = vmatmul.f32.gmra.mxu1 %v9049_v39  ;;  %5860 = vmatpush.msrb.mxu3 %v2067_v53 }
 0x66a   : > { %v5269_v14 = vpop.f32.mrf.mxu2  ;;  %5766 = vmatpush.msrb.mxu1 %v1875_v1 }
 0x66b   : > { %v5316_v44 = vpop.f32.mrf.mxu3  ;;  %v5270_v42 = vadd.f32 %v5269_v14, %v5223_v3  ;;  %5861 = vmatpush.msrb.mxu3 %v2061_v57  ;;  %v1953_v57 = vld [vmem:[#allocation7 + $0x6b8] sm:$0xff] }
 0x66c   : > { %5767 = vmatpush.msrb.mxu1 %v1869_v48  ;;  %v1857_v48 = vld [vmem:[#allocation7 + $0x3b8] sm:$0xff] }
 0x66d   : > { %v10255_v16 = vadd.f32 %v5316_v44, %v5270_v42  ;;  %v5181_v15 = vpop.f32.mrf.mxu0  ;;  %5862 = vmatpush.msrb.mxu3 %v2055_v19 }
 0x66e   : > { %v5228_v12 = vpop.f32.mrf.mxu1  ;;  %5768 = vmatpush.msrb.mxu1 %v1863_v40 }
 0x66f   : > { %5635 = vmatmul.f32.gmra.mxu2 %v11073_v13  ;;  %v5229_v60 = vadd.f32 %v5228_v12, %v5181_v15  ;;  %v1959_v15 = vld [vmem:[#allocation7 + $0x6e8] sm:$0xff] }
 0x670   : > { %5682 = vmatmul.f32.gmra.mxu3 %v11074_v30  ;;  %5544 = vmatmul.f32.gmra.mxu0 %v11075_v62  ;;  %v1767_v12 = vld [vmem:[#allocation7 + $0xe8] sm:$0xff] }
 0x671   : > { %5591 = vmatmul.f32.gmra.mxu1 %v11076_v23  ;;  %5815 = vmatpush.msrb.mxu2 %v1959_v15 }
 0x672   : > { %v5272_v26 = vpop.f32.mrf.mxu2  ;;  %5721 = vmatpush.msrb.mxu0 %v1767_v12  ;;  %5769 = vmatpush.msrb.mxu1 %v1857_v48  ;;  %v1743_v48 = vld [vmem:[#allocation7 + $0x28] sm:$0xff] }
 0x673   : > { %v5319_v58 = vpop.f32.mrf.mxu3  ;;  %v5273_v3 = vadd.f32 %v5272_v26, %v5226_v21  ;;  %5816 = vmatpush.msrb.mxu2 %v1953_v57  ;;  %v2043_v57 = vld [vmem:[#allocation7 + $0x988] sm:$0xff] }
 0x675   : > { %v10261_v14 = vadd.f32 %v5319_v58, %v5273_v3  ;;  %v5184_v44 = vpop.f32.mrf.mxu0 }
 0x676   : > { %v5231_v42 = vpop.f32.mrf.mxu1 }
 0x677   : > { %5638 = vmatmul.f32.gmra.mxu2 %v11079_v7  ;;  %v5232_v53 = vadd.f32 %v5231_v42, %v5184_v44  ;;  %v1947_v44 = vld [vmem:[#allocation7 + $0x688] sm:$0xff] }
 0x678   : > { %5685 = vmatmul.f32.gmra.mxu3 %v11080_v24  ;;  %5547 = vmatmul.f32.gmra.mxu0 %v11081_v50 }
 0x679   : > { %5594 = vmatmul.f32.gmra.mxu1 %v11160_v33  ;;  %5817 = vmatpush.msrb.mxu2 %v1947_v44  ;;  %v1839_v44 = vld [vmem:[#allocation7 + $0x328] sm:$0xff] }
 0x67a   : > { %v5275_v11 = vpop.f32.mrf.mxu2 }
 0x67b   : > { %v5322_v21 = vpop.f32.mrf.mxu3  ;;  %v5276_v32 = vadd.f32 %v5275_v11, %v5229_v60 }
 0x67d   : > { %v10267_v26 = vadd.f32 %v5322_v21, %v5276_v32  ;;  %v5187_v58 = vpop.f32.mrf.mxu0 }
 0x67e   : > { %v5234_v3 = vpop.f32.mrf.mxu1 }
 0x67f   : > { %5641 = vmatmul.f32.gmra.mxu2 %v11083_v10  ;;  %v5235_v42 = vadd.f32 %v5234_v3, %v5187_v58  ;;  %v2037_v3 = vld [vmem:[#allocation7 + $0x958] sm:$0xff] }
 0x680   : > { %5688 = vmatmul.f32.gmra.mxu3 %v11084_v2  ;;  %5550 = vmatmul.f32.gmra.mxu0 %v11161_v35  ;;  %v2049_v35 = vld [vmem:[#allocation7 + $0x9b8] sm:$0xff] }
 0x681   : > { %5597 = vmatmul.f32.gmra.mxu1 %v11162_v22  ;;  %v1761_v22 = vld [vmem:[#allocation7 + $0xb8] sm:$0xff]  ;;  %5863 = vmatpush.msrb.mxu3 %v2049_v35 }
 0x682   : > { %v5278_v1 = vpop.f32.mrf.mxu2  ;;  %5722 = vmatpush.msrb.mxu0 %v1761_v22  ;;  %v1749_v35 = vld [vmem:[#allocation7 + $0x58] sm:$0xff] }
 0x683   : > { %v5325_v60 = vpop.f32.mrf.mxu3  ;;  %v5279_v49 = vadd.f32 %v5278_v1, %v5232_v53  ;;  %v1755_v53 = vld [vmem:[#allocation7 + $0x88] sm:$0xff]  ;;  %5864 = vmatpush.msrb.mxu3 %v2043_v57  ;;  %v1845_v22 = vld [vmem:[#allocation7 + $0x358] sm:$0xff] }
 0x684   : > { %v1851_v1 = vld [vmem:[#allocation7 + $0x388] sm:$0xff]  ;;  %5723 = vmatpush.msrb.mxu0 %v1755_v53  ;;  %v2505_v57 = vld [vmem:[#allocation7 + $0x17f8] sm:$0xff] }
 0x685   : > { %v10273_v11 = vadd.f32 %v5325_v60, %v5279_v49  ;;  %v5190_v21 = vpop.f32.mrf.mxu0  ;;  %5770 = vmatpush.msrb.mxu1 %v1851_v1  ;;  %5865 = vmatpush.msrb.mxu3 %v2037_v3  ;;  %v1935_v53 = vld [vmem:[#allocation7 + $0x628] sm:$0xff] }
 0x686   : > { %v5237_v32 = vpop.f32.mrf.mxu1  ;;  %5724 = vmatpush.msrb.mxu0 %v1749_v35  ;;  %v2031_v1 = vld [vmem:[#allocation7 + $0x928] sm:$0xff] }
 0x687   : > { %5644 = vmatmul.f32.gmra.mxu2 %v11087_v51  ;;  %5771 = vmatpush.msrb.mxu1 %v1845_v22 }
 0x688   : > { %5691 = vmatmul.f32.gmra.mxu3 %v11088_v47  ;;  %5553 = vmatmul.f32.gmra.mxu0 %v11163_v59 }
 0x689   : > { %5600 = vmatmul.f32.gmra.mxu1 %v11164_v29  ;;  %v1941_v29 = vld [vmem:[#allocation7 + $0x658] sm:$0xff]  ;;  %5725 = vmatpush.msrb.mxu0 %v1743_v48 }
 0x68a   : > { %v5281_v15 = vpop.f32.mrf.mxu2  ;;  %5818 = vmatpush.msrb.mxu2 %v1941_v29  ;;  %5772 = vmatpush.msrb.mxu1 %v1839_v44 }
 0x68b   : > { %v5328_v12 = vpop.f32.mrf.mxu3  ;;  %v5282_v19 = vadd.f32 %v5281_v15, %v5235_v42  ;;  %v5238_v42 = vadd.f32 %v5237_v32, %v5190_v21  ;;  %5866 = vmatpush.msrb.mxu3 %v2031_v1  ;;  %v2409_v32 = vld [vmem:[#allocation7 + $0x14f8] sm:$0xff] }
 0x68c   : > { %5819 = vmatpush.msrb.mxu2 %v1935_v53  ;;  %v2397_v53 = vld [vmem:[#allocation7 + $0x1498] sm:$0xff] }
 0x68d   : > { %v10279_v60 = vadd.f32 %v5328_v12, %v5282_v19  ;;  %v5351_v49 = vpop.f32.mrf.mxu0  ;;  %6039 = vmatpush.msra.mxu3 %v2505_v57 }
 0x68e   : > { %v5398_v40 = vpop.f32.mrf.mxu1  ;;  %v5352_v59 = vadd.f32 %v5351_v49, %v10231_v37  ;;  %5992 = vmatpush.msra.mxu2 %v2409_v32 }
 0x68f   : > { %5647 = vmatmul.f32.gmra.mxu2 %v11092_v27 }
 0x690   : > { %5694 = vmatmul.f32.gmra.mxu3 %v11093_v61  ;;  %v5399_v58 = vadd.f32 %v5398_v40, %v5352_v59  ;;  %5556 = vmatmul.f32.gmra.mxu0 %v11094_v52  ;;  %v2217_v40 = vld [vmem:[#allocation7 + $0xef8] sm:$0xff] }
 0x691   : > { %5603 = vmatmul.f32.gmra.mxu1 %v11095_v45  ;;  %5898 = vmatpush.msra.mxu0 %v2217_v40 }
 0x692   : > { %v5284_v37 = vpop.f32.mrf.mxu2 }
 0x693   : > { %v5331_v15 = vpop.f32.mrf.mxu3  ;;  %v5285_v29 = vadd.f32 %v5284_v37, %v5238_v42  ;;  %v2313_v42 = vld [vmem:[#allocation7 + $0x11f8] sm:$0xff]  ;;  %v2403_v37 = vld [vmem:[#allocation7 + $0x14c8] sm:$0xff] }
 0x694   : > { %5945 = vmatpush.msra.mxu1 %v2313_v42  ;;  %5993 = vmatpush.msra.mxu2 %v2403_v37  ;;  %v11183_v42 = vld [vmem:[#allocation66_spill] sm:$0xff]  ;;  %v11184_v37 = vld [vmem:[#allocation69_spill] sm:$0xff] }
 0x695   : > { %v10286_v12 = vadd.f32 %v5331_v15, %v5285_v29  ;;  %v5354_v19 = vpop.f32.mrf.mxu0 }
 0x696   : > { %v5401_v59 = vpop.f32.mrf.mxu1  ;;  %v5355_v49 = vadd.f32 %v5354_v19, %v10237_v34  ;;  %v2499_v19 = vld [vmem:[#allocation7 + $0x17c8] sm:$0xff]  ;;  %5994 = vmatpush.msra.mxu2 %v2397_v53 }
 0x697   : > { %5650 = vmatmul.f32.gmra.mxu2 %v11097_v63  ;;  %6040 = vmatpush.msra.mxu3 %v2499_v19 }
 0x698   : > { %5697 = vmatmul.f32.gmra.mxu3 %v11098_v38  ;;  %v5402_v21 = vadd.f32 %v5401_v59, %v5355_v49  ;;  %5559 = vmatmul.f32.gmra.mxu0 %v11099_v8  ;;  %v2307_v59 = vld [vmem:[#allocation7 + $0x11c8] sm:$0xff] }
 0x699   : > { %5606 = vmatmul.f32.gmra.mxu1 %v11100_v54 }
 0x69a   : > { %v5445_v35 = vpop.f32.mrf.mxu2  ;;  %5946 = vmatpush.msra.mxu1 %v2307_v59 }
 0x69b   : > { %v5492_v22 = vpop.f32.mrf.mxu3  ;;  %v5446_v34 = vadd.f32 %v5445_v35, %v5399_v58  ;;  %v2211_v58 = vld [vmem:[#allocation7 + $0xec8] sm:$0xff]  ;;  %v2205_v35 = vld [vmem:[#allocation7 + $0xe98] sm:$0xff] }
 0x69c   : > { %5899 = vmatpush.msra.mxu0 %v2211_v58  ;;  %v2487_v58 = vld [vmem:[#allocation7 + $0x1768] sm:$0xff] }
 0x69d   : > { %v10293_v3 = vadd.f32 %v5492_v22, %v5446_v34  ;;  %v5357_v48 = vpop.f32.mrf.mxu0  ;;  %v2493_v22 = vld [vmem:[#allocation7 + $0x1798] sm:$0xff] }
 0x69e   : > { %v5404_v44 = vpop.f32.mrf.mxu1  ;;  %v5358_v15 = vadd.f32 %v5357_v48, %v10243_v0  ;;  %5900 = vmatpush.msra.mxu0 %v2205_v35  ;;  %6041 = vmatpush.msra.mxu3 %v2493_v22  ;;  %v2301_v48 = vld [vmem:[#allocation7 + $0x1198] sm:$0xff] }
 0x69f   : > { %5653 = vmatmul.f32.gmra.mxu2 %v9225_v28  ;;  %5947 = vmatpush.msra.mxu1 %v2301_v48  ;;  %v2193_v35 = vld [vmem:[#allocation7 + $0xe38] sm:$0xff] }
 0x6a0   : > { %5700 = vmatmul.f32.gmra.mxu3 %v9227_v56  ;;  %v5405_v29 = vadd.f32 %v5404_v44, %v5358_v15  ;;  %5562 = vmatmul.f32.gmra.mxu0 %v9339_v31  ;;  %v2199_v15 = vld [vmem:[#allocation7 + $0xe68] sm:$0xff]  ;;  %v2481_v22 = vld [vmem:[#allocation7 + $0x1738] sm:$0xff] }
 0x6a1   : > { %5609 = vmatmul.f32.gmra.mxu1 %v9341_v6  ;;  %5901 = vmatpush.msra.mxu0 %v2199_v15  ;;  %v11186_v48 = vld [vmem:[#allocation67_spill] sm:$0xff]  ;;  %v11187_v15 = vld [vmem:[#allocation104_spill] sm:$0xff] }
 0x6a2   : > { %v5448_v1 = vpop.f32.mrf.mxu2  ;;  %6042 = vmatpush.msra.mxu3 %v2487_v58  ;;  %v2289_v58 = vld [vmem:[#allocation7 + $0x1138] sm:$0xff] }
 0x6a3   : > { %v5495_v49 = vpop.f32.mrf.mxu3  ;;  %v5449_v0 = vadd.f32 %v5448_v1, %v5402_v21  ;;  %v2391_v21 = vld [vmem:[#allocation7 + $0x1468] sm:$0xff]  ;;  %5902 = vmatpush.msra.mxu0 %v2193_v35  ;;  %v11190_v35 = vld [vmem:[#allocation107_spill] sm:$0xff] }
 0x6a4   : > { %5995 = vmatpush.msra.mxu2 %v2391_v21  ;;  %6043 = vmatpush.msra.mxu3 %v2481_v22 }
 0x6a5   : > { %v10300_v32 = vadd.f32 %v5495_v49, %v5449_v0  ;;  %v5360_v40 = vpop.f32.mrf.mxu0  ;;  %v2295_v0 = vld [vmem:[#allocation7 + $0x1168] sm:$0xff] }
 0x6a6   : > { %v5407_v57 = vpop.f32.mrf.mxu1  ;;  %v5361_v34 = vadd.f32 %v5360_v40, %v10249_v43  ;;  %v2385_v40 = vld [vmem:[#allocation7 + $0x1438] sm:$0xff]  ;;  %5948 = vmatpush.msra.mxu1 %v2295_v0 }
 0x6a7   : > { %5656 = vmatmul.f32.gmra.mxu2 %v11181_v4 }
 0x6a8   : > { %5703 = vmatmul.f32.gmra.mxu3 %v11182_v36  ;;  %v5408_v44 = vadd.f32 %v5407_v57, %v5361_v34  ;;  %5565 = vmatmul.f32.gmra.mxu0 %v11183_v42  ;;  %v11185_v34 = vld [vmem:[#allocation70_spill] sm:$0xff]  ;;  %v2415_v42 = vld [vmem:[#allocation7 + $0x1528] sm:$0xff] }
 0x6a9   : > { %5612 = vmatmul.f32.gmra.mxu1 %v11184_v37  ;;  %5996 = vmatpush.msra.mxu2 %v2385_v40  ;;  %v2319_v37 = vld [vmem:[#allocation7 + $0x1228] sm:$0xff] }
 0x6aa   : > { %v5451_v19 = vpop.f32.mrf.mxu2  ;;  %5949 = vmatpush.msra.mxu1 %v2289_v58  ;;  %v2469_v58 = vld [vmem:[#allocation7 + $0x16d8] sm:$0xff] }
 0x6ab   : > { %v5498_v59 = vpop.f32.mrf.mxu3  ;;  %v5452_v43 = vadd.f32 %v5451_v19, %v5405_v29  ;;  %v11188_v29 = vld [vmem:[#allocation105_spill] sm:$0xff] }
 0x6ac   : > { %v2379_v19 = vld [vmem:[#allocation7 + $0x1408] sm:$0xff] }
 0x6ad   : > { %v10307_v53 = vadd.f32 %v5498_v59, %v5452_v43  ;;  %v5363_v1 = vpop.f32.mrf.mxu0  ;;  %5997 = vmatpush.msra.mxu2 %v2379_v19  ;;  %v2277_v19 = vld [vmem:[#allocation7 + $0x10d8] sm:$0xff] }
 0x6ae   : > { %v5410_v49 = vpop.f32.mrf.mxu1  ;;  %v5364_v57 = vadd.f32 %v5363_v1, %v10255_v16 }
 0x6af   : > { %5659 = vmatmul.f32.gmra.mxu2 %v11185_v34  ;;  %v2187_v34 = vld [vmem:[#allocation7 + $0xe08] sm:$0xff] }
 0x6b0   : > { %5706 = vmatmul.f32.gmra.mxu3 %v11186_v48  ;;  %v5411_v21 = vadd.f32 %v5410_v49, %v5364_v57  ;;  %5726 = vmatmul.f32.vlgmr.msrb.gmra.mxu0 %v11187_v15  ;;  %v2475_v48 = vld [vmem:[#allocation7 + $0x1708] sm:$0xff]  ;;  %v2373_v15 = vld [vmem:[#allocation7 + $0x13d8] sm:$0xff] }
 0x6b1   : > { %5773 = vmatmul.f32.vlgmr.msrb.gmra.mxu1 %v11188_v29  ;;  %5903 = vmatpush.msra.mxu0 %v2187_v34  ;;  %v2283_v57 = vld [vmem:[#allocation7 + $0x1108] sm:$0xff]  ;;  %v11189_v29 = vld [vmem:[#allocation106_spill] sm:$0xff] }
 0x6b2   : > { %v5454_v59 = vpop.f32.mrf.mxu2  ;;  %6044 = vmatpush.msra.mxu3 %v2475_v48  ;;  %5950 = vmatpush.msra.mxu1 %v2283_v57 }
 0x6b3   : > { %v5501_v43 = vpop.f32.mrf.mxu3  ;;  %v5455_v16 = vadd.f32 %v5454_v59, %v5408_v44  ;;  %v2181_v44 = vld [vmem:[#allocation7 + $0xdd8] sm:$0xff]  ;;  %5998 = vmatpush.msra.mxu2 %v2373_v15 }
 0x6b4   : > { %5904 = vmatpush.msra.mxu0 %v2181_v44  ;;  %6045 = vmatpush.msra.mxu3 %v2469_v58  ;;  %v2361_v15 = vld [vmem:[#allocation7 + $0x1378] sm:$0xff] }
 0x6b5   : > { %v10314_v1 = vadd.f32 %v5501_v43, %v5455_v16  ;;  %v5366_v0 = vpop.f32.mrf.mxu0  ;;  %5951 = vmatpush.msra.mxu1 %v2277_v19  ;;  %v2457_v44 = vld [vmem:[#allocation7 + $0x1678] sm:$0xff] }
 0x6b6   : > { %v5413_v40 = vpop.f32.mrf.mxu1  ;;  %v5367_v49 = vadd.f32 %v5366_v0, %v10261_v14  ;;  %v2367_v0 = vld [vmem:[#allocation7 + $0x13a8] sm:$0xff] }
 0x6b7   : > { %5820 = vmatmul.f32.vlgmr.msrb.gmra.mxu2 %v11189_v29  ;;  %v2463_v29 = vld [vmem:[#allocation7 + $0x16a8] sm:$0xff] }
 0x6b8   : > { %5867 = vmatmul.f32.vlgmr.msrb.gmra.mxu3 %v11190_v35  ;;  %v5414_v22 = vadd.f32 %v5413_v40, %v5367_v49  ;;  %5729 = vmatmul.f32.gmra.mxu0 %v11065_v9  ;;  %v2175_v40 = vld [vmem:[#allocation7 + $0xda8] sm:$0xff]  ;;  %v2169_v35 = vld [vmem:[#allocation7 + $0xd78] sm:$0xff] }
 0x6b9   : > { %5776 = vmatmul.f32.gmra.mxu1 %v11066_v17  ;;  %5999 = vmatpush.msra.mxu2 %v2367_v0 }
 0x6ba   : > { %v5457_v59 = vpop.f32.mrf.mxu2  ;;  %5905 = vmatpush.msra.mxu0 %v2175_v40  ;;  %6046 = vmatpush.msra.mxu3 %v2463_v29  ;;  %v2259_v29 = vld [vmem:[#allocation7 + $0x1048] sm:$0xff] }
 0x6bb   : > { %v5504_v14 = vpop.f32.mrf.mxu3  ;;  %v5458_v34 = vadd.f32 %v5457_v59, %v5411_v21  ;;  %v2271_v21 = vld [vmem:[#allocation7 + $0x10a8] sm:$0xff]  ;;  %6000 = vmatpush.msra.mxu2 %v2361_v15 }
 0x6bc   : > { %5952 = vmatpush.msra.mxu1 %v2271_v21  ;;  %5906 = vmatpush.msra.mxu0 %v2169_v35  ;;  %v2349_v21 = vld [vmem:[#allocation7 + $0x1318] sm:$0xff] }
 0x6bd   : > { %v10321_v48 = vadd.f32 %v5504_v14, %v5458_v34  ;;  %v5369_v43 = vpop.f32.mrf.mxu0  ;;  %6047 = vmatpush.msra.mxu3 %v2457_v44 }
 0x6be   : > { %v5416_v16 = vpop.f32.mrf.mxu1  ;;  %v5370_v49 = vadd.f32 %v5369_v43, %v10267_v26  ;;  %v2265_v43 = vld [vmem:[#allocation7 + $0x1078] sm:$0xff] }
 0x6bf   : > { %5823 = vmatmul.f32.gmra.mxu2 %v11067_v18  ;;  %5953 = vmatpush.msra.mxu1 %v2265_v43  ;;  %v2253_v43 = vld [vmem:[#allocation7 + $0x1018] sm:$0xff] }
 0x6c0   : > { %5870 = vmatmul.f32.gmra.mxu3 %v11068_v5  ;;  %v5417_v57 = vadd.f32 %v5416_v16, %v5370_v49  ;;  %5732 = vmatmul.f32.gmra.mxu0 %v11069_v25  ;;  %v2355_v16 = vld [vmem:[#allocation7 + $0x1348] sm:$0xff] }
 0x6c1   : > { %5779 = vmatmul.f32.gmra.mxu1 %v11070_v20  ;;  %6001 = vmatpush.msra.mxu2 %v2355_v16  ;;  %v2451_v49 = vld [vmem:[#allocation7 + $0x1648] sm:$0xff] }
 0x6c2   : > { %v5460_v58 = vpop.f32.mrf.mxu2  ;;  %6048 = vmatpush.msra.mxu3 %v2451_v49  ;;  %5954 = vmatpush.msra.mxu1 %v2259_v29 }
 0x6c3   : > { %v5507_v26 = vpop.f32.mrf.mxu3  ;;  %v5461_v19 = vadd.f32 %v5460_v58, %v5414_v22  ;;  %v2163_v22 = vld [vmem:[#allocation7 + $0xd48] sm:$0xff]  ;;  %6002 = vmatpush.msra.mxu2 %v2349_v21 }
 0x6c4   : > { %5907 = vmatpush.msra.mxu0 %v2163_v22  ;;  %v2439_v22 = vld [vmem:[#allocation7 + $0x15e8] sm:$0xff]  ;;  %5955 = vmatpush.msra.mxu1 %v2253_v43 }
 0x6c5   : > { %v10328_v59 = vadd.f32 %v5507_v26, %v5461_v19  ;;  %v5372_v14 = vpop.f32.mrf.mxu0 }
 0x6c6   : > { %v5419_v34 = vpop.f32.mrf.mxu1  ;;  %v5373_v0 = vadd.f32 %v5372_v14, %v10273_v11  ;;  %v2157_v14 = vld [vmem:[#allocation7 + $0xd18] sm:$0xff] }
 0x6c7   : > { %5826 = vmatmul.f32.gmra.mxu2 %v9011_v55  ;;  %5908 = vmatpush.msra.mxu0 %v2157_v14 }
 0x6c8   : > { %5873 = vmatmul.f32.gmra.mxu3 %v11071_v41  ;;  %v5420_v40 = vadd.f32 %v5419_v34, %v5373_v0  ;;  %5735 = vmatmul.f32.gmra.mxu0 %v11072_v46  ;;  %v2445_v34 = vld [vmem:[#allocation7 + $0x1618] sm:$0xff]  ;;  %v2343_v0 = vld [vmem:[#allocation7 + $0x12e8] sm:$0xff] }
 0x6c9   : > { %5782 = vmatmul.f32.gmra.mxu1 %v9049_v39  ;;  %6049 = vmatpush.msra.mxu3 %v2445_v34 }
 0x6ca   : > { %v5463_v15 = vpop.f32.mrf.mxu2  ;;  %6003 = vmatpush.msra.mxu2 %v2343_v0  ;;  %v2139_v0 = vld [vmem:[#allocation7 + $0xc88] sm:$0xff] }
 0x6cb   : > { %v5510_v35 = vpop.f32.mrf.mxu3  ;;  %v5464_v11 = vadd.f32 %v5463_v15, %v5417_v57  ;;  %v2151_v57 = vld [vmem:[#allocation7 + $0xce8] sm:$0xff]  ;;  %6050 = vmatpush.msra.mxu3 %v2439_v22 }
 0x6cc   : > { %5909 = vmatpush.msra.mxu0 %v2151_v57 }
 0x6cd   : > { %v10335_v44 = vadd.f32 %v5510_v35, %v5464_v11  ;;  %v5375_v58 = vpop.f32.mrf.mxu0 }
 0x6ce   : > { %v5422_v26 = vpop.f32.mrf.mxu1  ;;  %v5376_v19 = vadd.f32 %v5375_v58, %v10279_v60  ;;  %v2247_v58 = vld [vmem:[#allocation7 + $0xfe8] sm:$0xff] }
 0x6cf   : > { %5829 = vmatmul.f32.gmra.mxu2 %v11073_v13  ;;  %5956 = vmatpush.msra.mxu1 %v2247_v58  ;;  %v2229_v58 = vld [vmem:[#allocation7 + $0xf58] sm:$0xff] }
 0x6d0   : > { %5876 = vmatmul.f32.gmra.mxu3 %v11074_v30  ;;  %v5423_v16 = vadd.f32 %v5422_v26, %v5376_v19  ;;  %5738 = vmatmul.f32.gmra.mxu0 %v11075_v62  ;;  %v2241_v19 = vld [vmem:[#allocation7 + $0xfb8] sm:$0xff] }
 0x6d1   : > { %5785 = vmatmul.f32.gmra.mxu1 %v11076_v23 }
 0x6d2   : > { %v5466_v49 = vpop.f32.mrf.mxu2  ;;  %5957 = vmatpush.msra.mxu1 %v2241_v19  ;;  %v11191_v19 = vld [vmem:[#allocation40_spill] sm:$0xff] }
 0x6d3   : > { %v5513_v29 = vpop.f32.mrf.mxu3  ;;  %v5467_v60 = vadd.f32 %v5466_v49, %v5420_v40  ;;  %v2145_v40 = vld [vmem:[#allocation7 + $0xcb8] sm:$0xff] }
 0x6d4   : > { %5910 = vmatpush.msra.mxu0 %v2145_v40 }
 0x6d5   : > { %v10342_v21 = vadd.f32 %v5513_v29, %v5467_v60  ;;  %v5378_v15 = vpop.f32.mrf.mxu0  ;;  %v2337_v29 = vld [vmem:[#allocation7 + $0x12b8] sm:$0xff] }
 0x6d6   : > { %v5425_v35 = vpop.f32.mrf.mxu1  ;;  %v5379_v11 = vadd.f32 %v5378_v15, %v10286_v12  ;;  %v2235_v12 = vld [vmem:[#allocation7 + $0xf88] sm:$0xff]  ;;  %5911 = vmatpush.msra.mxu0 %v2139_v0  ;;  %v2433_v60 = vld [vmem:[#allocation7 + $0x15b8] sm:$0xff]  ;;  %6004 = vmatpush.msra.mxu2 %v2337_v29 }
 0x6d7   : > { %5832 = vmatmul.f32.gmra.mxu2 %v11079_v7  ;;  %5958 = vmatpush.msra.mxu1 %v2235_v12  ;;  %v2223_v0 = vld [vmem:[#allocation7 + $0xf28] sm:$0xff] }
 0x6d8   : > { %5879 = vmatmul.f32.gmra.mxu3 %v11080_v24  ;;  %v5426_v26 = vadd.f32 %v5425_v35, %v5379_v11  ;;  %5741 = vmatmul.f32.gmra.mxu0 %v11081_v50  ;;  %v2331_v35 = vld [vmem:[#allocation7 + $0x1288] sm:$0xff]  ;;  %v2133_v11 = vld [vmem:[#allocation7 + $0xc58] sm:$0xff] }
 0x6d9   : > { %5788 = vmatmul.f32.gmra.mxu1 %v11160_v33  ;;  %6051 = vmatpush.msra.mxu3 %v2433_v60 }
 0x6da   : > { %v5469_v14 = vpop.f32.mrf.mxu2  ;;  %6005 = vmatpush.msra.mxu2 %v2331_v35  ;;  %5912 = vmatpush.msra.mxu0 %v2133_v11  ;;  %v11194_v11 = vld [vmem:[#allocation35_spill] sm:$0xff] }
 0x6db   : > { %v5516_v34 = vpop.f32.mrf.mxu3  ;;  %v5470_v43 = vadd.f32 %v5469_v14, %v5423_v16  ;;  %v2427_v16 = vld [vmem:[#allocation7 + $0x1588] sm:$0xff]  ;;  %v11192_v14 = vld [vmem:[#allocation102_spill] sm:$0xff]  ;;  %5959 = vmatpush.msra.mxu1 %v2229_v58 }
 0x6dc   : > { %6052 = vmatpush.msra.mxu3 %v2427_v16 }
 0x6dd   : > { %v10349_v57 = vadd.f32 %v5516_v34, %v5470_v43  ;;  %v5539_v22 = vpop.f32.mrf.mxu0  ;;  %v2325_v34 = vld [vmem:[#allocation7 + $0x1258] sm:$0xff]  ;;  %5960 = vmatpush.msra.mxu1 %v2223_v0 }
 0x6de   : > { %v5586_v49 = vpop.f32.mrf.mxu1  ;;  %v5540_v15 = vadd.f32 %v5539_v22, %v10293_v3  ;;  %v2421_v43 = vld [vmem:[#allocation7 + $0x1558] sm:$0xff]  ;;  %v2127_v3 = vld [vmem:[#allocation7 + $0xc28] sm:$0xff]  ;;  %6006 = vmatpush.msra.mxu2 %v2325_v34 }
 0x6df   : > { %5835 = vmatmul.f32.gmra.mxu2 %v11083_v10  ;;  %6053 = vmatpush.msra.mxu3 %v2421_v43 }
 0x6e0   : > { %5882 = vmatmul.f32.gmra.mxu3 %v11084_v2  ;;  %v5587_v40 = vadd.f32 %v5586_v49, %v5540_v15  ;;  %5744 = vmatmul.f32.gmra.mxu0 %v11191_v19 }
 0x6e1   : > { %5791 = vmatmul.f32.gmra.mxu1 %v11192_v14  ;;  %5913 = vmatpush.msra.mxu0 %v2127_v3 }
 0x6e2   : > { %v5472_v12 = vpop.f32.mrf.mxu2  ;;  %6007 = vmatpush.msra.mxu2 %v2319_v37  ;;  %6054 = vmatpush.msra.mxu3 %v2415_v42  ;;  %v2889_v42 = vld [vmem:[#allocation7 + $0x23f8] sm:$0xff]  ;;  %v11195_v37 = vld [vmem:[#allocation80_spill] sm:$0xff] }
 0x6e3   : > { %v5519_v22 = vpop.f32.mrf.mxu3  ;;  %v5473_v29 = vadd.f32 %v5472_v12, %v5426_v26  ;;  %v11193_v26 = vld [vmem:[#allocation34_spill] sm:$0xff] }
 0x6e4   : > { %6227 = vmatpush.msrb.mxu3 %v2889_v42 }
 0x6e5   : > { %v10356_v49 = vadd.f32 %v5519_v22, %v5473_v29  ;;  %v5542_v60 = vpop.f32.mrf.mxu0  ;;  %v2793_v22 = vld [vmem:[#allocation7 + $0x20f8] sm:$0xff] }
 0x6e6   : > { %v5589_v15 = vpop.f32.mrf.mxu1  ;;  %v5543_v35 = vadd.f32 %v5542_v60, %v10300_v32  ;;  %v2601_v29 = vld [vmem:[#allocation7 + $0x1af8] sm:$0xff]  ;;  %6180 = vmatpush.msrb.mxu2 %v2793_v22 }
 0x6e7   : > { %5838 = vmatmul.f32.gmra.mxu2 %v11087_v51  ;;  %6086 = vmatpush.msrb.mxu0 %v2601_v29 }
 0x6e8   : > { %5885 = vmatmul.f32.gmra.mxu3 %v11088_v47  ;;  %v5590_v16 = vadd.f32 %v5589_v15, %v5543_v35  ;;  %5747 = vmatmul.f32.gmra.mxu0 %v11193_v26  ;;  %v2697_v15 = vld [vmem:[#allocation7 + $0x1df8] sm:$0xff]  ;;  %v2787_v35 = vld [vmem:[#allocation7 + $0x20c8] sm:$0xff] }
 0x6e9   : > { %5794 = vmatmul.f32.gmra.mxu1 %v11194_v11  ;;  %6181 = vmatpush.msrb.mxu2 %v2787_v35 }
 0x6ea   : > { %v5633_v58 = vpop.f32.mrf.mxu2  ;;  %6133 = vmatpush.msrb.mxu1 %v2697_v15 }
 0x6eb   : > { %v5680_v34 = vpop.f32.mrf.mxu3  ;;  %v5634_v43 = vadd.f32 %v5633_v58, %v5587_v40  ;;  %v2595_v40 = vld [vmem:[#allocation7 + $0x1ac8] sm:$0xff] }
 0x6ec   : > { %v2883_v58 = vld [vmem:[#allocation7 + $0x23c8] sm:$0xff]  ;;  %6087 = vmatpush.msrb.mxu0 %v2595_v40 }
 0x6ed   : > { %v5681_v3 = vadd.f32 %v5680_v34, %v5634_v43  ;;  %v5545_v0 = vpop.f32.mrf.mxu0  ;;  %v2691_v34 = vld [vmem:[#allocation7 + $0x1dc8] sm:$0xff]  ;;  %6228 = vmatpush.msrb.mxu3 %v2883_v58 }
 0x6ee   : > { %v5592_v12 = vpop.f32.mrf.mxu1  ;;  %v5546_v32 = vadd.f32 %v5545_v0, %v10307_v53  ;;  %v2781_v53 = vld [vmem:[#allocation7 + $0x2098] sm:$0xff]  ;;  %6134 = vmatpush.msrb.mxu1 %v2691_v34 }
 0x6ef   : > { %v6275_v60 = vmax.f32 %v11195_v37, %v5681_v3  ;;  %5841 = vmatmul.f32.gmra.mxu2 %v11092_v27  ;;  %v11196_v37 = vld [vmem:[#allocation85_spill] sm:$0xff] }
 0x6f0   : > { %5888 = vmatmul.f32.gmra.mxu3 %v11093_v61  ;;  %v5593_v36 = vadd.f32 %v5592_v12, %v5546_v32  ;;  %5750 = vmatmul.f32.gmra.mxu0 %v11094_v52 }
 0x6f1   : > { %5797 = vmatmul.f32.gmra.mxu1 %v11095_v45  ;;  %6182 = vmatpush.msrb.mxu2 %v2781_v53 }
 0x6f2   : > { %v5636_v43 = vpop.f32.mrf.mxu2 }
 0x6f3   : > { %v5683_v0 = vpop.f32.mrf.mxu3  ;;  %v5637_v3 = vadd.f32 %v5636_v43, %v5590_v16  ;;  %v2877_v43 = vld [vmem:[#allocation7 + $0x2398] sm:$0xff] }
 0x6f4   : > { %6229 = vmatpush.msrb.mxu3 %v2877_v43 }
 0x6f5   : > { %v5684_v22 = vadd.f32 %v5683_v0, %v5637_v3  ;;  %v5548_v12 = vpop.f32.mrf.mxu0  ;;  %v2685_v3 = vld [vmem:[#allocation7 + $0x1d98] sm:$0xff] }
 0x6f6   : > { %v5595_v29 = vpop.f32.mrf.mxu1  ;;  %v5549_v32 = vadd.f32 %v5548_v12, %v10314_v1  ;;  %v2589_v1 = vld [vmem:[#allocation7 + $0x1a98] sm:$0xff]  ;;  %6135 = vmatpush.msrb.mxu1 %v2685_v3 }
 0x6f7   : > { %v6278_v4 = vmax.f32 %v11196_v37, %v5684_v22  ;;  %5844 = vmatmul.f32.gmra.mxu2 %v11097_v63  ;;  %6088 = vmatpush.msrb.mxu0 %v2589_v1  ;;  %v2775_v22 = vld [vmem:[#allocation7 + $0x2068] sm:$0xff]  ;;  %v11197_v12 = vld [vmem:[#allocation86_spill] sm:$0xff] }
 0x6f8   : > { %5891 = vmatmul.f32.gmra.mxu3 %v11098_v38  ;;  %v5596_v42 = vadd.f32 %v5595_v29, %v5549_v32  ;;  %5753 = vmatmul.f32.gmra.mxu0 %v11099_v8  ;;  %v2679_v32 = vld [vmem:[#allocation7 + $0x1d68] sm:$0xff]  ;;  %v2769_v37 = vld [vmem:[#allocation7 + $0x2038] sm:$0xff] }
 0x6f9   : > { %5800 = vmatmul.f32.gmra.mxu1 %v11100_v54  ;;  %v10375_v16 = vmax.f32 %v6275_v60, %v6278_v4  ;;  %v2583_v4 = vld [vmem:[#allocation7 + $0x1a68] sm:$0xff]  ;;  %6183 = vmatpush.msrb.mxu2 %v2775_v22 }
 0x6fa   : > { %v5639_v15 = vpop.f32.mrf.mxu2  ;;  %v2871_v60 = vld [vmem:[#allocation7 + $0x2368] sm:$0xff]  ;;  %6089 = vmatpush.msrb.mxu0 %v2583_v4  ;;  %6136 = vmatpush.msrb.mxu1 %v2679_v32 }
 0x6fb   : > { %v5686_v35 = vpop.f32.mrf.mxu3  ;;  %v5640_v40 = vadd.f32 %v5639_v15, %v5593_v36  ;;  %v2865_v15 = vld [vmem:[#allocation7 + $0x2338] sm:$0xff]  ;;  %6230 = vmatpush.msrb.mxu3 %v2871_v60  ;;  %6184 = vmatpush.msrb.mxu2 %v2769_v37 }
 0x6fd   : > { %v5687_v58 = vadd.f32 %v5686_v35, %v5640_v40  ;;  %v5551_v34 = vpop.f32.mrf.mxu0  ;;  %6231 = vmatpush.msrb.mxu3 %v2865_v15  ;;  %v2859_v15 = vld [vmem:[#allocation7 + $0x2308] sm:$0xff] }
 0x6fe   : > { %v5598_v53 = vpop.f32.mrf.mxu1  ;;  %v5552_v0 = vadd.f32 %v5551_v34, %v10321_v48  ;;  %v2577_v48 = vld [vmem:[#allocation7 + $0x1a38] sm:$0xff]  ;;  %v2763_v34 = vld [vmem:[#allocation7 + $0x2008] sm:$0xff] }
 0x6ff   : > { %v6281_v29 = vmax.f32 %v11197_v12, %v5687_v58  ;;  %5847 = vmatmul.f32.gmra.mxu2 %v9225_v28  ;;  %v2673_v58 = vld [vmem:[#allocation7 + $0x1d38] sm:$0xff]  ;;  %6090 = vmatpush.msrb.mxu0 %v2577_v48 }
 0x700   : > { %5894 = vmatmul.f32.gmra.mxu3 %v9227_v56  ;;  %v5599_v36 = vadd.f32 %v5598_v53, %v5552_v0  ;;  %5914 = vmatmul.f32.vlgmr.msra.gmra.mxu0 %v11065_v9  ;;  %v11198_v0 = vld [vmem:[#allocation81_spill] sm:$0xff] }
 0x701   : > { %5961 = vmatmul.f32.vlgmr.msra.gmra.mxu1 %v11066_v17  ;;  %6185 = vmatpush.msrb.mxu2 %v2763_v34  ;;  %v2853_v34 = vld [vmem:[#allocation7 + $0x22d8] sm:$0xff] }
 0x702   : > { %v5642_v35 = vpop.f32.mrf.mxu2  ;;  %6137 = vmatpush.msrb.mxu1 %v2673_v58  ;;  %6232 = vmatpush.msrb.mxu3 %v2859_v15  ;;  %v11200_v15 = vld [vmem:[#allocation87_spill] sm:$0xff] }
 0x703   : > { %v5689_v40 = vpop.f32.mrf.mxu3  ;;  %v5643_v1 = vadd.f32 %v5642_v35, %v5596_v42 }
 0x704   : > { %6233 = vmatpush.msrb.mxu3 %v2853_v34 }
 0x705   : > { %v5690_v9 = vadd.f32 %v5689_v40, %v5643_v1  ;;  %v5554_v53 = vpop.f32.mrf.mxu0  ;;  %v11199_v40 = vld [vmem:[#allocation82_spill] sm:$0xff] }
 0x706   : > { %v5601_v17 = vpop.f32.mrf.mxu1  ;;  %v5555_v43 = vadd.f32 %v5554_v53, %v10328_v59  ;;  %v2571_v59 = vld [vmem:[#allocation7 + $0x1a08] sm:$0xff]  ;;  %v2661_v1 = vld [vmem:[#allocation7 + $0x1cd8] sm:$0xff] }
 0x707   : > { %v6284_v3 = vmax.f32 %v11198_v0, %v5690_v9  ;;  %6008 = vmatmul.f32.vlgmr.msra.gmra.mxu2 %v11067_v18  ;;  %6091 = vmatpush.msrb.mxu0 %v2571_v59  ;;  %v2667_v18 = vld [vmem:[#allocation7 + $0x1d08] sm:$0xff] }
 0x708   : > { %6055 = vmatmul.f32.vlgmr.msra.gmra.mxu3 %v11068_v5  ;;  %v5602_v22 = vadd.f32 %v5601_v17, %v5555_v43  ;;  %5917 = vmatmul.f32.gmra.mxu0 %v11069_v25  ;;  %v2757_v5 = vld [vmem:[#allocation7 + $0x1fd8] sm:$0xff]  ;;  %v2751_v9 = vld [vmem:[#allocation7 + $0x1fa8] sm:$0xff] }
 0x709   : > { %5964 = vmatmul.f32.gmra.mxu1 %v11070_v20  ;;  %v10389_v42 = vmax.f32 %v6281_v29, %v6284_v3  ;;  %v2565_v29 = vld [vmem:[#allocation7 + $0x19d8] sm:$0xff]  ;;  %6186 = vmatpush.msrb.mxu2 %v2757_v5  ;;  %v2847_v53 = vld [vmem:[#allocation7 + $0x22a8] sm:$0xff] }
 0x70a   : > { %v5645_v12 = vpop.f32.mrf.mxu2  ;;  %6138 = vmatpush.msrb.mxu1 %v2667_v18  ;;  %6092 = vmatpush.msrb.mxu0 %v2565_v29  ;;  %v2655_v0 = vld [vmem:[#allocation7 + $0x1ca8] sm:$0xff]  ;;  %v2745_v3 = vld [vmem:[#allocation7 + $0x1f78] sm:$0xff] }
 0x70b   : > { %v5692_v4 = vpop.f32.mrf.mxu3  ;;  %v5646_v60 = vadd.f32 %v5645_v12, %v5599_v36  ;;  %6187 = vmatpush.msrb.mxu2 %v2751_v9  ;;  %6234 = vmatpush.msrb.mxu3 %v2847_v53  ;;  %v2649_v9 = vld [vmem:[#allocation7 + $0x1c78] sm:$0xff] }
 0x70c   : > { %6139 = vmatpush.msrb.mxu1 %v2661_v1 }
 0x70d   : > { %v5693_v32 = vadd.f32 %v5692_v4, %v5646_v60  ;;  %v5557_v37 = vpop.f32.mrf.mxu0  ;;  %v2553_v4 = vld [vmem:[#allocation7 + $0x1978] sm:$0xff]  ;;  %6188 = vmatpush.msrb.mxu2 %v2745_v3 }
 0x70e   : > { %v5604_v48 = vpop.f32.mrf.mxu1  ;;  %v5558_v35 = vadd.f32 %v5557_v37, %v10335_v44  ;;  %v2559_v44 = vld [vmem:[#allocation7 + $0x19a8] sm:$0xff]  ;;  %v2841_v60 = vld [vmem:[#allocation7 + $0x2278] sm:$0xff]  ;;  %6140 = vmatpush.msrb.mxu1 %v2655_v0 }
 0x70f   : > { %v6287_v58 = vmax.f32 %v11199_v40, %v5693_v32  ;;  %6011 = vmatmul.f32.gmra.mxu2 %v9011_v55  ;;  %6093 = vmatpush.msrb.mxu0 %v2559_v44  ;;  %v2739_v44 = vld [vmem:[#allocation7 + $0x1f48] sm:$0xff] }
 0x710   : > { %6058 = vmatmul.f32.gmra.mxu3 %v11071_v41  ;;  %v5605_v36 = vadd.f32 %v5604_v48, %v5558_v35  ;;  %5920 = vmatmul.f32.gmra.mxu0 %v11072_v46  ;;  %v11201_v0 = vld [vmem:[#allocation88_spill] sm:$0xff] }
 0x711   : > { %5967 = vmatmul.f32.gmra.mxu1 %v9049_v39  ;;  %6094 = vmatpush.msrb.mxu0 %v2553_v4  ;;  %v2541_v4 = vld [vmem:[#allocation7 + $0x1918] sm:$0xff] }
 0x712   : > { %v5648_v17 = vpop.f32.mrf.mxu2  ;;  %6235 = vmatpush.msrb.mxu3 %v2841_v60  ;;  %6141 = vmatpush.msrb.mxu1 %v2649_v9  ;;  %v2829_v60 = vld [vmem:[#allocation7 + $0x2218] sm:$0xff] }
 0x713   : > { %v5695_v43 = vpop.f32.mrf.mxu3  ;;  %v5649_v12 = vadd.f32 %v5648_v17, %v5602_v22  ;;  %6189 = vmatpush.msrb.mxu2 %v2739_v44  ;;  %v2547_v17 = vld [vmem:[#allocation7 + $0x1948] sm:$0xff]  ;;  %v2529_v9 = vld [vmem:[#allocation7 + $0x18b8] sm:$0xff] }
 0x714   : > { %6095 = vmatpush.msrb.mxu0 %v2547_v17  ;;  %v2817_v44 = vld [vmem:[#allocation7 + $0x21b8] sm:$0xff] }
 0x715   : > { %v5696_v32 = vadd.f32 %v5695_v43, %v5649_v12  ;;  %v5560_v37 = vpop.f32.mrf.mxu0  ;;  %v2835_v43 = vld [vmem:[#allocation7 + $0x2248] sm:$0xff]  ;;  %v2733_v12 = vld [vmem:[#allocation7 + $0x1f18] sm:$0xff] }
 0x716   : > { %v5607_v48 = vpop.f32.mrf.mxu1  ;;  %v5561_v59 = vadd.f32 %v5560_v37, %v10342_v21  ;;  %6236 = vmatpush.msrb.mxu3 %v2835_v43  ;;  %6190 = vmatpush.msrb.mxu2 %v2733_v12  ;;  %v2715_v43 = vld [vmem:[#allocation7 + $0x1e88] sm:$0xff] }
 0x717   : > { %v6290_v35 = vmax.f32 %v11200_v15, %v5696_v32  ;;  %6014 = vmatmul.f32.gmra.mxu2 %v11073_v13  ;;  %v2727_v32 = vld [vmem:[#allocation7 + $0x1ee8] sm:$0xff]  ;;  %6096 = vmatpush.msrb.mxu0 %v2541_v4 }
 0x718   : > { %6061 = vmatmul.f32.gmra.mxu3 %v11074_v30  ;;  %v5608_v22 = vadd.f32 %v5607_v48, %v5561_v59  ;;  %5923 = vmatmul.f32.gmra.mxu0 %v11075_v62  ;;  %v2535_v59 = vld [vmem:[#allocation7 + $0x18e8] sm:$0xff] }
 0x719   : > { %5970 = vmatmul.f32.gmra.mxu1 %v11076_v23  ;;  %v10403_v18 = vmax.f32 %v6287_v58, %v6290_v35  ;;  %v2643_v58 = vld [vmem:[#allocation7 + $0x1c48] sm:$0xff]  ;;  %6237 = vmatpush.msrb.mxu3 %v2829_v60 }
 0x71a   : > { %v5651_v5 = vpop.f32.mrf.mxu2  ;;  %6142 = vmatpush.msrb.mxu1 %v2643_v58  ;;  %v2823_v15 = vld [vmem:[#allocation7 + $0x21e8] sm:$0xff]  ;;  %6191 = vmatpush.msrb.mxu2 %v2727_v32  ;;  %v7527_v58 = vld [vmem:[#allocation8] sm:$0x7] }
 0x71b   : > { %v5698_v40 = vpop.f32.mrf.mxu3  ;;  %v5652_v29 = vadd.f32 %v5651_v5, %v5605_v36  ;;  %6097 = vmatpush.msrb.mxu0 %v2535_v59  ;;  %6238 = vmatpush.msrb.mxu3 %v2823_v15  ;;  %v10417_v12 = vperm.slane %v7527_v58, 1 }
 0x71d   : > { %v5699_v34 = vadd.f32 %v5698_v40, %v5652_v29  ;;  %v5563_v21 = vpop.f32.mrf.mxu0  ;;  %6098 = vmatpush.msrb.mxu0 %v2529_v9  ;;  %6239 = vmatpush.msrb.mxu3 %v2817_v44  ;;  %v2607_v9 = vld [vmem:[#allocation7 + $0x1b28] sm:$0xff] }
 0x71e   : > { %v5610_v1 = vpop.f32.mrf.mxu1  ;;  %v5564_v53 = vadd.f32 %v5563_v21, %v10349_v57  ;;  %v2637_v57 = vld [vmem:[#allocation7 + $0x1c18] sm:$0xff] }
 0x71f   : > { %v6293_v3 = vmax.f32 %v11201_v0, %v5699_v34  ;;  %6017 = vmatmul.f32.gmra.mxu2 %v11079_v7  ;;  %6143 = vmatpush.msrb.mxu1 %v2637_v57  ;;  %v2631_v34 = vld [vmem:[#allocation7 + $0x1be8] sm:$0xff]  ;;  %v2721_v21 = vld [vmem:[#allocation7 + $0x1eb8] sm:$0xff] }
 0x720   : > { %6064 = vmatmul.f32.gmra.mxu3 %v11080_v24  ;;  %v5611_v36 = vadd.f32 %v5610_v1, %v5564_v53  ;;  %5926 = vmatmul.f32.gmra.mxu0 %v11081_v50  ;;  %v11202_v53 = vld [vmem:[#allocation83_spill] sm:$0xff] }
 0x721   : > { %5973 = vmatmul.f32.gmra.mxu1 %v11160_v33  ;;  %6192 = vmatpush.msrb.mxu2 %v2721_v21 }
 0x722   : > { %v5654_v37 = vpop.f32.mrf.mxu2  ;;  %6144 = vmatpush.msrb.mxu1 %v2631_v34  ;;  %v11203_v34 = vld [vmem:[#allocation84_spill] sm:$0xff] }
 0x723   : > { %v5701_v48 = vpop.f32.mrf.mxu3  ;;  %v5655_v35 = vadd.f32 %v5654_v37, %v5608_v22  ;;  %v2625_v22 = vld [vmem:[#allocation7 + $0x1bb8] sm:$0xff]  ;;  %6193 = vmatpush.msrb.mxu2 %v2715_v43  ;;  %v2523_v37 = vld [vmem:[#allocation7 + $0x1888] sm:$0xff] }
 0x724   : > { %6145 = vmatpush.msrb.mxu1 %v2625_v22  ;;  %6099 = vmatpush.msrb.mxu0 %v2523_v37 }
 0x725   : > { %v5702_v5 = vadd.f32 %v5701_v48, %v5655_v35  ;;  %v5566_v40 = vpop.f32.mrf.mxu0  ;;  %v2619_v48 = vld [vmem:[#allocation7 + $0x1b88] sm:$0xff] }
 0x726   : > { %v5613_v29 = vpop.f32.mrf.mxu1  ;;  %v5567_v1 = vadd.f32 %v5566_v40, %v10356_v49  ;;  %6146 = vmatpush.msrb.mxu1 %v2619_v48  ;;  %v2709_v40 = vld [vmem:[#allocation7 + $0x1e58] sm:$0xff] }
 0x727   : > { %v6296_v17 = vmax.f32 %v11202_v53, %v5702_v5  ;;  %6020 = vmatmul.f32.gmra.mxu2 %v11083_v10  ;;  %v2811_v5 = vld [vmem:[#allocation7 + $0x2188] sm:$0xff] }
 0x728   : > { %6067 = vmatmul.f32.gmra.mxu3 %v11084_v2  ;;  %v5614_v0 = vadd.f32 %v5613_v29, %v5567_v1  ;;  %5929 = vmatmul.f32.gmra.mxu0 %v11191_v19  ;;  %v2613_v29 = vld [vmem:[#allocation7 + $0x1b58] sm:$0xff]  ;;  %v2511_v1 = vld [vmem:[#allocation7 + $0x1828] sm:$0xff] }
 0x729   : > { %5976 = vmatmul.f32.gmra.mxu1 %v11192_v14  ;;  %v6340_v49 = vmax.f32 %v6293_v3, %v6296_v17  ;;  %6240 = vmatpush.msrb.mxu3 %v2811_v5  ;;  %v2517_v3 = vld [vmem:[#allocation7 + $0x1858] sm:$0xff] }
 0x72a   : > { %v5657_v4 = vpop.f32.mrf.mxu2  ;;  %6194 = vmatpush.msrb.mxu2 %v2709_v40  ;;  %6100 = vmatpush.msrb.mxu0 %v2517_v3 }
 0x72b   : > { %v5704_v60 = vpop.f32.mrf.mxu3  ;;  %v10420_v57 = vadd.f32 %v6340_v49, %v10417_v12  ;;  %v5658_v32 = vadd.f32 %v5657_v4, %v5611_v36  ;;  %v2805_v36 = vld [vmem:[#allocation7 + $0x2158] sm:$0xff]  ;;  %6147 = vmatpush.msrb.mxu1 %v2613_v29  ;;  %v2703_v49 = vld [vmem:[#allocation7 + $0x1e28] sm:$0xff] }
 0x72c   : > { %6241 = vmatpush.msrb.mxu3 %v2805_v36  ;;  %6101 = vmatpush.msrb.mxu0 %v2511_v1  ;;  %v2799_v4 = vld [vmem:[#allocation7 + $0x2128] sm:$0xff] }
 0x72d   : > { %v5705_v59 = vadd.f32 %v5704_v60, %v5658_v32  ;;  %v5727_v15 = vpop.f32.mrf.mxu0  ;;  %6148 = vmatpush.msrb.mxu1 %v2607_v9  ;;  %6195 = vmatpush.msrb.mxu2 %v2703_v49  ;;  %v11204_v60 = vld [vmem:[#allocation52_spill] sm:$0xff] }
 0x72e   : > { %v5774_v35 = vpop.f32.mrf.mxu1  ;;  %6242 = vmatpush.msrb.mxu3 %v2799_v4  ;;  %v6372_v49 = vld [vmem:[#allocation10 + $0x78] sm:$0xff] }
 0x72f   : > { %v6299_v21 = vmax.f32 %v11203_v34, %v5705_v59  ;;  %6023 = vmatmul.f32.gmra.mxu2 %v11087_v51  ;;  %6601 = vmatpush.msra.mxu0 %v6372_v49 }
 0x730   : > { %6070 = vmatmul.f32.gmra.mxu3 %v11088_v47  ;;  %5932 = vmatmul.f32.gmra.mxu0 %v11193_v26 }
 0x731   : > { %5979 = vmatmul.f32.gmra.mxu1 %v11194_v11 }
 0x732   : > { %v5660_v44 = vpop.f32.mrf.mxu2 }
 0x733   : > { %v5707_v53 = vpop.f32.mrf.mxu3  ;;  %v5661_v17 = vadd.f32 %v5660_v44, %v5614_v0  ;;  %v5775_v0 = vadd.f32 %v5774_v35, %v5727_v15 }
 0x735   : > { %v5708_v22 = vadd.f32 %v5707_v53, %v5661_v17  ;;  %v5730_v43 = vpop.f32.mrf.mxu0 }
 0x736   : > { %v5777_v58 = vpop.f32.mrf.mxu1 }
 0x737   : > { %v6302_v32 = vmax.f32 %v11204_v60, %v5708_v22  ;;  %6026 = vmatmul.f32.gmra.mxu2 %v11092_v27  ;;  %v5778_v15 = vadd.f32 %v5777_v58, %v5730_v43  ;;  %v6371_v58 = vld [vmem:[#allocation10 + $0x70] sm:$0xff] }
 0x738   : > { %6073 = vmatmul.f32.gmra.mxu3 %v11093_v61  ;;  %5935 = vmatmul.f32.gmra.mxu0 %v11094_v52 }
 0x739   : > { %5982 = vmatmul.f32.gmra.mxu1 %v11095_v45  ;;  %v6349_v37 = vmax.f32 %v6299_v21, %v6302_v32  ;;  %6602 = vmatpush.msra.mxu0 %v6371_v58 }
 0x73a   : > { %v5821_v48 = vpop.f32.mrf.mxu2 }
 0x73b   : > { %v5868_v59 = vpop.f32.mrf.mxu3  ;;  %v10433_v5 = vadd.f32 %v6349_v37, %v10417_v12  ;;  %v5822_v40 = vadd.f32 %v5821_v48, %v5775_v0  ;;  %v6370_v0 = vld [vmem:[#allocation10 + $0x68] sm:$0xff]  ;;  %v11205_v37 = vld [vmem:[#allocation60_spill] sm:$0xff]  ;;  %v11206_v48 = vld [vmem:[#allocation63_spill] sm:$0xff] }
 0x73c   : > { %6603 = vmatpush.msra.mxu0 %v6370_v0 }
 0x73d   : > { %v10435_v3 = vadd.f32 %v5868_v59, %v5822_v40  ;;  %v5733_v29 = vpop.f32.mrf.mxu0  ;;  %v6369_v59 = vld [vmem:[#allocation10 + $0x60] sm:$0xff]  ;;  %v6420_v40 = vld [vmem:[#allocation10 + $0x1f8] sm:$0xff] }
 0x73e   : > { %v5780_v34 = vpop.f32.mrf.mxu1  ;;  %6661 = vmatpush.msra.mxu3 %v6420_v40  ;;  %6604 = vmatpush.msra.mxu0 %v6369_v59  ;;  %v6365_v59 = vld [vmem:[#allocation10 + $0x40] sm:$0xff]  ;;  %v6415_v40 = vld [vmem:[#allocation10 + $0x1d0] sm:$0xff] }
 0x73f   : > { %6029 = vmatmul.f32.gmra.mxu2 %v11097_v63  ;;  %v5781_v53 = vadd.f32 %v5780_v34, %v5733_v29 }
 0x740   : > { %6076 = vmatmul.f32.gmra.mxu3 %v11098_v38  ;;  %5938 = vmatmul.f32.gmra.mxu0 %v11099_v8 }
 0x741   : > { %5985 = vmatmul.f32.gmra.mxu1 %v11100_v54 }
 0x742   : > { %v5824_v35 = vpop.f32.mrf.mxu2 }
 0x743   : > { %v5871_v21 = vpop.f32.mrf.mxu3  ;;  %v5825_v36 = vadd.f32 %v5824_v35, %v5778_v15  ;;  %v6368_v35 = vld [vmem:[#allocation10 + $0x58] sm:$0xff] }
 0x744   : > { %6605 = vmatpush.msra.mxu0 %v6368_v35  ;;  %v6388_v35 = vld [vmem:[#allocation10 + $0xf8] sm:$0xff] }
 0x745   : > { %v10441_v1 = vadd.f32 %v5871_v21, %v5825_v36  ;;  %v5736_v9 = vpop.f32.mrf.mxu0  ;;  %v6419_v21 = vld [vmem:[#allocation10 + $0x1f0] sm:$0xff]  ;;  %6621 = vmatpush.msra.mxu1 %v6388_v35  ;;  %v6436_v35 = vld [vmem:[#allocation10 + $0x278] sm:$0xff] }
 0x746   : > { %v5783_v44 = vpop.f32.mrf.mxu1  ;;  %6662 = vmatpush.msra.mxu3 %v6419_v21 }
 0x747   : > { %6032 = vmatmul.f32.gmra.mxu2 %v9225_v28  ;;  %v5784_v29 = vadd.f32 %v5783_v44, %v5736_v9  ;;  %v6366_v9 = vld [vmem:[#allocation10 + $0x48] sm:$0xff]  ;;  %v6416_v44 = vld [vmem:[#allocation10 + $0x1d8] sm:$0xff] }
 0x748   : > { %6079 = vmatmul.f32.gmra.mxu3 %v9227_v56  ;;  %5941 = vmatmul.f32.gmra.mxu0 %v9339_v31 }
 0x749   : > { %5988 = vmatmul.f32.gmra.mxu1 %v9341_v6 }
 0x74a   : > { %v5827_v17 = vpop.f32.mrf.mxu2 }
 0x74b   : > { %v5874_v22 = vpop.f32.mrf.mxu3  ;;  %v5828_v43 = vadd.f32 %v5827_v17, %v5781_v53  ;;  %v6418_v53 = vld [vmem:[#allocation10 + $0x1e8] sm:$0xff] }
 0x74c   : > { %6663 = vmatpush.msra.mxu3 %v6418_v53  ;;  %v6362_v53 = vld [vmem:[#allocation10 + $0x28] sm:$0xff] }
 0x74d   : > { %v10447_v4 = vadd.f32 %v5874_v22, %v5828_v43  ;;  %v5739_v60 = vpop.f32.mrf.mxu0 }
 0x74e   : > { %v5786_v32 = vpop.f32.mrf.mxu1 }
 0x74f   : > { %6035 = vmatmul.f32.gmra.mxu2 %v11205_v37  ;;  %v5787_v43 = vadd.f32 %v5786_v32, %v5739_v60  ;;  %v6363_v60 = vld [vmem:[#allocation10 + $0x30] sm:$0xff]  ;;  %v6413_v32 = vld [vmem:[#allocation10 + $0x1c0] sm:$0xff] }
 0x750   : > { %6082 = vmatmul.f32.gmra.mxu3 %v11206_v48  ;;  %6102 = vmatmul.f32.vlgmr.msrb.gmra.mxu0 %v11069_v25  ;;  %v6367_v25 = vld [vmem:[#allocation10 + $0x50] sm:$0xff] }
 0x751   : > { %6149 = vmatmul.f32.vlgmr.msrb.gmra.mxu1 %v11070_v20  ;;  %v6417_v20 = vld [vmem:[#allocation10 + $0x1e0] sm:$0xff]  ;;  %6606 = vmatpush.msra.mxu0 %v6367_v25  ;;  %v6412_v25 = vld [vmem:[#allocation10 + $0x1b8] sm:$0xff] }
 0x752   : > { %v5830_v34 = vpop.f32.mrf.mxu2  ;;  %6664 = vmatpush.msra.mxu3 %v6417_v20 }
 0x753   : > { %v5877_v15 = vpop.f32.mrf.mxu3  ;;  %v5831_v36 = vadd.f32 %v5830_v34, %v5784_v29  ;;  %6607 = vmatpush.msra.mxu0 %v6366_v9  ;;  %v6411_v9 = vld [vmem:[#allocation10 + $0x1b0] sm:$0xff] }
 0x754   : > { %6665 = vmatpush.msra.mxu3 %v6416_v44  ;;  %v6385_v44 = vld [vmem:[#allocation10 + $0xe0] sm:$0xff] }
 0x755   : > { %v10453_v17 = vadd.f32 %v5877_v15, %v5831_v36  ;;  %v5742_v22 = vpop.f32.mrf.mxu0  ;;  %6608 = vmatpush.msra.mxu0 %v6365_v59 }
 0x756   : > { %v5789_v49 = vpop.f32.mrf.mxu1  ;;  %6666 = vmatpush.msra.mxu3 %v6415_v40 }
 0x757   : > { %6196 = vmatmul.f32.vlgmr.msrb.gmra.mxu2 %v9011_v55  ;;  %v5790_v15 = vadd.f32 %v5789_v49, %v5742_v22  ;;  %v6386_v22 = vld [vmem:[#allocation10 + $0xe8] sm:$0xff]  ;;  %v6361_v49 = vld [vmem:[#allocation10 + $0x20] sm:$0xff] }
 0x758   : > { %6243 = vmatmul.f32.vlgmr.msrb.gmra.mxu3 %v11071_v41  ;;  %6105 = vmatmul.f32.gmra.mxu0 %v11072_v46  ;;  %v6414_v46 = vld [vmem:[#allocation10 + $0x1c8] sm:$0xff] }
 0x759   : > { %6152 = vmatmul.f32.gmra.mxu1 %v9049_v39  ;;  %v6364_v39 = vld [vmem:[#allocation10 + $0x38] sm:$0xff]  ;;  %6667 = vmatpush.msra.mxu3 %v6414_v46 }
 0x75a   : > { %v5833_v58 = vpop.f32.mrf.mxu2  ;;  %6609 = vmatpush.msra.mxu0 %v6364_v39  ;;  %v6409_v39 = vld [vmem:[#allocation10 + $0x1a0] sm:$0xff]  ;;  %v6408_v46 = vld [vmem:[#allocation10 + $0x198] sm:$0xff] }
 0x75b   : > { %v5880_v0 = vpop.f32.mrf.mxu3  ;;  %v5834_v29 = vadd.f32 %v5833_v58, %v5787_v43  ;;  %6668 = vmatpush.msra.mxu3 %v6413_v32  ;;  %v6360_v43 = vld [vmem:[#allocation10 + $0x18] sm:$0xff]  ;;  %v6410_v58 = vld [vmem:[#allocation10 + $0x1a8] sm:$0xff]  ;;  %v6357_v32 = vld [vmem:[#allocation10] sm:$0xff] }
 0x75c   : > { %6610 = vmatpush.msra.mxu0 %v6363_v60  ;;  %v6382_v60 = vld [vmem:[#allocation10 + $0xc8] sm:$0xff] }
 0x75d   : > { %v10459_v34 = vadd.f32 %v5880_v0, %v5834_v29  ;;  %v10461_v55 = vpop.f32.mrf.mxu0  ;;  %6669 = vmatpush.msra.mxu3 %v6412_v25  ;;  %v6384_v0 = vld [vmem:[#allocation10 + $0xd8] sm:$0xff]  ;;  %v6359_v29 = vld [vmem:[#allocation10 + $0x10] sm:$0xff]  ;;  %v6406_v25 = vld [vmem:[#allocation10 + $0x188] sm:$0xff] }
 0x75e   : > { %v10463_v41 = vpop.f32.mrf.mxu1  ;;  %6611 = vmatpush.msra.mxu0 %v6362_v53 }
 0x75f   : > { %6199 = vmatmul.f32.gmra.mxu2 %v11073_v13  ;;  %v6387_v13 = vld [vmem:[#allocation10 + $0xf0] sm:$0xff]  ;;  %6670 = vmatpush.msra.mxu3 %v6411_v9  ;;  %v6433_v9 = vld [vmem:[#allocation10 + $0x260] sm:$0xff] }
 0x760   : > { %6246 = vmatmul.f32.gmra.mxu3 %v11074_v30  ;;  %6108 = vmatmul.f32.gmra.mxu0 %v11075_v62 }
 0x761   : > { %6155 = vmatmul.f32.gmra.mxu1 %v11076_v23  ;;  %6612 = vmatpush.msra.mxu0 %v6361_v49  ;;  %v6379_v49 = vld [vmem:[#allocation10 + $0xb0] sm:$0xff] }
 0x762   : > { %v5836_v21 = vpop.f32.mrf.mxu2  ;;  %6622 = vmatpush.msra.mxu1 %v6387_v13  ;;  %6671 = vmatpush.msra.mxu3 %v6410_v58  ;;  %v6405_v13 = vld [vmem:[#allocation10 + $0x180] sm:$0xff] }
 0x763   : > { %v5883_v36 = vpop.f32.mrf.mxu3  ;;  %v5837_v20 = vadd.f32 %v5836_v21, %v5790_v15  ;;  %6613 = vmatpush.msra.mxu0 %v6360_v43  ;;  %v6407_v15 = vld [vmem:[#allocation10 + $0x190] sm:$0xff]  ;;  %v6381_v21 = vld [vmem:[#allocation10 + $0xc0] sm:$0xff]  ;;  %v6378_v43 = vld [vmem:[#allocation10 + $0xa8] sm:$0xff] }
 0x764   : > { %6623 = vmatpush.msra.mxu1 %v6386_v22  ;;  %6672 = vmatpush.msra.mxu3 %v6409_v39  ;;  %v6484_v22 = vld [vmem:[#allocation10 + $0x3f8] sm:$0xff] }
 0x765   : > { %v10469_v30 = vadd.f32 %v5883_v36, %v5837_v20  ;;  %v10471_v62 = vpop.f32.mrf.mxu0  ;;  %6614 = vmatpush.msra.mxu0 %v6359_v29  ;;  %v6434_v20 = vld [vmem:[#allocation10 + $0x268] sm:$0xff]  ;;  %v6432_v29 = vld [vmem:[#allocation10 + $0x258] sm:$0xff] }
 0x766   : > { %v10473_v23 = vpop.f32.mrf.mxu1  ;;  %6624 = vmatpush.msra.mxu1 %v6385_v44  ;;  %6673 = vmatpush.msra.mxu3 %v6408_v46  ;;  %v6483_v44 = vld [vmem:[#allocation10 + $0x3f0] sm:$0xff]  ;;  %v6376_v46 = vld [vmem:[#allocation10 + $0x98] sm:$0xff] }
 0x767   : > { %6202 = vmatmul.f32.gmra.mxu2 %v11079_v7  ;;  %v6383_v7 = vld [vmem:[#allocation10 + $0xd0] sm:$0xff] }
 0x768   : > { %6249 = vmatmul.f32.gmra.mxu3 %v11080_v24  ;;  %6111 = vmatmul.f32.gmra.mxu0 %v11081_v50 }
 0x769   : > { %6158 = vmatmul.f32.gmra.mxu1 %v11160_v33  ;;  %v6358_v33 = vld [vmem:[#allocation10 + $0x8] sm:$0xff]  ;;  %6674 = vmatpush.msra.mxu3 %v6407_v15  ;;  %v6480_v15 = vld [vmem:[#allocation10 + $0x3d8] sm:$0xff] }
 0x76a   : > { %v10479_v59 = vpop.f32.mrf.mxu2  ;;  %6625 = vmatpush.msra.mxu1 %v6384_v0  ;;  %6615 = vmatpush.msra.mxu0 %v6358_v33  ;;  %v6481_v33 = vld [vmem:[#allocation10 + $0x3e0] sm:$0xff] }
 0x76b   : > { %v10481_v40 = vpop.f32.mrf.mxu3  ;;  %6675 = vmatpush.msra.mxu3 %v6406_v25  ;;  %v6429_v25 = vld [vmem:[#allocation10 + $0x240] sm:$0xff] }
 0x76c   : > { %6626 = vmatpush.msra.mxu1 %v6383_v7  ;;  %6616 = vmatpush.msra.mxu0 %v6357_v32  ;;  %v6431_v7 = vld [vmem:[#allocation10 + $0x250] sm:$0xff]  ;;  %v6430_v32 = vld [vmem:[#allocation10 + $0x248] sm:$0xff] }
 0x76d   : > { %v10483_v24 = vpop.f32.mrf.mxu0  ;;  %6676 = vmatpush.msra.mxu3 %v6405_v13  ;;  %v6373_v13 = vld [vmem:[#allocation10 + $0x80] sm:$0xff] }
 0x76e   : > { %v10485_v50 = vpop.f32.mrf.mxu1  ;;  %6627 = vmatpush.msra.mxu1 %v6382_v60  ;;  %6681 = vmatpush.msrb.mxu0 %v6436_v35  ;;  %v6375_v35 = vld [vmem:[#allocation10 + $0x90] sm:$0xff] }
 0x76f   : > { %6205 = vmatmul.f32.gmra.mxu2 %v11083_v10  ;;  %v6435_v10 = vld [vmem:[#allocation10 + $0x270] sm:$0xff]  ;;  %6741 = vmatpush.msrb.mxu3 %v6484_v22 }
 0x770   : > { %6252 = vmatmul.f32.gmra.mxu3 %v11084_v2  ;;  %6114 = vmatmul.f32.gmra.mxu0 %v11191_v19  ;;  %v6380_v2 = vld [vmem:[#allocation10 + $0xb8] sm:$0xff] }
 0x771   : > { %6161 = vmatmul.f32.gmra.mxu1 %v11192_v14  ;;  %6682 = vmatpush.msrb.mxu0 %v6435_v10 }
 0x772   : > { %v10491_v36 = vpop.f32.mrf.mxu2  ;;  %6628 = vmatpush.msra.mxu1 %v6381_v21  ;;  %6742 = vmatpush.msrb.mxu3 %v6483_v44 }
 0x773   : > { %v10493_v53 = vpop.f32.mrf.mxu3  ;;  %6683 = vmatpush.msrb.mxu0 %v6434_v20  ;;  %v6478_v20 = vld [vmem:[#allocation10 + $0x3c8] sm:$0xff] }
 0x774   : > { %6629 = vmatpush.msra.mxu1 %v6380_v2  ;;  %v6428_v2 = vld [vmem:[#allocation10 + $0x238] sm:$0xff] }
 0x775   : > { %v10495_v19 = vpop.f32.mrf.mxu0  ;;  %6684 = vmatpush.msrb.mxu0 %v6433_v9  ;;  %v6477_v9 = vld [vmem:[#allocation10 + $0x3c0] sm:$0xff] }
 0x776   : > { %v10497_v14 = vpop.f32.mrf.mxu1  ;;  %6630 = vmatpush.msra.mxu1 %v6379_v49  ;;  %v6427_v49 = vld [vmem:[#allocation10 + $0x230] sm:$0xff] }
 0x777   : > { %6208 = vmatmul.f32.gmra.mxu2 %v11087_v51  ;;  %v6482_v51 = vld [vmem:[#allocation10 + $0x3e8] sm:$0xff]  ;;  %6685 = vmatpush.msrb.mxu0 %v6432_v29  ;;  %v6476_v29 = vld [vmem:[#allocation10 + $0x3b8] sm:$0xff] }
 0x778   : > { %6255 = vmatmul.f32.gmra.mxu3 %v11088_v47  ;;  %6117 = vmatmul.f32.gmra.mxu0 %v11193_v26  ;;  %v6377_v47 = vld [vmem:[#allocation10 + $0xa0] sm:$0xff] }
 0x779   : > { %6164 = vmatmul.f32.gmra.mxu1 %v11194_v11  ;;  %6743 = vmatpush.msrb.mxu3 %v6482_v51 }
 0x77a   : > { %v10503_v58 = vpop.f32.mrf.mxu2  ;;  %6631 = vmatpush.msra.mxu1 %v6378_v43  ;;  %6686 = vmatpush.msrb.mxu0 %v6431_v7  ;;  %v6474_v7 = vld [vmem:[#allocation10 + $0x3a8] sm:$0xff] }
 0x77b   : > { %v10505_v0 = vpop.f32.mrf.mxu3  ;;  %6744 = vmatpush.msrb.mxu3 %v6481_v33  ;;  %v6404_v33 = vld [vmem:[#allocation10 + $0x178] sm:$0xff] }
 0x77c   : > { %6632 = vmatpush.msra.mxu1 %v6377_v47  ;;  %6687 = vmatpush.msrb.mxu0 %v6430_v32  ;;  %v6423_v32 = vld [vmem:[#allocation10 + $0x210] sm:$0xff] }
 0x77d   : > { %v5915_v26 = vpop.f32.mrf.mxu0  ;;  %6745 = vmatpush.msrb.mxu3 %v6480_v15  ;;  %6641 = vmatpush.msra.mxu2 %v6404_v33  ;;  %v6403_v15 = vld [vmem:[#allocation10 + $0x170] sm:$0xff] }
 0x77e   : > { %v5962_v39 = vpop.f32.mrf.mxu1  ;;  %v5916_v11 = vadd.f32 %v5915_v26, %v10435_v3  ;;  %6633 = vmatpush.msra.mxu1 %v6376_v46  ;;  %6688 = vmatpush.msrb.mxu0 %v6429_v25  ;;  %v6475_v26 = vld [vmem:[#allocation10 + $0x3b0] sm:$0xff] }
 0x77f   : > { %6211 = vmatmul.f32.gmra.mxu2 %v11092_v27  ;;  %v6479_v27 = vld [vmem:[#allocation10 + $0x3d0] sm:$0xff] }
 0x780   : > { %6258 = vmatmul.f32.gmra.mxu3 %v11093_v61  ;;  %v5963_v60 = vadd.f32 %v5962_v39, %v5916_v11  ;;  %6120 = vmatmul.f32.gmra.mxu0 %v11094_v52  ;;  %v6374_v61 = vld [vmem:[#allocation10 + $0x88] sm:$0xff]  ;;  %v6424_v11 = vld [vmem:[#allocation10 + $0x218] sm:$0xff] }
 0x781   : > { %6167 = vmatmul.f32.gmra.mxu1 %v11095_v45  ;;  %6746 = vmatpush.msrb.mxu3 %v6479_v27  ;;  %v6422_v27 = vld [vmem:[#allocation10 + $0x208] sm:$0xff]  ;;  %v11212_v33 = vld [vmem:[#allocation67_spill] sm:$0xff] }
 0x782   : > { %v10512_v3 = vpop.f32.mrf.mxu2  ;;  %6634 = vmatpush.msra.mxu1 %v6375_v35  ;;  %6689 = vmatpush.msrb.mxu0 %v6428_v2  ;;  %v11208_v2 = vld [vmem:[#allocation69_spill] sm:$0xff] }
 0x783   : > { %v10514_v21 = vpop.f32.mrf.mxu3  ;;  %6747 = vmatpush.msrb.mxu3 %v6478_v20  ;;  %6642 = vmatpush.msra.mxu2 %v6403_v15  ;;  %v6421_v20 = vld [vmem:[#allocation10 + $0x200] sm:$0xff] }
 0x784   : > { %6635 = vmatpush.msra.mxu1 %v6374_v61  ;;  %6690 = vmatpush.msrb.mxu0 %v6427_v49  ;;  %v6472_v61 = vld [vmem:[#allocation10 + $0x398] sm:$0xff]  ;;  %v11209_v49 = vld [vmem:[#allocation57_spill] sm:$0xff] }
 0x785   : > { %v5918_v10 = vpop.f32.mrf.mxu0  ;;  %6748 = vmatpush.msrb.mxu3 %v6477_v9 }
 0x786   : > { %v5965_v52 = vpop.f32.mrf.mxu1  ;;  %v5919_v45 = vadd.f32 %v5918_v10, %v10441_v1  ;;  %v6426_v1 = vld [vmem:[#allocation10 + $0x228] sm:$0xff]  ;;  %6636 = vmatpush.msra.mxu1 %v6373_v13  ;;  %v6401_v10 = vld [vmem:[#allocation10 + $0x160] sm:$0xff]  ;;  %v6471_v13 = vld [vmem:[#allocation10 + $0x390] sm:$0xff] }
 0x787   : > { %6214 = vmatmul.f32.gmra.mxu2 %v11097_v63  ;;  %6691 = vmatpush.msrb.mxu0 %v6426_v1 }
 0x788   : > { %6261 = vmatmul.f32.gmra.mxu3 %v11098_v38  ;;  %v5966_v22 = vadd.f32 %v5965_v52, %v5919_v45  ;;  %6123 = vmatmul.f32.gmra.mxu0 %v11099_v8  ;;  %v11207_v45 = vld [vmem:[#allocation66_spill] sm:$0xff] }
 0x789   : > { %6170 = vmatmul.f32.gmra.mxu1 %v11100_v54  ;;  %6749 = vmatpush.msrb.mxu3 %v6476_v29  ;;  %v6425_v54 = vld [vmem:[#allocation10 + $0x220] sm:$0xff]  ;;  %v6399_v29 = vld [vmem:[#allocation10 + $0x150] sm:$0xff] }
 0x78a   : > { %v6009_v44 = vpop.f32.mrf.mxu2  ;;  %6692 = vmatpush.msrb.mxu0 %v6425_v54 }
 0x78b   : > { %v6056_v43 = vpop.f32.mrf.mxu3  ;;  %v6010_v51 = vadd.f32 %v6009_v44, %v5963_v60  ;;  %6750 = vmatpush.msrb.mxu3 %v6475_v26  ;;  %v6316_v44 = vadd.f32 %v10417_v12, %v10375_v16  ;;  %v6398_v16 = vld [vmem:[#allocation10 + $0x148] sm:$0xff] }
 0x78c   : > { %6693 = vmatpush.msrb.mxu0 %v6424_v11  ;;  %v6469_v11 = vld [vmem:[#allocation10 + $0x380] sm:$0xff] }
 0x78d   : > { %v10521_v63 = vadd.f32 %v6056_v43, %v6010_v51  ;;  %v5921_v38 = vpop.f32.mrf.mxu0  ;;  %6751 = vmatpush.msrb.mxu3 %v6474_v7  ;;  %v6319_v54 = vmax.f32 %v6316_v44, 0.0  ;;  %v11211_v7 = vld [vmem:[#allocation70_spill] sm:$0xff]  ;;  %v6448_v44 = vld [vmem:[#allocation10 + $0x2d8] sm:$0xff] }
 0x78e   : > { %v5968_v47 = vpop.f32.mrf.mxu1  ;;  %v5922_v8 = vadd.f32 %v5921_v38, %v10447_v4  ;;  %v6473_v4 = vld [vmem:[#allocation10 + $0x3a0] sm:$0xff]  ;;  %6694 = vmatpush.msrb.mxu0 %v6423_v32  ;;  %v11213_v32 = vld [vmem:[#allocation58_spill] sm:$0xff] }
 0x78f   : > { %6217 = vmatmul.f32.gmra.mxu2 %v9225_v28  ;;  %v6402_v28 = vld [vmem:[#allocation10 + $0x168] sm:$0xff]  ;;  %6752 = vmatpush.msrb.mxu3 %v6473_v4 }
 0x790   : > { %6264 = vmatmul.f32.gmra.mxu3 %v9227_v56  ;;  %v5969_v39 = vadd.f32 %v5968_v47, %v5922_v8  ;;  %6126 = vmatmul.f32.gmra.mxu0 %v9339_v31 }
 0x791   : > { %6173 = vmatmul.f32.gmra.mxu1 %v9341_v6  ;;  %6643 = vmatpush.msra.mxu2 %v6402_v28  ;;  %v6396_v28 = vld [vmem:[#allocation10 + $0x138] sm:$0xff] }
 0x792   : > { %v6012_v46 = vpop.f32.mrf.mxu2  ;;  %6695 = vmatpush.msrb.mxu0 %v6422_v27  ;;  %6753 = vmatpush.msrb.mxu3 %v6472_v61  ;;  %v6450_v27 = vld [vmem:[#allocation10 + $0x2e8] sm:$0xff] }
 0x793   : > { %v6059_v60 = vpop.f32.mrf.mxu3  ;;  %v6013_v35 = vadd.f32 %v6012_v46, %v5966_v22  ;;  %v6400_v22 = vld [vmem:[#allocation10 + $0x158] sm:$0xff]  ;;  %6644 = vmatpush.msra.mxu2 %v6401_v10  ;;  %v6397_v46 = vld [vmem:[#allocation10 + $0x140] sm:$0xff] }
 0x794   : > { %6696 = vmatpush.msrb.mxu0 %v6421_v20  ;;  %6754 = vmatpush.msrb.mxu3 %v6471_v13 }
 0x795   : > { %v10528_v56 = vadd.f32 %v6059_v60, %v6013_v35  ;;  %v5924_v31 = vpop.f32.mrf.mxu0  ;;  %6645 = vmatpush.msra.mxu2 %v6400_v22  ;;  %v6452_v60 = vld [vmem:[#allocation10 + $0x2f8] sm:$0xff]  ;;  %v6394_v22 = vld [vmem:[#allocation10 + $0x128] sm:$0xff] }
 0x796   : > { %v5971_v6 = vpop.f32.mrf.mxu1  ;;  %v5925_v25 = vadd.f32 %v5924_v31, %v10453_v17  ;;  %v11210_v17 = vld [vmem:[#allocation50_spill] sm:$0xff]  ;;  %6701 = vmatpush.msrb.mxu1 %v6452_v60 }
 0x797   : > { %6220 = vmatmul.f32.gmra.mxu2 %v11205_v37  ;;  %v6315_v9 = vadd.f32 %v11210_v17, %v11209_v49  ;;  %v6324_v4 = vadd.f32 %v11213_v32, %v11210_v17  ;;  %v6451_v31 = vld [vmem:[#allocation10 + $0x2f0] sm:$0xff]  ;;  %v6449_v49 = vld [vmem:[#allocation10 + $0x2e0] sm:$0xff] }
 0x798   : > { %6267 = vmatmul.f32.gmra.mxu3 %v11206_v48  ;;  %v5972_v52 = vadd.f32 %v5971_v6, %v5925_v25  ;;  %6129 = vmatmul.f32.gmra.mxu0 %v11207_v45  ;;  %v6470_v48 = vld [vmem:[#allocation10 + $0x388] sm:$0xff]  ;;  %v6395_v25 = vld [vmem:[#allocation10 + $0x130] sm:$0xff] }
 0x799   : > { %6176 = vmatmul.f32.gmra.mxu1 %v11208_v2  ;;  %6755 = vmatpush.msrb.mxu3 %v6470_v48  ;;  %v6318_v8 = vmax.f32 %v6315_v9, 0.0  ;;  %v6327_v61 = vmax.f32 %v6324_v4, 0.0  ;;  %v6393_v9 = vld [vmem:[#allocation10 + $0x120] sm:$0xff]  ;;  %v6443_v32 = vld [vmem:[#allocation10 + $0x2b0] sm:$0xff] }
 0x79a   : > { %v6015_v37 = vpop.f32.mrf.mxu2  ;;  %6646 = vmatpush.msra.mxu2 %v6399_v29  ;;  %6702 = vmatpush.msrb.mxu1 %v6451_v31  ;;  %v6391_v29 = vld [vmem:[#allocation10 + $0x110] sm:$0xff]  ;;  %v5799_v31 = vadd.f32 %v10485_v50, %v10483_v24 }
 0x79b   : > { %v6062_v43 = vpop.f32.mrf.mxu3  ;;  %v6016_v1 = vadd.f32 %v6015_v37, %v5969_v39  ;;  %6756 = vmatpush.msrb.mxu3 %v6469_v11  ;;  %v6334_v37 = vadd.f32 %v10403_v18, %v10417_v12  ;;  %v5796_v18 = vadd.f32 %v10473_v23, %v10471_v62  ;;  %v6445_v11 = vld [vmem:[#allocation10 + $0x2c0] sm:$0xff]  ;;  %v6467_v62 = vld [vmem:[#allocation10 + $0x370] sm:$0xff] }
 0x79c   : > { %6647 = vmatpush.msra.mxu2 %v6398_v16  ;;  %6703 = vmatpush.msrb.mxu1 %v6450_v27  ;;  %v6465_v27 = vld [vmem:[#allocation10 + $0x360] sm:$0xff]  ;;  %v6499_v24 = vld [vmem:[#allocation10 + $0x470] sm:$0xff] }
 0x79d   : > { %v10539_v51 = vadd.f32 %v6062_v43, %v6016_v1  ;;  %v5927_v38 = vpop.f32.mrf.mxu0 }
 0x79e   : > { %v5974_v47 = vpop.f32.mrf.mxu1  ;;  %v5928_v26 = vadd.f32 %v5927_v38, %v10459_v34  ;;  %v6325_v34 = vadd.f32 %v10389_v42, %v10417_v12  ;;  %6648 = vmatpush.msra.mxu2 %v6397_v46  ;;  %v5793_v42 = vadd.f32 %v10463_v41, %v10461_v55  ;;  %6704 = vmatpush.msrb.mxu1 %v6449_v49  ;;  %v6392_v41 = vld [vmem:[#allocation10 + $0x118] sm:$0xff]  ;;  %v6337_v38 = vmax.f32 %v6334_v37, 0.0  ;;  %v6463_v49 = vld [vmem:[#allocation10 + $0x350] sm:$0xff] }
 0x79f   : > { %6223 = vmatmul.f32.gmra.mxu2 %v11211_v7  ;;  %v6389_v7 = vld [vmem:[#allocation10 + $0x100] sm:$0xff] }
 0x7a0   : > { %6270 = vmatmul.f32.gmra.mxu3 %v11212_v33  ;;  %v5975_v39 = vadd.f32 %v5974_v47, %v5928_v26  ;;  %6617 = vmatmul.f32.vlgmr.msra.gmra.mxu0 %v6318_v8  ;;  %v6328_v20 = vmax.f32 %v6325_v34, 0.0  ;;  %v6390_v26 = vld [vmem:[#allocation10 + $0x108] sm:$0xff]  ;;  %v6444_v33 = vld [vmem:[#allocation10 + $0x2b8] sm:$0xff] }
 0x7a1   : > { %6637 = vmatmul.f32.vlgmr.msra.gmra.mxu1 %v6319_v54  ;;  %6649 = vmatpush.msra.mxu2 %v6396_v28  ;;  %v6442_v34 = vld [vmem:[#allocation10 + $0x2a8] sm:$0xff] }
 0x7a2   : > { %v6018_v15 = vpop.f32.mrf.mxu2  ;;  %6705 = vmatpush.msrb.mxu1 %v6448_v44  ;;  %v6466_v28 = vld [vmem:[#allocation10 + $0x368] sm:$0xff] }
 0x7a3   : > { %v6065_v35 = vpop.f32.mrf.mxu3  ;;  %v6019_v6 = vadd.f32 %v6018_v15, %v5972_v52  ;;  %6650 = vmatpush.msra.mxu2 %v6395_v25  ;;  %v5840_v52 = vadd.f32 %v10479_v59, %v5793_v42  ;;  %v6446_v59 = vld [vmem:[#allocation10 + $0x2c8] sm:$0xff]  ;;  %v6441_v25 = vld [vmem:[#allocation10 + $0x2a0] sm:$0xff] }
 0x7a5   : > { %v10548_v10 = vadd.f32 %v6065_v35, %v6019_v6  ;;  %v5930_v45 = vpop.f32.mrf.mxu0  ;;  %6651 = vmatpush.msra.mxu2 %v6394_v22  ;;  %v5887_v1 = vadd.f32 %v10481_v40, %v5840_v52  ;;  %v5843_v40 = vadd.f32 %v10491_v36, %v5796_v18  ;;  %v6439_v22 = vld [vmem:[#allocation10 + $0x290] sm:$0xff] }
 0x7a6   : > { %v5977_v2 = vpop.f32.mrf.mxu1  ;;  %v5931_v13 = vadd.f32 %v5930_v45, %v10469_v30  ;;  %v6447_v30 = vld [vmem:[#allocation10 + $0x2d0] sm:$0xff] }
 0x7a7   : > { %6652 = vmatpush.msra.mxu2 %v6393_v9  ;;  %6706 = vmatpush.msrb.mxu1 %v6447_v30  ;;  %v5890_v23 = vadd.f32 %v10493_v53, %v5843_v40  ;;  %v6440_v53 = vld [vmem:[#allocation10 + $0x298] sm:$0xff]  ;;  %v6437_v30 = vld [vmem:[#allocation10 + $0x280] sm:$0xff] }
 0x7a8   : > { %6677 = vmatmul.f32.vlgmr.msra.gmra.mxu3 %v6327_v61  ;;  %v5978_v17 = vadd.f32 %v5977_v2, %v5931_v13  ;;  %6697 = vmatmul.f32.vlgmr.msrb.gmra.mxu0 %v6328_v20  ;;  %v5846_v61 = vadd.f32 %v10503_v58, %v5799_v31  ;;  %v6500_v2 = vld [vmem:[#allocation10 + $0x478] sm:$0xff]  ;;  %v6438_v58 = vld [vmem:[#allocation10 + $0x288] sm:$0xff]  ;;  %v6491_v31 = vld [vmem:[#allocation10 + $0x430] sm:$0xff] }
 0x7a9   : > { %6653 = vmatpush.msra.mxu2 %v6392_v41  ;;  %6707 = vmatpush.msrb.mxu1 %v6446_v59  ;;  %v6464_v20 = vld [vmem:[#allocation10 + $0x358] sm:$0xff] }
 0x7aa   : > { %v6021_v43 = vpop.f32.mrf.mxu2  ;;  %6761 = vmatpush.msra.mxu0 %v6500_v2  ;;  %v5893_v52 = vadd.f32 %v10505_v0, %v5846_v61  ;;  %v6516_v0 = vld [vmem:[#allocation10 + $0x4f8] sm:$0xff]  ;;  %v6490_v61 = vld [vmem:[#allocation10 + $0x428] sm:$0xff] }
 0x7ab   : > { %v6068_v55 = vpop.f32.mrf.mxu3  ;;  %v6022_v48 = vadd.f32 %v6021_v43, %v5975_v39  ;;  %6654 = vmatpush.msra.mxu2 %v6391_v29  ;;  %6708 = vmatpush.msrb.mxu1 %v6445_v11  ;;  %v6468_v39 = vld [vmem:[#allocation10 + $0x378] sm:$0xff]  ;;  %v6462_v43 = vld [vmem:[#allocation10 + $0x348] sm:$0xff] }
 0x7ac   : > { %6762 = vmatpush.msra.mxu0 %v6499_v24  ;;  %v6514_v11 = vld [vmem:[#allocation10 + $0x4e8] sm:$0xff]  ;;  %v6508_v24 = vld [vmem:[#allocation10 + $0x4b8] sm:$0xff] }
 0x7ad   : > { %v10557_v47 = vadd.f32 %v6068_v55, %v6022_v48  ;;  %v5933_v8 = vpop.f32.mrf.mxu0  ;;  %6655 = vmatpush.msra.mxu2 %v6390_v26  ;;  %6709 = vmatpush.msrb.mxu1 %v6444_v33  ;;  %v5802_v55 = vadd.f32 %v10497_v14, %v10495_v19  ;;  %v6497_v48 = vld [vmem:[#allocation10 + $0x460] sm:$0xff]  ;;  %v6495_v14 = vld [vmem:[#allocation10 + $0x450] sm:$0xff] }
 0x7ae   : > { %v5980_v54 = vpop.f32.mrf.mxu1  ;;  %v5934_v12 = vadd.f32 %v5933_v8, %v5887_v1  ;;  %v6461_v1 = vld [vmem:[#allocation10 + $0x340] sm:$0xff]  ;;  %v6460_v8 = vld [vmem:[#allocation10 + $0x338] sm:$0xff]  ;;  %v6459_v26 = vld [vmem:[#allocation10 + $0x330] sm:$0xff] }
 0x7af   : > { %6656 = vmatpush.msra.mxu2 %v6389_v7  ;;  %6710 = vmatpush.msrb.mxu1 %v6443_v32  ;;  %v5849_v29 = vadd.f32 %v10512_v3, %v5802_v55  ;;  %v6494_v3 = vld [vmem:[#allocation10 + $0x448] sm:$0xff]  ;;  %v6493_v32 = vld [vmem:[#allocation10 + $0x440] sm:$0xff] }
 0x7b0   : > { %6757 = vmatmul.f32.vlgmr.msrb.gmra.mxu3 %v6337_v38  ;;  %v5981_v16 = vadd.f32 %v5980_v54, %v5934_v12  ;;  %v6496_v38 = vld [vmem:[#allocation10 + $0x458] sm:$0xff]  ;;  %v6515_v54 = vld [vmem:[#allocation10 + $0x4f0] sm:$0xff] }
 0x7b1   : > { %6721 = vmatpush.msrb.mxu2 %v6468_v39  ;;  %6711 = vmatpush.msrb.mxu1 %v6442_v34  ;;  %v5896_v40 = vadd.f32 %v10514_v21, %v5849_v29  ;;  %v6458_v39 = vld [vmem:[#allocation10 + $0x328] sm:$0xff]  ;;  %v6492_v21 = vld [vmem:[#allocation10 + $0x438] sm:$0xff] }
 0x7b2   : > { %v6024_v46 = vpop.f32.mrf.mxu2  ;;  %v6456_v34 = vld [vmem:[#allocation10 + $0x318] sm:$0xff] }
 0x7b3   : > { %v6071_v60 = vpop.f32.mrf.mxu3  ;;  %v6025_v4 = vadd.f32 %v6024_v46, %v5978_v17  ;;  %6722 = vmatpush.msrb.mxu2 %v6467_v62  ;;  %6712 = vmatpush.msrb.mxu1 %v6441_v25  ;;  %v6498_v17 = vld [vmem:[#allocation10 + $0x468] sm:$0xff]  ;;  %v6513_v46 = vld [vmem:[#allocation10 + $0x4e0] sm:$0xff]  ;;  %v6512_v62 = vld [vmem:[#allocation10 + $0x4d8] sm:$0xff] }
 0x7b4   : > { %6763 = vmatpush.msra.mxu0 %v6498_v17  ;;  %v6455_v25 = vld [vmem:[#allocation10 + $0x310] sm:$0xff]  ;;  %v6504_v29 = vld [vmem:[#allocation10 + $0x498] sm:$0xff] }
 0x7b5   : > { %v10563_v15 = vadd.f32 %v6071_v60, %v6025_v4  ;;  %v5936_v36 = vpop.f32.mrf.mxu0  ;;  %6723 = vmatpush.msrb.mxu2 %v6466_v28  ;;  %6713 = vmatpush.msrb.mxu1 %v6440_v53  ;;  %v6457_v4 = vld [vmem:[#allocation10 + $0x320] sm:$0xff] }
 0x7b6   : > { %v5983_v35 = vpop.f32.mrf.mxu1  ;;  %v5937_v6 = vadd.f32 %v5936_v36, %v5890_v23  ;;  %6764 = vmatpush.msra.mxu0 %v6497_v48  ;;  %v6511_v36 = vld [vmem:[#allocation10 + $0x4d0] sm:$0xff]  ;;  %v6486_v48 = vld [vmem:[#allocation10 + $0x408] sm:$0xff] }
 0x7b7   : > { %6724 = vmatpush.msrb.mxu2 %v6465_v27  ;;  %6714 = vmatpush.msrb.mxu1 %v6439_v22  ;;  %v6510_v27 = vld [vmem:[#allocation10 + $0x4c8] sm:$0xff]  ;;  %v6453_v22 = vld [vmem:[#allocation10 + $0x300] sm:$0xff] }
 0x7b8   : > { %v5984_v45 = vadd.f32 %v5983_v35, %v5937_v6  ;;  %6765 = vmatpush.msra.mxu0 %v6496_v38 }
 0x7b9   : > { %6725 = vmatpush.msrb.mxu2 %v6464_v20  ;;  %6715 = vmatpush.msrb.mxu1 %v6438_v58  ;;  %v6454_v20 = vld [vmem:[#allocation10 + $0x308] sm:$0xff]  ;;  %v6507_v58 = vld [vmem:[#allocation10 + $0x4b0] sm:$0xff] }
 0x7ba   : > { %v6027_v42 = vpop.f32.mrf.mxu2  ;;  %6766 = vmatpush.msra.mxu0 %v6495_v14  ;;  %v6502_v14 = vld [vmem:[#allocation10 + $0x488] sm:$0xff] }
 0x7bb   : > { %v6074_v13 = vpop.f32.mrf.mxu3  ;;  %v6028_v50 = vadd.f32 %v6027_v42, %v5981_v16  ;;  %6726 = vmatpush.msrb.mxu2 %v6463_v49  ;;  %6716 = vmatpush.msrb.mxu1 %v6437_v30  ;;  %v6509_v42 = vld [vmem:[#allocation10 + $0x4c0] sm:$0xff] }
 0x7bc   : > { %6767 = vmatpush.msra.mxu0 %v6494_v3 }
 0x7bd   : > { %v10569_v9 = vadd.f32 %v6074_v13, %v6028_v50  ;;  %v5939_v44 = vpop.f32.mrf.mxu0  ;;  %6727 = vmatpush.msrb.mxu2 %v6462_v43  ;;  %6781 = vmatpush.msra.mxu1 %v6516_v0  ;;  %v6489_v13 = vld [vmem:[#allocation10 + $0x420] sm:$0xff]  ;;  %v6488_v50 = vld [vmem:[#allocation10 + $0x418] sm:$0xff] }
 0x7be   : > { %v5986_v37 = vpop.f32.mrf.mxu1  ;;  %v5940_v41 = vadd.f32 %v5939_v44, %v5893_v52  ;;  %6768 = vmatpush.msra.mxu0 %v6493_v32  ;;  %v6487_v44 = vld [vmem:[#allocation10 + $0x410] sm:$0xff]  ;;  %v6485_v0 = vld [vmem:[#allocation10 + $0x400] sm:$0xff]  ;;  %v6560_v32 = vld [vmem:[#allocation10 + $0x658] sm:$0xff] }
 0x7bf   : > { %6728 = vmatpush.msrb.mxu2 %v6461_v1  ;;  %6782 = vmatpush.msra.mxu1 %v6515_v54  ;;  %v6505_v1 = vld [vmem:[#allocation10 + $0x4a0] sm:$0xff] }
 0x7c0   : > { %v5987_v59 = vadd.f32 %v5986_v37, %v5940_v41  ;;  %6769 = vmatpush.msra.mxu0 %v6492_v21  ;;  %v6506_v37 = vld [vmem:[#allocation10 + $0x4a8] sm:$0xff]  ;;  %v6547_v21 = vld [vmem:[#allocation10 + $0x5f0] sm:$0xff] }
 0x7c1   : > { %6729 = vmatpush.msrb.mxu2 %v6460_v8  ;;  %6783 = vmatpush.msra.mxu1 %v6514_v11 }
 0x7c2   : > { %v6030_v18 = vpop.f32.mrf.mxu2  ;;  %6770 = vmatpush.msra.mxu0 %v6491_v31 }
 0x7c3   : > { %v6077_v19 = vpop.f32.mrf.mxu3  ;;  %v6031_v12 = vadd.f32 %v6030_v18, %v5984_v45  ;;  %6730 = vmatpush.msrb.mxu2 %v6459_v26  ;;  %6784 = vmatpush.msra.mxu1 %v6513_v46  ;;  %v6503_v18 = vld [vmem:[#allocation10 + $0x490] sm:$0xff] }
 0x7c4   : > { %6771 = vmatpush.msra.mxu0 %v6490_v61  ;;  %v6557_v61 = vld [vmem:[#allocation10 + $0x640] sm:$0xff] }
 0x7c5   : > { %v10575_v16 = vadd.f32 %v6077_v19, %v6031_v12  ;;  %v5942_v7 = vpop.f32.mrf.mxu0  ;;  %6731 = vmatpush.msrb.mxu2 %v6458_v39  ;;  %6785 = vmatpush.msra.mxu1 %v6512_v62  ;;  %v6562_v12 = vld [vmem:[#allocation10 + $0x668] sm:$0xff] }
 0x7c6   : > { %v5989_v33 = vpop.f32.mrf.mxu1  ;;  %v5943_v60 = vadd.f32 %v5942_v7, %v5896_v40  ;;  %6772 = vmatpush.msra.mxu0 %v6489_v13  ;;  %v6501_v7 = vld [vmem:[#allocation10 + $0x480] sm:$0xff]  ;;  %v6544_v13 = vld [vmem:[#allocation10 + $0x5d8] sm:$0xff] }
 0x7c7   : > { %6732 = vmatpush.msrb.mxu2 %v6457_v4  ;;  %6786 = vmatpush.msra.mxu1 %v6511_v36  ;;  %v11214_v39 = vld [vmem:[#allocation61_spill] sm:$0xff] }
 0x7c8   : > { %v5990_v23 = vadd.f32 %v5989_v33, %v5943_v60  ;;  %6773 = vmatpush.msra.mxu0 %v6488_v50  ;;  %v6561_v33 = vld [vmem:[#allocation10 + $0x660] sm:$0xff]  ;;  %v6548_v60 = vld [vmem:[#allocation10 + $0x5f8] sm:$0xff]  ;;  %v6546_v36 = vld [vmem:[#allocation10 + $0x5e8] sm:$0xff] }
 0x7c9   : > { %6733 = vmatpush.msrb.mxu2 %v6456_v34  ;;  %6787 = vmatpush.msra.mxu1 %v6510_v27  ;;  %v6545_v27 = vld [vmem:[#allocation10 + $0x5e0] sm:$0xff] }
 0x7ca   : > { %v6033_v35 = vpop.f32.mrf.mxu2  ;;  %6774 = vmatpush.msra.mxu0 %v6487_v44  ;;  %6821 = vmatpush.msra.mxu3 %v6548_v60 }
 0x7cb   : > { %v6080_v28 = vpop.f32.mrf.mxu3  ;;  %v6034_v6 = vadd.f32 %v6033_v35, %v5987_v59  ;;  %6734 = vmatpush.msrb.mxu2 %v6455_v25  ;;  %6788 = vmatpush.msra.mxu1 %v6509_v42  ;;  %v6564_v59 = vld [vmem:[#allocation10 + $0x678] sm:$0xff]  ;;  %v6558_v35 = vld [vmem:[#allocation10 + $0x648] sm:$0xff] }
 0x7cc   : > { %6775 = vmatpush.msra.mxu0 %v6486_v48  ;;  %6822 = vmatpush.msra.mxu3 %v6547_v21  ;;  %v6537_v21 = vld [vmem:[#allocation10 + $0x5a0] sm:$0xff] }
 0x7cd   : > { %v10577_v45 = vadd.f32 %v6080_v28, %v6034_v6  ;;  %v6103_v53 = vpop.f32.mrf.mxu0  ;;  %6735 = vmatpush.msrb.mxu2 %v6454_v20  ;;  %6789 = vmatpush.msra.mxu1 %v6508_v24  ;;  %v7528_v20 = vld [vmem:[#allocation8] sm:$0x7] }
 0x7ce   : > { %v6150_v2 = vpop.f32.mrf.mxu1  ;;  %v6104_v43 = vadd.f32 %v6103_v53, %v10521_v63  ;;  %6776 = vmatpush.msra.mxu0 %v6485_v0  ;;  %v6563_v63 = vld [vmem:[#allocation10 + $0x670] sm:$0xff]  ;;  %6823 = vmatpush.msra.mxu3 %v6546_v36  ;;  %v11215_v53 = vld [vmem:[#allocation56_spill] sm:$0xff]  ;;  %v10586_v42 = vperm.slane %v7528_v20, 2 }
 0x7cf   : > { %6736 = vmatpush.msrb.mxu2 %v6453_v22  ;;  %6790 = vmatpush.msra.mxu1 %v6507_v58  ;;  %v6556_v22 = vld [vmem:[#allocation10 + $0x638] sm:$0xff]  ;;  %v6555_v58 = vld [vmem:[#allocation10 + $0x630] sm:$0xff] }
 0x7d0   : > { %v6151_v38 = vadd.f32 %v6150_v2, %v6104_v43  ;;  %6841 = vmatpush.msrb.mxu0 %v6564_v59  ;;  %6824 = vmatpush.msra.mxu3 %v6545_v27  ;;  %v6554_v43 = vld [vmem:[#allocation10 + $0x628] sm:$0xff]  ;;  %v6541_v59 = vld [vmem:[#allocation10 + $0x5c0] sm:$0xff] }
 0x7d1   : > { %6791 = vmatpush.msra.mxu1 %v6506_v37  ;;  %v6542_v37 = vld [vmem:[#allocation10 + $0x5c8] sm:$0xff] }
 0x7d2   : > { %v6036_v49 = vpop.f32.mrf.mxu2  ;;  %6842 = vmatpush.msrb.mxu0 %v6563_v63  ;;  %6825 = vmatpush.msra.mxu3 %v6544_v13  ;;  %v6540_v63 = vld [vmem:[#allocation10 + $0x5b8] sm:$0xff]  ;;  %v6525_v13 = vld [vmem:[#allocation10 + $0x540] sm:$0xff] }
 0x7d3   : > { %v6083_v52 = vpop.f32.mrf.mxu3  ;;  %v6037_v17 = vadd.f32 %v6036_v49, %v5990_v23  ;;  %6792 = vmatpush.msra.mxu1 %v6505_v1 }
 0x7d4   : > { %6843 = vmatpush.msrb.mxu0 %v6562_v12  ;;  %v6530_v12 = vld [vmem:[#allocation10 + $0x568] sm:$0xff] }
 0x7d5   : > { %v10580_v55 = vadd.f32 %v6083_v52, %v6037_v17  ;;  %v6106_v41 = vpop.f32.mrf.mxu0  ;;  %6793 = vmatpush.msra.mxu1 %v6504_v29  ;;  %v6543_v52 = vld [vmem:[#allocation10 + $0x5d0] sm:$0xff]  ;;  %v6532_v29 = vld [vmem:[#allocation10 + $0x578] sm:$0xff] }
 0x7d6   : > { %v6153_v30 = vpop.f32.mrf.mxu1  ;;  %v6107_v26 = vadd.f32 %v6106_v41, %v10528_v56  ;;  %6844 = vmatpush.msrb.mxu0 %v6561_v33  ;;  %v6559_v56 = vld [vmem:[#allocation10 + $0x650] sm:$0xff]  ;;  %6826 = vmatpush.msra.mxu3 %v6543_v52  ;;  %v6538_v33 = vld [vmem:[#allocation10 + $0x5a8] sm:$0xff]  ;;  %v6524_v52 = vld [vmem:[#allocation10 + $0x538] sm:$0xff] }
 0x7d7   : > { %6794 = vmatpush.msra.mxu1 %v6503_v18  ;;  %v6531_v18 = vld [vmem:[#allocation10 + $0x570] sm:$0xff] }
 0x7d8   : > { %v6154_v4 = vadd.f32 %v6153_v30, %v6107_v26  ;;  %6845 = vmatpush.msrb.mxu0 %v6560_v32  ;;  %6827 = vmatpush.msra.mxu3 %v6542_v37 }
 0x7d9   : > { %6795 = vmatpush.msra.mxu1 %v6502_v14 }
 0x7da   : > { %v6197_v8 = vpop.f32.mrf.mxu2  ;;  %6846 = vmatpush.msrb.mxu0 %v6559_v56  ;;  %6828 = vmatpush.msra.mxu3 %v6541_v59  ;;  %v6549_v56 = vld [vmem:[#allocation10 + $0x600] sm:$0xff] }
 0x7db   : > { %v6244_v54 = vpop.f32.mrf.mxu3  ;;  %v6198_v19 = vadd.f32 %v6197_v8, %v6151_v38  ;;  %6796 = vmatpush.msra.mxu1 %v6501_v7  ;;  %v6553_v38 = vld [vmem:[#allocation10 + $0x620] sm:$0xff] }
 0x7dc   : > { %6847 = vmatpush.msrb.mxu0 %v6558_v35  ;;  %v11216_v8 = vld [vmem:[#allocation93_spill] sm:$0xff]  ;;  %6829 = vmatpush.msra.mxu3 %v6540_v63 }
 0x7dd   : > { %v6245_v11 = vadd.f32 %v6244_v54, %v6198_v19  ;;  %v6109_v40 = vpop.f32.mrf.mxu0  ;;  %v6552_v19 = vld [vmem:[#allocation10 + $0x618] sm:$0xff]  ;;  %v6529_v7 = vld [vmem:[#allocation10 + $0x560] sm:$0xff] }
 0x7de   : > { %v6156_v3 = vpop.f32.mrf.mxu1  ;;  %v6110_v28 = vadd.f32 %v6109_v40, %v10539_v51  ;;  %6848 = vmatpush.msrb.mxu0 %v6557_v61  ;;  %v6551_v40 = vld [vmem:[#allocation10 + $0x610] sm:$0xff] }
 0x7df   : > { %v6276_v46 = vmax.f32 %v11214_v39, %v6245_v11  ;;  %v6539_v11 = vld [vmem:[#allocation10 + $0x5b0] sm:$0xff]  ;;  %v6550_v39 = vld [vmem:[#allocation10 + $0x608] sm:$0xff] }
 0x7e0   : > { %v6157_v24 = vadd.f32 %v6156_v3, %v6110_v28  ;;  %6849 = vmatpush.msrb.mxu0 %v6556_v22  ;;  %6830 = vmatpush.msra.mxu3 %v6539_v11  ;;  %v6527_v28 = vld [vmem:[#allocation10 + $0x550] sm:$0xff]  ;;  %v6534_v22 = vld [vmem:[#allocation10 + $0x588] sm:$0xff] }
 0x7e2   : > { %v6200_v62 = vpop.f32.mrf.mxu2  ;;  %6850 = vmatpush.msrb.mxu0 %v6555_v58  ;;  %6831 = vmatpush.msra.mxu3 %v6538_v33  ;;  %v6580_v58 = vld [vmem:[#allocation10 + $0x6f8] sm:$0xff] }
 0x7e3   : > { %v6247_v23 = vpop.f32.mrf.mxu3  ;;  %v6201_v34 = vadd.f32 %v6200_v62, %v6154_v4 }
 0x7e4   : > { %6851 = vmatpush.msrb.mxu0 %v6554_v43  ;;  %6832 = vmatpush.msra.mxu3 %v6537_v21  ;;  %v6523_v43 = vld [vmem:[#allocation10 + $0x530] sm:$0xff] }
 0x7e5   : > { %v6248_v31 = vadd.f32 %v6247_v23, %v6201_v34  ;;  %v6112_v6 = vpop.f32.mrf.mxu0  ;;  %v6528_v23 = vld [vmem:[#allocation10 + $0x558] sm:$0xff]  ;;  %v11218_v34 = vld [vmem:[#allocation49_spill] sm:$0xff] }
 0x7e6   : > { %v6159_v25 = vpop.f32.mrf.mxu1  ;;  %v6113_v30 = vadd.f32 %v6112_v6, %v10548_v10  ;;  %6852 = vmatpush.msrb.mxu0 %v6553_v38  ;;  %v6521_v38 = vld [vmem:[#allocation10 + $0x520] sm:$0xff] }
 0x7e7   : > { %v6279_v2 = vmax.f32 %v11215_v53, %v6248_v31  ;;  %v6536_v31 = vld [vmem:[#allocation10 + $0x598] sm:$0xff]  ;;  %v6535_v53 = vld [vmem:[#allocation10 + $0x590] sm:$0xff] }
 0x7e8   : > { %v6160_v14 = vadd.f32 %v6159_v25, %v6113_v30  ;;  %6853 = vmatpush.msrb.mxu0 %v6552_v19  ;;  %6833 = vmatpush.msra.mxu3 %v6536_v31  ;;  %v6596_v31 = vld [vmem:[#allocation10 + $0x778] sm:$0xff] }
 0x7e9   : > { %v6307_v50 = vmax.f32 %v6276_v46, %v6279_v2  ;;  %v11217_v46 = vld [vmem:[#allocation95_spill] sm:$0xff] }
 0x7ea   : > { %v6203_v51 = vpop.f32.mrf.mxu2  ;;  %6854 = vmatpush.msrb.mxu0 %v6551_v40  ;;  %v6336_v60 = vmax.f32 %v11217_v46, 0.0  ;;  %6834 = vmatpush.msra.mxu3 %v6535_v53  ;;  %v6519_v40 = vld [vmem:[#allocation10 + $0x510] sm:$0xff]  ;;  %v6574_v46 = vld [vmem:[#allocation10 + $0x6c8] sm:$0xff] }
 0x7eb   : > { %v6250_v49 = vpop.f32.mrf.mxu3  ;;  %v6317_v17 = vadd.f32 %v10586_v42, %v6307_v50  ;;  %v6204_v44 = vadd.f32 %v6203_v51, %v6157_v24 }
 0x7ec   : > { %6855 = vmatpush.msrb.mxu0 %v6550_v39  ;;  %6835 = vmatpush.msra.mxu3 %v6534_v22  ;;  %v6518_v39 = vld [vmem:[#allocation10 + $0x508] sm:$0xff]  ;;  %v6569_v22 = vld [vmem:[#allocation10 + $0x6a0] sm:$0xff] }
 0x7ed   : > { %v6320_v41 = vmax.f32 %v6317_v17, 0.0  ;;  %v6251_v48 = vadd.f32 %v6250_v49, %v6204_v44  ;;  %v6115_v1 = vpop.f32.mrf.mxu0  ;;  %v6533_v17 = vld [vmem:[#allocation10 + $0x580] sm:$0xff]  ;;  %v11219_v44 = vld [vmem:[#allocation94_spill] sm:$0xff] }
 0x7ee   : > { %v6162_v0 = vpop.f32.mrf.mxu1  ;;  %v6116_v32 = vadd.f32 %v6115_v1, %v10557_v47  ;;  %6856 = vmatpush.msrb.mxu0 %v6549_v56  ;;  %v6526_v47 = vld [vmem:[#allocation10 + $0x548] sm:$0xff]  ;;  %6836 = vmatpush.msra.mxu3 %v6533_v17  ;;  %v6346_v56 = vmax.f32 %v10420_v57, 0.0  ;;  %v6592_v17 = vld [vmem:[#allocation10 + $0x758] sm:$0xff] }
 0x7ef   : > { %v6282_v54 = vmax.f32 %v11216_v8, %v6251_v48  ;;  %6657 = vmatmul.f32.vlgmr.msra.gmra.mxu2 %v6320_v41  ;;  %v6579_v41 = vld [vmem:[#allocation10 + $0x6f0] sm:$0xff]  ;;  %v6522_v1 = vld [vmem:[#allocation10 + $0x528] sm:$0xff]  ;;  %v6577_v8 = vld [vmem:[#allocation10 + $0x6e0] sm:$0xff] }
 0x7f0   : > { %6801 = vmatpush.msra.mxu2 %v6532_v29  ;;  %v6163_v6 = vadd.f32 %v6162_v0, %v6116_v32  ;;  %v6578_v0 = vld [vmem:[#allocation10 + $0x6e8] sm:$0xff] }
 0x7f1   : > { %v6594_v57 = vld [vmem:[#allocation10 + $0x768] sm:$0xff] }
 0x7f2   : > { %6802 = vmatpush.msra.mxu2 %v6531_v18  ;;  %v6206_v10 = vpop.f32.mrf.mxu2 }
 0x7f3   : > { %v6253_v26 = vpop.f32.mrf.mxu3  ;;  %v6207_v3 = vadd.f32 %v6206_v10, %v6160_v14  ;;  %v6576_v10 = vld [vmem:[#allocation10 + $0x6d8] sm:$0xff] }
 0x7f4   : > { %6803 = vmatpush.msra.mxu2 %v6530_v12  ;;  %v6520_v12 = vld [vmem:[#allocation10 + $0x518] sm:$0xff] }
 0x7f5   : > { %v6254_v4 = vadd.f32 %v6253_v26, %v6207_v3  ;;  %v6118_v62 = vpop.f32.mrf.mxu0  ;;  %v11221_v26 = vld [vmem:[#allocation62_spill] sm:$0xff] }
 0x7f6   : > { %6804 = vmatpush.msra.mxu2 %v6529_v7  ;;  %v6165_v35 = vpop.f32.mrf.mxu1  ;;  %v6119_v50 = vadd.f32 %v6118_v62, %v10563_v15  ;;  %v6575_v3 = vld [vmem:[#allocation10 + $0x6d0] sm:$0xff]  ;;  %v6517_v62 = vld [vmem:[#allocation10 + $0x500] sm:$0xff] }
 0x7f7   : > { %v6285_v36 = vmax.f32 %v11218_v34, %v6254_v4  ;;  %6737 = vmatmul.f32.vlgmr.msrb.gmra.mxu2 %v6336_v60 }
 0x7f8   : > { %6805 = vmatpush.msra.mxu2 %v6528_v23  ;;  %v6166_v30 = vadd.f32 %v6165_v35, %v6119_v50  ;;  %v6573_v23 = vld [vmem:[#allocation10 + $0x6c0] sm:$0xff] }
 0x7f9   : > { %v6323_v25 = vmax.f32 %v6282_v54, %v6285_v36  ;;  %v11220_v54 = vld [vmem:[#allocation51_spill] sm:$0xff]  ;;  %v11223_v50 = vld [vmem:[#allocation96_spill] sm:$0xff] }
 0x7fa   : > { %6806 = vmatpush.msra.mxu2 %v6527_v28  ;;  %v6209_v27 = vpop.f32.mrf.mxu2  ;;  %v6345_v18 = vmax.f32 %v11220_v54, 0.0  ;;  %v6572_v28 = vld [vmem:[#allocation10 + $0x6b8] sm:$0xff]  ;;  %v6565_v54 = vld [vmem:[#allocation10 + $0x680] sm:$0xff] }
 0x7fb   : > { %v6256_v61 = vpop.f32.mrf.mxu3  ;;  %v6326_v2 = vadd.f32 %v6323_v25, %v10586_v42  ;;  %v6210_v20 = vadd.f32 %v6209_v27, %v6163_v6  ;;  %v11222_v6 = vld [vmem:[#allocation44_spill] sm:$0xff]  ;;  %v6571_v27 = vld [vmem:[#allocation10 + $0x6b0] sm:$0xff] }
 0x7fc   : > { %6807 = vmatpush.msra.mxu2 %v6526_v47 }
 0x7fd   : > { %v6329_v24 = vmax.f32 %v6326_v2, 0.0  ;;  %v6257_v51 = vadd.f32 %v6256_v61, %v6210_v20  ;;  %v6121_v49 = vpop.f32.mrf.mxu0  ;;  %v6595_v61 = vld [vmem:[#allocation10 + $0x770] sm:$0xff]  ;;  %v6570_v2 = vld [vmem:[#allocation10 + $0x6a8] sm:$0xff] }
 0x7fe   : > { %6808 = vmatpush.msra.mxu2 %v6525_v13  ;;  %v6168_v48 = vpop.f32.mrf.mxu1  ;;  %v6122_v63 = vadd.f32 %v6121_v49, %v10569_v9 }
 0x7ff   : > { %v6288_v37 = vmax.f32 %v11219_v44, %v6257_v51  ;;  %6717 = vmatmul.f32.vlgmr.msrb.gmra.mxu1 %v6329_v24  ;;  %v6593_v24 = vld [vmem:[#allocation10 + $0x760] sm:$0xff]  ;;  %v6354_v51 = vmax.f32 %v11223_v50, 0.0 }
 0x800   : > { %6809 = vmatpush.msra.mxu2 %v6524_v52  ;;  %6861 = vmatpush.msrb.mxu1 %v6580_v58  ;;  %v6169_v7 = vadd.f32 %v6168_v48, %v6122_v63  ;;  %v6568_v58 = vld [vmem:[#allocation10 + $0x698] sm:$0xff]  ;;  %v6355_v63 = vmax.f32 %v10433_v5, 0.0  ;;  %v6585_v5 = vld [vmem:[#allocation10 + $0x720] sm:$0xff] }
 0x802   : > { %6810 = vmatpush.msra.mxu2 %v6523_v43  ;;  %6862 = vmatpush.msrb.mxu1 %v6579_v41  ;;  %v6212_v15 = vpop.f32.mrf.mxu2  ;;  %v6567_v41 = vld [vmem:[#allocation10 + $0x690] sm:$0xff] }
 0x803   : > { %v6259_v29 = vpop.f32.mrf.mxu3  ;;  %v6213_v59 = vadd.f32 %v6212_v15, %v6166_v30  ;;  %v6591_v30 = vld [vmem:[#allocation10 + $0x750] sm:$0xff]  ;;  %v6566_v15 = vld [vmem:[#allocation10 + $0x688] sm:$0xff] }
 0x804   : > { %6811 = vmatpush.msra.mxu2 %v6522_v1  ;;  %6863 = vmatpush.msrb.mxu1 %v6578_v0 }
 0x805   : > { %v6260_v19 = vadd.f32 %v6259_v29, %v6213_v59  ;;  %v6124_v14 = vpop.f32.mrf.mxu0  ;;  %v6590_v29 = vld [vmem:[#allocation10 + $0x748] sm:$0xff] }
 0x806   : > { %6812 = vmatpush.msra.mxu2 %v6521_v38  ;;  %6864 = vmatpush.msrb.mxu1 %v6577_v8  ;;  %v6171_v21 = vpop.f32.mrf.mxu1  ;;  %v6125_v36 = vadd.f32 %v6124_v14, %v10575_v16 }
 0x807   : > { %v6291_v11 = vmax.f32 %v11221_v26, %v6260_v19  ;;  %6797 = vmatmul.f32.vlgmr.msra.gmra.mxu1 %v6345_v18  ;;  %v6589_v18 = vld [vmem:[#allocation10 + $0x740] sm:$0xff] }
 0x808   : > { %6813 = vmatpush.msra.mxu2 %v6520_v12  ;;  %6865 = vmatpush.msrb.mxu1 %v6576_v10  ;;  %v6172_v53 = vadd.f32 %v6171_v21, %v6125_v36  ;;  %v6588_v10 = vld [vmem:[#allocation10 + $0x738] sm:$0xff]  ;;  %v11225_v26 = vld [vmem:[#allocation53_spill] sm:$0xff] }
 0x809   : > { %v6332_v33 = vmax.f32 %v6288_v37, %v6291_v11  ;;  %v11224_v37 = vld [vmem:[#allocation89_spill] sm:$0xff] }
 0x80a   : > { %6814 = vmatpush.msra.mxu2 %v6519_v40  ;;  %6866 = vmatpush.msrb.mxu1 %v6575_v3  ;;  %v6215_v9 = vpop.f32.mrf.mxu2  ;;  %v6587_v40 = vld [vmem:[#allocation10 + $0x730] sm:$0xff]  ;;  %v6582_v21 = vld [vmem:[#allocation10 + $0x708] sm:$0xff] }
 0x80b   : > { %v6262_v60 = vpop.f32.mrf.mxu3  ;;  %v6335_v32 = vadd.f32 %v6332_v33, %v10586_v42  ;;  %v6216_v4 = vadd.f32 %v6215_v9, %v6169_v7  ;;  %v6586_v33 = vld [vmem:[#allocation10 + $0x728] sm:$0xff] }
 0x80c   : > { %6815 = vmatpush.msra.mxu2 %v6518_v39  ;;  %6867 = vmatpush.msrb.mxu1 %v6574_v46 }
 0x80d   : > { %v6338_v34 = vmax.f32 %v6335_v32, 0.0  ;;  %v6263_v35 = vadd.f32 %v6262_v60, %v6216_v4  ;;  %v6127_v47 = vpop.f32.mrf.mxu0  ;;  %v6584_v60 = vld [vmem:[#allocation10 + $0x718] sm:$0xff]  ;;  %v11226_v32 = vld [vmem:[#allocation90_spill] sm:$0xff] }
 0x80e   : > { %6816 = vmatpush.msra.mxu2 %v6517_v62  ;;  %6868 = vmatpush.msrb.mxu1 %v6573_v23  ;;  %v6128_v49 = vadd.f32 %v6127_v47, %v10577_v45  ;;  %v6174_v44 = vpop.f32.mrf.mxu1  ;;  %v6583_v62 = vld [vmem:[#allocation10 + $0x710] sm:$0xff] }
 0x80f   : > { %v6294_v25 = vmax.f32 %v11222_v6, %v6263_v35  ;;  %6817 = vmatmul.f32.vlgmr.msra.gmra.mxu2 %v6346_v56  ;;  %6777 = vmatmul.f32.vlgmr.msra.gmra.mxu0 %v6338_v34  ;;  %v6581_v34 = vld [vmem:[#allocation10 + $0x700] sm:$0xff]  ;;  %v6917_v35 = vld [vmem:[%s10700_s7 + $0x78] sm:$0xff] }
 0x810   : > { %6869 = vmatpush.msrb.mxu1 %v6572_v28  ;;  %6881 = vmatpush.msrb.mxu2 %v6596_v31  ;;  %v6175_v48 = vadd.f32 %v6174_v44, %v6128_v49  ;;  %v6916_v28 = vld [vmem:[%s10700_s7 + $0x70] sm:$0xff]  ;;  %v6915_v31 = vld [vmem:[%s10700_s7 + $0x68] sm:$0xff]  ;;  %v6913_v6 = vld [vmem:[%s10700_s7 + $0x58] sm:$0xff] }
 0x811   : > { %6922 = vmatpush.msrb.mxu3 %v6917_v35 }
 0x812   : > { %6870 = vmatpush.msrb.mxu1 %v6571_v27  ;;  %v6218_v20 = vpop.f32.mrf.mxu2  ;;  %6882 = vmatpush.msrb.mxu2 %v6595_v61  ;;  %v6912_v27 = vld [vmem:[%s10700_s7 + $0x50] sm:$0xff]  ;;  %v6911_v61 = vld [vmem:[%s10700_s7 + $0x48] sm:$0xff] }
 0x813   : > { %v6265_v16 = vpop.f32.mrf.mxu3  ;;  %v6219_v13 = vadd.f32 %v6218_v20, %v6172_v53  ;;  %6923 = vmatpush.msrb.mxu3 %v6916_v28 }
 0x814   : > { %6871 = vmatpush.msrb.mxu1 %v6570_v2  ;;  %6883 = vmatpush.msrb.mxu2 %v6594_v57  ;;  %v6910_v2 = vld [vmem:[%s10700_s7 + $0x40] sm:$0xff]  ;;  %v6909_v57 = vld [vmem:[%s10700_s7 + $0x38] sm:$0xff] }
 0x815   : > { %v6266_v52 = vadd.f32 %v6265_v16, %v6219_v13  ;;  %v6130_v0 = vpop.f32.mrf.mxu0  ;;  %6924 = vmatpush.msrb.mxu3 %v6915_v31  ;;  %v6908_v13 = vld [vmem:[%s10700_s7 + $0x30] sm:$0xff] }
 0x816   : > { %6872 = vmatpush.msrb.mxu1 %v6569_v22  ;;  %6884 = vmatpush.msrb.mxu2 %v6593_v24  ;;  %v6131_v14 = vadd.f32 %v6130_v0, %v10580_v55  ;;  %v6177_v3 = vpop.f32.mrf.mxu1  ;;  %v6907_v24 = vld [vmem:[%s10700_s7 + $0x28] sm:$0xff]  ;;  %v6949_v0 = vld [vmem:[#allocation14 + $0x30] sm:$0xff] }
 0x817   : > { %v6297_v43 = vmax.f32 %v11224_v37, %v6266_v52  ;;  %6857 = vmatmul.f32.vlgmr.msrb.gmra.mxu0 %v6354_v51  ;;  %v6906_v51 = vld [vmem:[%s10700_s7 + $0x20] sm:$0xff]  ;;  %v6905_v52 = vld [vmem:[%s10700_s7 + $0x18] sm:$0xff]  ;;  %v6904_v37 = vld [vmem:[%s10700_s7 + $0x10] sm:$0xff] }
 0x818   : > { %6873 = vmatpush.msrb.mxu1 %v6568_v58  ;;  %6885 = vmatpush.msrb.mxu2 %v6592_v17  ;;  %v6178_v7 = vadd.f32 %v6177_v3, %v6131_v14 }
 0x819   : > { %v6341_v1 = vmax.f32 %v6294_v25, %v6297_v43  ;;  %v7524_v25 = vld [vmem:[#allocation11] ss:$0 sm:$0xff] }
 0x81a   : > { %6874 = vmatpush.msrb.mxu1 %v6567_v41  ;;  %v6221_v45 = vpop.f32.mrf.mxu2  ;;  %6886 = vmatpush.msrb.mxu2 %v6591_v30  ;;  %v6903_v41 = vld [vmem:[%s10700_s7 + $0x8] sm:$0xff] }
 0x81b   : > { %v6268_v59 = vpop.f32.mrf.mxu3  ;;  %v6344_v38 = vadd.f32 %v6341_v1, %v10586_v42  ;;  %v6222_v8 = vadd.f32 %v6221_v45, %v6175_v48  ;;  %v6902_v48 = vld [vmem:[%s10700_s7] sm:$0xff]  ;;  %v6948_v45 = vld [vmem:[#allocation14 + $0x28] sm:$0xff] }
 0x81c   : > { %6875 = vmatpush.msrb.mxu1 %v6566_v15  ;;  %6887 = vmatpush.msrb.mxu2 %v6590_v29  ;;  %v6950_v1 = vld [vmem:[#allocation14 + $0x38] sm:$0xff] }
 0x81d   : > { %v6347_v19 = vmax.f32 %v6344_v38, 0.0  ;;  %v6269_v12 = vadd.f32 %v6268_v59, %v6222_v8  ;;  %v6618_v47 = vpop.f32.mrf.mxu0  ;;  %6967 = vmatpush.msra.mxu0 %v6950_v1  ;;  %v6947_v59 = vld [vmem:[#allocation14 + $0x20] sm:$0xff] }
 0x81e   : > { %6876 = vmatpush.msrb.mxu1 %v6565_v54  ;;  %6888 = vmatpush.msrb.mxu2 %v6589_v18  ;;  %v6619_v53 = vadd.f32 %v7524_v25, %v6618_v47  ;;  %v6638_v20 = vpop.f32.mrf.mxu1  ;;  %v6946_v18 = vld [vmem:[#allocation14 + $0x18] sm:$0xff] }
 0x81f   : > { %v6300_v11 = vmax.f32 %v11225_v26, %v6269_v12  ;;  %6877 = vmatmul.f32.vlgmr.msrb.gmra.mxu1 %v6355_v63  ;;  %6837 = vmatmul.f32.vlgmr.msra.gmra.mxu3 %v6347_v19 }
 0x820   : > { %6889 = vmatpush.msrb.mxu2 %v6588_v10  ;;  %v6639_v22 = vadd.f32 %v6638_v20, %v6619_v53  ;;  %6968 = vmatpush.msra.mxu0 %v6949_v0 }
 0x822   : > { %v6224_v39 = vpop.f32.mrf.mxu2  ;;  %6890 = vmatpush.msrb.mxu2 %v6587_v40  ;;  %6969 = vmatpush.msra.mxu0 %v6948_v45 }
 0x823   : > { %v6225_v46 = vadd.f32 %v6224_v39, %v6178_v7  ;;  %v6271_v9 = vpop.f32.mrf.mxu3 }
 0x824   : > { %6891 = vmatpush.msrb.mxu2 %v6586_v33  ;;  %6970 = vmatpush.msra.mxu0 %v6947_v59 }
 0x825   : > { %v6272_v55 = vadd.f32 %v6271_v9, %v6225_v46  ;;  %v6698_v17 = vpop.f32.mrf.mxu0  ;;  %v6945_v9 = vld [vmem:[#allocation14 + $0x10] sm:$0xff] }
 0x826   : > { %6892 = vmatpush.msrb.mxu2 %v6585_v5  ;;  %6971 = vmatpush.msra.mxu0 %v6946_v18 }
 0x827   : > { %v6303_v4 = vmax.f32 %v11226_v32, %v6272_v55  ;;  %v6944_v55 = vld [vmem:[#allocation14 + $0x8] sm:$0xff]  ;;  %v7525_v32 = vld [vmem:[#allocation13] ss:$0 sm:$0xff] }
 0x828   : > { %6893 = vmatpush.msrb.mxu2 %v6584_v60  ;;  %6972 = vmatpush.msra.mxu0 %v6945_v9  ;;  %v6943_v60 = vld [vmem:[#allocation14] sm:$0xff] }
 0x829   : > { %v6350_v23 = vmax.f32 %v6300_v11, %v6303_v4 }
 0x82a   : > { %6894 = vmatpush.msrb.mxu2 %v6583_v62  ;;  %6973 = vmatpush.msra.mxu0 %v6944_v55 }
 0x82b   : > { %v6353_v56 = vadd.f32 %v6350_v23, %v10586_v42  ;;  %v6914_v42 = vld [vmem:[%s10700_s7 + $0x60] sm:$0xff]  ;;  %v6678_v49 = vpop.f32.mrf.mxu3 }
 0x82c   : > { %6895 = vmatpush.msrb.mxu2 %v6582_v21  ;;  %6925 = vmatpush.msrb.mxu3 %v6914_v42  ;;  %v7526_v21 = vld [vmem:[#allocation16] ss:$0 sm:$0xff] }
 0x82d   : > { %v6356_v36 = vmax.f32 %v6353_v56, 0.0  ;;  %6974 = vmatpush.msra.mxu0 %v6943_v60 }
 0x82e   : > { %6896 = vmatpush.msrb.mxu2 %v6581_v34  ;;  %6926 = vmatpush.msrb.mxu3 %v6913_v6 }
 0x82f   : > { %6897 = vmatmul.f32.vlgmr.msrb.gmra.mxu2 %v6356_v36 }
 0x830   : > { %6927 = vmatpush.msrb.mxu3 %v6912_v27 }
 0x832   : > { %6928 = vmatpush.msrb.mxu3 %v6911_v61 }
 0x833   : > { %v6758_v38 = vpop.f32.mrf.mxu3 }
 0x834   : > { %6929 = vmatpush.msrb.mxu3 %v6910_v2 }
 0x836   : > { %6930 = vmatpush.msrb.mxu3 %v6909_v57 }
 0x838   : > { %6931 = vmatpush.msrb.mxu3 %v6908_v13 }
 0x83a   : > { %6932 = vmatpush.msrb.mxu3 %v6907_v24 }
 0x83c   : > { %6933 = vmatpush.msrb.mxu3 %v6906_v51 }
 0x83e   : > { %6934 = vmatpush.msrb.mxu3 %v6905_v52 }
 0x840   : > { %6935 = vmatpush.msrb.mxu3 %v6904_v37 }
 0x842   : > { %6936 = vmatpush.msrb.mxu3 %v6903_v41 }
 0x844   : > { %6937 = vmatpush.msrb.mxu3 %v6902_v48 }
 0x872   : > { %v6658_v16 = vpop.f32.mrf.mxu2 }
 0x873   : > { %v6659_v50 = vadd.f32 %v6658_v16, %v6639_v22 }
 0x875   : > { %v6679_v58 = vadd.f32 %v6678_v49, %v6659_v50 }
 0x877   : > { %v6699_v43 = vadd.f32 %v6698_v17, %v6679_v58 }
 0x87a   : > { %v6738_v15 = vpop.f32.mrf.mxu2 }
 0x87c   : > { %v6718_v44 = vpop.f32.mrf.mxu1 }
 0x87d   : > { %v6719_v30 = vadd.f32 %v6718_v44, %v6699_v43 }
 0x87f   : > { %v6739_v29 = vadd.f32 %v6738_v15, %v6719_v30 }
 0x881   : > { %v6759_v54 = vadd.f32 %v6758_v38, %v6739_v29 }
 0x884   : > { %v6798_v19 = vpop.f32.mrf.mxu1 }
 0x88c   : > { %v6778_v8 = vpop.f32.mrf.mxu0 }
 0x88d   : > { %v6779_v63 = vadd.f32 %v6778_v8, %v6759_v54 }
 0x88f   : > { %v6799_v14 = vadd.f32 %v6798_v19, %v6779_v63 }
 0x892   : > { %v6818_v12 = vpop.f32.mrf.mxu2 }
 0x893   : > { %v6819_v26 = vadd.f32 %v6818_v12, %v6799_v14 }
 0x894   : > { %v6858_v40 = vpop.f32.mrf.mxu0 }
 0x89c   : > { %v6878_v7 = vpop.f32.mrf.mxu1 }
 0x8a2   : > { %v6838_v10 = vpop.f32.mrf.mxu3 }
 0x8a3   : > { %v6839_v11 = vadd.f32 %v6838_v10, %v6819_v26 }
 0x8a5   : > { %v6859_v3 = vadd.f32 %v6858_v40, %v6839_v11 }
 0x8a7   : > { %v6879_v33 = vadd.f32 %v6878_v7, %v6859_v3 }
 0x8b2   : > { %v6898_v39 = vpop.f32.mrf.mxu2 }
 0x8b3   : > { %v6899_v46 = vadd.f32 %v6898_v39, %v6879_v33 }
 0x8b5   : > { %v6901_v5 = vmax.f32 %v6899_v46, 0.0 }
 0x8b7   : > { %6938 = vmatmul.f32.vlgmr.msrb.gmra.mxu3 %v6901_v5 }
 0x93a   : > { %v6939_v4 = vpop.f32.mrf.mxu3 }
 0x93b   : > { %v6940_v62 = vadd.f32 %v7525_v32, %v6939_v4 }
 0x93d   : > { %v6942_v23 = vmax.f32 %v6940_v62, 0.0 }
 0x93f   : > { %7383 = vmatmul.msk.f32.vlgmr.msra.gmra.mxu0 %vm6955_vm2, %v6942_v23 }
 0x9bc   : > { %v6976_v56 = vpop.f32.mrf.mxu0 }
 0x9bd   : > { %v6977_v34 = vadd.f32 %v7526_v21, %v6976_v56 }
 0x9bf   : > { %6979 = vst [vmem:[%s519_s26] sm:$0xff] %v6977_v34 }
 0x9c0   : > { %7826 = shalt.err (!%p7823_p8)
}
 0x9c1   : > { %7424 = dma.vmem_to_hbm [thread:$0]  (%p7996_p5), %s6994_s16, 128, %s6996_s19, %s6981_s2  }
 0x9c2 PF: > { %p7476_p9 = scmp.ge.s32.totalorder %s7881_s20, 2  ;;  %s7007_s9 = sand.u32 1, %s7869_s17  }
 0x9c3   : > { %s7008_s22 = scalar_lea.sflag [#allocation4], %s7007_s9 }
 0x9c4   : > { %p7455_p10 = pnand %p7476_p9, %p8000_p6 }
 0x9c6   : > { %p7456_p11 = pneg %p7455_p10 }
 0x9c8   : > { %7864 = dma.done.wait (%p7456_p11), %s7008_s22, 128  }
 0x9c9   : > { %7866 = vsyncadd (%p7456_p11), %s7008_s22, 4294967168  ;;  %s11227_s20 = sld [smem:[#allocation25_spill]]  ;;  %s11230_s17 = smov %s7873_s18 }
 0x9ca   : > { %s11228_s13 = sld [smem:[#allocation24_spill]] }
 0x9cb   : > { %s11229_s19 = sld [smem:[#allocation26_spill]] }
 0x9cf   : > { %p26_p12 = scmp.ge.s32.totalorder %s11227_s20, 4  }
 0x9d0   : > { %s11231_s18 = smov %s11228_s13 }
 0x9d1   :  { %28 = sbr.rel (!%p26_p12) target bundleno = 15 (0xf), region = 136 }
 0x9d6   :  { %7014 = vsyncpa [#allocation3], 1 }
 0x9d7   :  { %7016 = vsyncpa [#allocation3 + $0x1], 1 }
 0x9d8   :  { %7017 = vsyncpa [#allocation6], 1 }
 0x9d9   :  { %7018 = vsyncpa [#allocation9], 1 }
 0x9da   :  { %7019 = vsyncpa [#allocation12], 1 }
 0x9db   :  { %7020 = vsyncpa [#allocation15], 1 }
 0x9dc   :  { %7021 = vsyncpa [#allocation4], 1 }
 0x9dd   :  { %7023 = vsyncpa [#allocation4 + $0x1], 1 }

</bundles_post_ra>
